<compile_context>
chip_gen: v7x
topology: tpu7x:2x2x1
jax: 0.10.0
libtpu: 0.0.40
codegen_flags: <defaults>
</compile_context>

<pallas_src>
import jax
import jax.numpy as jnp
import numpy as np
from jax import lax
from jax.experimental import pallas as pl
from jax.experimental.pallas import tpu as pltpu

PARAM_ORDER = ("w_in", "b_in", "wd", "bd", "w1", "b1", "w_out", "b_out")
BF16 = jnp.bfloat16


# ---------------------------------------------------------------------------
# Fused Pallas kernel: full MultiStageModel forward for bb batch elements.
# ---------------------------------------------------------------------------
def _make_fused_kernel(T, Fm, C, dilations, R, bb, out_w, maxpad):
    """R = number of refinement stages (num_stages - 1); bb = batch block."""
    L = len(dilations)
    M = bb * T  # matmul rows per grid step

    def kernel(*refs):
        x_ref, m_ref = refs[0], refs[1]
        tw = refs[2:10]                      # fused tower params (2*Fm lanes, 5 taps)
        if R > 0:
            rf = refs[10:18]                 # stacked refinement params (Fm lanes, 3 taps)
            out_ref, hp_t, hp_r = refs[18], refs[19], refs[20]
        else:
            rf = None
            out_ref, hp_t = refs[10], refs[11]
            hp_r = None

        # Zero ONLY the halo bands (rows [0,maxpad) and [maxpad+T, end) of every
        # batch slot).  The center band is fully rewritten before any tap read,
        # so this is all the zero padding the dilated convs need.  Done every
        # grid step (cheap, O(maxpad)) rather than gated on program_id==0, which
        # would be wrong when the "parallel" grid is split across TensorCores
        # (each core owns its own scratch copy).
        z2 = jnp.zeros((bb, maxpad, 2 * Fm), BF16)
        hp_t[:, pl.ds(0, maxpad), :] = z2
        hp_t[:, pl.ds(maxpad + T, maxpad), :] = z2
        if R > 0:
            z1 = jnp.zeros((bb, maxpad, Fm), BF16)
            hp_r[:, pl.ds(0, maxpad), :] = z1
            hp_r[:, pl.ds(maxpad + T, maxpad), :] = z1

        m = m_ref[...]                       # (M, 1) f32 == mask[:, 0:1, :]
        x = x_ref[...]                       # (M, Din) f32

        # TODO(synk): arch='casual' (left-only padding) variant not implemented;
        #             the module default is the non-causal arch implemented here.
        def run_stage(inp, hp, nw, ntap, w_in, b_in, get_wd, get_bd, get_w1,
                      get_b1, w_out, b_out):
            """One SingleStage (or the fused pair of tower stages).

            inp: (M, Cin) f32.  hp: halo scratch ref (bb, T+2*maxpad, nw) bf16.
            Tap j has time offset (j - (ntap-1)//2) * dilation.
            """
            center = (ntap - 1) // 2
            # conv_1x1 (Cin -> nw)
            h = jnp.dot(inp.astype(BF16), w_in,
                        preferred_element_type=jnp.float32) + b_in
            # TODO(synk): for production depths (L=10 x 4 stages) drive this loop
            #             with lax.fori_loop over stacked weights instead of
            #             full Python unrolling.
            for li, d in enumerate(dilations):
                # Write the center band per batch slot (taps never cross a batch
                # boundary); halo rows stay zero -> conv zero padding.
                hb = h.astype(BF16)
                for b in range(bb):
                    hp[b, pl.ds(maxpad, T), :] = hb[b * T:(b + 1) * T, :]
                # Dilated conv = ntap accumulated matmuls on shifted slices
                # (no per-layer lane concatenation).
                acc = None
                for j in range(ntap):
                    off = maxpad + (j - center) * d
                    tap = hp[:, pl.ds(off, T), :].reshape(M, nw)
                    part = jnp.dot(tap, get_wd(li, j),
                                   preferred_element_type=jnp.float32)
                    acc = part if acc is None else acc + part
                a = jnp.maximum(acc + get_bd(li), 0.0)            # ReLU
                a = jnp.dot(a.astype(BF16), get_w1(li),
                            preferred_element_type=jnp.float32) + get_b1(li)
                # TODO(synk): nn.Dropout() is identity in eval mode; training dropout omitted.
                h = (h + a) * m                                   # residual * mask
            fin = (jnp.dot(h.astype(BF16), w_out,
                           preferred_element_type=jnp.float32) + b_out) * m
            return h, fin

        # ---- fused tower: stages K=3 and K=5 in lockstep on 2*Fm lanes ----
        (tw_in, tb_in, t_wd, t_bd, t_w1, t_b1, tw_out, tb_out) = tw
        h_tower, out = run_stage(
            x, hp_t, 2 * Fm, 5,
            tw_in[...], tb_in[...],
            lambda li, j: t_wd[li * 5 + j], lambda li: t_bd[li],
            lambda li: t_w1[li], lambda li: t_b1[li],
            tw_out[...], tb_out[...])
        logits = [out]
        # Tower feature (h1 + h2) is only live when there are no refinement stages.
        middle = (h_tower[:, :Fm] + h_tower[:, Fm:]) if R == 0 else None

        # ---- refinement stages ----
        for s in range(R):
            # F.softmax(out, dim=classes) * mask, fused (exact division).
            xm = jnp.max(out, axis=-1, keepdims=True)
            ex = jnp.exp(out - xm)
            sm = (ex / jnp.sum(ex, axis=-1, keepdims=True)) * m
            (rw_in, rb_in, r_wd, r_bd, r_w1, r_b1, rw_out, rb_out) = rf
            middle, out = run_stage(
                sm, hp_r, Fm, 3,
                rw_in[s], rb_in[s],
                lambda li, j, _s=s: r_wd[_s, li * 3 + j],
                lambda li, _s=s: r_bd[_s, li],
                lambda li, _s=s: r_w1[_s, li],
                lambda li, _s=s: r_b1[_s, li],
                rw_out[s], rb_out[s])
            logits.append(out)

        # Single lane-dense bf16 store: [middle | logits_0 ... logits_{S-1} | pad].
        parts = [middle] + logits
        used = Fm + len(logits) * C
        if out_w > used:
            parts.append(jnp.zeros((M, out_w - used), jnp.float32))
        out_ref[...] = jnp.concatenate(parts, axis=-1).astype(BF16)

    return kernel


# ---------------------------------------------------------------------------
# Host-side parameter packing.
# ---------------------------------------------------------------------------
def _fuse_tower_params(p1, p2):
    """Fuse the K=3 and K=5 tower stages into one stage on 2*Fm lanes (5 taps)."""
    L, K1, Fm, _ = p1["wd"].shape
    K2 = p2["wd"].shape[1]
    w_in = jnp.concatenate([p1["w_in"], p2["w_in"]], axis=-1)          # (Din, 2Fm)
    b_in = jnp.concatenate([p1["b_in"], p2["b_in"]], axis=-1)          # (1, 2Fm)
    wd = jnp.zeros((L, K2, 2 * Fm, 2 * Fm), jnp.float32)
    wd = wd.at[:, :, Fm:, Fm:].set(p2["wd"])                           # tower-2 block
    toff = (K2 - K1) // 2                                              # tower-1 taps centered
    wd = wd.at[:, toff:toff + K1, :Fm, :Fm].set(p1["wd"])
    bd = jnp.concatenate([p1["bd"], p2["bd"]], axis=-1)                # (L, 1, 2Fm)
    w1 = jnp.zeros((L, 2 * Fm, 2 * Fm), jnp.float32)
    w1 = w1.at[:, :Fm, :Fm].set(p1["w1"]).at[:, Fm:, Fm:].set(p2["w1"])
    b1 = jnp.concatenate([p1["b1"], p2["b1"]], axis=-1)
    w_out = jnp.concatenate([p1["w_out"], p2["w_out"]], axis=0)        # (2Fm, C)
    b_out = p1["b_out"] + p2["b_out"]
    return dict(w_in=w_in, b_in=b_in, wd=wd, bd=bd, w1=w1, b1=b1,
                w_out=w_out, b_out=b_out)


def _pack_stage(p):
    """bf16 matmul weights; dilated weights flattened (L,K,Fin,Fout)->(L*K,Fin,Fout)
    so the kernel indexes one (Fin,Fout) tap matrix per accumulated matmul."""
    L, K, Fin, Fout = p["wd"].shape
    return dict(
        w_in=p["w_in"].astype(BF16),
        b_in=p["b_in"],
        wd=p["wd"].reshape(L * K, Fin, Fout).astype(BF16),
        bd=p["bd"],
        w1=p["w1"].astype(BF16),
        b1=p["b1"],
        w_out=p["w_out"].astype(BF16),
        b_out=p["b_out"],
    )


# ---------------------------------------------------------------------------
# pallas_call wrapper.
# ---------------------------------------------------------------------------
def multi_stage_pallas(x, mask, params, batch_block=None):
    """Fused MultiStageModel forward.  x: (B,T,dim), mask: (B,T,1)."""
    B, T, Din = x.shape
    dilations = tuple(params["dilations"])
    Fm = params["tower1"]["w_in"].shape[-1]
    C = params["tower1"]["w_out"].shape[-1]
    L = len(dilations)
    R = len(params["stages"])
    S = R + 1

    # Halo width: worst-case padding is the K=5 tower branch (2*d), rounded up to
    # 16 so the per-layer bf16 center-band store is packed-vreg aligned.
    maxpad = max(2 * d for d in dilations)
    maxpad = ((maxpad + 15) // 16) * 16

    # Batch blocking: bb batch elements per grid step -> matmuls see M = bb*T rows.
    if batch_block is None:
        batch_block = max(1, min(B, -(-256 // T)))     # ceil(256/T), capped at B
    bb = int(batch_block)
    B_pad = ((B + bb - 1) // bb) * bb
    if B_pad != B:
        pad_n = B_pad - B
        x = jnp.concatenate([x, jnp.zeros((pad_n, T, Din), x.dtype)], axis=0)
        mask = jnp.concatenate([mask, jnp.zeros((pad_n, T, 1), mask.dtype)], axis=0)

    out_w = ((Fm + S * C + 127) // 128) * 128          # lane-dense output slab width

    tower = _pack_stage(_fuse_tower_params(params["tower1"], params["tower2"]))
    groups = [tower]
    if R > 0:
        ps = [_pack_stage(sp) for sp in params["stages"]]
        groups.append({k: jnp.stack([p[k] for p in ps], axis=0) for k in PARAM_ORDER})

    x2 = x.reshape(B_pad * T, Din)
    m2 = mask.reshape(B_pad * T, 1)

    inputs = [x2, m2]
    in_specs = [pl.BlockSpec((bb * T, Din), lambda i: (i, 0)),
                pl.BlockSpec((bb * T, 1), lambda i: (i, 0))]
    for g in groups:
        for name in PARAM_ORDER:
            arr = g[name]
            inputs.append(arr)
            # TODO(synk): on v7x, pipeline_mode=pl.Buffered(1) on these constant-index
            #             weight specs would halve their VMEM footprint.
            in_specs.append(pl.BlockSpec(arr.shape, lambda i, _nd=arr.ndim: (0,) * _nd))

    kernel = _make_fused_kernel(T, Fm, C, dilations, R, bb, out_w, maxpad)

    scratch = [pltpu.VMEM((bb, T + 2 * maxpad, 2 * Fm), BF16)]
    if R > 0:
        scratch.append(pltpu.VMEM((bb, T + 2 * maxpad, Fm), BF16))

    # Advisory cost estimate for XLA scheduling around the fused call.
    rows = B_pad * T
    flops = 2 * rows * (Din * 2 * Fm + L * 6 * (2 * Fm) ** 2 + 2 * Fm * C)
    flops += R * 2 * rows * (C * Fm + L * 4 * Fm * Fm + Fm * C)
    transcendentals = R * rows * C
    bytes_accessed = (x2.size * x2.dtype.itemsize + m2.size * m2.dtype.itemsize
                      + rows * out_w * 2
                      + sum(int(g[k].size) * g[k].dtype.itemsize
                            for g in groups for k in PARAM_ORDER))

    out_slab = pl.pallas_call(
        kernel,
        out_shape=jax.ShapeDtypeStruct((B_pad * T, out_w), BF16),
        grid=(B_pad // bb,),
        in_specs=in_specs,
        out_specs=pl.BlockSpec((bb * T, out_w), lambda i: (i, 0)),
        scratch_shapes=scratch,
        compiler_params=pltpu.CompilerParams(
            dimension_semantics=("parallel",),
            vmem_limit_bytes=48 * 1024 * 1024),
        cost_estimate=pl.CostEstimate(flops=flops,
                                      transcendentals=transcendentals,
                                      bytes_accessed=bytes_accessed),
    )(*inputs)

    out_slab = out_slab.reshape(B_pad, T, out_w)[:B].astype(jnp.float32)
    middle = out_slab[..., :Fm]                                   # (B, T, Fm)
    outputs = out_slab[..., Fm:Fm + S * C].reshape(B, T, S, C)
    outputs = jnp.transpose(outputs, (2, 0, 1, 3))                # (S, B, T, C)
    return middle, outputs


# ---------------------------------------------------------------------------
# Pure-JAX reference (independent check via lax.conv_general_dilated),
# matched to the kernel's bf16-matmul / f32-accumulate / bf16-output policy.
# ---------------------------------------------------------------------------
def _run_stage_ref(x, mask, p, K, dilations, apply_softmax):
    bf = jnp.bfloat16
    if apply_softmax:
        x = jax.nn.softmax(x, axis=-1) * mask
    h = jnp.dot(x.astype(bf), p["w_in"].astype(bf),
                preferred_element_type=jnp.float32) + p["b_in"]
    for li, d in enumerate(dilations):
        pad = d * (1 + (K - 3) // 2)
        out = lax.conv_general_dilated(
            h.astype(bf), p["wd"][li].astype(bf), window_strides=(1,),
            padding=[(pad, pad)], rhs_dilation=(d,),
            dimension_numbers=("NWC", "WIO", "NWC"),
            preferred_element_type=jnp.float32)
        out = jax.nn.relu(out + p["bd"][li])
        out = jnp.dot(out.astype(bf), p["w1"][li].astype(bf),
                      preferred_element_type=jnp.float32) + p["b1"][li]
        h = (h + out) * mask
    final = (jnp.dot(h.astype(bf), p["w_out"].astype(bf),
                     preferred_element_type=jnp.float32) + p["b_out"]) * mask
    return h, final


def multi_stage_ref(x, mask, params):
    dils = params["dilations"]
    f1, o1 = _run_stage_ref(x, mask, params["tower1"], 3, dils, False)
    f2, o2 = _run_stage_ref(x, mask, params["tower2"], 5, dils, False)
    middle, out = f1 + f2, o1 + o2
    outputs = [out]
    for sp in params["stages"]:
        middle, out = _run_stage_ref(out, mask, sp, 3, dils, True)
        outputs.append(out)
    # Mirror the kernel's bf16 output-slab storage precision.
    to_bf = lambda a: a.astype(jnp.bfloat16).astype(jnp.float32)
    return to_bf(middle), to_bf(jnp.stack(outputs, axis=0))


# ---------------------------------------------------------------------------
# Deterministic parameter init.
# ---------------------------------------------------------------------------
def init_stage_params(key, Din, Fm, C, L, K, scale=0.1):
    ks = jax.random.split(key, 8)
    return dict(
        w_in=scale * jax.random.normal(ks[0], (Din, Fm), jnp.float32),
        b_in=scale * jax.random.normal(ks[1], (1, Fm), jnp.float32),
        wd=scale * jax.random.normal(ks[2], (L, K, Fm, Fm), jnp.float32),
        bd=scale * jax.random.normal(ks[3], (L, 1, Fm), jnp.float32),
        w1=scale * jax.random.normal(ks[4], (L, Fm, Fm), jnp.float32),
        b1=scale * jax.random.normal(ks[5], (L, 1, Fm), jnp.float32),
        w_out=scale * jax.random.normal(ks[6], (Fm, C), jnp.float32),
        b_out=scale * jax.random.normal(ks[7], (1, C), jnp.float32),
    )


if __name__ == "__main__":
    # Small config: num_stages=3, num_layers=3, num_f_maps=32, dim=16, num_classes=8
    B, T, dim, num_f_maps, num_classes = 2, 64, 16, 32, 8
    num_layers, num_stages = 3, 3
    dilations = tuple(2 ** i for i in range(num_layers))

    key = jax.random.PRNGKey(0)
    kx, kp = jax.random.split(key)
    x = jax.random.normal(kx, (B, T, dim), jnp.float32)

    # mask[:, 0:1, :] in PyTorch == (B, T, 1) here; second sequence is shorter.
    lengths = jnp.array([T, T - 16])
    mask = (jnp.arange(T)[None, :, None] < lengths[:, None, None]).astype(jnp.float32)

    pkeys = jax.random.split(kp, num_stages + 1)
    params = {
        "dilations": dilations,
        "tower1": init_stage_params(pkeys[0], dim, num_f_maps, num_classes, num_layers, 3),
        "tower2": init_stage_params(pkeys[1], dim, num_f_maps, num_classes, num_layers, 5),
        "stages": [init_stage_params(pkeys[2 + s], num_classes, num_f_maps,
                                     num_classes, num_layers, 3)
                   for s in range(num_stages - 1)],
    }

    middle_out, outputs = multi_stage_pallas(x, mask, params)
    jax.block_until_ready((middle_out, outputs))

    middle_ref, outputs_ref = multi_stage_ref(x, mask, params)
    np.testing.assert_allclose(np.asarray(middle_out), np.asarray(middle_ref),
                               rtol=2e-2, atol=2e-2)
    np.testing.assert_allclose(np.asarray(outputs), np.asarray(outputs_ref),
                               rtol=2e-2, atol=2e-2)
    assert outputs.shape == (num_stages, B, T, num_classes)
    assert middle_out.shape == (B, T, num_f_maps)

    print("KERNEL_OK")
</pallas_src>

<mosaic_0001>
module attributes {stable_mosaic.version = 11 : i64} {
  func.func @kernel(%arg0: i32, %arg1: memref<128x16xf32, #tpu.memory_space<vmem>>, %arg2: memref<128x1xf32, #tpu.memory_space<vmem>>, %arg3: memref<16x64xbf16, #tpu.memory_space<vmem>>, %arg4: memref<1x64xf32, #tpu.memory_space<vmem>>, %arg5: memref<15x64x64xbf16, #tpu.memory_space<vmem>>, %arg6: memref<3x1x64xf32, #tpu.memory_space<vmem>>, %arg7: memref<3x64x64xbf16, #tpu.memory_space<vmem>>, %arg8: memref<3x1x64xf32, #tpu.memory_space<vmem>>, %arg9: memref<64x8xbf16, #tpu.memory_space<vmem>>, %arg10: memref<1x8xf32, #tpu.memory_space<vmem>>, %arg11: memref<2x8x32xbf16, #tpu.memory_space<vmem>>, %arg12: memref<2x1x32xf32, #tpu.memory_space<vmem>>, %arg13: memref<2x9x32x32xbf16, #tpu.memory_space<vmem>>, %arg14: memref<2x3x1x32xf32, #tpu.memory_space<vmem>>, %arg15: memref<2x3x32x32xbf16, #tpu.memory_space<vmem>>, %arg16: memref<2x3x1x32xf32, #tpu.memory_space<vmem>>, %arg17: memref<2x32x8xbf16, #tpu.memory_space<vmem>>, %arg18: memref<2x1x8xf32, #tpu.memory_space<vmem>>, %arg19: memref<128x128xbf16, #tpu.memory_space<vmem>>, %arg20: memref<2x96x64xbf16, #tpu.memory_space<vmem>>, %arg21: memref<2x96x32xbf16, #tpu.memory_space<vmem>>) attributes {dimension_semantics = [#tpu.dimension_semantics<parallel>], iteration_bounds = array<i64: 1>, scalar_prefetch = 0 : i64, scratch_operands = 2 : i64, tpu.core_type = #tpu.core_type<tc>, window_params = [{transform_indices = @transform_0, window_bounds = array<i64: 128, 16>}, {transform_indices = @transform_1, window_bounds = array<i64: 128, 1>}, {pipeline_mode = #tpu.pipeline_mode<synchronous>, transform_indices = @transform_2, window_bounds = array<i64: 16, 64>}, {pipeline_mode = #tpu.pipeline_mode<synchronous>, transform_indices = @transform_3, window_bounds = array<i64: 1, 64>}, {pipeline_mode = #tpu.pipeline_mode<synchronous>, transform_indices = @transform_4, window_bounds = array<i64: 15, 64, 64>}, {pipeline_mode = #tpu.pipeline_mode<synchronous>, transform_indices = @transform_5, window_bounds = array<i64: 3, 1, 64>}, {pipeline_mode = #tpu.pipeline_mode<synchronous>, transform_indices = @transform_6, window_bounds = array<i64: 3, 64, 64>}, {pipeline_mode = #tpu.pipeline_mode<synchronous>, transform_indices = @transform_7, window_bounds = array<i64: 3, 1, 64>}, {pipeline_mode = #tpu.pipeline_mode<synchronous>, transform_indices = @transform_8, window_bounds = array<i64: 64, 8>}, {pipeline_mode = #tpu.pipeline_mode<synchronous>, transform_indices = @transform_9, window_bounds = array<i64: 1, 8>}, {pipeline_mode = #tpu.pipeline_mode<synchronous>, transform_indices = @transform_10, window_bounds = array<i64: 2, 8, 32>}, {pipeline_mode = #tpu.pipeline_mode<synchronous>, transform_indices = @transform_11, window_bounds = array<i64: 2, 1, 32>}, {pipeline_mode = #tpu.pipeline_mode<synchronous>, transform_indices = @transform_12, window_bounds = array<i64: 2, 9, 32, 32>}, {pipeline_mode = #tpu.pipeline_mode<synchronous>, transform_indices = @transform_13, window_bounds = array<i64: 2, 3, 1, 32>}, {pipeline_mode = #tpu.pipeline_mode<synchronous>, transform_indices = @transform_14, window_bounds = array<i64: 2, 3, 32, 32>}, {pipeline_mode = #tpu.pipeline_mode<synchronous>, transform_indices = @transform_15, window_bounds = array<i64: 2, 3, 1, 32>}, {pipeline_mode = #tpu.pipeline_mode<synchronous>, transform_indices = @transform_16, window_bounds = array<i64: 2, 32, 8>}, {pipeline_mode = #tpu.pipeline_mode<synchronous>, transform_indices = @transform_17, window_bounds = array<i64: 2, 1, 8>}, {transform_indices = @transform_18, window_bounds = array<i64: 128, 128>}]} {
    %cst = arith.constant 0.000000e+00 : bf16
    %0 = vector.broadcast %cst : bf16 to vector<2x16x64xbf16>
    %c0 = arith.constant 0 : index
    %c0_0 = arith.constant 0 : index
    %c0_1 = arith.constant 0 : index
    %1 = vector.load %arg20[%c0, %c0_0, %c0_1] : memref<2x96x64xbf16, #tpu.memory_space<vmem>>, vector<2x16x64xbf16>
    tpu.vector_store %arg20[%c0, %c0_0, %c0_1], %0 {strides = array<i32>} : memref<2x96x64xbf16, #tpu.memory_space<vmem>>, vector<2x16x64xbf16>,
    %c0_2 = arith.constant 0 : index
    %c80 = arith.constant 80 : index
    %c0_3 = arith.constant 0 : index
    %2 = vector.load %arg20[%c0_2, %c80, %c0_3] : memref<2x96x64xbf16, #tpu.memory_space<vmem>>, vector<2x16x64xbf16>
    tpu.vector_store %arg20[%c0_2, %c80, %c0_3], %0 {strides = array<i32>} : memref<2x96x64xbf16, #tpu.memory_space<vmem>>, vector<2x16x64xbf16>,
    %cst_4 = arith.constant 0.000000e+00 : bf16
    %3 = vector.broadcast %cst_4 : bf16 to vector<2x16x32xbf16>
    %c0_5 = arith.constant 0 : index
    %c0_6 = arith.constant 0 : index
    %c0_7 = arith.constant 0 : index
    %4 = vector.load %arg21[%c0_5, %c0_6, %c0_7] : memref<2x96x32xbf16, #tpu.memory_space<vmem>>, vector<2x16x32xbf16>
    tpu.vector_store %arg21[%c0_5, %c0_6, %c0_7], %3 {strides = array<i32>} : memref<2x96x32xbf16, #tpu.memory_space<vmem>>, vector<2x16x32xbf16>,
    %c0_8 = arith.constant 0 : index
    %c80_9 = arith.constant 80 : index
    %c0_10 = arith.constant 0 : index
    %5 = vector.load %arg21[%c0_8, %c80_9, %c0_10] : memref<2x96x32xbf16, #tpu.memory_space<vmem>>, vector<2x16x32xbf16>
    tpu.vector_store %arg21[%c0_8, %c80_9, %c0_10], %3 {strides = array<i32>} : memref<2x96x32xbf16, #tpu.memory_space<vmem>>, vector<2x16x32xbf16>,
    %c0_11 = arith.constant 0 : index
    %c0_12 = arith.constant 0 : index
    %6 = vector.load %arg2[%c0_11, %c0_12] : memref<128x1xf32, #tpu.memory_space<vmem>>, vector<128x1xf32>
    %c0_13 = arith.constant 0 : index
    %c0_14 = arith.constant 0 : index
    %7 = vector.load %arg1[%c0_13, %c0_14] : memref<128x16xf32, #tpu.memory_space<vmem>>, vector<128x16xf32>
    %c0_15 = arith.constant 0 : index
    %c0_16 = arith.constant 0 : index
    %8 = vector.load %arg3[%c0_15, %c0_16] : memref<16x64xbf16, #tpu.memory_space<vmem>>, vector<16x64xbf16>
    %c0_17 = arith.constant 0 : index
    %c0_18 = arith.constant 0 : index
    %9 = vector.load %arg4[%c0_17, %c0_18] : memref<1x64xf32, #tpu.memory_space<vmem>>, vector<1x64xf32>
    %c0_19 = arith.constant 0 : index
    %c0_20 = arith.constant 0 : index
    %10 = vector.load %arg9[%c0_19, %c0_20] : memref<64x8xbf16, #tpu.memory_space<vmem>>, vector<64x8xbf16>
    %c0_21 = arith.constant 0 : index
    %c0_22 = arith.constant 0 : index
    %11 = vector.load %arg10[%c0_21, %c0_22] : memref<1x8xf32, #tpu.memory_space<vmem>>, vector<1x8xf32>
    %12 = arith.truncf %7 : vector<128x16xf32> to vector<128x16xbf16>
    %cst_23 = arith.constant dense<0.000000e+00> : vector<128x64xf32>
    %13 = tpu.matmul %12, %8, %cst_23 {dimension_numbers = #tpu.dot_dimension_numbers<[1], [0], [0], [1], [0, 0, 1, 1], [], []>} : vector<128x16xbf16>, vector<16x64xbf16>, vector<128x64xf32> -> vector<128x64xf32>
    %14 = vector.broadcast %9 : vector<1x64xf32> to vector<128x64xf32>
    %15 = arith.addf %13, %14 : vector<128x64xf32>
    %16 = arith.truncf %15 : vector<128x64xf32> to vector<128x64xbf16>
    %17 = vector.extract_strided_slice %16 {offsets = [0, 0], sizes = [64, 64], strides = [1, 1]} : vector<128x64xbf16> to vector<64x64xbf16>
    %c0_24 = arith.constant 0 : index
    %c16 = arith.constant 16 : index
    %c0_25 = arith.constant 0 : index
    %18 = vector.load %arg20[%c0_24, %c16, %c0_25] : memref<2x96x64xbf16, #tpu.memory_space<vmem>>, vector<1x64x64xbf16>
    %19 = vector.shape_cast %18 : vector<1x64x64xbf16> to vector<64x64xbf16>
    %20 = vector.shape_cast %17 : vector<64x64xbf16> to vector<1x64x64xbf16>
    tpu.vector_store %arg20[%c0_24, %c16, %c0_25], %20 {strides = array<i32>} : memref<2x96x64xbf16, #tpu.memory_space<vmem>>, vector<1x64x64xbf16>,
    %21 = vector.extract_strided_slice %16 {offsets = [64, 0], sizes = [64, 64], strides = [1, 1]} : vector<128x64xbf16> to vector<64x64xbf16>
    %c1 = arith.constant 1 : index
    %c16_26 = arith.constant 16 : index
    %c0_27 = arith.constant 0 : index
    %22 = vector.load %arg20[%c1, %c16_26, %c0_27] : memref<2x96x64xbf16, #tpu.memory_space<vmem>>, vector<1x64x64xbf16>
    %23 = vector.shape_cast %22 : vector<1x64x64xbf16> to vector<64x64xbf16>
    %24 = vector.shape_cast %21 : vector<64x64xbf16> to vector<1x64x64xbf16>
    tpu.vector_store %arg20[%c1, %c16_26, %c0_27], %24 {strides = array<i32>} : memref<2x96x64xbf16, #tpu.memory_space<vmem>>, vector<1x64x64xbf16>,
    %c0_28 = arith.constant 0 : index
    %c14 = arith.constant 14 : index
    %c0_29 = arith.constant 0 : index
    %25 = vector.load %arg20[%c0_28, %c14, %c0_29] : memref<2x96x64xbf16, #tpu.memory_space<vmem>>, vector<2x64x64xbf16>
    %26 = vector.shape_cast %25 : vector<2x64x64xbf16> to vector<128x64xbf16>
    %c0_30 = arith.constant 0 : index
    %c0_31 = arith.constant 0 : index
    %c0_32 = arith.constant 0 : index
    %27 = vector.load %arg5[%c0_30, %c0_31, %c0_32] : memref<15x64x64xbf16, #tpu.memory_space<vmem>>, vector<1x64x64xbf16>
    %28 = vector.shape_cast %27 : vector<1x64x64xbf16> to vector<64x64xbf16>
    %cst_33 = arith.constant dense<0.000000e+00> : vector<128x64xf32>
    %29 = tpu.matmul %26, %28, %cst_33 {dimension_numbers = #tpu.dot_dimension_numbers<[1], [0], [0], [1], [0, 0, 1, 1], [], []>} : vector<128x64xbf16>, vector<64x64xbf16>, vector<128x64xf32> -> vector<128x64xf32>
    %c0_34 = arith.constant 0 : index
    %c15 = arith.constant 15 : index
    %c0_35 = arith.constant 0 : index
    %30 = vector.load %arg20[%c0_34, %c15, %c0_35] : memref<2x96x64xbf16, #tpu.memory_space<vmem>>, vector<2x64x64xbf16>
    %31 = vector.shape_cast %30 : vector<2x64x64xbf16> to vector<128x64xbf16>
    %c1_36 = arith.constant 1 : index
    %c0_37 = arith.constant 0 : index
    %c0_38 = arith.constant 0 : index
    %32 = vector.load %arg5[%c1_36, %c0_37, %c0_38] : memref<15x64x64xbf16, #tpu.memory_space<vmem>>, vector<1x64x64xbf16>
    %33 = vector.shape_cast %32 : vector<1x64x64xbf16> to vector<64x64xbf16>
    %cst_39 = arith.constant dense<0.000000e+00> : vector<128x64xf32>
    %34 = tpu.matmul %31, %33, %cst_39 {dimension_numbers = #tpu.dot_dimension_numbers<[1], [0], [0], [1], [0, 0, 1, 1], [], []>} : vector<128x64xbf16>, vector<64x64xbf16>, vector<128x64xf32> -> vector<128x64xf32>
    %35 = arith.addf %29, %34 : vector<128x64xf32>
    %c0_40 = arith.constant 0 : index
    %c16_41 = arith.constant 16 : index
    %c0_42 = arith.constant 0 : index
    %36 = vector.load %arg20[%c0_40, %c16_41, %c0_42] : memref<2x96x64xbf16, #tpu.memory_space<vmem>>, vector<2x64x64xbf16>
    %37 = vector.shape_cast %36 : vector<2x64x64xbf16> to vector<128x64xbf16>
    %c2 = arith.constant 2 : index
    %c0_43 = arith.constant 0 : index
    %c0_44 = arith.constant 0 : index
    %38 = vector.load %arg5[%c2, %c0_43, %c0_44] : memref<15x64x64xbf16, #tpu.memory_space<vmem>>, vector<1x64x64xbf16>
    %39 = vector.shape_cast %38 : vector<1x64x64xbf16> to vector<64x64xbf16>
    %cst_45 = arith.constant dense<0.000000e+00> : vector<128x64xf32>
    %40 = tpu.matmul %37, %39, %cst_45 {dimension_numbers = #tpu.dot_dimension_numbers<[1], [0], [0], [1], [0, 0, 1, 1], [], []>} : vector<128x64xbf16>, vector<64x64xbf16>, vector<128x64xf32> -> vector<128x64xf32>
    %41 = arith.addf %35, %40 : vector<128x64xf32>
    %c0_46 = arith.constant 0 : index
    %c17 = arith.constant 17 : index
    %c0_47 = arith.constant 0 : index
    %42 = vector.load %arg20[%c0_46, %c17, %c0_47] : memref<2x96x64xbf16, #tpu.memory_space<vmem>>, vector<2x64x64xbf16>
    %43 = vector.shape_cast %42 : vector<2x64x64xbf16> to vector<128x64xbf16>
    %c3 = arith.constant 3 : index
    %c0_48 = arith.constant 0 : index
    %c0_49 = arith.constant 0 : index
    %44 = vector.load %arg5[%c3, %c0_48, %c0_49] : memref<15x64x64xbf16, #tpu.memory_space<vmem>>, vector<1x64x64xbf16>
    %45 = vector.shape_cast %44 : vector<1x64x64xbf16> to vector<64x64xbf16>
    %cst_50 = arith.constant dense<0.000000e+00> : vector<128x64xf32>
    %46 = tpu.matmul %43, %45, %cst_50 {dimension_numbers = #tpu.dot_dimension_numbers<[1], [0], [0], [1], [0, 0, 1, 1], [], []>} : vector<128x64xbf16>, vector<64x64xbf16>, vector<128x64xf32> -> vector<128x64xf32>
    %47 = arith.addf %41, %46 : vector<128x64xf32>
    %c0_51 = arith.constant 0 : index
    %c18 = arith.constant 18 : index
    %c0_52 = arith.constant 0 : index
    %48 = vector.load %arg20[%c0_51, %c18, %c0_52] : memref<2x96x64xbf16, #tpu.memory_space<vmem>>, vector<2x64x64xbf16>
    %49 = vector.shape_cast %48 : vector<2x64x64xbf16> to vector<128x64xbf16>
    %c4 = arith.constant 4 : index
    %c0_53 = arith.constant 0 : index
    %c0_54 = arith.constant 0 : index
    %50 = vector.load %arg5[%c4, %c0_53, %c0_54] : memref<15x64x64xbf16, #tpu.memory_space<vmem>>, vector<1x64x64xbf16>
    %51 = vector.shape_cast %50 : vector<1x64x64xbf16> to vector<64x64xbf16>
    %cst_55 = arith.constant dense<0.000000e+00> : vector<128x64xf32>
    %52 = tpu.matmul %49, %51, %cst_55 {dimension_numbers = #tpu.dot_dimension_numbers<[1], [0], [0], [1], [0, 0, 1, 1], [], []>} : vector<128x64xbf16>, vector<64x64xbf16>, vector<128x64xf32> -> vector<128x64xf32>
    %53 = arith.addf %47, %52 : vector<128x64xf32>
    %c0_56 = arith.constant 0 : index
    %c0_57 = arith.constant 0 : index
    %c0_58 = arith.constant 0 : index
    %54 = vector.load %arg6[%c0_56, %c0_57, %c0_58] : memref<3x1x64xf32, #tpu.memory_space<vmem>>, vector<1x1x64xf32>
    %55 = vector.shape_cast %54 : vector<1x1x64xf32> to vector<1x64xf32>
    %56 = vector.broadcast %55 : vector<1x64xf32> to vector<128x64xf32>
    %57 = arith.addf %53, %56 : vector<128x64xf32>
    %cst_59 = arith.constant 0.000000e+00 : f32
    %58 = vector.broadcast %cst_59 : f32 to vector<128x64xf32>
    %59 = arith.maximumf %57, %58 : vector<128x64xf32>
    %60 = arith.truncf %59 : vector<128x64xf32> to vector<128x64xbf16>
    %c0_60 = arith.constant 0 : index
    %c0_61 = arith.constant 0 : index
    %c0_62 = arith.constant 0 : index
    %61 = vector.load %arg7[%c0_60, %c0_61, %c0_62] : memref<3x64x64xbf16, #tpu.memory_space<vmem>>, vector<1x64x64xbf16>
    %62 = vector.shape_cast %61 : vector<1x64x64xbf16> to vector<64x64xbf16>
    %cst_63 = arith.constant dense<0.000000e+00> : vector<128x64xf32>
    %63 = tpu.matmul %60, %62, %cst_63 {dimension_numbers = #tpu.dot_dimension_numbers<[1], [0], [0], [1], [0, 0, 1, 1], [], []>} : vector<128x64xbf16>, vector<64x64xbf16>, vector<128x64xf32> -> vector<128x64xf32>
    %c0_64 = arith.constant 0 : index
    %c0_65 = arith.constant 0 : index
    %c0_66 = arith.constant 0 : index
    %64 = vector.load %arg8[%c0_64, %c0_65, %c0_66] : memref<3x1x64xf32, #tpu.memory_space<vmem>>, vector<1x1x64xf32>
    %65 = vector.shape_cast %64 : vector<1x1x64xf32> to vector<1x64xf32>
    %66 = vector.broadcast %65 : vector<1x64xf32> to vector<128x64xf32>
    %67 = arith.addf %63, %66 : vector<128x64xf32>
    %68 = arith.addf %15, %67 : vector<128x64xf32>
    %69 = vector.broadcast %6 : vector<128x1xf32> to vector<128x64xf32>
    %70 = arith.mulf %68, %69 : vector<128x64xf32>
    %71 = arith.truncf %70 : vector<128x64xf32> to vector<128x64xbf16>
    %72 = vector.extract_strided_slice %71 {offsets = [0, 0], sizes = [64, 64], strides = [1, 1]} : vector<128x64xbf16> to vector<64x64xbf16>
    %c0_67 = arith.constant 0 : index
    %c16_68 = arith.constant 16 : index
    %c0_69 = arith.constant 0 : index
    %73 = vector.load %arg20[%c0_67, %c16_68, %c0_69] : memref<2x96x64xbf16, #tpu.memory_space<vmem>>, vector<1x64x64xbf16>
    %74 = vector.shape_cast %73 : vector<1x64x64xbf16> to vector<64x64xbf16>
    %75 = vector.shape_cast %72 : vector<64x64xbf16> to vector<1x64x64xbf16>
    tpu.vector_store %arg20[%c0_67, %c16_68, %c0_69], %75 {strides = array<i32>} : memref<2x96x64xbf16, #tpu.memory_space<vmem>>, vector<1x64x64xbf16>,
    %76 = vector.extract_strided_slice %71 {offsets = [64, 0], sizes = [64, 64], strides = [1, 1]} : vector<128x64xbf16> to vector<64x64xbf16>
    %c1_70 = arith.constant 1 : index
    %c16_71 = arith.constant 16 : index
    %c0_72 = arith.constant 0 : index
    %77 = vector.load %arg20[%c1_70, %c16_71, %c0_72] : memref<2x96x64xbf16, #tpu.memory_space<vmem>>, vector<1x64x64xbf16>
    %78 = vector.shape_cast %77 : vector<1x64x64xbf16> to vector<64x64xbf16>
    %79 = vector.shape_cast %76 : vector<64x64xbf16> to vector<1x64x64xbf16>
    tpu.vector_store %arg20[%c1_70, %c16_71, %c0_72], %79 {strides = array<i32>} : memref<2x96x64xbf16, #tpu.memory_space<vmem>>, vector<1x64x64xbf16>,
    %c0_73 = arith.constant 0 : index
    %c12 = arith.constant 12 : index
    %c0_74 = arith.constant 0 : index
    %80 = vector.load %arg20[%c0_73, %c12, %c0_74] : memref<2x96x64xbf16, #tpu.memory_space<vmem>>, vector<2x64x64xbf16>
    %81 = vector.shape_cast %80 : vector<2x64x64xbf16> to vector<128x64xbf16>
    %c5 = arith.constant 5 : index
    %c0_75 = arith.constant 0 : index
    %c0_76 = arith.constant 0 : index
    %82 = vector.load %arg5[%c5, %c0_75, %c0_76] : memref<15x64x64xbf16, #tpu.memory_space<vmem>>, vector<1x64x64xbf16>
    %83 = vector.shape_cast %82 : vector<1x64x64xbf16> to vector<64x64xbf16>
    %cst_77 = arith.constant dense<0.000000e+00> : vector<128x64xf32>
    %84 = tpu.matmul %81, %83, %cst_77 {dimension_numbers = #tpu.dot_dimension_numbers<[1], [0], [0], [1], [0, 0, 1, 1], [], []>} : vector<128x64xbf16>, vector<64x64xbf16>, vector<128x64xf32> -> vector<128x64xf32>
    %c0_78 = arith.constant 0 : index
    %c14_79 = arith.constant 14 : index
    %c0_80 = arith.constant 0 : index
    %85 = vector.load %arg20[%c0_78, %c14_79, %c0_80] : memref<2x96x64xbf16, #tpu.memory_space<vmem>>, vector<2x64x64xbf16>
    %86 = vector.shape_cast %85 : vector<2x64x64xbf16> to vector<128x64xbf16>
    %c6 = arith.constant 6 : index
    %c0_81 = arith.constant 0 : index
    %c0_82 = arith.constant 0 : index
    %87 = vector.load %arg5[%c6, %c0_81, %c0_82] : memref<15x64x64xbf16, #tpu.memory_space<vmem>>, vector<1x64x64xbf16>
    %88 = vector.shape_cast %87 : vector<1x64x64xbf16> to vector<64x64xbf16>
    %cst_83 = arith.constant dense<0.000000e+00> : vector<128x64xf32>
    %89 = tpu.matmul %86, %88, %cst_83 {dimension_numbers = #tpu.dot_dimension_numbers<[1], [0], [0], [1], [0, 0, 1, 1], [], []>} : vector<128x64xbf16>, vector<64x64xbf16>, vector<128x64xf32> -> vector<128x64xf32>
    %90 = arith.addf %84, %89 : vector<128x64xf32>
    %c0_84 = arith.constant 0 : index
    %c16_85 = arith.constant 16 : index
    %c0_86 = arith.constant 0 : index
    %91 = vector.load %arg20[%c0_84, %c16_85, %c0_86] : memref<2x96x64xbf16, #tpu.memory_space<vmem>>, vector<2x64x64xbf16>
    %92 = vector.shape_cast %91 : vector<2x64x64xbf16> to vector<128x64xbf16>
    %c7 = arith.constant 7 : index
    %c0_87 = arith.constant 0 : index
    %c0_88 = arith.constant 0 : index
    %93 = vector.load %arg5[%c7, %c0_87, %c0_88] : memref<15x64x64xbf16, #tpu.memory_space<vmem>>, vector<1x64x64xbf16>
    %94 = vector.shape_cast %93 : vector<1x64x64xbf16> to vector<64x64xbf16>
    %cst_89 = arith.constant dense<0.000000e+00> : vector<128x64xf32>
    %95 = tpu.matmul %92, %94, %cst_89 {dimension_numbers = #tpu.dot_dimension_numbers<[1], [0], [0], [1], [0, 0, 1, 1], [], []>} : vector<128x64xbf16>, vector<64x64xbf16>, vector<128x64xf32> -> vector<128x64xf32>
    %96 = arith.addf %90, %95 : vector<128x64xf32>
    %c0_90 = arith.constant 0 : index
    %c18_91 = arith.constant 18 : index
    %c0_92 = arith.constant 0 : index
    %97 = vector.load %arg20[%c0_90, %c18_91, %c0_92] : memref<2x96x64xbf16, #tpu.memory_space<vmem>>, vector<2x64x64xbf16>
    %98 = vector.shape_cast %97 : vector<2x64x64xbf16> to vector<128x64xbf16>
    %c8 = arith.constant 8 : index
    %c0_93 = arith.constant 0 : index
    %c0_94 = arith.constant 0 : index
    %99 = vector.load %arg5[%c8, %c0_93, %c0_94] : memref<15x64x64xbf16, #tpu.memory_space<vmem>>, vector<1x64x64xbf16>
    %100 = vector.shape_cast %99 : vector<1x64x64xbf16> to vector<64x64xbf16>
    %cst_95 = arith.constant dense<0.000000e+00> : vector<128x64xf32>
    %101 = tpu.matmul %98, %100, %cst_95 {dimension_numbers = #tpu.dot_dimension_numbers<[1], [0], [0], [1], [0, 0, 1, 1], [], []>} : vector<128x64xbf16>, vector<64x64xbf16>, vector<128x64xf32> -> vector<128x64xf32>
    %102 = arith.addf %96, %101 : vector<128x64xf32>
    %c0_96 = arith.constant 0 : index
    %c20 = arith.constant 20 : index
    %c0_97 = arith.constant 0 : index
    %103 = vector.load %arg20[%c0_96, %c20, %c0_97] : memref<2x96x64xbf16, #tpu.memory_space<vmem>>, vector<2x64x64xbf16>
    %104 = vector.shape_cast %103 : vector<2x64x64xbf16> to vector<128x64xbf16>
    %c9 = arith.constant 9 : index
    %c0_98 = arith.constant 0 : index
    %c0_99 = arith.constant 0 : index
    %105 = vector.load %arg5[%c9, %c0_98, %c0_99] : memref<15x64x64xbf16, #tpu.memory_space<vmem>>, vector<1x64x64xbf16>
    %106 = vector.shape_cast %105 : vector<1x64x64xbf16> to vector<64x64xbf16>
    %cst_100 = arith.constant dense<0.000000e+00> : vector<128x64xf32>
    %107 = tpu.matmul %104, %106, %cst_100 {dimension_numbers = #tpu.dot_dimension_numbers<[1], [0], [0], [1], [0, 0, 1, 1], [], []>} : vector<128x64xbf16>, vector<64x64xbf16>, vector<128x64xf32> -> vector<128x64xf32>
    %108 = arith.addf %102, %107 : vector<128x64xf32>
    %c1_101 = arith.constant 1 : index
    %c0_102 = arith.constant 0 : index
    %c0_103 = arith.constant 0 : index
    %109 = vector.load %arg6[%c1_101, %c0_102, %c0_103] : memref<3x1x64xf32, #tpu.memory_space<vmem>>, vector<1x1x64xf32>
    %110 = vector.shape_cast %109 : vector<1x1x64xf32> to vector<1x64xf32>
    %111 = vector.broadcast %110 : vector<1x64xf32> to vector<128x64xf32>
    %112 = arith.addf %108, %111 : vector<128x64xf32>
    %cst_104 = arith.constant 0.000000e+00 : f32
    %113 = vector.broadcast %cst_104 : f32 to vector<128x64xf32>
    %114 = arith.maximumf %112, %113 : vector<128x64xf32>
    %115 = arith.truncf %114 : vector<128x64xf32> to vector<128x64xbf16>
    %c1_105 = arith.constant 1 : index
    %c0_106 = arith.constant 0 : index
    %c0_107 = arith.constant 0 : index
    %116 = vector.load %arg7[%c1_105, %c0_106, %c0_107] : memref<3x64x64xbf16, #tpu.memory_space<vmem>>, vector<1x64x64xbf16>
    %117 = vector.shape_cast %116 : vector<1x64x64xbf16> to vector<64x64xbf16>
    %cst_108 = arith.constant dense<0.000000e+00> : vector<128x64xf32>
    %118 = tpu.matmul %115, %117, %cst_108 {dimension_numbers = #tpu.dot_dimension_numbers<[1], [0], [0], [1], [0, 0, 1, 1], [], []>} : vector<128x64xbf16>, vector<64x64xbf16>, vector<128x64xf32> -> vector<128x64xf32>
    %c1_109 = arith.constant 1 : index
    %c0_110 = arith.constant 0 : index
    %c0_111 = arith.constant 0 : index
    %119 = vector.load %arg8[%c1_109, %c0_110, %c0_111] : memref<3x1x64xf32, #tpu.memory_space<vmem>>, vector<1x1x64xf32>
    %120 = vector.shape_cast %119 : vector<1x1x64xf32> to vector<1x64xf32>
    %121 = vector.broadcast %120 : vector<1x64xf32> to vector<128x64xf32>
    %122 = arith.addf %118, %121 : vector<128x64xf32>
    %123 = arith.addf %70, %122 : vector<128x64xf32>
    %124 = vector.broadcast %6 : vector<128x1xf32> to vector<128x64xf32>
    %125 = arith.mulf %123, %124 : vector<128x64xf32>
    %126 = arith.truncf %125 : vector<128x64xf32> to vector<128x64xbf16>
    %127 = vector.extract_strided_slice %126 {offsets = [0, 0], sizes = [64, 64], strides = [1, 1]} : vector<128x64xbf16> to vector<64x64xbf16>
    %c0_112 = arith.constant 0 : index
    %c16_113 = arith.constant 16 : index
    %c0_114 = arith.constant 0 : index
    %128 = vector.load %arg20[%c0_112, %c16_113, %c0_114] : memref<2x96x64xbf16, #tpu.memory_space<vmem>>, vector<1x64x64xbf16>
    %129 = vector.shape_cast %128 : vector<1x64x64xbf16> to vector<64x64xbf16>
    %130 = vector.shape_cast %127 : vector<64x64xbf16> to vector<1x64x64xbf16>
    tpu.vector_store %arg20[%c0_112, %c16_113, %c0_114], %130 {strides = array<i32>} : memref<2x96x64xbf16, #tpu.memory_space<vmem>>, vector<1x64x64xbf16>,
    %131 = vector.extract_strided_slice %126 {offsets = [64, 0], sizes = [64, 64], strides = [1, 1]} : vector<128x64xbf16> to vector<64x64xbf16>
    %c1_115 = arith.constant 1 : index
    %c16_116 = arith.constant 16 : index
    %c0_117 = arith.constant 0 : index
    %132 = vector.load %arg20[%c1_115, %c16_116, %c0_117] : memref<2x96x64xbf16, #tpu.memory_space<vmem>>, vector<1x64x64xbf16>
    %133 = vector.shape_cast %132 : vector<1x64x64xbf16> to vector<64x64xbf16>
    %134 = vector.shape_cast %131 : vector<64x64xbf16> to vector<1x64x64xbf16>
    tpu.vector_store %arg20[%c1_115, %c16_116, %c0_117], %134 {strides = array<i32>} : memref<2x96x64xbf16, #tpu.memory_space<vmem>>, vector<1x64x64xbf16>,
    %c0_118 = arith.constant 0 : index
    %c8_119 = arith.constant 8 : index
    %c0_120 = arith.constant 0 : index
    %135 = vector.load %arg20[%c0_118, %c8_119, %c0_120] : memref<2x96x64xbf16, #tpu.memory_space<vmem>>, vector<2x64x64xbf16>
    %136 = vector.shape_cast %135 : vector<2x64x64xbf16> to vector<128x64xbf16>
    %c10 = arith.constant 10 : index
    %c0_121 = arith.constant 0 : index
    %c0_122 = arith.constant 0 : index
    %137 = vector.load %arg5[%c10, %c0_121, %c0_122] : memref<15x64x64xbf16, #tpu.memory_space<vmem>>, vector<1x64x64xbf16>
    %138 = vector.shape_cast %137 : vector<1x64x64xbf16> to vector<64x64xbf16>
    %cst_123 = arith.constant dense<0.000000e+00> : vector<128x64xf32>
    %139 = tpu.matmul %136, %138, %cst_123 {dimension_numbers = #tpu.dot_dimension_numbers<[1], [0], [0], [1], [0, 0, 1, 1], [], []>} : vector<128x64xbf16>, vector<64x64xbf16>, vector<128x64xf32> -> vector<128x64xf32>
    %c0_124 = arith.constant 0 : index
    %c12_125 = arith.constant 12 : index
    %c0_126 = arith.constant 0 : index
    %140 = vector.load %arg20[%c0_124, %c12_125, %c0_126] : memref<2x96x64xbf16, #tpu.memory_space<vmem>>, vector<2x64x64xbf16>
    %141 = vector.shape_cast %140 : vector<2x64x64xbf16> to vector<128x64xbf16>
    %c11 = arith.constant 11 : index
    %c0_127 = arith.constant 0 : index
    %c0_128 = arith.constant 0 : index
    %142 = vector.load %arg5[%c11, %c0_127, %c0_128] : memref<15x64x64xbf16, #tpu.memory_space<vmem>>, vector<1x64x64xbf16>
    %143 = vector.shape_cast %142 : vector<1x64x64xbf16> to vector<64x64xbf16>
    %cst_129 = arith.constant dense<0.000000e+00> : vector<128x64xf32>
    %144 = tpu.matmul %141, %143, %cst_129 {dimension_numbers = #tpu.dot_dimension_numbers<[1], [0], [0], [1], [0, 0, 1, 1], [], []>} : vector<128x64xbf16>, vector<64x64xbf16>, vector<128x64xf32> -> vector<128x64xf32>
    %145 = arith.addf %139, %144 : vector<128x64xf32>
    %c0_130 = arith.constant 0 : index
    %c16_131 = arith.constant 16 : index
    %c0_132 = arith.constant 0 : index
    %146 = vector.load %arg20[%c0_130, %c16_131, %c0_132] : memref<2x96x64xbf16, #tpu.memory_space<vmem>>, vector<2x64x64xbf16>
    %147 = vector.shape_cast %146 : vector<2x64x64xbf16> to vector<128x64xbf16>
    %c12_133 = arith.constant 12 : index
    %c0_134 = arith.constant 0 : index
    %c0_135 = arith.constant 0 : index
    %148 = vector.load %arg5[%c12_133, %c0_134, %c0_135] : memref<15x64x64xbf16, #tpu.memory_space<vmem>>, vector<1x64x64xbf16>
    %149 = vector.shape_cast %148 : vector<1x64x64xbf16> to vector<64x64xbf16>
    %cst_136 = arith.constant dense<0.000000e+00> : vector<128x64xf32>
    %150 = tpu.matmul %147, %149, %cst_136 {dimension_numbers = #tpu.dot_dimension_numbers<[1], [0], [0], [1], [0, 0, 1, 1], [], []>} : vector<128x64xbf16>, vector<64x64xbf16>, vector<128x64xf32> -> vector<128x64xf32>
    %151 = arith.addf %145, %150 : vector<128x64xf32>
    %c0_137 = arith.constant 0 : index
    %c20_138 = arith.constant 20 : index
    %c0_139 = arith.constant 0 : index
    %152 = vector.load %arg20[%c0_137, %c20_138, %c0_139] : memref<2x96x64xbf16, #tpu.memory_space<vmem>>, vector<2x64x64xbf16>
    %153 = vector.shape_cast %152 : vector<2x64x64xbf16> to vector<128x64xbf16>
    %c13 = arith.constant 13 : index
    %c0_140 = arith.constant 0 : index
    %c0_141 = arith.constant 0 : index
    %154 = vector.load %arg5[%c13, %c0_140, %c0_141] : memref<15x64x64xbf16, #tpu.memory_space<vmem>>, vector<1x64x64xbf16>
    %155 = vector.shape_cast %154 : vector<1x64x64xbf16> to vector<64x64xbf16>
    %cst_142 = arith.constant dense<0.000000e+00> : vector<128x64xf32>
    %156 = tpu.matmul %153, %155, %cst_142 {dimension_numbers = #tpu.dot_dimension_numbers<[1], [0], [0], [1], [0, 0, 1, 1], [], []>} : vector<128x64xbf16>, vector<64x64xbf16>, vector<128x64xf32> -> vector<128x64xf32>
    %157 = arith.addf %151, %156 : vector<128x64xf32>
    %c0_143 = arith.constant 0 : index
    %c24 = arith.constant 24 : index
    %c0_144 = arith.constant 0 : index
    %158 = vector.load %arg20[%c0_143, %c24, %c0_144] : memref<2x96x64xbf16, #tpu.memory_space<vmem>>, vector<2x64x64xbf16>
    %159 = vector.shape_cast %158 : vector<2x64x64xbf16> to vector<128x64xbf16>
    %c14_145 = arith.constant 14 : index
    %c0_146 = arith.constant 0 : index
    %c0_147 = arith.constant 0 : index
    %160 = vector.load %arg5[%c14_145, %c0_146, %c0_147] : memref<15x64x64xbf16, #tpu.memory_space<vmem>>, vector<1x64x64xbf16>
    %161 = vector.shape_cast %160 : vector<1x64x64xbf16> to vector<64x64xbf16>
    %cst_148 = arith.constant dense<0.000000e+00> : vector<128x64xf32>
    %162 = tpu.matmul %159, %161, %cst_148 {dimension_numbers = #tpu.dot_dimension_numbers<[1], [0], [0], [1], [0, 0, 1, 1], [], []>} : vector<128x64xbf16>, vector<64x64xbf16>, vector<128x64xf32> -> vector<128x64xf32>
    %163 = arith.addf %157, %162 : vector<128x64xf32>
    %c2_149 = arith.constant 2 : index
    %c0_150 = arith.constant 0 : index
    %c0_151 = arith.constant 0 : index
    %164 = vector.load %arg6[%c2_149, %c0_150, %c0_151] : memref<3x1x64xf32, #tpu.memory_space<vmem>>, vector<1x1x64xf32>
    %165 = vector.shape_cast %164 : vector<1x1x64xf32> to vector<1x64xf32>
    %166 = vector.broadcast %165 : vector<1x64xf32> to vector<128x64xf32>
    %167 = arith.addf %163, %166 : vector<128x64xf32>
    %cst_152 = arith.constant 0.000000e+00 : f32
    %168 = vector.broadcast %cst_152 : f32 to vector<128x64xf32>
    %169 = arith.maximumf %167, %168 : vector<128x64xf32>
    %170 = arith.truncf %169 : vector<128x64xf32> to vector<128x64xbf16>
    %c2_153 = arith.constant 2 : index
    %c0_154 = arith.constant 0 : index
    %c0_155 = arith.constant 0 : index
    %171 = vector.load %arg7[%c2_153, %c0_154, %c0_155] : memref<3x64x64xbf16, #tpu.memory_space<vmem>>, vector<1x64x64xbf16>
    %172 = vector.shape_cast %171 : vector<1x64x64xbf16> to vector<64x64xbf16>
    %cst_156 = arith.constant dense<0.000000e+00> : vector<128x64xf32>
    %173 = tpu.matmul %170, %172, %cst_156 {dimension_numbers = #tpu.dot_dimension_numbers<[1], [0], [0], [1], [0, 0, 1, 1], [], []>} : vector<128x64xbf16>, vector<64x64xbf16>, vector<128x64xf32> -> vector<128x64xf32>
    %c2_157 = arith.constant 2 : index
    %c0_158 = arith.constant 0 : index
    %c0_159 = arith.constant 0 : index
    %174 = vector.load %arg8[%c2_157, %c0_158, %c0_159] : memref<3x1x64xf32, #tpu.memory_space<vmem>>, vector<1x1x64xf32>
    %175 = vector.shape_cast %174 : vector<1x1x64xf32> to vector<1x64xf32>
    %176 = vector.broadcast %175 : vector<1x64xf32> to vector<128x64xf32>
    %177 = arith.addf %173, %176 : vector<128x64xf32>
    %178 = arith.addf %125, %177 : vector<128x64xf32>
    %179 = vector.broadcast %6 : vector<128x1xf32> to vector<128x64xf32>
    %180 = arith.mulf %178, %179 : vector<128x64xf32>
    %181 = arith.truncf %180 : vector<128x64xf32> to vector<128x64xbf16>
    %cst_160 = arith.constant dense<0.000000e+00> : vector<128x8xf32>
    %182 = tpu.matmul %181, %10, %cst_160 {dimension_numbers = #tpu.dot_dimension_numbers<[1], [0], [0], [1], [0, 0, 1, 1], [], []>} : vector<128x64xbf16>, vector<64x8xbf16>, vector<128x8xf32> -> vector<128x8xf32>
    %183 = vector.broadcast %11 : vector<1x8xf32> to vector<128x8xf32>
    %184 = arith.addf %182, %183 : vector<128x8xf32>
    %185 = vector.broadcast %6 : vector<128x1xf32> to vector<128x8xf32>
    %186 = arith.mulf %184, %185 : vector<128x8xf32>
    %cst_161 = arith.constant dense<0xFF800000> : vector<128xf32>
    %187 = vector.multi_reduction <maximumf>, %186, %cst_161 [1] : vector<128x8xf32> to vector<128xf32>
    %188 = vector.shape_cast %187 : vector<128xf32> to vector<128x1xf32>
    %189 = vector.broadcast %188 : vector<128x1xf32> to vector<128x8xf32>
    %190 = arith.subf %186, %189 : vector<128x8xf32>
    %191 = math.exp %190 : vector<128x8xf32>
    %cst_162 = arith.constant dense<0.000000e+00> : vector<128xf32>
    %192 = vector.multi_reduction <add>, %191, %cst_162 [1] : vector<128x8xf32> to vector<128xf32>
    %193 = vector.shape_cast %192 : vector<128xf32> to vector<128x1xf32>
    %194 = vector.broadcast %193 : vector<128x1xf32> to vector<128x8xf32>
    %195 = arith.divf %191, %194 : vector<128x8xf32>
    %196 = vector.broadcast %6 : vector<128x1xf32> to vector<128x8xf32>
    %197 = arith.mulf %195, %196 : vector<128x8xf32>
    %c0_163 = arith.constant 0 : index
    %c0_164 = arith.constant 0 : index
    %c0_165 = arith.constant 0 : index
    %198 = vector.load %arg11[%c0_163, %c0_164, %c0_165] : memref<2x8x32xbf16, #tpu.memory_space<vmem>>, vector<1x8x32xbf16>
    %199 = vector.shape_cast %198 : vector<1x8x32xbf16> to vector<8x32xbf16>
    %c0_166 = arith.constant 0 : index
    %c0_167 = arith.constant 0 : index
    %c0_168 = arith.constant 0 : index
    %200 = vector.load %arg12[%c0_166, %c0_167, %c0_168] : memref<2x1x32xf32, #tpu.memory_space<vmem>>, vector<1x1x32xf32>
    %201 = vector.shape_cast %200 : vector<1x1x32xf32> to vector<1x32xf32>
    %c0_169 = arith.constant 0 : index
    %c0_170 = arith.constant 0 : index
    %c0_171 = arith.constant 0 : index
    %202 = vector.load %arg17[%c0_169, %c0_170, %c0_171] : memref<2x32x8xbf16, #tpu.memory_space<vmem>>, vector<1x32x8xbf16>
    %203 = vector.shape_cast %202 : vector<1x32x8xbf16> to vector<32x8xbf16>
    %c0_172 = arith.constant 0 : index
    %c0_173 = arith.constant 0 : index
    %c0_174 = arith.constant 0 : index
    %204 = vector.load %arg18[%c0_172, %c0_173, %c0_174] : memref<2x1x8xf32, #tpu.memory_space<vmem>>, vector<1x1x8xf32>
    %205 = vector.shape_cast %204 : vector<1x1x8xf32> to vector<1x8xf32>
    %206 = arith.truncf %197 : vector<128x8xf32> to vector<128x8xbf16>
    %cst_175 = arith.constant dense<0.000000e+00> : vector<128x32xf32>
    %207 = tpu.matmul %206, %199, %cst_175 {dimension_numbers = #tpu.dot_dimension_numbers<[1], [0], [0], [1], [0, 0, 1, 1], [], []>} : vector<128x8xbf16>, vector<8x32xbf16>, vector<128x32xf32> -> vector<128x32xf32>
    %208 = vector.broadcast %201 : vector<1x32xf32> to vector<128x32xf32>
    %209 = arith.addf %207, %208 : vector<128x32xf32>
    %210 = arith.truncf %209 : vector<128x32xf32> to vector<128x32xbf16>
    %211 = vector.extract_strided_slice %210 {offsets = [0, 0], sizes = [64, 32], strides = [1, 1]} : vector<128x32xbf16> to vector<64x32xbf16>
    %c0_176 = arith.constant 0 : index
    %c16_177 = arith.constant 16 : index
    %c0_178 = arith.constant 0 : index
    %212 = vector.load %arg21[%c0_176, %c16_177, %c0_178] : memref<2x96x32xbf16, #tpu.memory_space<vmem>>, vector<1x64x32xbf16>
    %213 = vector.shape_cast %212 : vector<1x64x32xbf16> to vector<64x32xbf16>
    %214 = vector.shape_cast %211 : vector<64x32xbf16> to vector<1x64x32xbf16>
    tpu.vector_store %arg21[%c0_176, %c16_177, %c0_178], %214 {strides = array<i32>} : memref<2x96x32xbf16, #tpu.memory_space<vmem>>, vector<1x64x32xbf16>,
    %215 = vector.extract_strided_slice %210 {offsets = [64, 0], sizes = [64, 32], strides = [1, 1]} : vector<128x32xbf16> to vector<64x32xbf16>
    %c1_179 = arith.constant 1 : index
    %c16_180 = arith.constant 16 : index
    %c0_181 = arith.constant 0 : index
    %216 = vector.load %arg21[%c1_179, %c16_180, %c0_181] : memref<2x96x32xbf16, #tpu.memory_space<vmem>>, vector<1x64x32xbf16>
    %217 = vector.shape_cast %216 : vector<1x64x32xbf16> to vector<64x32xbf16>
    %218 = vector.shape_cast %215 : vector<64x32xbf16> to vector<1x64x32xbf16>
    tpu.vector_store %arg21[%c1_179, %c16_180, %c0_181], %218 {strides = array<i32>} : memref<2x96x32xbf16, #tpu.memory_space<vmem>>, vector<1x64x32xbf16>,
    %c0_182 = arith.constant 0 : index
    %c15_183 = arith.constant 15 : index
    %c0_184 = arith.constant 0 : index
    %219 = vector.load %arg21[%c0_182, %c15_183, %c0_184] : memref<2x96x32xbf16, #tpu.memory_space<vmem>>, vector<2x64x32xbf16>
    %220 = vector.shape_cast %219 : vector<2x64x32xbf16> to vector<128x32xbf16>
    %c0_185 = arith.constant 0 : index
    %c0_186 = arith.constant 0 : index
    %c0_187 = arith.constant 0 : index
    %c0_188 = arith.constant 0 : index
    %221 = vector.load %arg13[%c0_185, %c0_186, %c0_187, %c0_188] : memref<2x9x32x32xbf16, #tpu.memory_space<vmem>>, vector<1x1x32x32xbf16>
    %222 = vector.shape_cast %221 : vector<1x1x32x32xbf16> to vector<32x32xbf16>
    %cst_189 = arith.constant dense<0.000000e+00> : vector<128x32xf32>
    %223 = tpu.matmul %220, %222, %cst_189 {dimension_numbers = #tpu.dot_dimension_numbers<[1], [0], [0], [1], [0, 0, 1, 1], [], []>} : vector<128x32xbf16>, vector<32x32xbf16>, vector<128x32xf32> -> vector<128x32xf32>
    %c0_190 = arith.constant 0 : index
    %c16_191 = arith.constant 16 : index
    %c0_192 = arith.constant 0 : index
    %224 = vector.load %arg21[%c0_190, %c16_191, %c0_192] : memref<2x96x32xbf16, #tpu.memory_space<vmem>>, vector<2x64x32xbf16>
    %225 = vector.shape_cast %224 : vector<2x64x32xbf16> to vector<128x32xbf16>
    %c0_193 = arith.constant 0 : index
    %c1_194 = arith.constant 1 : index
    %c0_195 = arith.constant 0 : index
    %c0_196 = arith.constant 0 : index
    %226 = vector.load %arg13[%c0_193, %c1_194, %c0_195, %c0_196] : memref<2x9x32x32xbf16, #tpu.memory_space<vmem>>, vector<1x1x32x32xbf16>
    %227 = vector.shape_cast %226 : vector<1x1x32x32xbf16> to vector<32x32xbf16>
    %cst_197 = arith.constant dense<0.000000e+00> : vector<128x32xf32>
    %228 = tpu.matmul %225, %227, %cst_197 {dimension_numbers = #tpu.dot_dimension_numbers<[1], [0], [0], [1], [0, 0, 1, 1], [], []>} : vector<128x32xbf16>, vector<32x32xbf16>, vector<128x32xf32> -> vector<128x32xf32>
    %229 = arith.addf %223, %228 : vector<128x32xf32>
    %c0_198 = arith.constant 0 : index
    %c17_199 = arith.constant 17 : index
    %c0_200 = arith.constant 0 : index
    %230 = vector.load %arg21[%c0_198, %c17_199, %c0_200] : memref<2x96x32xbf16, #tpu.memory_space<vmem>>, vector<2x64x32xbf16>
    %231 = vector.shape_cast %230 : vector<2x64x32xbf16> to vector<128x32xbf16>
    %c0_201 = arith.constant 0 : index
    %c2_202 = arith.constant 2 : index
    %c0_203 = arith.constant 0 : index
    %c0_204 = arith.constant 0 : index
    %232 = vector.load %arg13[%c0_201, %c2_202, %c0_203, %c0_204] : memref<2x9x32x32xbf16, #tpu.memory_space<vmem>>, vector<1x1x32x32xbf16>
    %233 = vector.shape_cast %232 : vector<1x1x32x32xbf16> to vector<32x32xbf16>
    %cst_205 = arith.constant dense<0.000000e+00> : vector<128x32xf32>
    %234 = tpu.matmul %231, %233, %cst_205 {dimension_numbers = #tpu.dot_dimension_numbers<[1], [0], [0], [1], [0, 0, 1, 1], [], []>} : vector<128x32xbf16>, vector<32x32xbf16>, vector<128x32xf32> -> vector<128x32xf32>
    %235 = arith.addf %229, %234 : vector<128x32xf32>
    %c0_206 = arith.constant 0 : index
    %c0_207 = arith.constant 0 : index
    %c0_208 = arith.constant 0 : index
    %c0_209 = arith.constant 0 : index
    %236 = vector.load %arg14[%c0_206, %c0_207, %c0_208, %c0_209] : memref<2x3x1x32xf32, #tpu.memory_space<vmem>>, vector<1x1x1x32xf32>
    %237 = vector.shape_cast %236 : vector<1x1x1x32xf32> to vector<1x32xf32>
    %238 = vector.broadcast %237 : vector<1x32xf32> to vector<128x32xf32>
    %239 = arith.addf %235, %238 : vector<128x32xf32>
    %cst_210 = arith.constant 0.000000e+00 : f32
    %240 = vector.broadcast %cst_210 : f32 to vector<128x32xf32>
    %241 = arith.maximumf %239, %240 : vector<128x32xf32>
    %242 = arith.truncf %241 : vector<128x32xf32> to vector<128x32xbf16>
    %c0_211 = arith.constant 0 : index
    %c0_212 = arith.constant 0 : index
    %c0_213 = arith.constant 0 : index
    %c0_214 = arith.constant 0 : index
    %243 = vector.load %arg15[%c0_211, %c0_212, %c0_213, %c0_214] : memref<2x3x32x32xbf16, #tpu.memory_space<vmem>>, vector<1x1x32x32xbf16>
    %244 = vector.shape_cast %243 : vector<1x1x32x32xbf16> to vector<32x32xbf16>
    %cst_215 = arith.constant dense<0.000000e+00> : vector<128x32xf32>
    %245 = tpu.matmul %242, %244, %cst_215 {dimension_numbers = #tpu.dot_dimension_numbers<[1], [0], [0], [1], [0, 0, 1, 1], [], []>} : vector<128x32xbf16>, vector<32x32xbf16>, vector<128x32xf32> -> vector<128x32xf32>
    %c0_216 = arith.constant 0 : index
    %c0_217 = arith.constant 0 : index
    %c0_218 = arith.constant 0 : index
    %c0_219 = arith.constant 0 : index
    %246 = vector.load %arg16[%c0_216, %c0_217, %c0_218, %c0_219] : memref<2x3x1x32xf32, #tpu.memory_space<vmem>>, vector<1x1x1x32xf32>
    %247 = vector.shape_cast %246 : vector<1x1x1x32xf32> to vector<1x32xf32>
    %248 = vector.broadcast %247 : vector<1x32xf32> to vector<128x32xf32>
    %249 = arith.addf %245, %248 : vector<128x32xf32>
    %250 = arith.addf %209, %249 : vector<128x32xf32>
    %251 = vector.broadcast %6 : vector<128x1xf32> to vector<128x32xf32>
    %252 = arith.mulf %250, %251 : vector<128x32xf32>
    %253 = arith.truncf %252 : vector<128x32xf32> to vector<128x32xbf16>
    %254 = vector.extract_strided_slice %253 {offsets = [0, 0], sizes = [64, 32], strides = [1, 1]} : vector<128x32xbf16> to vector<64x32xbf16>
    %c0_220 = arith.constant 0 : index
    %c16_221 = arith.constant 16 : index
    %c0_222 = arith.constant 0 : index
    %255 = vector.load %arg21[%c0_220, %c16_221, %c0_222] : memref<2x96x32xbf16, #tpu.memory_space<vmem>>, vector<1x64x32xbf16>
    %256 = vector.shape_cast %255 : vector<1x64x32xbf16> to vector<64x32xbf16>
    %257 = vector.shape_cast %254 : vector<64x32xbf16> to vector<1x64x32xbf16>
    tpu.vector_store %arg21[%c0_220, %c16_221, %c0_222], %257 {strides = array<i32>} : memref<2x96x32xbf16, #tpu.memory_space<vmem>>, vector<1x64x32xbf16>,
    %258 = vector.extract_strided_slice %253 {offsets = [64, 0], sizes = [64, 32], strides = [1, 1]} : vector<128x32xbf16> to vector<64x32xbf16>
    %c1_223 = arith.constant 1 : index
    %c16_224 = arith.constant 16 : index
    %c0_225 = arith.constant 0 : index
    %259 = vector.load %arg21[%c1_223, %c16_224, %c0_225] : memref<2x96x32xbf16, #tpu.memory_space<vmem>>, vector<1x64x32xbf16>
    %260 = vector.shape_cast %259 : vector<1x64x32xbf16> to vector<64x32xbf16>
    %261 = vector.shape_cast %258 : vector<64x32xbf16> to vector<1x64x32xbf16>
    tpu.vector_store %arg21[%c1_223, %c16_224, %c0_225], %261 {strides = array<i32>} : memref<2x96x32xbf16, #tpu.memory_space<vmem>>, vector<1x64x32xbf16>,
    %c0_226 = arith.constant 0 : index
    %c14_227 = arith.constant 14 : index
    %c0_228 = arith.constant 0 : index
    %262 = vector.load %arg21[%c0_226, %c14_227, %c0_228] : memref<2x96x32xbf16, #tpu.memory_space<vmem>>, vector<2x64x32xbf16>
    %263 = vector.shape_cast %262 : vector<2x64x32xbf16> to vector<128x32xbf16>
    %c0_229 = arith.constant 0 : index
    %c3_230 = arith.constant 3 : index
    %c0_231 = arith.constant 0 : index
    %c0_232 = arith.constant 0 : index
    %264 = vector.load %arg13[%c0_229, %c3_230, %c0_231, %c0_232] : memref<2x9x32x32xbf16, #tpu.memory_space<vmem>>, vector<1x1x32x32xbf16>
    %265 = vector.shape_cast %264 : vector<1x1x32x32xbf16> to vector<32x32xbf16>
    %cst_233 = arith.constant dense<0.000000e+00> : vector<128x32xf32>
    %266 = tpu.matmul %263, %265, %cst_233 {dimension_numbers = #tpu.dot_dimension_numbers<[1], [0], [0], [1], [0, 0, 1, 1], [], []>} : vector<128x32xbf16>, vector<32x32xbf16>, vector<128x32xf32> -> vector<128x32xf32>
    %c0_234 = arith.constant 0 : index
    %c16_235 = arith.constant 16 : index
    %c0_236 = arith.constant 0 : index
    %267 = vector.load %arg21[%c0_234, %c16_235, %c0_236] : memref<2x96x32xbf16, #tpu.memory_space<vmem>>, vector<2x64x32xbf16>
    %268 = vector.shape_cast %267 : vector<2x64x32xbf16> to vector<128x32xbf16>
    %c0_237 = arith.constant 0 : index
    %c4_238 = arith.constant 4 : index
    %c0_239 = arith.constant 0 : index
    %c0_240 = arith.constant 0 : index
    %269 = vector.load %arg13[%c0_237, %c4_238, %c0_239, %c0_240] : memref<2x9x32x32xbf16, #tpu.memory_space<vmem>>, vector<1x1x32x32xbf16>
    %270 = vector.shape_cast %269 : vector<1x1x32x32xbf16> to vector<32x32xbf16>
    %cst_241 = arith.constant dense<0.000000e+00> : vector<128x32xf32>
    %271 = tpu.matmul %268, %270, %cst_241 {dimension_numbers = #tpu.dot_dimension_numbers<[1], [0], [0], [1], [0, 0, 1, 1], [], []>} : vector<128x32xbf16>, vector<32x32xbf16>, vector<128x32xf32> -> vector<128x32xf32>
    %272 = arith.addf %266, %271 : vector<128x32xf32>
    %c0_242 = arith.constant 0 : index
    %c18_243 = arith.constant 18 : index
    %c0_244 = arith.constant 0 : index
    %273 = vector.load %arg21[%c0_242, %c18_243, %c0_244] : memref<2x96x32xbf16, #tpu.memory_space<vmem>>, vector<2x64x32xbf16>
    %274 = vector.shape_cast %273 : vector<2x64x32xbf16> to vector<128x32xbf16>
    %c0_245 = arith.constant 0 : index
    %c5_246 = arith.constant 5 : index
    %c0_247 = arith.constant 0 : index
    %c0_248 = arith.constant 0 : index
    %275 = vector.load %arg13[%c0_245, %c5_246, %c0_247, %c0_248] : memref<2x9x32x32xbf16, #tpu.memory_space<vmem>>, vector<1x1x32x32xbf16>
    %276 = vector.shape_cast %275 : vector<1x1x32x32xbf16> to vector<32x32xbf16>
    %cst_249 = arith.constant dense<0.000000e+00> : vector<128x32xf32>
    %277 = tpu.matmul %274, %276, %cst_249 {dimension_numbers = #tpu.dot_dimension_numbers<[1], [0], [0], [1], [0, 0, 1, 1], [], []>} : vector<128x32xbf16>, vector<32x32xbf16>, vector<128x32xf32> -> vector<128x32xf32>
    %278 = arith.addf %272, %277 : vector<128x32xf32>
    %c0_250 = arith.constant 0 : index
    %c1_251 = arith.constant 1 : index
    %c0_252 = arith.constant 0 : index
    %c0_253 = arith.constant 0 : index
    %279 = vector.load %arg14[%c0_250, %c1_251, %c0_252, %c0_253] : memref<2x3x1x32xf32, #tpu.memory_space<vmem>>, vector<1x1x1x32xf32>
    %280 = vector.shape_cast %279 : vector<1x1x1x32xf32> to vector<1x32xf32>
    %281 = vector.broadcast %280 : vector<1x32xf32> to vector<128x32xf32>
    %282 = arith.addf %278, %281 : vector<128x32xf32>
    %cst_254 = arith.constant 0.000000e+00 : f32
    %283 = vector.broadcast %cst_254 : f32 to vector<128x32xf32>
    %284 = arith.maximumf %282, %283 : vector<128x32xf32>
    %285 = arith.truncf %284 : vector<128x32xf32> to vector<128x32xbf16>
    %c0_255 = arith.constant 0 : index
    %c1_256 = arith.constant 1 : index
    %c0_257 = arith.constant 0 : index
    %c0_258 = arith.constant 0 : index
    %286 = vector.load %arg15[%c0_255, %c1_256, %c0_257, %c0_258] : memref<2x3x32x32xbf16, #tpu.memory_space<vmem>>, vector<1x1x32x32xbf16>
    %287 = vector.shape_cast %286 : vector<1x1x32x32xbf16> to vector<32x32xbf16>
    %cst_259 = arith.constant dense<0.000000e+00> : vector<128x32xf32>
    %288 = tpu.matmul %285, %287, %cst_259 {dimension_numbers = #tpu.dot_dimension_numbers<[1], [0], [0], [1], [0, 0, 1, 1], [], []>} : vector<128x32xbf16>, vector<32x32xbf16>, vector<128x32xf32> -> vector<128x32xf32>
    %c0_260 = arith.constant 0 : index
    %c1_261 = arith.constant 1 : index
    %c0_262 = arith.constant 0 : index
    %c0_263 = arith.constant 0 : index
    %289 = vector.load %arg16[%c0_260, %c1_261, %c0_262, %c0_263] : memref<2x3x1x32xf32, #tpu.memory_space<vmem>>, vector<1x1x1x32xf32>
    %290 = vector.shape_cast %289 : vector<1x1x1x32xf32> to vector<1x32xf32>
    %291 = vector.broadcast %290 : vector<1x32xf32> to vector<128x32xf32>
    %292 = arith.addf %288, %291 : vector<128x32xf32>
    %293 = arith.addf %252, %292 : vector<128x32xf32>
    %294 = vector.broadcast %6 : vector<128x1xf32> to vector<128x32xf32>
    %295 = arith.mulf %293, %294 : vector<128x32xf32>
    %296 = arith.truncf %295 : vector<128x32xf32> to vector<128x32xbf16>
    %297 = vector.extract_strided_slice %296 {offsets = [0, 0], sizes = [64, 32], strides = [1, 1]} : vector<128x32xbf16> to vector<64x32xbf16>
    %c0_264 = arith.constant 0 : index
    %c16_265 = arith.constant 16 : index
    %c0_266 = arith.constant 0 : index
    %298 = vector.load %arg21[%c0_264, %c16_265, %c0_266] : memref<2x96x32xbf16, #tpu.memory_space<vmem>>, vector<1x64x32xbf16>
    %299 = vector.shape_cast %298 : vector<1x64x32xbf16> to vector<64x32xbf16>
    %300 = vector.shape_cast %297 : vector<64x32xbf16> to vector<1x64x32xbf16>
    tpu.vector_store %arg21[%c0_264, %c16_265, %c0_266], %300 {strides = array<i32>} : memref<2x96x32xbf16, #tpu.memory_space<vmem>>, vector<1x64x32xbf16>,
    %301 = vector.extract_strided_slice %296 {offsets = [64, 0], sizes = [64, 32], strides = [1, 1]} : vector<128x32xbf16> to vector<64x32xbf16>
    %c1_267 = arith.constant 1 : index
    %c16_268 = arith.constant 16 : index
    %c0_269 = arith.constant 0 : index
    %302 = vector.load %arg21[%c1_267, %c16_268, %c0_269] : memref<2x96x32xbf16, #tpu.memory_space<vmem>>, vector<1x64x32xbf16>
    %303 = vector.shape_cast %302 : vector<1x64x32xbf16> to vector<64x32xbf16>
    %304 = vector.shape_cast %301 : vector<64x32xbf16> to vector<1x64x32xbf16>
    tpu.vector_store %arg21[%c1_267, %c16_268, %c0_269], %304 {strides = array<i32>} : memref<2x96x32xbf16, #tpu.memory_space<vmem>>, vector<1x64x32xbf16>,
    %c0_270 = arith.constant 0 : index
    %c12_271 = arith.constant 12 : index
    %c0_272 = arith.constant 0 : index
    %305 = vector.load %arg21[%c0_270, %c12_271, %c0_272] : memref<2x96x32xbf16, #tpu.memory_space<vmem>>, vector<2x64x32xbf16>
    %306 = vector.shape_cast %305 : vector<2x64x32xbf16> to vector<128x32xbf16>
    %c0_273 = arith.constant 0 : index
    %c6_274 = arith.constant 6 : index
    %c0_275 = arith.constant 0 : index
    %c0_276 = arith.constant 0 : index
    %307 = vector.load %arg13[%c0_273, %c6_274, %c0_275, %c0_276] : memref<2x9x32x32xbf16, #tpu.memory_space<vmem>>, vector<1x1x32x32xbf16>
    %308 = vector.shape_cast %307 : vector<1x1x32x32xbf16> to vector<32x32xbf16>
    %cst_277 = arith.constant dense<0.000000e+00> : vector<128x32xf32>
    %309 = tpu.matmul %306, %308, %cst_277 {dimension_numbers = #tpu.dot_dimension_numbers<[1], [0], [0], [1], [0, 0, 1, 1], [], []>} : vector<128x32xbf16>, vector<32x32xbf16>, vector<128x32xf32> -> vector<128x32xf32>
    %c0_278 = arith.constant 0 : index
    %c16_279 = arith.constant 16 : index
    %c0_280 = arith.constant 0 : index
    %310 = vector.load %arg21[%c0_278, %c16_279, %c0_280] : memref<2x96x32xbf16, #tpu.memory_space<vmem>>, vector<2x64x32xbf16>
    %311 = vector.shape_cast %310 : vector<2x64x32xbf16> to vector<128x32xbf16>
    %c0_281 = arith.constant 0 : index
    %c7_282 = arith.constant 7 : index
    %c0_283 = arith.constant 0 : index
    %c0_284 = arith.constant 0 : index
    %312 = vector.load %arg13[%c0_281, %c7_282, %c0_283, %c0_284] : memref<2x9x32x32xbf16, #tpu.memory_space<vmem>>, vector<1x1x32x32xbf16>
    %313 = vector.shape_cast %312 : vector<1x1x32x32xbf16> to vector<32x32xbf16>
    %cst_285 = arith.constant dense<0.000000e+00> : vector<128x32xf32>
    %314 = tpu.matmul %311, %313, %cst_285 {dimension_numbers = #tpu.dot_dimension_numbers<[1], [0], [0], [1], [0, 0, 1, 1], [], []>} : vector<128x32xbf16>, vector<32x32xbf16>, vector<128x32xf32> -> vector<128x32xf32>
    %315 = arith.addf %309, %314 : vector<128x32xf32>
    %c0_286 = arith.constant 0 : index
    %c20_287 = arith.constant 20 : index
    %c0_288 = arith.constant 0 : index
    %316 = vector.load %arg21[%c0_286, %c20_287, %c0_288] : memref<2x96x32xbf16, #tpu.memory_space<vmem>>, vector<2x64x32xbf16>
    %317 = vector.shape_cast %316 : vector<2x64x32xbf16> to vector<128x32xbf16>
    %c0_289 = arith.constant 0 : index
    %c8_290 = arith.constant 8 : index
    %c0_291 = arith.constant 0 : index
    %c0_292 = arith.constant 0 : index
    %318 = vector.load %arg13[%c0_289, %c8_290, %c0_291, %c0_292] : memref<2x9x32x32xbf16, #tpu.memory_space<vmem>>, vector<1x1x32x32xbf16>
    %319 = vector.shape_cast %318 : vector<1x1x32x32xbf16> to vector<32x32xbf16>
    %cst_293 = arith.constant dense<0.000000e+00> : vector<128x32xf32>
    %320 = tpu.matmul %317, %319, %cst_293 {dimension_numbers = #tpu.dot_dimension_numbers<[1], [0], [0], [1], [0, 0, 1, 1], [], []>} : vector<128x32xbf16>, vector<32x32xbf16>, vector<128x32xf32> -> vector<128x32xf32>
    %321 = arith.addf %315, %320 : vector<128x32xf32>
    %c0_294 = arith.constant 0 : index
    %c2_295 = arith.constant 2 : index
    %c0_296 = arith.constant 0 : index
    %c0_297 = arith.constant 0 : index
    %322 = vector.load %arg14[%c0_294, %c2_295, %c0_296, %c0_297] : memref<2x3x1x32xf32, #tpu.memory_space<vmem>>, vector<1x1x1x32xf32>
    %323 = vector.shape_cast %322 : vector<1x1x1x32xf32> to vector<1x32xf32>
    %324 = vector.broadcast %323 : vector<1x32xf32> to vector<128x32xf32>
    %325 = arith.addf %321, %324 : vector<128x32xf32>
    %cst_298 = arith.constant 0.000000e+00 : f32
    %326 = vector.broadcast %cst_298 : f32 to vector<128x32xf32>
    %327 = arith.maximumf %325, %326 : vector<128x32xf32>
    %328 = arith.truncf %327 : vector<128x32xf32> to vector<128x32xbf16>
    %c0_299 = arith.constant 0 : index
    %c2_300 = arith.constant 2 : index
    %c0_301 = arith.constant 0 : index
    %c0_302 = arith.constant 0 : index
    %329 = vector.load %arg15[%c0_299, %c2_300, %c0_301, %c0_302] : memref<2x3x32x32xbf16, #tpu.memory_space<vmem>>, vector<1x1x32x32xbf16>
    %330 = vector.shape_cast %329 : vector<1x1x32x32xbf16> to vector<32x32xbf16>
    %cst_303 = arith.constant dense<0.000000e+00> : vector<128x32xf32>
    %331 = tpu.matmul %328, %330, %cst_303 {dimension_numbers = #tpu.dot_dimension_numbers<[1], [0], [0], [1], [0, 0, 1, 1], [], []>} : vector<128x32xbf16>, vector<32x32xbf16>, vector<128x32xf32> -> vector<128x32xf32>
    %c0_304 = arith.constant 0 : index
    %c2_305 = arith.constant 2 : index
    %c0_306 = arith.constant 0 : index
    %c0_307 = arith.constant 0 : index
    %332 = vector.load %arg16[%c0_304, %c2_305, %c0_306, %c0_307] : memref<2x3x1x32xf32, #tpu.memory_space<vmem>>, vector<1x1x1x32xf32>
    %333 = vector.shape_cast %332 : vector<1x1x1x32xf32> to vector<1x32xf32>
    %334 = vector.broadcast %333 : vector<1x32xf32> to vector<128x32xf32>
    %335 = arith.addf %331, %334 : vector<128x32xf32>
    %336 = arith.addf %295, %335 : vector<128x32xf32>
    %337 = vector.broadcast %6 : vector<128x1xf32> to vector<128x32xf32>
    %338 = arith.mulf %336, %337 : vector<128x32xf32>
    %339 = arith.truncf %338 : vector<128x32xf32> to vector<128x32xbf16>
    %cst_308 = arith.constant dense<0.000000e+00> : vector<128x8xf32>
    %340 = tpu.matmul %339, %203, %cst_308 {dimension_numbers = #tpu.dot_dimension_numbers<[1], [0], [0], [1], [0, 0, 1, 1], [], []>} : vector<128x32xbf16>, vector<32x8xbf16>, vector<128x8xf32> -> vector<128x8xf32>
    %341 = vector.broadcast %205 : vector<1x8xf32> to vector<128x8xf32>
    %342 = arith.addf %340, %341 : vector<128x8xf32>
    %343 = vector.broadcast %6 : vector<128x1xf32> to vector<128x8xf32>
    %344 = arith.mulf %342, %343 : vector<128x8xf32>
    %cst_309 = arith.constant dense<0xFF800000> : vector<128xf32>
    %345 = vector.multi_reduction <maximumf>, %344, %cst_309 [1] : vector<128x8xf32> to vector<128xf32>
    %346 = vector.shape_cast %345 : vector<128xf32> to vector<128x1xf32>
    %347 = vector.broadcast %346 : vector<128x1xf32> to vector<128x8xf32>
    %348 = arith.subf %344, %347 : vector<128x8xf32>
    %349 = math.exp %348 : vector<128x8xf32>
    %cst_310 = arith.constant dense<0.000000e+00> : vector<128xf32>
    %350 = vector.multi_reduction <add>, %349, %cst_310 [1] : vector<128x8xf32> to vector<128xf32>
    %351 = vector.shape_cast %350 : vector<128xf32> to vector<128x1xf32>
    %352 = vector.broadcast %351 : vector<128x1xf32> to vector<128x8xf32>
    %353 = arith.divf %349, %352 : vector<128x8xf32>
    %354 = vector.broadcast %6 : vector<128x1xf32> to vector<128x8xf32>
    %355 = arith.mulf %353, %354 : vector<128x8xf32>
    %c1_311 = arith.constant 1 : index
    %c0_312 = arith.constant 0 : index
    %c0_313 = arith.constant 0 : index
    %356 = vector.load %arg11[%c1_311, %c0_312, %c0_313] : memref<2x8x32xbf16, #tpu.memory_space<vmem>>, vector<1x8x32xbf16>
    %357 = vector.shape_cast %356 : vector<1x8x32xbf16> to vector<8x32xbf16>
    %c1_314 = arith.constant 1 : index
    %c0_315 = arith.constant 0 : index
    %c0_316 = arith.constant 0 : index
    %358 = vector.load %arg12[%c1_314, %c0_315, %c0_316] : memref<2x1x32xf32, #tpu.memory_space<vmem>>, vector<1x1x32xf32>
    %359 = vector.shape_cast %358 : vector<1x1x32xf32> to vector<1x32xf32>
    %c1_317 = arith.constant 1 : index
    %c0_318 = arith.constant 0 : index
    %c0_319 = arith.constant 0 : index
    %360 = vector.load %arg17[%c1_317, %c0_318, %c0_319] : memref<2x32x8xbf16, #tpu.memory_space<vmem>>, vector<1x32x8xbf16>
    %361 = vector.shape_cast %360 : vector<1x32x8xbf16> to vector<32x8xbf16>
    %c1_320 = arith.constant 1 : index
    %c0_321 = arith.constant 0 : index
    %c0_322 = arith.constant 0 : index
    %362 = vector.load %arg18[%c1_320, %c0_321, %c0_322] : memref<2x1x8xf32, #tpu.memory_space<vmem>>, vector<1x1x8xf32>
    %363 = vector.shape_cast %362 : vector<1x1x8xf32> to vector<1x8xf32>
    %364 = arith.truncf %355 : vector<128x8xf32> to vector<128x8xbf16>
    %cst_323 = arith.constant dense<0.000000e+00> : vector<128x32xf32>
    %365 = tpu.matmul %364, %357, %cst_323 {dimension_numbers = #tpu.dot_dimension_numbers<[1], [0], [0], [1], [0, 0, 1, 1], [], []>} : vector<128x8xbf16>, vector<8x32xbf16>, vector<128x32xf32> -> vector<128x32xf32>
    %366 = vector.broadcast %359 : vector<1x32xf32> to vector<128x32xf32>
    %367 = arith.addf %365, %366 : vector<128x32xf32>
    %368 = arith.truncf %367 : vector<128x32xf32> to vector<128x32xbf16>
    %369 = vector.extract_strided_slice %368 {offsets = [0, 0], sizes = [64, 32], strides = [1, 1]} : vector<128x32xbf16> to vector<64x32xbf16>
    %c0_324 = arith.constant 0 : index
    %c16_325 = arith.constant 16 : index
    %c0_326 = arith.constant 0 : index
    %370 = vector.load %arg21[%c0_324, %c16_325, %c0_326] : memref<2x96x32xbf16, #tpu.memory_space<vmem>>, vector<1x64x32xbf16>
    %371 = vector.shape_cast %370 : vector<1x64x32xbf16> to vector<64x32xbf16>
    %372 = vector.shape_cast %369 : vector<64x32xbf16> to vector<1x64x32xbf16>
    tpu.vector_store %arg21[%c0_324, %c16_325, %c0_326], %372 {strides = array<i32>} : memref<2x96x32xbf16, #tpu.memory_space<vmem>>, vector<1x64x32xbf16>,
    %373 = vector.extract_strided_slice %368 {offsets = [64, 0], sizes = [64, 32], strides = [1, 1]} : vector<128x32xbf16> to vector<64x32xbf16>
    %c1_327 = arith.constant 1 : index
    %c16_328 = arith.constant 16 : index
    %c0_329 = arith.constant 0 : index
    %374 = vector.load %arg21[%c1_327, %c16_328, %c0_329] : memref<2x96x32xbf16, #tpu.memory_space<vmem>>, vector<1x64x32xbf16>
    %375 = vector.shape_cast %374 : vector<1x64x32xbf16> to vector<64x32xbf16>
    %376 = vector.shape_cast %373 : vector<64x32xbf16> to vector<1x64x32xbf16>
    tpu.vector_store %arg21[%c1_327, %c16_328, %c0_329], %376 {strides = array<i32>} : memref<2x96x32xbf16, #tpu.memory_space<vmem>>, vector<1x64x32xbf16>,
    %c0_330 = arith.constant 0 : index
    %c15_331 = arith.constant 15 : index
    %c0_332 = arith.constant 0 : index
    %377 = vector.load %arg21[%c0_330, %c15_331, %c0_332] : memref<2x96x32xbf16, #tpu.memory_space<vmem>>, vector<2x64x32xbf16>
    %378 = vector.shape_cast %377 : vector<2x64x32xbf16> to vector<128x32xbf16>
    %c1_333 = arith.constant 1 : index
    %c0_334 = arith.constant 0 : index
    %c0_335 = arith.constant 0 : index
    %c0_336 = arith.constant 0 : index
    %379 = vector.load %arg13[%c1_333, %c0_334, %c0_335, %c0_336] : memref<2x9x32x32xbf16, #tpu.memory_space<vmem>>, vector<1x1x32x32xbf16>
    %380 = vector.shape_cast %379 : vector<1x1x32x32xbf16> to vector<32x32xbf16>
    %cst_337 = arith.constant dense<0.000000e+00> : vector<128x32xf32>
    %381 = tpu.matmul %378, %380, %cst_337 {dimension_numbers = #tpu.dot_dimension_numbers<[1], [0], [0], [1], [0, 0, 1, 1], [], []>} : vector<128x32xbf16>, vector<32x32xbf16>, vector<128x32xf32> -> vector<128x32xf32>
    %c0_338 = arith.constant 0 : index
    %c16_339 = arith.constant 16 : index
    %c0_340 = arith.constant 0 : index
    %382 = vector.load %arg21[%c0_338, %c16_339, %c0_340] : memref<2x96x32xbf16, #tpu.memory_space<vmem>>, vector<2x64x32xbf16>
    %383 = vector.shape_cast %382 : vector<2x64x32xbf16> to vector<128x32xbf16>
    %c1_341 = arith.constant 1 : index
    %c1_342 = arith.constant 1 : index
    %c0_343 = arith.constant 0 : index
    %c0_344 = arith.constant 0 : index
    %384 = vector.load %arg13[%c1_341, %c1_342, %c0_343, %c0_344] : memref<2x9x32x32xbf16, #tpu.memory_space<vmem>>, vector<1x1x32x32xbf16>
    %385 = vector.shape_cast %384 : vector<1x1x32x32xbf16> to vector<32x32xbf16>
    %cst_345 = arith.constant dense<0.000000e+00> : vector<128x32xf32>
    %386 = tpu.matmul %383, %385, %cst_345 {dimension_numbers = #tpu.dot_dimension_numbers<[1], [0], [0], [1], [0, 0, 1, 1], [], []>} : vector<128x32xbf16>, vector<32x32xbf16>, vector<128x32xf32> -> vector<128x32xf32>
    %387 = arith.addf %381, %386 : vector<128x32xf32>
    %c0_346 = arith.constant 0 : index
    %c17_347 = arith.constant 17 : index
    %c0_348 = arith.constant 0 : index
    %388 = vector.load %arg21[%c0_346, %c17_347, %c0_348] : memref<2x96x32xbf16, #tpu.memory_space<vmem>>, vector<2x64x32xbf16>
    %389 = vector.shape_cast %388 : vector<2x64x32xbf16> to vector<128x32xbf16>
    %c1_349 = arith.constant 1 : index
    %c2_350 = arith.constant 2 : index
    %c0_351 = arith.constant 0 : index
    %c0_352 = arith.constant 0 : index
    %390 = vector.load %arg13[%c1_349, %c2_350, %c0_351, %c0_352] : memref<2x9x32x32xbf16, #tpu.memory_space<vmem>>, vector<1x1x32x32xbf16>
    %391 = vector.shape_cast %390 : vector<1x1x32x32xbf16> to vector<32x32xbf16>
    %cst_353 = arith.constant dense<0.000000e+00> : vector<128x32xf32>
    %392 = tpu.matmul %389, %391, %cst_353 {dimension_numbers = #tpu.dot_dimension_numbers<[1], [0], [0], [1], [0, 0, 1, 1], [], []>} : vector<128x32xbf16>, vector<32x32xbf16>, vector<128x32xf32> -> vector<128x32xf32>
    %393 = arith.addf %387, %392 : vector<128x32xf32>
    %c1_354 = arith.constant 1 : index
    %c0_355 = arith.constant 0 : index
    %c0_356 = arith.constant 0 : index
    %c0_357 = arith.constant 0 : index
    %394 = vector.load %arg14[%c1_354, %c0_355, %c0_356, %c0_357] : memref<2x3x1x32xf32, #tpu.memory_space<vmem>>, vector<1x1x1x32xf32>
    %395 = vector.shape_cast %394 : vector<1x1x1x32xf32> to vector<1x32xf32>
    %396 = vector.broadcast %395 : vector<1x32xf32> to vector<128x32xf32>
    %397 = arith.addf %393, %396 : vector<128x32xf32>
    %cst_358 = arith.constant 0.000000e+00 : f32
    %398 = vector.broadcast %cst_358 : f32 to vector<128x32xf32>
    %399 = arith.maximumf %397, %398 : vector<128x32xf32>
    %400 = arith.truncf %399 : vector<128x32xf32> to vector<128x32xbf16>
    %c1_359 = arith.constant 1 : index
    %c0_360 = arith.constant 0 : index
    %c0_361 = arith.constant 0 : index
    %c0_362 = arith.constant 0 : index
    %401 = vector.load %arg15[%c1_359, %c0_360, %c0_361, %c0_362] : memref<2x3x32x32xbf16, #tpu.memory_space<vmem>>, vector<1x1x32x32xbf16>
    %402 = vector.shape_cast %401 : vector<1x1x32x32xbf16> to vector<32x32xbf16>
    %cst_363 = arith.constant dense<0.000000e+00> : vector<128x32xf32>
    %403 = tpu.matmul %400, %402, %cst_363 {dimension_numbers = #tpu.dot_dimension_numbers<[1], [0], [0], [1], [0, 0, 1, 1], [], []>} : vector<128x32xbf16>, vector<32x32xbf16>, vector<128x32xf32> -> vector<128x32xf32>
    %c1_364 = arith.constant 1 : index
    %c0_365 = arith.constant 0 : index
    %c0_366 = arith.constant 0 : index
    %c0_367 = arith.constant 0 : index
    %404 = vector.load %arg16[%c1_364, %c0_365, %c0_366, %c0_367] : memref<2x3x1x32xf32, #tpu.memory_space<vmem>>, vector<1x1x1x32xf32>
    %405 = vector.shape_cast %404 : vector<1x1x1x32xf32> to vector<1x32xf32>
    %406 = vector.broadcast %405 : vector<1x32xf32> to vector<128x32xf32>
    %407 = arith.addf %403, %406 : vector<128x32xf32>
    %408 = arith.addf %367, %407 : vector<128x32xf32>
    %409 = vector.broadcast %6 : vector<128x1xf32> to vector<128x32xf32>
    %410 = arith.mulf %408, %409 : vector<128x32xf32>
    %411 = arith.truncf %410 : vector<128x32xf32> to vector<128x32xbf16>
    %412 = vector.extract_strided_slice %411 {offsets = [0, 0], sizes = [64, 32], strides = [1, 1]} : vector<128x32xbf16> to vector<64x32xbf16>
    %c0_368 = arith.constant 0 : index
    %c16_369 = arith.constant 16 : index
    %c0_370 = arith.constant 0 : index
    %413 = vector.load %arg21[%c0_368, %c16_369, %c0_370] : memref<2x96x32xbf16, #tpu.memory_space<vmem>>, vector<1x64x32xbf16>
    %414 = vector.shape_cast %413 : vector<1x64x32xbf16> to vector<64x32xbf16>
    %415 = vector.shape_cast %412 : vector<64x32xbf16> to vector<1x64x32xbf16>
    tpu.vector_store %arg21[%c0_368, %c16_369, %c0_370], %415 {strides = array<i32>} : memref<2x96x32xbf16, #tpu.memory_space<vmem>>, vector<1x64x32xbf16>,
    %416 = vector.extract_strided_slice %411 {offsets = [64, 0], sizes = [64, 32], strides = [1, 1]} : vector<128x32xbf16> to vector<64x32xbf16>
    %c1_371 = arith.constant 1 : index
    %c16_372 = arith.constant 16 : index
    %c0_373 = arith.constant 0 : index
    %417 = vector.load %arg21[%c1_371, %c16_372, %c0_373] : memref<2x96x32xbf16, #tpu.memory_space<vmem>>, vector<1x64x32xbf16>
    %418 = vector.shape_cast %417 : vector<1x64x32xbf16> to vector<64x32xbf16>
    %419 = vector.shape_cast %416 : vector<64x32xbf16> to vector<1x64x32xbf16>
    tpu.vector_store %arg21[%c1_371, %c16_372, %c0_373], %419 {strides = array<i32>} : memref<2x96x32xbf16, #tpu.memory_space<vmem>>, vector<1x64x32xbf16>,
    %c0_374 = arith.constant 0 : index
    %c14_375 = arith.constant 14 : index
    %c0_376 = arith.constant 0 : index
    %420 = vector.load %arg21[%c0_374, %c14_375, %c0_376] : memref<2x96x32xbf16, #tpu.memory_space<vmem>>, vector<2x64x32xbf16>
    %421 = vector.shape_cast %420 : vector<2x64x32xbf16> to vector<128x32xbf16>
    %c1_377 = arith.constant 1 : index
    %c3_378 = arith.constant 3 : index
    %c0_379 = arith.constant 0 : index
    %c0_380 = arith.constant 0 : index
    %422 = vector.load %arg13[%c1_377, %c3_378, %c0_379, %c0_380] : memref<2x9x32x32xbf16, #tpu.memory_space<vmem>>, vector<1x1x32x32xbf16>
    %423 = vector.shape_cast %422 : vector<1x1x32x32xbf16> to vector<32x32xbf16>
    %cst_381 = arith.constant dense<0.000000e+00> : vector<128x32xf32>
    %424 = tpu.matmul %421, %423, %cst_381 {dimension_numbers = #tpu.dot_dimension_numbers<[1], [0], [0], [1], [0, 0, 1, 1], [], []>} : vector<128x32xbf16>, vector<32x32xbf16>, vector<128x32xf32> -> vector<128x32xf32>
    %c0_382 = arith.constant 0 : index
    %c16_383 = arith.constant 16 : index
    %c0_384 = arith.constant 0 : index
    %425 = vector.load %arg21[%c0_382, %c16_383, %c0_384] : memref<2x96x32xbf16, #tpu.memory_space<vmem>>, vector<2x64x32xbf16>
    %426 = vector.shape_cast %425 : vector<2x64x32xbf16> to vector<128x32xbf16>
    %c1_385 = arith.constant 1 : index
    %c4_386 = arith.constant 4 : index
    %c0_387 = arith.constant 0 : index
    %c0_388 = arith.constant 0 : index
    %427 = vector.load %arg13[%c1_385, %c4_386, %c0_387, %c0_388] : memref<2x9x32x32xbf16, #tpu.memory_space<vmem>>, vector<1x1x32x32xbf16>
    %428 = vector.shape_cast %427 : vector<1x1x32x32xbf16> to vector<32x32xbf16>
    %cst_389 = arith.constant dense<0.000000e+00> : vector<128x32xf32>
    %429 = tpu.matmul %426, %428, %cst_389 {dimension_numbers = #tpu.dot_dimension_numbers<[1], [0], [0], [1], [0, 0, 1, 1], [], []>} : vector<128x32xbf16>, vector<32x32xbf16>, vector<128x32xf32> -> vector<128x32xf32>
    %430 = arith.addf %424, %429 : vector<128x32xf32>
    %c0_390 = arith.constant 0 : index
    %c18_391 = arith.constant 18 : index
    %c0_392 = arith.constant 0 : index
    %431 = vector.load %arg21[%c0_390, %c18_391, %c0_392] : memref<2x96x32xbf16, #tpu.memory_space<vmem>>, vector<2x64x32xbf16>
    %432 = vector.shape_cast %431 : vector<2x64x32xbf16> to vector<128x32xbf16>
    %c1_393 = arith.constant 1 : index
    %c5_394 = arith.constant 5 : index
    %c0_395 = arith.constant 0 : index
    %c0_396 = arith.constant 0 : index
    %433 = vector.load %arg13[%c1_393, %c5_394, %c0_395, %c0_396] : memref<2x9x32x32xbf16, #tpu.memory_space<vmem>>, vector<1x1x32x32xbf16>
    %434 = vector.shape_cast %433 : vector<1x1x32x32xbf16> to vector<32x32xbf16>
    %cst_397 = arith.constant dense<0.000000e+00> : vector<128x32xf32>
    %435 = tpu.matmul %432, %434, %cst_397 {dimension_numbers = #tpu.dot_dimension_numbers<[1], [0], [0], [1], [0, 0, 1, 1], [], []>} : vector<128x32xbf16>, vector<32x32xbf16>, vector<128x32xf32> -> vector<128x32xf32>
    %436 = arith.addf %430, %435 : vector<128x32xf32>
    %c1_398 = arith.constant 1 : index
    %c1_399 = arith.constant 1 : index
    %c0_400 = arith.constant 0 : index
    %c0_401 = arith.constant 0 : index
    %437 = vector.load %arg14[%c1_398, %c1_399, %c0_400, %c0_401] : memref<2x3x1x32xf32, #tpu.memory_space<vmem>>, vector<1x1x1x32xf32>
    %438 = vector.shape_cast %437 : vector<1x1x1x32xf32> to vector<1x32xf32>
    %439 = vector.broadcast %438 : vector<1x32xf32> to vector<128x32xf32>
    %440 = arith.addf %436, %439 : vector<128x32xf32>
    %cst_402 = arith.constant 0.000000e+00 : f32
    %441 = vector.broadcast %cst_402 : f32 to vector<128x32xf32>
    %442 = arith.maximumf %440, %441 : vector<128x32xf32>
    %443 = arith.truncf %442 : vector<128x32xf32> to vector<128x32xbf16>
    %c1_403 = arith.constant 1 : index
    %c1_404 = arith.constant 1 : index
    %c0_405 = arith.constant 0 : index
    %c0_406 = arith.constant 0 : index
    %444 = vector.load %arg15[%c1_403, %c1_404, %c0_405, %c0_406] : memref<2x3x32x32xbf16, #tpu.memory_space<vmem>>, vector<1x1x32x32xbf16>
    %445 = vector.shape_cast %444 : vector<1x1x32x32xbf16> to vector<32x32xbf16>
    %cst_407 = arith.constant dense<0.000000e+00> : vector<128x32xf32>
    %446 = tpu.matmul %443, %445, %cst_407 {dimension_numbers = #tpu.dot_dimension_numbers<[1], [0], [0], [1], [0, 0, 1, 1], [], []>} : vector<128x32xbf16>, vector<32x32xbf16>, vector<128x32xf32> -> vector<128x32xf32>
    %c1_408 = arith.constant 1 : index
    %c1_409 = arith.constant 1 : index
    %c0_410 = arith.constant 0 : index
    %c0_411 = arith.constant 0 : index
    %447 = vector.load %arg16[%c1_408, %c1_409, %c0_410, %c0_411] : memref<2x3x1x32xf32, #tpu.memory_space<vmem>>, vector<1x1x1x32xf32>
    %448 = vector.shape_cast %447 : vector<1x1x1x32xf32> to vector<1x32xf32>
    %449 = vector.broadcast %448 : vector<1x32xf32> to vector<128x32xf32>
    %450 = arith.addf %446, %449 : vector<128x32xf32>
    %451 = arith.addf %410, %450 : vector<128x32xf32>
    %452 = vector.broadcast %6 : vector<128x1xf32> to vector<128x32xf32>
    %453 = arith.mulf %451, %452 : vector<128x32xf32>
    %454 = arith.truncf %453 : vector<128x32xf32> to vector<128x32xbf16>
    %455 = vector.extract_strided_slice %454 {offsets = [0, 0], sizes = [64, 32], strides = [1, 1]} : vector<128x32xbf16> to vector<64x32xbf16>
    %c0_412 = arith.constant 0 : index
    %c16_413 = arith.constant 16 : index
    %c0_414 = arith.constant 0 : index
    %456 = vector.load %arg21[%c0_412, %c16_413, %c0_414] : memref<2x96x32xbf16, #tpu.memory_space<vmem>>, vector<1x64x32xbf16>
    %457 = vector.shape_cast %456 : vector<1x64x32xbf16> to vector<64x32xbf16>
    %458 = vector.shape_cast %455 : vector<64x32xbf16> to vector<1x64x32xbf16>
    tpu.vector_store %arg21[%c0_412, %c16_413, %c0_414], %458 {strides = array<i32>} : memref<2x96x32xbf16, #tpu.memory_space<vmem>>, vector<1x64x32xbf16>,
    %459 = vector.extract_strided_slice %454 {offsets = [64, 0], sizes = [64, 32], strides = [1, 1]} : vector<128x32xbf16> to vector<64x32xbf16>
    %c1_415 = arith.constant 1 : index
    %c16_416 = arith.constant 16 : index
    %c0_417 = arith.constant 0 : index
    %460 = vector.load %arg21[%c1_415, %c16_416, %c0_417] : memref<2x96x32xbf16, #tpu.memory_space<vmem>>, vector<1x64x32xbf16>
    %461 = vector.shape_cast %460 : vector<1x64x32xbf16> to vector<64x32xbf16>
    %462 = vector.shape_cast %459 : vector<64x32xbf16> to vector<1x64x32xbf16>
    tpu.vector_store %arg21[%c1_415, %c16_416, %c0_417], %462 {strides = array<i32>} : memref<2x96x32xbf16, #tpu.memory_space<vmem>>, vector<1x64x32xbf16>,
    %c0_418 = arith.constant 0 : index
    %c12_419 = arith.constant 12 : index
    %c0_420 = arith.constant 0 : index
    %463 = vector.load %arg21[%c0_418, %c12_419, %c0_420] : memref<2x96x32xbf16, #tpu.memory_space<vmem>>, vector<2x64x32xbf16>
    %464 = vector.shape_cast %463 : vector<2x64x32xbf16> to vector<128x32xbf16>
    %c1_421 = arith.constant 1 : index
    %c6_422 = arith.constant 6 : index
    %c0_423 = arith.constant 0 : index
    %c0_424 = arith.constant 0 : index
    %465 = vector.load %arg13[%c1_421, %c6_422, %c0_423, %c0_424] : memref<2x9x32x32xbf16, #tpu.memory_space<vmem>>, vector<1x1x32x32xbf16>
    %466 = vector.shape_cast %465 : vector<1x1x32x32xbf16> to vector<32x32xbf16>
    %cst_425 = arith.constant dense<0.000000e+00> : vector<128x32xf32>
    %467 = tpu.matmul %464, %466, %cst_425 {dimension_numbers = #tpu.dot_dimension_numbers<[1], [0], [0], [1], [0, 0, 1, 1], [], []>} : vector<128x32xbf16>, vector<32x32xbf16>, vector<128x32xf32> -> vector<128x32xf32>
    %c0_426 = arith.constant 0 : index
    %c16_427 = arith.constant 16 : index
    %c0_428 = arith.constant 0 : index
    %468 = vector.load %arg21[%c0_426, %c16_427, %c0_428] : memref<2x96x32xbf16, #tpu.memory_space<vmem>>, vector<2x64x32xbf16>
    %469 = vector.shape_cast %468 : vector<2x64x32xbf16> to vector<128x32xbf16>
    %c1_429 = arith.constant 1 : index
    %c7_430 = arith.constant 7 : index
    %c0_431 = arith.constant 0 : index
    %c0_432 = arith.constant 0 : index
    %470 = vector.load %arg13[%c1_429, %c7_430, %c0_431, %c0_432] : memref<2x9x32x32xbf16, #tpu.memory_space<vmem>>, vector<1x1x32x32xbf16>
    %471 = vector.shape_cast %470 : vector<1x1x32x32xbf16> to vector<32x32xbf16>
    %cst_433 = arith.constant dense<0.000000e+00> : vector<128x32xf32>
    %472 = tpu.matmul %469, %471, %cst_433 {dimension_numbers = #tpu.dot_dimension_numbers<[1], [0], [0], [1], [0, 0, 1, 1], [], []>} : vector<128x32xbf16>, vector<32x32xbf16>, vector<128x32xf32> -> vector<128x32xf32>
    %473 = arith.addf %467, %472 : vector<128x32xf32>
    %c0_434 = arith.constant 0 : index
    %c20_435 = arith.constant 20 : index
    %c0_436 = arith.constant 0 : index
    %474 = vector.load %arg21[%c0_434, %c20_435, %c0_436] : memref<2x96x32xbf16, #tpu.memory_space<vmem>>, vector<2x64x32xbf16>
    %475 = vector.shape_cast %474 : vector<2x64x32xbf16> to vector<128x32xbf16>
    %c1_437 = arith.constant 1 : index
    %c8_438 = arith.constant 8 : index
    %c0_439 = arith.constant 0 : index
    %c0_440 = arith.constant 0 : index
    %476 = vector.load %arg13[%c1_437, %c8_438, %c0_439, %c0_440] : memref<2x9x32x32xbf16, #tpu.memory_space<vmem>>, vector<1x1x32x32xbf16>
    %477 = vector.shape_cast %476 : vector<1x1x32x32xbf16> to vector<32x32xbf16>
    %cst_441 = arith.constant dense<0.000000e+00> : vector<128x32xf32>
    %478 = tpu.matmul %475, %477, %cst_441 {dimension_numbers = #tpu.dot_dimension_numbers<[1], [0], [0], [1], [0, 0, 1, 1], [], []>} : vector<128x32xbf16>, vector<32x32xbf16>, vector<128x32xf32> -> vector<128x32xf32>
    %479 = arith.addf %473, %478 : vector<128x32xf32>
    %c1_442 = arith.constant 1 : index
    %c2_443 = arith.constant 2 : index
    %c0_444 = arith.constant 0 : index
    %c0_445 = arith.constant 0 : index
    %480 = vector.load %arg14[%c1_442, %c2_443, %c0_444, %c0_445] : memref<2x3x1x32xf32, #tpu.memory_space<vmem>>, vector<1x1x1x32xf32>
    %481 = vector.shape_cast %480 : vector<1x1x1x32xf32> to vector<1x32xf32>
    %482 = vector.broadcast %481 : vector<1x32xf32> to vector<128x32xf32>
    %483 = arith.addf %479, %482 : vector<128x32xf32>
    %cst_446 = arith.constant 0.000000e+00 : f32
    %484 = vector.broadcast %cst_446 : f32 to vector<128x32xf32>
    %485 = arith.maximumf %483, %484 : vector<128x32xf32>
    %486 = arith.truncf %485 : vector<128x32xf32> to vector<128x32xbf16>
    %c1_447 = arith.constant 1 : index
    %c2_448 = arith.constant 2 : index
    %c0_449 = arith.constant 0 : index
    %c0_450 = arith.constant 0 : index
    %487 = vector.load %arg15[%c1_447, %c2_448, %c0_449, %c0_450] : memref<2x3x32x32xbf16, #tpu.memory_space<vmem>>, vector<1x1x32x32xbf16>
    %488 = vector.shape_cast %487 : vector<1x1x32x32xbf16> to vector<32x32xbf16>
    %cst_451 = arith.constant dense<0.000000e+00> : vector<128x32xf32>
    %489 = tpu.matmul %486, %488, %cst_451 {dimension_numbers = #tpu.dot_dimension_numbers<[1], [0], [0], [1], [0, 0, 1, 1], [], []>} : vector<128x32xbf16>, vector<32x32xbf16>, vector<128x32xf32> -> vector<128x32xf32>
    %c1_452 = arith.constant 1 : index
    %c2_453 = arith.constant 2 : index
    %c0_454 = arith.constant 0 : index
    %c0_455 = arith.constant 0 : index
    %490 = vector.load %arg16[%c1_452, %c2_453, %c0_454, %c0_455] : memref<2x3x1x32xf32, #tpu.memory_space<vmem>>, vector<1x1x1x32xf32>
    %491 = vector.shape_cast %490 : vector<1x1x1x32xf32> to vector<1x32xf32>
    %492 = vector.broadcast %491 : vector<1x32xf32> to vector<128x32xf32>
    %493 = arith.addf %489, %492 : vector<128x32xf32>
    %494 = arith.addf %453, %493 : vector<128x32xf32>
    %495 = vector.broadcast %6 : vector<128x1xf32> to vector<128x32xf32>
    %496 = arith.mulf %494, %495 : vector<128x32xf32>
    %497 = arith.truncf %496 : vector<128x32xf32> to vector<128x32xbf16>
    %cst_456 = arith.constant dense<0.000000e+00> : vector<128x8xf32>
    %498 = tpu.matmul %497, %361, %cst_456 {dimension_numbers = #tpu.dot_dimension_numbers<[1], [0], [0], [1], [0, 0, 1, 1], [], []>} : vector<128x32xbf16>, vector<32x8xbf16>, vector<128x8xf32> -> vector<128x8xf32>
    %499 = vector.broadcast %363 : vector<1x8xf32> to vector<128x8xf32>
    %500 = arith.addf %498, %499 : vector<128x8xf32>
    %501 = vector.broadcast %6 : vector<128x1xf32> to vector<128x8xf32>
    %502 = arith.mulf %500, %501 : vector<128x8xf32>
    %cst_457 = arith.constant 0.000000e+00 : f32
    %503 = vector.broadcast %cst_457 : f32 to vector<128x72xf32>
    %504 = tpu.concatenate %496, %186, %344, %502, %503 in 1 : vector<128x32xf32>, vector<128x8xf32>, vector<128x8xf32>, vector<128x8xf32>, vector<128x72xf32> -> vector<128x128xf32>
    %505 = arith.truncf %504 : vector<128x128xf32> to vector<128x128xbf16>
    %c0_458 = arith.constant 0 : index
    %c0_459 = arith.constant 0 : index
    %506 = vector.load %arg19[%c0_458, %c0_459] : memref<128x128xbf16, #tpu.memory_space<vmem>>, vector<128x128xbf16>
    tpu.vector_store %arg19[%c0_458, %c0_459], %505 {strides = array<i32>} : memref<128x128xbf16, #tpu.memory_space<vmem>>, vector<128x128xbf16>,
    return
  }
  func.func @transform_0(%arg0: i32) -> (i32, i32) {
    %c0_i32 = arith.constant 0 : i32
    %c0_i32_0 = arith.constant 0 : i32
    return %arg0, %c0_i32 : i32, i32
  }
  func.func @transform_1(%arg0: i32) -> (i32, i32) {
    %c0_i32 = arith.constant 0 : i32
    %c0_i32_0 = arith.constant 0 : i32
    return %arg0, %c0_i32 : i32, i32
  }
  func.func @transform_2(%arg0: i32) -> (i32, i32) {
    %c0_i32 = arith.constant 0 : i32
    %c0_i32_0 = arith.constant 0 : i32
    %c0_i32_1 = arith.constant 0 : i32
    return %c0_i32, %c0_i32_0 : i32, i32
  }
  func.func @transform_3(%arg0: i32) -> (i32, i32) {
    %c0_i32 = arith.constant 0 : i32
    %c0_i32_0 = arith.constant 0 : i32
    %c0_i32_1 = arith.constant 0 : i32
    return %c0_i32, %c0_i32_0 : i32, i32
  }
  func.func @transform_4(%arg0: i32) -> (i32, i32, i32) {
    %c0_i32 = arith.constant 0 : i32
    %c0_i32_0 = arith.constant 0 : i32
    %c0_i32_1 = arith.constant 0 : i32
    %c0_i32_2 = arith.constant 0 : i32
    return %c0_i32, %c0_i32_0, %c0_i32_1 : i32, i32, i32
  }
  func.func @transform_5(%arg0: i32) -> (i32, i32, i32) {
    %c0_i32 = arith.constant 0 : i32
    %c0_i32_0 = arith.constant 0 : i32
    %c0_i32_1 = arith.constant 0 : i32
    %c0_i32_2 = arith.constant 0 : i32
    return %c0_i32, %c0_i32_0, %c0_i32_1 : i32, i32, i32
  }
  func.func @transform_6(%arg0: i32) -> (i32, i32, i32) {
    %c0_i32 = arith.constant 0 : i32
    %c0_i32_0 = arith.constant 0 : i32
    %c0_i32_1 = arith.constant 0 : i32
    %c0_i32_2 = arith.constant 0 : i32
    return %c0_i32, %c0_i32_0, %c0_i32_1 : i32, i32, i32
  }
  func.func @transform_7(%arg0: i32) -> (i32, i32, i32) {
    %c0_i32 = arith.constant 0 : i32
    %c0_i32_0 = arith.constant 0 : i32
    %c0_i32_1 = arith.constant 0 : i32
    %c0_i32_2 = arith.constant 0 : i32
    return %c0_i32, %c0_i32_0, %c0_i32_1 : i32, i32, i32
  }
  func.func @transform_8(%arg0: i32) -> (i32, i32) {
    %c0_i32 = arith.constant 0 : i32
    %c0_i32_0 = arith.constant 0 : i32
    %c0_i32_1 = arith.constant 0 : i32
    return %c0_i32, %c0_i32_0 : i32, i32
  }
  func.func @transform_9(%arg0: i32) -> (i32, i32) {
    %c0_i32 = arith.constant 0 : i32
    %c0_i32_0 = arith.constant 0 : i32
    %c0_i32_1 = arith.constant 0 : i32
    return %c0_i32, %c0_i32_0 : i32, i32
  }
  func.func @transform_10(%arg0: i32) -> (i32, i32, i32) {
    %c0_i32 = arith.constant 0 : i32
    %c0_i32_0 = arith.constant 0 : i32
    %c0_i32_1 = arith.constant 0 : i32
    %c0_i32_2 = arith.constant 0 : i32
    return %c0_i32, %c0_i32_0, %c0_i32_1 : i32, i32, i32
  }
  func.func @transform_11(%arg0: i32) -> (i32, i32, i32) {
    %c0_i32 = arith.constant 0 : i32
    %c0_i32_0 = arith.constant 0 : i32
    %c0_i32_1 = arith.constant 0 : i32
    %c0_i32_2 = arith.constant 0 : i32
    return %c0_i32, %c0_i32_0, %c0_i32_1 : i32, i32, i32
  }
  func.func @transform_12(%arg0: i32) -> (i32, i32, i32, i32) {
    %c0_i32 = arith.constant 0 : i32
    %c0_i32_0 = arith.constant 0 : i32
    %c0_i32_1 = arith.constant 0 : i32
    %c0_i32_2 = arith.constant 0 : i32
    %c0_i32_3 = arith.constant 0 : i32
    return %c0_i32, %c0_i32_0, %c0_i32_1, %c0_i32_2 : i32, i32, i32, i32
  }
  func.func @transform_13(%arg0: i32) -> (i32, i32, i32, i32) {
    %c0_i32 = arith.constant 0 : i32
    %c0_i32_0 = arith.constant 0 : i32
    %c0_i32_1 = arith.constant 0 : i32
    %c0_i32_2 = arith.constant 0 : i32
    %c0_i32_3 = arith.constant 0 : i32
    return %c0_i32, %c0_i32_0, %c0_i32_1, %c0_i32_2 : i32, i32, i32, i32
  }
  func.func @transform_14(%arg0: i32) -> (i32, i32, i32, i32) {
    %c0_i32 = arith.constant 0 : i32
    %c0_i32_0 = arith.constant 0 : i32
    %c0_i32_1 = arith.constant 0 : i32
    %c0_i32_2 = arith.constant 0 : i32
    %c0_i32_3 = arith.constant 0 : i32
    return %c0_i32, %c0_i32_0, %c0_i32_1, %c0_i32_2 : i32, i32, i32, i32
  }
  func.func @transform_15(%arg0: i32) -> (i32, i32, i32, i32) {
    %c0_i32 = arith.constant 0 : i32
    %c0_i32_0 = arith.constant 0 : i32
    %c0_i32_1 = arith.constant 0 : i32
    %c0_i32_2 = arith.constant 0 : i32
    %c0_i32_3 = arith.constant 0 : i32
    return %c0_i32, %c0_i32_0, %c0_i32_1, %c0_i32_2 : i32, i32, i32, i32
  }
  func.func @transform_16(%arg0: i32) -> (i32, i32, i32) {
    %c0_i32 = arith.constant 0 : i32
    %c0_i32_0 = arith.constant 0 : i32
    %c0_i32_1 = arith.constant 0 : i32
    %c0_i32_2 = arith.constant 0 : i32
    return %c0_i32, %c0_i32_0, %c0_i32_1 : i32, i32, i32
  }
  func.func @transform_17(%arg0: i32) -> (i32, i32, i32) {
    %c0_i32 = arith.constant 0 : i32
    %c0_i32_0 = arith.constant 0 : i32
    %c0_i32_1 = arith.constant 0 : i32
    %c0_i32_2 = arith.constant 0 : i32
    return %c0_i32, %c0_i32_0, %c0_i32_1 : i32, i32, i32
  }
  func.func @transform_18(%arg0: i32) -> (i32, i32) {
    %c0_i32 = arith.constant 0 : i32
    %c0_i32_0 = arith.constant 0 : i32
    return %arg0, %c0_i32 : i32, i32
  }
}

</mosaic_0001>

<bundles_post_ra>
// kernel: tpu_custom_call.1
= control target key start
LH: loop header
LB: loop body
LE: loop exit
PB: predicated region body
PF: predicated region fallthrough
CT: control target
= control target key end

     0   :  { %s16818_s0 = inlined_call_operand.vmem [shape: f32[128,16], index: 0, kind: input, shape index: {}]   ;;  %s16819_s1 = inlined_call_operand.vmem [shape: f32[128,1], index: 1, kind: input, shape index: {}]   ;;  %s16820_s2 = inlined_call_operand.vmem [shape: bf16[16,64], index: 2, kind: input, shape index: {}]   ;;  %s16821_s3 = inlined_call_operand.vmem [shape: f32[1,64], index: 3, kind: input, shape index: {}]   ;;  %s16822_s4 = inlined_call_operand.hbm [shape: bf16[15,64,64], index: 4, kind: input, shape index: {}]   ;;  %s16823_s5 = inlined_call_operand.hbm [shape: f32[3,1,64], index: 5, kind: input, shape index: {}]   ;;  %s16824_s6 = inlined_call_operand.vmem [shape: bf16[3,64,64], index: 6, kind: input, shape index: {}]   ;;  %s16825_s7 = inlined_call_operand.hbm [shape: f32[3,1,64], index: 7, kind: input, shape index: {}]   ;;  %s16826_s8 = inlined_call_operand.vmem [shape: bf16[64,8], index: 8, kind: input, shape index: {}]   ;;  %s16827_s9 = inlined_call_operand.vmem [shape: f32[1,8], index: 9, kind: input, shape index: {}]   ;;  %s16828_s10 = inlined_call_operand.hbm [shape: bf16[2,8,32], index: 10, kind: input, shape index: {}]   ;;  %s16829_s11 = inlined_call_operand.hbm [shape: f32[2,1,32], index: 11, kind: input, shape index: {}]   ;;  %s16830_s12 = inlined_call_operand.vmem [shape: bf16[2,9,32,32], index: 12, kind: input, shape index: {}]   ;;  %s16831_s13 = inlined_call_operand.hbm [shape: f32[2,3,1,32], index: 13, kind: input, shape index: {}]   ;;  %s16832_s14 = inlined_call_operand.hbm [shape: bf16[2,3,32,32], index: 14, kind: input, shape index: {}]   ;;  %s16833_s15 = inlined_call_operand.hbm [shape: f32[2,3,1,32], index: 15, kind: input, shape index: {}]   ;;  %s16834_s16 = inlined_call_operand.vmem [shape: bf16[2,32,8], index: 16, kind: input, shape index: {}]   ;;  %s16835_s17 = inlined_call_operand.vmem [shape: f32[2,1,8], index: 17, kind: input, shape index: {}]   ;;  %s16836_s18 = inlined_call_operand.hbm [shape: bf16[128,128], index: 18, kind: output, shape index: {}]  }
   0x1   :  { %16862 = sst [smem:[#allocation42_spill]] %s16818_s0 }
   0x2   :  { %16863 = sst [smem:[#allocation43_spill]] %s16819_s1 }
   0x3   :  { %16864 = sst [smem:[#allocation44_spill]] %s16820_s2 }
   0x4   :  { %16865 = sst [smem:[#allocation45_spill]] %s16836_s18 }
   0x5   :  { %23 = vsyncpa [#allocation5], 0 }
   0x6   :  { %24 = vsyncpa [#allocation8], 0 }
   0x7   :  { %25 = vsyncpa [#allocation11], 0 }
   0x8   :  { %26 = vsyncpa [#allocation14], 0 }
   0x9   :  { %27 = vsyncpa [#allocation17], 0 }
   0xa   :  { %28 = vsyncpa [#allocation6], 0  ;;  %s13590_s27 = smov [#allocation7]   ;;  %s13380_s0 = scalar_lea.hbm %s16823_s5, 48 }
   0xb   :  { %s54_s28 = sshll.u32 %s13590_s27, 4  ;;  %p13381_p0 = scmp.ne.s32.totalorder %s16823_s5, %s13380_s0  ;;  %s55_s28 = int_to_ptr.vmem [resolvable:$true] %s54_s28 }
   0xc   :  { %p13384_p1 = scmp.lt.u32.totalorder %s13380_s0, %s16823_s5 }
   0xe   :  { %p13386_p2 = pnand %p13384_p1, %p13381_p0 }
  0x10   :  { %13389 = shalt.err (!%p13386_p2)
}
  0x11   :  { %s13390_s22 = scalar_lea.vmem %s55_s28, 48  ;;  %s13394_s2 = scalar_lea.vmem %s55_s28, 64 }
  0x12   :  { %p13391_p3 = scmp.ne.s32.totalorder %s55_s28, %s13390_s22  ;;  %p13395_p4 = scmp.lt.s32.totalorder %s55_s28, %s55_s28 }
  0x13   :  { %p13396_p5 = scmp.lt.s32.totalorder %s13394_s2, %s13390_s22 }
  0x15   :  { %p13397_p6 = por %p13396_p5, %p13395_p4 }
  0x17   :  { %p13398_p7 = pnand %p13397_p6, %p13391_p3 }
  0x19   :  { %13401 = shalt.err (!%p13398_p7)
}
  0x1a   :  { %s13591_s23 = smov 16   ;;  %s13592_s24 = smov 1  }
  0x1b   :  { %60 = dma.hbm_to_vmem [thread:$0]  %s16823_s5, 48, %s55_s28, [#allocation8], %s13591_s23, %s13591_s23, %s13592_s24  }
  0x1c   :  { %s13593_s27 = smov [#allocation10]   ;;  %s13594_s30 = smov [#allocation13]  }
  0x1d   :  { %s84_s29 = sshll.u32 %s13593_s27, 4  ;;  %s110_s0 = sshll.u32 %s13594_s30, 4  ;;  %s85_s29 = int_to_ptr.vmem [resolvable:$true] %s84_s29  ;;  %s111_s0 = int_to_ptr.vmem [resolvable:$true] %s110_s0 }
  0x1e   :  { %s13402_s20 = scalar_lea.hbm %s16828_s10, 128 }
  0x1f   :  { %p13403_p8 = scmp.ne.s32.totalorder %s16828_s10, %s13402_s20  ;;  %p13406_p9 = scmp.lt.u32.totalorder %s13402_s20, %s16828_s10 }
  0x21   :  { %p13408_p10 = pnand %p13406_p9, %p13403_p8 }
  0x23   :  { %13411 = shalt.err (!%p13408_p10)
}
  0x24   :  { %s13412_s5 = scalar_lea.vmem %s85_s29, 128  ;;  %p13417_p12 = scmp.lt.s32.totalorder %s85_s29, %s85_s29 }
  0x25   :  { %p13413_p11 = scmp.ne.s32.totalorder %s85_s29, %s13412_s5  ;;  %p13418_p13 = scmp.lt.s32.totalorder %s13412_s5, %s13412_s5 }
  0x27   :  { %p13419_p0 = por %p13418_p13, %p13417_p12 }
  0x29   :  { %p13420_p1 = pnand %p13419_p0, %p13413_p11 }
  0x2b   :  { %13423 = shalt.err (!%p13420_p1)
}
  0x2c   :  { %s13595_s28 = smov 64   ;;  %s13596_s25 = smov 4  }
  0x2d   :  { %90 = dma.hbm_to_vmem [thread:$0]  %s16828_s10, 128, %s85_s29, [#allocation11], %s13595_s28, %s13595_s28, %s13596_s25  }
  0x2e   :  { %s13424_s19 = scalar_lea.hbm %s16831_s13, 96 }
  0x2f   :  { %p13425_p2 = scmp.ne.s32.totalorder %s16831_s13, %s13424_s19  ;;  %p13428_p3 = scmp.lt.u32.totalorder %s13424_s19, %s16831_s13 }
  0x31   :  { %p13430_p4 = pnand %p13428_p3, %p13425_p2 }
  0x33   :  { %13433 = shalt.err (!%p13430_p4)
}
  0x34   :  { %s13434_s2 = scalar_lea.vmem %s111_s0, 96  ;;  %p13439_p6 = scmp.lt.s32.totalorder %s111_s0, %s111_s0 }
  0x35   :  { %p13435_p5 = scmp.ne.s32.totalorder %s111_s0, %s13434_s2  ;;  %p13440_p7 = scmp.lt.s32.totalorder %s13434_s2, %s13434_s2 }
  0x37   :  { %p13441_p8 = por %p13440_p7, %p13439_p6 }
  0x39   :  { %p13442_p9 = pnand %p13441_p8, %p13435_p5 }
  0x3b   :  { %13445 = shalt.err (!%p13442_p9)
}
  0x3c   :  { %116 = dma.hbm_to_vmem [thread:$0]  %s16831_s13, 96, %s111_s0, [#allocation14], %s13591_s23, %s13591_s23, %s13592_s24  }
  0x3d   :  { %s13597_s5 = smov [#allocation4]   ;;  %s13598_s27 = smov [#allocation9]  }
  0x3e   :  { %s42_s26 = sshll.u32 %s13597_s5, 4  ;;  %s68_s18 = sshll.u32 %s13598_s27, 4  ;;  %s43_s26 = int_to_ptr.vmem [resolvable:$true] %s42_s26  ;;  %s69_s18 = int_to_ptr.vmem [resolvable:$true] %s68_s18 }
  0x3f   :  { %s13446_s1 = scalar_lea.hbm %s16822_s4, 7680 }
  0x40   :  { %p13447_p10 = scmp.ne.s32.totalorder %s16822_s4, %s13446_s1  ;;  %p13450_p11 = scmp.lt.u32.totalorder %s13446_s1, %s16822_s4 }
  0x42   :  { %p13452_p12 = pnand %p13450_p11, %p13447_p10 }
  0x44   :  { %13455 = shalt.err (!%p13452_p12)
}
  0x45   :  { %s13456_s13 = scalar_lea.vmem %s43_s26, 7680  ;;  %p13461_p0 = scmp.lt.s32.totalorder %s43_s26, %s43_s26 }
  0x46   :  { %p13457_p13 = scmp.ne.s32.totalorder %s43_s26, %s13456_s13  ;;  %p13462_p1 = scmp.lt.s32.totalorder %s13456_s13, %s13456_s13 }
  0x48   :  { %p13463_p2 = por %p13462_p1, %p13461_p0 }
  0x4a   :  { %p13464_p3 = pnand %p13463_p2, %p13457_p13 }
  0x4c   :  { %13467 = shalt.err (!%p13464_p3)
}
  0x4d   :  { %48 = dma.hbm_to_vmem [thread:$0]  %s16822_s4, 7680, %s43_s26, [#allocation5], %s13595_s28, %s13595_s28, %s13596_s25  }
  0x4e   :  { %s13468_s27 = scalar_lea.hbm %s16825_s7, 48 }
  0x4f   :  { %p13469_p4 = scmp.ne.s32.totalorder %s16825_s7, %s13468_s27  ;;  %p13472_p5 = scmp.lt.u32.totalorder %s13468_s27, %s16825_s7 }
  0x51   :  { %p13474_p6 = pnand %p13472_p5, %p13469_p4 }
  0x53   :  { %13477 = shalt.err (!%p13474_p6)
}
  0x54   :  { %s13478_s21 = scalar_lea.vmem %s69_s18, 48  ;;  %s13482_s22 = scalar_lea.vmem %s69_s18, 64 }
  0x55   :  { %p13479_p7 = scmp.ne.s32.totalorder %s69_s18, %s13478_s21  ;;  %p13483_p8 = scmp.lt.s32.totalorder %s69_s18, %s69_s18 }
  0x56   :  { %p13484_p9 = scmp.lt.s32.totalorder %s13482_s22, %s13478_s21 }
  0x58   :  { %p13485_p10 = por %p13484_p9, %p13483_p8 }
  0x5a   :  { %p13486_p11 = pnand %p13485_p10, %p13479_p7 }
  0x5c   :  { %13489 = shalt.err (!%p13486_p11)
}
  0x5d   :  { %74 = dma.hbm_to_vmem [thread:$0]  %s16825_s7, 48, %s69_s18, [#allocation8], %s13591_s23, %s13591_s23, %s13592_s24  }
  0x5e   :  { %s13599_s2 = smov [#allocation12]   ;;  %s13600_s0 = smov [#allocation15]  }
  0x5f   :  { %s96_s13 = sshll.u32 %s13599_s2, 4  ;;  %s122_s10 = sshll.u32 %s13600_s0, 4  ;;  %s97_s13 = int_to_ptr.vmem [resolvable:$true] %s96_s13  ;;  %s123_s10 = int_to_ptr.vmem [resolvable:$true] %s122_s10 }
  0x60   :  { %s13490_s27 = scalar_lea.hbm %s16829_s11, 32 }
  0x61   :  { %p13491_p12 = scmp.ne.s32.totalorder %s16829_s11, %s13490_s27  ;;  %p13494_p13 = scmp.lt.u32.totalorder %s13490_s27, %s16829_s11 }
  0x63   :  { %p13496_p0 = pnand %p13494_p13, %p13491_p12 }
  0x65   :  { %13499 = shalt.err (!%p13496_p0)
}
  0x66   :  { %s13500_s7 = scalar_lea.vmem %s97_s13, 32  ;;  %p13505_p2 = scmp.lt.s32.totalorder %s97_s13, %s97_s13 }
  0x67   :  { %p13501_p1 = scmp.ne.s32.totalorder %s97_s13, %s13500_s7  ;;  %p13506_p3 = scmp.lt.s32.totalorder %s13500_s7, %s13500_s7 }
  0x69   :  { %p13507_p4 = por %p13506_p3, %p13505_p2 }
  0x6b   :  { %p13508_p5 = pnand %p13507_p4, %p13501_p1 }
  0x6d   :  { %13511 = shalt.err (!%p13508_p5)
}
  0x6e   :  { %102 = dma.hbm_to_vmem [thread:$0]  %s16829_s11, 32, %s97_s13, [#allocation11], %s13591_s23, %s13591_s23, %s13592_s24  }
  0x6f   :  { %s13512_s26 = scalar_lea.hbm %s16832_s14, 1536 }
  0x70   :  { %p13513_p6 = scmp.ne.s32.totalorder %s16832_s14, %s13512_s26  ;;  %p13516_p7 = scmp.lt.u32.totalorder %s13512_s26, %s16832_s14 }
  0x72   :  { %p13518_p8 = pnand %p13516_p7, %p13513_p6 }
  0x74   :  { %13521 = shalt.err (!%p13518_p8)
}
  0x75   :  { %s13522_s27 = scalar_lea.vmem %s123_s10, 1536  ;;  %p13527_p10 = scmp.lt.s32.totalorder %s123_s10, %s123_s10 }
  0x76   :  { %p13523_p9 = scmp.ne.s32.totalorder %s123_s10, %s13522_s27  ;;  %p13528_p11 = scmp.lt.s32.totalorder %s13522_s27, %s13522_s27 }
  0x78   :  { %p13529_p12 = por %p13528_p11, %p13527_p10 }
  0x7a   :  { %p13530_p13 = pnand %p13529_p12, %p13523_p9 }
  0x7c   :  { %13533 = shalt.err (!%p13530_p13)
}
  0x7d   :  { %128 = dma.hbm_to_vmem [thread:$0]  %s16832_s14, 1536, %s123_s10, [#allocation14], %s13595_s28, %s13595_s28, %s13596_s25  }
  0x7e   :  { %s13601_s30 = smov [#allocation16]   ;;  %s13534_s7 = scalar_lea.hbm %s16833_s15, 96 }
  0x7f   :  { %s134_s19 = sshll.u32 %s13601_s30, 4  ;;  %p13535_p0 = scmp.ne.s32.totalorder %s16833_s15, %s13534_s7  ;;  %s135_s19 = int_to_ptr.vmem [resolvable:$true] %s134_s19 }
  0x80   :  { %p13538_p1 = scmp.lt.u32.totalorder %s13534_s7, %s16833_s15 }
  0x82   :  { %p13540_p2 = pnand %p13538_p1, %p13535_p0 }
  0x84   :  { %13543 = shalt.err (!%p13540_p2)
}
  0x85   :  { %s13544_s26 = scalar_lea.vmem %s135_s19, 96  ;;  %p13549_p4 = scmp.lt.s32.totalorder %s135_s19, %s135_s19 }
  0x86   :  { %p13545_p3 = scmp.ne.s32.totalorder %s135_s19, %s13544_s26  ;;  %p13550_p5 = scmp.lt.s32.totalorder %s13544_s26, %s13544_s26 }
  0x88   :  { %p13551_p6 = por %p13550_p5, %p13549_p4 }
  0x8a   :  { %p13552_p7 = pnand %p13551_p6, %p13545_p3 }
  0x8c   :  { %13555 = shalt.err (!%p13552_p7)
}
  0x8d   :  { %140 = dma.hbm_to_vmem [thread:$0]  %s16833_s15, 96, %s135_s19, [#allocation17], %s13591_s23, %s13591_s23, %s13592_s24  }
  0x8e   :  { %13578 = dma.done.wait [#allocation5], 7680  }
  0x8f   :  { %13579 = vsyncadd [#allocation5], 4294959616 }
  0x90   :  { %13580 = dma.done.wait [#allocation8], 96  }
  0x91   :  { %13581 = vsyncadd [#allocation8], 4294967200 }
  0x92   :  { %13582 = dma.done.wait [#allocation11], 160  }
  0x93   :  { %13583 = vsyncadd [#allocation11], 4294967136 }
  0x94   :  { %13584 = dma.done.wait [#allocation14], 1632  }
  0x95   :  { %13585 = vsyncadd [#allocation14], 4294965664 }
  0x96   :  { %13586 = dma.done.wait [#allocation17], 96  }
  0x97   :  { %13587 = vsyncadd [#allocation17], 4294967200  ;;  %s16866_s29 = sld [smem:[#allocation44_spill]]  ;;  %s16867_s11 = sld [smem:[#allocation42_spill]]  ;;  %vm244_vm0 = vcmask 130048   ;;  %vm170_vm1 = vcmask 523264  }
  0x98   :  { %v13124_v25 = vld [vmem:[#allocation4 + $0x20] sm:$0xff]   ;;  %v13602_v26 = vmov 0   ;;  %v13125_v27 = vld [vmem:[#allocation4 + $0x28] sm:$0xff]   ;;  %v13126_v28 = vld [vmem:[#allocation4 + $0x30] sm:$0xff]   ;;  %vm432_vm2 = vsmask.f32 256 }
  0x99   :  { %11586 = vmatprep.subr.bf16.mxu1 %v13124_v25  ;;  %171 = vst.msk [vmem:[#allocation2] sm:$0xff] %vm170_vm1, %v13602_v26  ;;  %172 = vst.msk [vmem:[#allocation2 + $0x30] sm:$0xff] %vm170_vm1, %v13602_v26  ;;  %13001 = vset.pattern.permute.xlu0 %v13602_v26  ;;  %v13127_v29 = vld [vmem:[#allocation4 + $0x38] sm:$0xff]   ;;  %v13891_v30 = vld [vmem:[#allocation4] sm:$0xff]   ;;  %vm976_vm3 = vsmask.f32 7424 }
  0x9a   :  { %173 = vst.msk [vmem:[#allocation2 + $0x28] sm:$0xff] %vm170_vm1, %v13602_v26  ;;  %174 = vst.msk [vmem:[#allocation2 + $0x58] sm:$0xff] %vm170_vm1, %v13602_v26  ;;  %11587 = vmatpush3.bf16.msra.mxu1 %v13124_v25  ;;  %13002 = vset.pattern.permute.xlu1 %v13602_v26  ;;  %v13897_v32 = vld [vmem:[%s16821_s3] ss:$0 sm:$0xff]  ;;  %vm403_vm4 = vcmask 1040384   ;;  %vm1231_vm5 = vcmask 1046528  }
  0x9b   :  { %11588 = vmatprep.subr.bf16.mxu1 %v13125_v27  ;;  %s16868_s5 = sld [smem:[#allocation43_spill]]  ;;  %vm1775_vm6 = vcmask 1041408   ;;  %vm2516_vm7 = vcmask 1045504   ;;  %vm2983_vm8 = vcmask 1043456   ;;  %vm4329_vm9 = vcmask 64512   ;;  %s13603_s13 = smov 32  }
  0x9c   :  { %vm175_vm10 = vcmask 261120   ;;  %s13604_s15 = smov 40   ;;  %vm10196_vm11 = vcmask 326656   ;;  %vm10213_vm12 = vcmask 392192   ;;  %vm10230_vm13 = vcmask 457728   ;;  %s13606_s21 = smov [#allocation18]  }
  0x9d   :  { %v13123_v0 = vld [vmem:[%s16866_s29] sm:$0xff]   ;;  %v197_v2 = vld [vmem:[%s16867_s11 + $0x8] sm:$0xff]  ;;  %v198_v3 = vld [vmem:[%s16867_s11 + $0x10] sm:$0xff]  ;;  %176 = vst.msk [vmem:[#allocation3] sm:$0xff] %vm175_vm10, %v13602_v26  ;;  %s10332_s22 = sshll.u32 %s13606_s21, 4  ;;  %s10333_s22 = int_to_ptr.vmem [resolvable:$true] %s10332_s22 }
  0x9e   :  { %v196_v1 = vld [vmem:[%s16867_s11] sm:$0xff]  ;;  %11568 = vmatprep.subr.bf16.mxu0 %v13123_v0  ;;  %v199_v5 = vld [vmem:[%s16867_s11 + $0x18] sm:$0xff]  ;;  %v201_v7 = vld [vmem:[%s16867_s11 + $0x28] sm:$0xff]  ;;  %11589 = vmatpush3.bf16.msra.mxu1 %v13125_v27  ;;  %177 = vst.msk [vmem:[#allocation3 + $0x30] sm:$0xff] %vm175_vm10, %v13602_v26  ;;  %s13556_s4 = scalar_lea.vmem %s10333_s22, 1024  ;;  %p13561_p9 = scmp.lt.s32.totalorder %s10333_s22, %s10333_s22 }
  0x9f   :  { %v224_v4 = vpack.c.bf16 %v197_v2, %v196_v1  ;;  %v200_v6 = vld [vmem:[%s16867_s11 + $0x20] sm:$0xff]  ;;  %11569 = vmatpush3.bf16.msra.mxu0 %v13123_v0  ;;  %v225_v8 = vpack.c.bf16 %v199_v5, %v198_v3  ;;  %v202_v10 = vld [vmem:[%s16867_s11 + $0x30] sm:$0xff]  ;;  %v203_v11 = vld [vmem:[%s16867_s11 + $0x38] sm:$0xff]  ;;  %11590 = vmatprep.subr.bf16.mxu1 %v13126_v28  ;;  %178 = vst.msk [vmem:[#allocation3 + $0x28] sm:$0xff] %vm175_vm10, %v13602_v26  ;;  %p13557_p8 = scmp.ne.s32.totalorder %s10333_s22, %s13556_s4  ;;  %p13562_p10 = scmp.lt.s32.totalorder %s13556_s4, %s13556_s4 }
  0xa0   :  { %v226_v9 = vpack.c.bf16 %v201_v7, %v200_v6  ;;  %v204_v12 = vld [vmem:[%s16867_s11 + $0x40] sm:$0xff]  ;;  %v205_v13 = vld [vmem:[%s16867_s11 + $0x48] sm:$0xff]  ;;  %v227_v14 = vpack.c.bf16 %v203_v11, %v202_v10  ;;  %v206_v16 = vld [vmem:[%s16867_s11 + $0x50] sm:$0xff]  ;;  %179 = vst.msk [vmem:[#allocation3 + $0x58] sm:$0xff] %vm175_vm10, %v13602_v26 }
  0xa1   :  { %11570 = vmatprep.mubr.msk.bf16.mxu0 %vm244_vm0, %v224_v4  ;;  %v228_v15 = vpack.c.bf16 %v205_v13, %v204_v12  ;;  %v207_v17 = vld [vmem:[%s16867_s11 + $0x58] sm:$0xff]  ;;  %v208_v18 = vld [vmem:[%s16867_s11 + $0x60] sm:$0xff]  ;;  %v209_v19 = vld [vmem:[%s16867_s11 + $0x68] sm:$0xff]  ;;  %p13563_p11 = por %p13562_p10, %p13561_p9 }
  0xa2   :  { %11571 = vmatmul.mubr.msk.bf16.vlgmr.msra.gmra.mrb[0].mxu0 %vm244_vm0, %v225_v8  ;;  %v229_v20 = vpack.c.bf16 %v207_v17, %v206_v16  ;;  %v230_v21 = vpack.c.bf16 %v209_v19, %v208_v18  ;;  %v210_v22 = vld [vmem:[%s16867_s11 + $0x70] sm:$0xff]  ;;  %v211_v23 = vld [vmem:[%s16867_s11 + $0x78] sm:$0xff]  ;;  %11591 = vmatpush3.bf16.msra.mxu1 %v13126_v28  ;;  %v13931_v51 = vld [vmem:[#allocation2] sm:$0x80] }
  0xa3   :  { %11574 = vmatprep.mubr.msk.bf16.mxu0 %vm244_vm0, %v226_v9  ;;  %v231_v24 = vpack.c.bf16 %v211_v23, %v210_v22  ;;  %11592 = vmatprep.subr.bf16.mxu1 %v13127_v29  ;;  %v434_v53 = vshrl.u32 %v13931_v51, 16  ;;  %v13129_v16 = vld [vmem:[#allocation4 + $0x8] sm:$0xff]   ;;  %p13564_p12 = pnand %p13563_p11, %p13557_p8 }
  0xa5   :  { %v436_v2 = vrot.slane %v434_v53, 7  ;;  %v13996_v53 = vld [vmem:[#allocation2 + $0x30] sm:$0x80] }
  0xa6   :  { %11593 = vmatpush3.bf16.msra.mxu1 %v13127_v29 }
  0xa7   :  { %11610 = vmatprep.subr.bf16.mxu1 %v13891_v30 }
  0xaa   :  { %11575 = vmatmul.mubr.msk.bf16.gmra.mrb[4].mxu0 %vm244_vm0, %v227_v14 }
  0xab   :  { %11578 = vmatprep.mubr.msk.bf16.mxu0 %vm244_vm0, %v228_v15 }
  0xb2   :  { %11579 = vmatmul.mubr.msk.bf16.gmra.mrb[8].mxu0 %vm244_vm0, %v229_v20 }
  0xb3   :  { %11582 = vmatprep.mubr.msk.bf16.mxu0 %vm244_vm0, %v230_v21 }
  0xba   :  { %11583 = vmatmul.mubr.msk.bf16.gmra.mrb[12].mxu0 %vm244_vm0, %v231_v24 }
 0x175   :  { %v11572_v31 = vpop.f32.mrb[0].mxu0 }
 0x176   :  { %v303_v33 = vpop.f32.mrb[1].mxu0  ;;  %v13900_v35 = vadd.f32 %v11572_v31, %v13897_v32 }
 0x177   :  { %v11573_v34 = vpop.f32.mrb[2].mxu0  ;;  %v13906_v38 = vadd.f32 %v13897_v32, %v303_v33 }
 0x178   :  { %v13903_v36 = vadd.f32 %v11573_v34, %v13897_v32  ;;  %v306_v37 = vpop.f32.mrb[3].mxu0 }
 0x179   :  { %v13909_v39 = vadd.f32 %v13897_v32, %v306_v37  ;;  %v13130_v37 = vld [vmem:[#allocation4 + $0x10] sm:$0xff]  }
 0x17a   :  { %v367_v40 = vpack.c.bf16 %v13903_v36, %v13900_v35 }
 0x17b   :  { %v366_v41 = vpack.c.bf16 %v13909_v39, %v13906_v38 }
 0x17c   :  { %375 = vst.msk [vmem:[#allocation2 + $0x10] sm:$0xff] %vm170_vm1, %v367_v40 }
 0x17d   :  { %374 = vst.msk [vmem:[#allocation2 + $0x8] sm:$0xff] %vm170_vm1, %v366_v41  ;;  %v11576_v42 = vpop.f32.mrb[4].mxu0 }
 0x17e   :  { %v319_v43 = vpop.f32.mrb[5].mxu0  ;;  %v13918_v45 = vadd.f32 %v11576_v42, %v13897_v32 }
 0x17f   :  { %v11577_v44 = vpop.f32.mrb[6].mxu0  ;;  %v13924_v48 = vadd.f32 %v13897_v32, %v319_v43 }
 0x180   :  { %v13921_v46 = vadd.f32 %v11577_v44, %v13897_v32  ;;  %v322_v47 = vpop.f32.mrb[7].mxu0 }
 0x181   :  { %v13927_v49 = vadd.f32 %v13897_v32, %v322_v47 }
 0x182   :  { %v369_v50 = vpack.c.bf16 %v13921_v46, %v13918_v45 }
 0x183   :  { %v368_v52 = vpack.c.bf16 %v13927_v49, %v13924_v48  ;;  %v13936_v54 = vld [vmem:[#allocation2 + $0x10] sm:$0xff] }
 0x184   :  { %377 = vst.msk [vmem:[#allocation2 + $0x20] sm:$0xff] %vm170_vm1, %v369_v50  ;;  %v13939_v55 = vld [vmem:[#allocation2 + $0x8] sm:$0xff]  ;;  %v446_v56 = vshrl.u32 %v13936_v54, 16  ;;  %v449_v57 = vshll.u32 %v13936_v54, 16 }
 0x185   :  { %376 = vst.msk [vmem:[#allocation2 + $0x18] sm:$0xff] %vm170_vm1, %v368_v52  ;;  %v11580_v58 = vpop.f32.mrb[8].mxu0  ;;  %v438_v59 = vshrl.u32 %v13939_v55, 16  ;;  %v441_v60 = vshll.u32 %v13939_v55, 16 }
 0x186   :  { %v335_v61 = vpop.f32.mrb[9].mxu0  ;;  %v448_v62 = vrot.slane %v446_v56, 7  ;;  %v987_v63 = vrot.slane %v449_v57, 1  ;;  %v13947_v0 = vadd.f32 %v11580_v58, %v13897_v32 }
 0x187   :  { %v11581_v1 = vpop.f32.mrb[10].mxu0  ;;  %v440_v3 = vrot.slane %v438_v59, 7  ;;  %v982_v7 = vrot.slane %v441_v60, 1  ;;  %v13953_v9 = vadd.f32 %v13897_v32, %v335_v61  ;;  %v13131_v61 = vld [vmem:[#allocation4 + $0x18] sm:$0xff]  }
 0x188   :  { %v13950_v4 = vadd.f32 %v11581_v1, %v13897_v32  ;;  %v338_v5 = vpop.f32.mrb[11].mxu0  ;;  %v451_v6 = vor.u32 %v449_v57, %v448_v62  ;;  %v991_v8 = vor.u32 %v987_v63, %v446_v56 }
 0x189   :  { %v13956_v10 = vadd.f32 %v13897_v32, %v338_v5  ;;  %v443_v11 = vor.u32 %v441_v60, %v440_v3  ;;  %v983_v13 = vor.u32 %v982_v7, %v438_v59  ;;  %v470_v60 = vshrl.u32 %v13996_v53, 16 }
 0x18a   :  { %v371_v12 = vpack.c.bf16 %v13950_v4, %v13947_v0  ;;  %v452_v18 = vsel %vm432_vm2, %v440_v3, %v451_v6 }
 0x18b   :  { %v370_v14 = vpack.c.bf16 %v13956_v10, %v13953_v9  ;;  %v444_v15 = vsel %vm432_vm2, %v436_v2, %v443_v11  ;;  %v13963_v17 = vld [vmem:[#allocation2 + $0x20] sm:$0xff]  ;;  %v13973_v22 = vsel %vm976_vm3, %v983_v13, %v987_v63  ;;  %v472_v11 = vrot.slane %v470_v60, 7 }
 0x18c   :  { %380 = vst.msk [vmem:[#allocation2 + $0x40] sm:$0xff] %vm170_vm1, %v371_v12  ;;  %11594 = vmatprep.mubr.msk.bf16.mxu1 %vm170_vm1, %v444_v15  ;;  %v13968_v19 = vld [vmem:[#allocation2 + $0x18] sm:$0xff]  ;;  %v462_v20 = vshrl.u32 %v13963_v17, 16  ;;  %v465_v21 = vshll.u32 %v13963_v17, 16  ;;  %v13132_v13 = vld [vmem:[#allocation4 + $0x40] sm:$0xff]  }
 0x18d   :  { %379 = vst.msk [vmem:[#allocation2 + $0x38] sm:$0xff] %vm170_vm1, %v370_v14  ;;  %v11584_v23 = vpop.f32.mrb[12].mxu0  ;;  %11595 = vmatmul.mubr.msk.bf16.vlgmr.msra.gmra.mrb[0].mxu1 %vm170_vm1, %v452_v18  ;;  %v454_v24 = vshrl.u32 %v13968_v19, 16  ;;  %v457_v25 = vshll.u32 %v13968_v19, 16 }
 0x18e   :  { %11611 = vmatpush3.bf16.msra.mxu1 %v13891_v30  ;;  %v351_v27 = vpop.f32.mrb[13].mxu0  ;;  %v464_v28 = vrot.slane %v462_v20, 7  ;;  %v1003_v29 = vrot.slane %v465_v21, 1  ;;  %v13981_v31 = vadd.f32 %v11584_v23, %v13897_v32 }
 0x18f   :  { %v11585_v33 = vpop.f32.mrb[14].mxu0  ;;  %v456_v34 = vrot.slane %v454_v24, 7  ;;  %11612 = vmatprep.subr.bf16.mxu1 %v13129_v16  ;;  %v995_v43 = vrot.slane %v457_v25, 1  ;;  %v13989_v30 = vadd.f32 %v13897_v32, %v351_v27 }
 0x190   :  { %v13984_v40 = vadd.f32 %v11585_v33, %v13897_v32  ;;  %v354_v41 = vpop.f32.mrb[15].mxu0  ;;  %v467_v42 = vor.u32 %v465_v21, %v464_v28  ;;  %v13986_v44 = vor.u32 %v1003_v29, %v462_v20 }
 0x191   :  { %v13992_v47 = vadd.f32 %v13897_v32, %v354_v41  ;;  %v459_v50 = vor.u32 %v457_v25, %v456_v34  ;;  %v13999_v56 = vsel %vm976_vm3, %v991_v8, %v995_v43  ;;  %v999_v57 = vor.u32 %v995_v43, %v454_v24 }
 0x192   :  { %v373_v52 = vpack.c.bf16 %v13984_v40, %v13981_v31  ;;  %11613 = vmatpush3.bf16.msra.mxu1 %v13129_v16  ;;  %v468_v63 = vsel %vm432_vm2, %v456_v34, %v467_v42 }
 0x193   :  { %v372_v58 = vpack.c.bf16 %v13992_v47, %v13989_v30  ;;  %v460_v59 = vsel %vm432_vm2, %v448_v62, %v459_v50  ;;  %11614 = vmatprep.subr.bf16.mxu1 %v13130_v37  ;;  %v14005_v32 = vld [vmem:[#allocation2 + $0x40] sm:$0xff]  ;;  %v14015_v62 = vsel %vm976_vm3, %v999_v57, %v1003_v29  ;;  %v404_v50 = vrot.slane %v13931_v51, 7 }
 0x194   :  { %382 = vst.msk [vmem:[#allocation2 + $0x50] sm:$0xff] %vm170_vm1, %v373_v52  ;;  %11598 = vmatprep.mubr.msk.bf16.mxu1 %vm170_vm1, %v460_v59  ;;  %v14010_v1 = vld [vmem:[#allocation2 + $0x38] sm:$0xff]  ;;  %v482_v2 = vshrl.u32 %v14005_v32, 16  ;;  %v485_v3 = vshll.u32 %v14005_v32, 16  ;;  %v405_v59 = vrot.slane %v13939_v55, 7 }
 0x195   :  { %381 = vst.msk [vmem:[#allocation2 + $0x48] sm:$0xff] %vm170_vm1, %v372_v58  ;;  %11599 = vmatmul.mubr.msk.bf16.gmra.mrb[4].mxu1 %vm170_vm1, %v468_v63  ;;  %v474_v5 = vshrl.u32 %v14010_v1, 16  ;;  %v477_v6 = vshll.u32 %v14010_v1, 16 }
 0x196   :  { %v484_v7 = vrot.slane %v482_v2, 7  ;;  %11615 = vmatpush3.bf16.msra.mxu1 %v13130_v37  ;;  %v1023_v8 = vrot.slane %v485_v3, 1 }
 0x197   :  { %v476_v12 = vrot.slane %v474_v5, 7  ;;  %11616 = vmatprep.subr.bf16.mxu1 %v13131_v61  ;;  %v1018_v14 = vrot.slane %v477_v6, 1 }
 0x198   :  { %v487_v15 = vor.u32 %v485_v3, %v484_v7  ;;  %v1027_v16 = vor.u32 %v1023_v8, %v482_v2  ;;  %v406_v3 = vsel %vm403_vm4, %v404_v50, %v405_v59 }
 0x199   :  { %v479_v18 = vor.u32 %v477_v6, %v476_v12  ;;  %v1019_v20 = vor.u32 %v1018_v14, %v474_v5  ;;  %v13144_v5 = vld [vmem:[%s16824_s6] sm:$0xff]   ;;  %v13145_v6 = vld [vmem:[%s16824_s6 + $0x8] sm:$0xff]  }
 0x19a   :  { %11617 = vmatpush3.bf16.msra.mxu1 %v13131_v61  ;;  %v488_v25 = vsel %vm432_vm2, %v476_v12, %v487_v15  ;;  %11706 = vmatprep.subr.bf16.mxu0 %v13144_v5  ;;  %v13133_v12 = vld [vmem:[#allocation4 + $0x48] sm:$0xff]  }
 0x19b   :  { %v480_v21 = vsel %vm432_vm2, %v472_v11, %v479_v18  ;;  %v14022_v23 = vld [vmem:[#allocation2 + $0x50] sm:$0xff]  ;;  %11634 = vmatprep.subr.bf16.mxu1 %v13132_v13  ;;  %v14025_v24 = vsel %vm976_vm3, %v1019_v20, %v1023_v8  ;;  %11707 = vmatpush3.bf16.msra.mxu0 %v13144_v5  ;;  %v409_v8 = vrot.slane %v13968_v19, 7  ;;  %v13143_v5 = vld [vmem:[#allocation4 + $0x98] sm:$0xff]  }
 0x19c   :  { %11602 = vmatprep.mubr.msk.bf16.mxu1 %vm170_vm1, %v480_v21  ;;  %v14029_v27 = vld [vmem:[#allocation2 + $0x48] sm:$0xff]  ;;  %v498_v28 = vshrl.u32 %v14022_v23, 16  ;;  %v501_v29 = vshll.u32 %v14022_v23, 16  ;;  %11708 = vmatprep.subr.bf16.mxu0 %v13145_v6  ;;  %v13146_v11 = vld [vmem:[%s16824_s6 + $0x10] sm:$0xff]   ;;  %v413_v21 = vrot.slane %v13996_v53, 7 }
 0x19d   :  { %11603 = vmatmul.mubr.msk.bf16.gmra.mrb[8].mxu1 %vm170_vm1, %v488_v25  ;;  %v490_v33 = vshrl.u32 %v14029_v27, 16  ;;  %v493_v34 = vshll.u32 %v14029_v27, 16  ;;  %v13134_v18 = vld [vmem:[#allocation4 + $0x50] sm:$0xff]   ;;  %v414_v25 = vrot.slane %v14010_v1, 7  ;;  %v418_v53 = vrot.slane %v14029_v27, 7 }
 0x19e   :  { %v500_v37 = vrot.slane %v498_v28, 7  ;;  %v1039_v41 = vrot.slane %v501_v29, 1 }
 0x19f   :  { %v492_v42 = vrot.slane %v490_v33, 7  ;;  %v1031_v43 = vrot.slane %v493_v34, 1  ;;  %11709 = vmatpush3.bf16.msra.mxu0 %v13145_v6 }
 0x1a0   :  { %v503_v52 = vor.u32 %v501_v29, %v500_v37  ;;  %v14037_v57 = vor.u32 %v1039_v41, %v498_v28  ;;  %11710 = vmatprep.subr.bf16.mxu0 %v13146_v11  ;;  %v13135_v28 = vld [vmem:[#allocation4 + $0x58] sm:$0xff]  }
 0x1a1   :  { %v495_v58 = vor.u32 %v493_v34, %v492_v42  ;;  %v14041_v60 = vsel %vm976_vm3, %v1027_v16, %v1031_v43  ;;  %v1035_v61 = vor.u32 %v1031_v43, %v490_v33  ;;  %v387_v16 = vld [vmem:[#allocation2 + $0x20] sm:$0x7f]  ;;  %v415_v33 = vsel %vm403_vm4, %v413_v21, %v414_v25 }
 0x1a2   :  { %v504_v51 = vsel %vm432_vm2, %v492_v42, %v503_v52  ;;  %v411_v20 = vrot.slane %v387_v16, 7  ;;  %v416_v34 = vrot.slane %v14005_v32, 7  ;;  %v392_v42 = vld [vmem:[#allocation2 + $0x50] sm:$0x7f]  ;;  %v13137_v52 = vld [vmem:[#allocation4 + $0x68] sm:$0xff]   ;;  %v1242_v16 = vrot.slane %v14005_v32, 1 }
 0x1a3   :  { %v496_v63 = vsel %vm432_vm2, %v484_v7, %v495_v58  ;;  %v14045_v2 = vsel %vm976_vm3, %v1035_v61, %v1039_v41  ;;  %v407_v7 = vrot.slane %v13936_v54, 7  ;;  %11711 = vmatpush3.bf16.msra.mxu0 %v13146_v11  ;;  %v420_v43 = vrot.slane %v392_v42, 7  ;;  %v13138_v58 = vld [vmem:[#allocation4 + $0x70] sm:$0xff]   ;;  %v13141_v61 = vld [vmem:[#allocation4 + $0x88] sm:$0xff]   ;;  %v13148_v42 = vld [vmem:[#allocation4 + $0xc0] sm:$0xff]  }
 0x1a4   :  { %11606 = vmatprep.mubr.msk.bf16.mxu1 %vm170_vm1, %v496_v63  ;;  %v412_v29 = vsel %vm403_vm4, %v409_v8, %v411_v20  ;;  %v417_v37 = vsel %vm403_vm4, %v414_v25, %v416_v34  ;;  %v419_v41 = vsel %vm403_vm4, %v416_v34, %v418_v53  ;;  %v970_v63 = vld [vmem:[#allocation2 + $0x28] sm:$0x1]  ;;  %v1246_v20 = vrot.slane %v14022_v23, 1  ;;  %v184_v34 = vld [vmem:[%s16868_s5 + $0x20] sm:$0xff] }
 0x1a5   :  { %11607 = vmatmul.mubr.msk.bf16.gmra.mrb[12].mxu1 %vm170_vm1, %v504_v51  ;;  %v408_v14 = vsel %vm403_vm4, %v405_v59, %v407_v7  ;;  %v410_v15 = vsel %vm403_vm4, %v407_v7, %v409_v8  ;;  %v421_v50 = vsel %vm403_vm4, %v418_v53, %v420_v43  ;;  %v13139_v59 = vld [vmem:[#allocation4 + $0x78] sm:$0xff]   ;;  %v13142_v51 = vld [vmem:[#allocation4 + $0x90] sm:$0xff]   ;;  %v185_v53 = vld [vmem:[%s16868_s5 + $0x28] sm:$0xff] }
 0x1a6   :  { %11618 = vmatprep.mubr.msk.bf16.mxu1 %vm170_vm1, %v406_v3  ;;  %v188_v43 = vld [vmem:[%s16868_s5 + $0x40] sm:$0xff] }
 0x1ad   :  { %11619 = vmatmul.mubr.msk.bf16.vlgmr.msra.gmra.mrb[0].mxu1 %vm170_vm1, %v408_v14  ;;  %v1220_v14 = vld [vmem:[#allocation2 + $0x38] sm:$0xfe] }
 0x1ae   :  { %11635 = vmatpush3.bf16.msra.mxu1 %v13132_v13  ;;  %11622 = vmatprep.mubr.msk.bf16.mxu1 %vm170_vm1, %v410_v15  ;;  %v13136_v13 = vld [vmem:[#allocation4 + $0x60] sm:$0xff]   ;;  %v1241_v15 = vrot.slane %v1220_v14, 1 }
 0x1af   :  { %11636 = vmatprep.subr.bf16.mxu1 %v13133_v12 }
 0x1b2   :  { %11637 = vmatpush3.bf16.msra.mxu1 %v13133_v12  ;;  %v1237_v12 = vrot.slane %v13963_v17, 1 }
 0x1b3   :  { %11638 = vmatprep.subr.bf16.mxu1 %v13134_v18 }
 0x1b5   :  { %11623 = vmatmul.mubr.msk.bf16.gmra.mrb[4].mxu1 %vm170_vm1, %v412_v29  ;;  %v13147_v29 = vld [vmem:[%s16824_s6 + $0x18] sm:$0xff]  }
 0x1b6   :  { %11626 = vmatprep.mubr.msk.bf16.mxu1 %vm170_vm1, %v415_v33  ;;  %11639 = vmatpush3.bf16.msra.mxu1 %v13134_v18  ;;  %v181_v33 = vld [vmem:[%s16868_s5 + $0x8] sm:$0xff] }
 0x1b7   :  { %11640 = vmatprep.subr.bf16.mxu1 %v13135_v28  ;;  %11712 = vmatprep.subr.bf16.mxu0 %v13147_v29 }
 0x1b8   :  { %11713 = vmatpush3.bf16.msra.mxu0 %v13147_v29 }
 0x1b9   :  { %11730 = vmatprep.subr.bf16.mxu0 %v13148_v42 }
 0x1ba   :  { %11641 = vmatpush3.bf16.msra.mxu1 %v13135_v28 }
 0x1bb   :  { %11658 = vmatprep.subr.bf16.mxu1 %v13136_v13 }
 0x1bd   :  { %11627 = vmatmul.mubr.msk.bf16.gmra.mrb[8].mxu1 %vm170_vm1, %v417_v37  ;;  %v186_v37 = vld [vmem:[%s16868_s5 + $0x30] sm:$0xff] }
 0x1be   :  { %11630 = vmatprep.mubr.msk.bf16.mxu1 %vm170_vm1, %v419_v41  ;;  %v187_v41 = vld [vmem:[%s16868_s5 + $0x38] sm:$0xff] }
 0x1c5   :  { %11631 = vmatmul.mubr.msk.bf16.gmra.mrb[12].mxu1 %vm170_vm1, %v421_v50  ;;  %v189_v50 = vld [vmem:[%s16868_s5 + $0x48] sm:$0xff] }
 0x1c6   :  { %11642 = vmatprep.mubr.msk.bf16.mxu1 %vm170_vm1, %v13939_v55  ;;  %v13140_v55 = vld [vmem:[#allocation4 + $0x80] sm:$0xff]  }
 0x1cd   :  { %11643 = vmatmul.mubr.msk.bf16.vlgmr.msra.gmra.mrb[0].mxu1 %vm170_vm1, %v13936_v54 }
 0x1ce   :  { %11659 = vmatpush3.bf16.msra.mxu1 %v13136_v13  ;;  %11646 = vmatprep.mubr.msk.bf16.mxu1 %vm170_vm1, %v13968_v19  ;;  %v183_v13 = vld [vmem:[%s16868_s5 + $0x18] sm:$0xff] }
 0x1cf   :  { %11660 = vmatprep.subr.bf16.mxu1 %v13137_v52 }
 0x1d2   :  { %11661 = vmatpush3.bf16.msra.mxu1 %v13137_v52  ;;  %v190_v52 = vld [vmem:[%s16868_s5 + $0x50] sm:$0xff] }
 0x1d3   :  { %11662 = vmatprep.subr.bf16.mxu1 %v13138_v58 }
 0x1d5   :  { %11647 = vmatmul.mubr.msk.bf16.gmra.mrb[4].mxu1 %vm170_vm1, %v13963_v17  ;;  %v1244_v17 = vrot.slane %v14029_v27, 1 }
 0x1d6   :  { %11650 = vmatprep.mubr.msk.bf16.mxu1 %vm170_vm1, %v14010_v1  ;;  %11663 = vmatpush3.bf16.msra.mxu1 %v13138_v58  ;;  %v1009_v1 = vshll.u32 %v970_v63, 16  ;;  %v191_v58 = vld [vmem:[%s16868_s5 + $0x58] sm:$0xff] }
 0x1d7   :  { %11664 = vmatprep.subr.bf16.mxu1 %v13139_v59  ;;  %v1245_v21 = vsel %vm1231_vm5, %v1242_v16, %v1244_v17  ;;  %v1247_v25 = vsel %vm1231_vm5, %v1244_v17, %v1246_v20 }
 0x1d8   :  { %v1011_v3 = vrot.slane %v1009_v1, 1  ;;  %v10418_v1 = vld [vmem:[#allocation7] ss:$0 sm:$0xff] }
 0x1da   :  { %11665 = vmatpush3.bf16.msra.mxu1 %v13139_v59  ;;  %v1012_v6 = vsel %vm976_vm3, %v13986_v44, %v1011_v3  ;;  %v1233_v44 = vrot.slane %v13936_v54, 1  ;;  %v192_v59 = vld [vmem:[%s16868_s5 + $0x60] sm:$0xff] }
 0x1db   :  { %11682 = vmatprep.subr.bf16.mxu1 %v13140_v55 }
 0x1dd   :  { %11651 = vmatmul.mubr.msk.bf16.gmra.mrb[8].mxu1 %vm170_vm1, %v14005_v32 }
 0x1de   :  { %11654 = vmatprep.mubr.msk.bf16.mxu1 %vm170_vm1, %v14029_v27  ;;  %v182_v27 = vld [vmem:[%s16868_s5 + $0x10] sm:$0xff] }
 0x1df   :  { %1655 = vperm.xlu1 %13002, %v182_v27  }
 0x1e3   :  { %1660 = vperm.xlu1 %13002, %v183_v13  }
 0x1e5   :  { %11655 = vmatmul.mubr.msk.bf16.gmra.mrb[12].mxu1 %vm170_vm1, %v14022_v23  ;;  %v180_v23 = vld [vmem:[%s16868_s5] sm:$0xff] }
 0x1e6   :  { %11666 = vmatprep.mubr.msk.bf16.mxu1 %vm170_vm1, %v13973_v22  ;;  %v975_v22 = vld [vmem:[#allocation2 + $0x58] sm:$0x1]  ;;  %1645 = vperm.xlu0 %13001, %v180_v23  }
 0x1e7   :  { %v1248_v32 = vrot.slane %v975_v22, 1  ;;  %1670 = vperm.xlu1 %13002, %v185_v53  }
 0x1e9   :  { %v1249_v28 = vsel %vm1231_vm5, %v1246_v20, %v1248_v32 }
 0x1ea   :  { %1650 = vperm.xlu0 %13001, %v181_v33  }
 0x1eb   :  { %1680 = vperm.xlu1 %13002, %v187_v41  }
 0x1ed   :  { %11667 = vmatmul.mubr.msk.bf16.vlgmr.msra.gmra.mrb[0].mxu1 %vm170_vm1, %v13999_v56  ;;  %v1045_v56 = vshll.u32 %v975_v22, 16 }
 0x1ee   :  { %11683 = vmatpush3.bf16.msra.mxu1 %v13140_v55  ;;  %11670 = vmatprep.mubr.msk.bf16.mxu1 %vm170_vm1, %v14015_v62  ;;  %v1219_v62 = vld [vmem:[#allocation2 + $0x8] sm:$0xfe] }
 0x1ef   :  { %11684 = vmatprep.subr.bf16.mxu1 %v13141_v61  ;;  %v1047_v7 = vrot.slane %v1045_v56, 1  ;;  %v1232_v8 = vrot.slane %v1219_v62, 1  ;;  %1665 = vperm.xlu0 %13001, %v184_v34   ;;  %v193_v55 = vld [vmem:[%s16868_s5 + $0x68] sm:$0xff] }
 0x1f0   :  { %1690 = vperm.xlu1 %13002, %v189_v50  }
 0x1f1   :  { %v1234_v11 = vsel %vm1231_vm5, %v1232_v8, %v1233_v44 }
 0x1f2   :  { %11685 = vmatpush3.bf16.msra.mxu1 %v13141_v61  ;;  %v194_v61 = vld [vmem:[%s16868_s5 + $0x70] sm:$0xff] }
 0x1f3   :  { %11686 = vmatprep.subr.bf16.mxu1 %v13142_v51  ;;  %1675 = vperm.xlu0 %13001, %v186_v37  }
 0x1f4   :  { %1700 = vperm.xlu1 %13002, %v191_v58  }
 0x1f5   :  { %11671 = vmatmul.mubr.msk.bf16.gmra.mrb[4].mxu1 %vm170_vm1, %v1012_v6 }
 0x1f6   :  { %11674 = vmatprep.mubr.msk.bf16.mxu1 %vm170_vm1, %v14025_v24  ;;  %11687 = vmatpush3.bf16.msra.mxu1 %v13142_v51  ;;  %v1048_v24 = vsel %vm976_vm3, %v14037_v57, %v1047_v7  ;;  %v1239_v57 = vrot.slane %v970_v63, 1  ;;  %v195_v63 = vld [vmem:[%s16868_s5 + $0x78] sm:$0xff] }
 0x1f7   :  { %11688 = vmatprep.subr.bf16.mxu1 %v13143_v5  ;;  %1685 = vperm.xlu0 %13001, %v188_v43  }
 0x1f8   :  { %v1240_v18 = vsel %vm1231_vm5, %v1237_v12, %v1239_v57  ;;  %1710 = vperm.xlu1 %13002, %v193_v55   ;;  %v13149_v57 = vld [vmem:[#allocation4 + $0xc8] sm:$0xff]  }
 0x1fa   :  { %11689 = vmatpush3.bf16.msra.mxu1 %v13143_v5 }
 0x1fb   :  { %1695 = vperm.xlu0 %13001, %v190_v52  }
 0x1fc   :  { %1720 = vperm.xlu1 %13002, %v195_v63  }
 0x1fd   :  { %11675 = vmatmul.mubr.msk.bf16.gmra.mrb[8].mxu1 %vm170_vm1, %v14041_v60  ;;  %v1235_v60 = vrot.slane %v13968_v19, 1  ;;  %v1243_v19 = vsel %vm1231_vm5, %v1241_v15, %v1242_v16 }
 0x1fe   :  { %11678 = vmatprep.mubr.msk.bf16.mxu1 %vm170_vm1, %v14045_v2 }
 0x1ff   :  { %v1236_v2 = vsel %vm1231_vm5, %v1233_v44, %v1235_v60  ;;  %v1238_v54 = vsel %vm1231_vm5, %v1235_v60, %v1237_v12  ;;  %1705 = vperm.xlu0 %13001, %v192_v59  }
 0x203   :  { %1715 = vperm.xlu0 %13001, %v194_v61  }
 0x205   :  { %11679 = vmatmul.mubr.msk.bf16.gmra.mrb[12].mxu1 %vm170_vm1, %v1048_v24 }
 0x206   :  { %11690 = vmatprep.mubr.msk.bf16.mxu1 %vm170_vm1, %v1234_v11 }
 0x20d   :  { %11691 = vmatmul.mubr.msk.bf16.vlgmr.msra.gmra.mrb[0].mxu1 %vm170_vm1, %v1236_v2 }
 0x20e   :  { %11694 = vmatprep.mubr.msk.bf16.mxu1 %vm170_vm1, %v1238_v54 }
 0x215   :  { %11695 = vmatmul.mubr.msk.bf16.gmra.mrb[4].mxu1 %vm170_vm1, %v1240_v18 }
 0x216   :  { %11698 = vmatprep.mubr.msk.bf16.mxu1 %vm170_vm1, %v1243_v19 }
 0x21d   :  { %11699 = vmatmul.mubr.msk.bf16.gmra.mrb[8].mxu1 %vm170_vm1, %v1245_v21 }
 0x21e   :  { %11702 = vmatprep.mubr.msk.bf16.mxu1 %vm170_vm1, %v1247_v25 }
 0x225   :  { %11703 = vmatmul.mubr.msk.bf16.gmra.mrb[12].mxu1 %vm170_vm1, %v1249_v28 }
 0x2e0   :  { %v11692_v51 = vpop.f32.mrb[0].mxu1 }
 0x2e1   :  { %v1429_v3 = vadd.f32 %v11692_v51, %v10418_v1  ;;  %v1341_v5 = vpop.f32.mrb[1].mxu1 }
 0x2e2   :  { %v1427_v6 = vadd.f32 %v10418_v1, %v1341_v5  ;;  %v11693_v22 = vpop.f32.mrb[2].mxu1 }
 0x2e3   :  { %v1430_v56 = vadd.f32 %v11693_v22, %v10418_v1  ;;  %v1344_v62 = vpop.f32.mrb[3].mxu1  ;;  %v1445_v8 = vmax.f32 %v1429_v3, 0.0 }
 0x2e4   :  { %v1428_v7 = vadd.f32 %v10418_v1, %v1344_v62  ;;  %v1443_v24 = vmax.f32 %v1427_v6, 0.0 }
 0x2e5   :  { %v1446_v44 = vmax.f32 %v1430_v56, 0.0 }
 0x2e6   :  { %v1444_v11 = vmax.f32 %v1428_v7, 0.0 }
 0x2e7   :  { %v1460_v60 = vpack.c.bf16 %v1446_v44, %v1445_v8 }
 0x2e8   :  { %v1459_v12 = vpack.c.bf16 %v1444_v11, %v1443_v24  ;;  %v11696_v2 = vpop.f32.mrb[4].mxu1  ;;  %v13150_v11 = vld [vmem:[#allocation4 + $0xd0] sm:$0xff]  }
 0x2e9   :  { %v1433_v54 = vadd.f32 %v11696_v2, %v10418_v1  ;;  %v1357_v14 = vpop.f32.mrb[5].mxu1  ;;  %v14201_v2 = vpop.permute.xlu1 %1655 }
 0x2ea   :  { %v1431_v15 = vadd.f32 %v10418_v1, %v1357_v14  ;;  %v11697_v16 = vpop.f32.mrb[6].mxu1  ;;  %11714 = vmatprep.mubr.msk.bf16.mxu0 %vm170_vm1, %v1459_v12  ;;  %v14196_v12 = vld [vmem:[#allocation4 + $0xa0] sm:$0xff]  }
 0x2eb   :  { %v1434_v18 = vadd.f32 %v11697_v16, %v10418_v1  ;;  %v1360_v19 = vpop.f32.mrb[7].mxu1  ;;  %11715 = vmatmul.mubr.msk.bf16.vlgmr.msra.gmra.mrb[16].mxu0 %vm170_vm1, %v1460_v60  ;;  %v1449_v20 = vmax.f32 %v1433_v54, 0.0  ;;  %v13151_v60 = vld [vmem:[#allocation4 + $0xd8] sm:$0xff]  }
 0x2ec   :  { %v1432_v17 = vadd.f32 %v10418_v1, %v1360_v19  ;;  %11731 = vmatpush3.bf16.msra.mxu0 %v13148_v42  ;;  %v1447_v25 = vmax.f32 %v1431_v15, 0.0 }
 0x2ed   :  { %v1450_v21 = vmax.f32 %v1434_v18, 0.0  ;;  %11732 = vmatprep.subr.bf16.mxu0 %v13149_v57  ;;  %v14205_v14 = vpop.permute.xlu1 %1660 }
 0x2ee   :  { %v1448_v32 = vmax.f32 %v1432_v17, 0.0 }
 0x2ef   :  { %v1462_v28 = vpack.c.bf16 %v1450_v21, %v1449_v20 }
 0x2f0   :  { %v1461_v29 = vpack.c.bf16 %v1448_v32, %v1447_v25  ;;  %v11700_v23 = vpop.f32.mrb[8].mxu1  ;;  %11733 = vmatpush3.bf16.msra.mxu0 %v13149_v57  ;;  %v14207_v57 = vld [vmem:[#allocation9] ss:$0 sm:$0xff] }
 0x2f1   :  { %v1437_v27 = vadd.f32 %v11700_v23, %v10418_v1  ;;  %v1373_v33 = vpop.f32.mrb[9].mxu1  ;;  %11734 = vmatprep.subr.bf16.mxu0 %v13150_v11  ;;  %v14211_v16 = vpop.permute.xlu1 %1670 }
 0x2f2   :  { %v1435_v13 = vadd.f32 %v10418_v1, %v1373_v33  ;;  %v11701_v34 = vpop.f32.mrb[10].mxu1  ;;  %11718 = vmatprep.mubr.msk.bf16.mxu0 %vm170_vm1, %v1461_v29 }
 0x2f3   :  { %v1438_v53 = vadd.f32 %v11701_v34, %v10418_v1  ;;  %v1376_v37 = vpop.f32.mrb[11].mxu1  ;;  %11719 = vmatmul.mubr.msk.bf16.gmra.mrb[20].mxu0 %vm170_vm1, %v1462_v28  ;;  %v1453_v42 = vmax.f32 %v1437_v27, 0.0 }
 0x2f4   :  { %v1436_v41 = vadd.f32 %v10418_v1, %v1376_v37  ;;  %v1451_v50 = vmax.f32 %v1435_v13, 0.0  ;;  %11735 = vmatpush3.bf16.msra.mxu0 %v13150_v11 }
 0x2f5   :  { %v1454_v43 = vmax.f32 %v1438_v53, 0.0  ;;  %11736 = vmatprep.subr.bf16.mxu0 %v13151_v60  ;;  %v14222_v13 = vpop.permute.xlu1 %1680 }
 0x2f6   :  { %v1452_v52 = vmax.f32 %v1436_v41, 0.0 }
 0x2f7   :  { %v1464_v58 = vpack.c.bf16 %v1454_v43, %v1453_v42 }
 0x2f8   :  { %v1463_v59 = vpack.c.bf16 %v1452_v52, %v1451_v50  ;;  %v11704_v55 = vpop.f32.mrb[12].mxu1  ;;  %11737 = vmatpush3.bf16.msra.mxu0 %v13151_v60 }
 0x2f9   :  { %v1441_v61 = vadd.f32 %v11704_v55, %v10418_v1  ;;  %v1389_v63 = vpop.f32.mrb[13].mxu1  ;;  %11754 = vmatprep.subr.bf16.mxu0 %v14196_v12 }
 0x2fa   :  { %v1439_v51 = vadd.f32 %v10418_v1, %v1389_v63  ;;  %v11705_v3 = vpop.f32.mrb[14].mxu1  ;;  %11722 = vmatprep.mubr.msk.bf16.mxu0 %vm170_vm1, %v1463_v59  ;;  %v14248_v63 = vpop.permute.xlu1 %1690 }
 0x2fb   :  { %v1442_v5 = vadd.f32 %v11705_v3, %v10418_v1  ;;  %v1392_v6 = vpop.f32.mrb[15].mxu1  ;;  %11723 = vmatmul.mubr.msk.bf16.gmra.mrb[24].mxu0 %vm170_vm1, %v1464_v58  ;;  %v1457_v56 = vmax.f32 %v1441_v61, 0.0 }
 0x2fc   :  { %v1440_v22 = vadd.f32 %v10418_v1, %v1392_v6  ;;  %v1455_v7 = vmax.f32 %v1439_v51, 0.0  ;;  %v14199_v1 = vpop.permute.xlu0 %1645 }
 0x2fd   :  { %v1458_v62 = vmax.f32 %v1442_v5, 0.0 }
 0x2fe   :  { %v1456_v8 = vmax.f32 %v1440_v22, 0.0 }
 0x2ff   :  { %v1466_v44 = vpack.c.bf16 %v1458_v62, %v1457_v56  ;;  %v1803_v56 = vld [vmem:[#allocation2] sm:$0x80] }
 0x300   :  { %v1465_v24 = vpack.c.bf16 %v1456_v8, %v1455_v7  ;;  %v14203_v54 = vpop.permute.xlu0 %1650 }
 0x302   :  { %11726 = vmatprep.mubr.msk.bf16.mxu0 %vm170_vm1, %v1465_v24  ;;  %v14272_v24 = vpop.permute.xlu1 %1700 }
 0x303   :  { %11727 = vmatmul.mubr.msk.bf16.gmra.mrb[28].mxu0 %vm170_vm1, %v1466_v44 }
 0x304   :  { %v14209_v15 = vpop.permute.xlu0 %1665 }
 0x308   :  { %v14219_v27 = vpop.permute.xlu0 %1675 }
 0x30c   :  { %v14243_v58 = vpop.permute.xlu0 %1685 }
 0x310   :  { %v14267_v8 = vpop.permute.xlu0 %1695 }
 0x3be   :  { %v11716_v18 = vpop.f32.mrb[16].mxu0 }
 0x3bf   :  { %v1573_v19 = vadd.f32 %v11716_v18, %v14207_v57  ;;  %v1564_v17 = vpop.f32.mrb[17].mxu0 }
 0x3c0   :  { %v1565_v20 = vadd.f32 %v14207_v57, %v1564_v17  ;;  %v11717_v21 = vpop.f32.mrb[18].mxu0 }
 0x3c1   :  { %v1629_v25 = vadd.f32 %v1573_v19, %v13900_v35  ;;  %v1576_v32 = vadd.f32 %v11717_v21, %v14207_v57  ;;  %v1567_v28 = vpop.f32.mrb[19].mxu0  ;;  %v1811_v19 = vrot.slane %v1803_v56, 7  ;;  %v13154_v56 = vld [vmem:[#allocation4 + $0xb0] sm:$0xff]  }
 0x3c2   :  { %v1627_v29 = vadd.f32 %v1565_v20, %v13906_v38  ;;  %v1568_v23 = vadd.f32 %v14207_v57, %v1567_v28 }
 0x3c3   :  { %v1630_v33 = vadd.f32 %v1576_v32, %v13903_v36  ;;  %v14226_v53 = vmul.f32 %v14201_v2, %v1629_v25 }
 0x3c4   :  { %v1628_v34 = vadd.f32 %v1568_v23, %v13909_v39  ;;  %v14232_v37 = vmul.f32 %v14199_v1, %v1627_v29 }
 0x3c5   :  { %v14229_v35 = vmul.f32 %v14205_v14, %v1630_v33 }
 0x3c6   :  { %v14235_v38 = vmul.f32 %v14203_v54, %v1628_v34  ;;  %v11720_v41 = vpop.f32.mrb[20].mxu0 }
 0x3c7   :  { %v1740_v36 = vpack.c.bf16 %v14229_v35, %v14226_v53  ;;  %v1589_v42 = vadd.f32 %v11720_v41, %v14207_v57  ;;  %v1580_v43 = vpop.f32.mrb[21].mxu0 }
 0x3c8   :  { %v1739_v39 = vpack.c.bf16 %v14235_v38, %v14232_v37  ;;  %v1581_v50 = vadd.f32 %v14207_v57, %v1580_v43  ;;  %v11721_v52 = vpop.f32.mrb[22].mxu0  ;;  %v14293_v43 = vpop.permute.xlu0 %1705 }
 0x3c9   :  { %1748 = vst.msk [vmem:[#allocation2 + $0x10] sm:$0xff] %vm170_vm1, %v1740_v36  ;;  %v1633_v59 = vadd.f32 %v1589_v42, %v13918_v45  ;;  %v1592_v55 = vadd.f32 %v11721_v52, %v14207_v57  ;;  %v1583_v61 = vpop.f32.mrb[23].mxu0  ;;  %v13153_v42 = vld [vmem:[#allocation4 + $0xa8] sm:$0xff]  }
 0x3ca   :  { %1747 = vst.msk [vmem:[#allocation2 + $0x8] sm:$0xff] %vm170_vm1, %v1739_v39  ;;  %v1631_v51 = vadd.f32 %v1581_v50, %v13924_v48  ;;  %v1584_v3 = vadd.f32 %v14207_v57, %v1583_v61  ;;  %v14302_v50 = vpop.permute.xlu1 %1710 }
 0x3cb   :  { %v1634_v5 = vadd.f32 %v1592_v55, %v13921_v46  ;;  %v14256_v22 = vmul.f32 %v14219_v27, %v1633_v59 }
 0x3cc   :  { %v1632_v6 = vadd.f32 %v1584_v3, %v13927_v49  ;;  %v14262_v62 = vmul.f32 %v14209_v15, %v1631_v51 }
 0x3cd   :  { %v14259_v45 = vmul.f32 %v14222_v13, %v1634_v5 }
 0x3ce   :  { %v14265_v7 = vmul.f32 %v14211_v16, %v1632_v6  ;;  %v11724_v48 = vpop.f32.mrb[24].mxu0 }
 0x3cf   :  { %v1742_v46 = vpack.c.bf16 %v14259_v45, %v14256_v22  ;;  %v1605_v49 = vadd.f32 %v11724_v48, %v14207_v57  ;;  %v1596_v44 = vpop.f32.mrb[25].mxu0 }
 0x3d0   :  { %v1741_v11 = vpack.c.bf16 %v14265_v7, %v14262_v62  ;;  %v1597_v60 = vadd.f32 %v14207_v57, %v1596_v44  ;;  %v11725_v18 = vpop.f32.mrb[26].mxu0  ;;  %v14277_v17 = vld [vmem:[#allocation2 + $0x10] sm:$0xff] }
 0x3d1   :  { %1750 = vst.msk [vmem:[#allocation2 + $0x20] sm:$0xff] %vm170_vm1, %v1742_v46  ;;  %v1637_v20 = vadd.f32 %v1605_v49, %v13947_v0  ;;  %v1608_v21 = vadd.f32 %v11725_v18, %v14207_v57  ;;  %v1599_v25 = vpop.f32.mrb[27].mxu0  ;;  %v14282_v32 = vld [vmem:[#allocation2 + $0x8] sm:$0xff]  ;;  %v1814_v28 = vrot.slane %v14277_v17, 7 }
 0x3d2   :  { %1749 = vst.msk [vmem:[#allocation2 + $0x18] sm:$0xff] %vm170_vm1, %v1741_v11  ;;  %v1635_v29 = vadd.f32 %v1597_v60, %v13953_v9  ;;  %v1600_v23 = vadd.f32 %v14207_v57, %v1599_v25  ;;  %v1812_v33 = vrot.slane %v14282_v32, 7 }
 0x3d3   :  { %v1638_v34 = vadd.f32 %v1608_v21, %v13950_v4  ;;  %v14296_v39 = vmul.f32 %v14267_v8, %v1637_v20  ;;  %v14328_v20 = vpop.permute.xlu0 %1715 }
 0x3d4   :  { %v1636_v41 = vadd.f32 %v1600_v23, %v13956_v10  ;;  %v1813_v0 = vsel %vm403_vm4, %v1811_v19, %v1812_v33  ;;  %v1815_v36 = vsel %vm403_vm4, %v1812_v33, %v1814_v28  ;;  %v14305_v4 = vmul.f32 %v14243_v58, %v1635_v29  ;;  %16869 = vst [vmem:[#allocation25_spill] sm:$0xff] %v14328_v20  ;;  %v13155_v23 = vld [vmem:[#allocation4 + $0xb8] sm:$0xff]  }
 0x3d5   :  { %v14299_v9 = vmul.f32 %v14272_v24, %v1638_v34  ;;  %11738 = vmatprep.mubr.msk.bf16.mxu0 %vm170_vm1, %v1813_v0 }
 0x3d6   :  { %v14308_v10 = vmul.f32 %v14248_v63, %v1636_v41  ;;  %v11728_v52 = vpop.f32.mrb[28].mxu0  ;;  %11739 = vmatmul.mubr.msk.bf16.vlgmr.msra.gmra.mrb[32].mxu0 %vm170_vm1, %v1815_v36  ;;  %v13156_v36 = vld [vmem:[#allocation4 + $0xe0] sm:$0xff]  }
 0x3d7   :  { %v1744_v59 = vpack.c.bf16 %v14299_v9, %v14296_v39  ;;  %v1621_v55 = vadd.f32 %v11728_v52, %v14207_v57  ;;  %11755 = vmatpush3.bf16.msra.mxu0 %v14196_v12  ;;  %v1612_v61 = vpop.f32.mrb[29].mxu0 }
 0x3d8   :  { %v1743_v51 = vpack.c.bf16 %v14308_v10, %v14305_v4  ;;  %v1613_v3 = vadd.f32 %v14207_v57, %v1612_v61  ;;  %v11729_v5 = vpop.f32.mrb[30].mxu0  ;;  %11756 = vmatprep.subr.bf16.mxu0 %v13153_v42  ;;  %v1804_v6 = vld [vmem:[#allocation2 + $0x20] sm:$0x7f] }
 0x3d9   :  { %1752 = vst.msk [vmem:[#allocation2 + $0x40] sm:$0xff] %vm170_vm1, %v1744_v59  ;;  %v1641_v48 = vadd.f32 %v1621_v55, %v13981_v31  ;;  %v1624_v46 = vadd.f32 %v11729_v5, %v14207_v57  ;;  %v1615_v49 = vpop.f32.mrb[31].mxu0  ;;  %v14321_v44 = vld [vmem:[#allocation2 + $0x18] sm:$0xff]  ;;  %v1818_v12 = vrot.slane %v1804_v6, 7  ;;  %v14330_v31 = vpop.permute.xlu1 %1720 }
 0x3da   :  { %1751 = vst.msk [vmem:[#allocation2 + $0x38] sm:$0xff] %vm170_vm1, %v1743_v51  ;;  %v1639_v11 = vadd.f32 %v1613_v3, %v13989_v30  ;;  %v1616_v60 = vadd.f32 %v14207_v57, %v1615_v49  ;;  %v1816_v18 = vrot.slane %v14321_v44, 7  ;;  %16870 = vst [vmem:[#allocation26_spill] sm:$0xff] %v14330_v31  ;;  %v1755_v51 = vld [vmem:[#allocation2] sm:$0xc0] }
 0x3db   :  { %v1642_v19 = vadd.f32 %v1624_v46, %v13984_v40  ;;  %11757 = vmatpush3.bf16.msra.mxu0 %v13153_v42  ;;  %v14336_v30 = vmul.f32 %v14328_v20, %v1641_v48  ;;  %v1805_v40 = vld [vmem:[#allocation2 + $0x30] sm:$0x80]  ;;  %v1776_v48 = vrot.slane %v1755_v51, 6  ;;  %v1777_v46 = vrot.slane %v14282_v32, 6 }
 0x3dc   :  { %v1640_v21 = vadd.f32 %v1616_v60, %v13992_v47  ;;  %v1817_v25 = vsel %vm403_vm4, %v1814_v28, %v1816_v18  ;;  %v1819_v29 = vsel %vm403_vm4, %v1816_v18, %v1818_v12  ;;  %11758 = vmatprep.subr.bf16.mxu0 %v13154_v56  ;;  %v14343_v33 = vmul.f32 %v14293_v43, %v1639_v11  ;;  %v13168_v60 = vld [vmem:[%s16824_s6 + $0x20] sm:$0xff]   ;;  %v13169_v18 = vld [vmem:[%s16824_s6 + $0x28] sm:$0xff]  }
 0x3dd   :  { %v14339_v57 = vmul.f32 %v14330_v31, %v1642_v19  ;;  %11742 = vmatprep.mubr.msk.bf16.mxu0 %vm170_vm1, %v1817_v25  ;;  %v1820_v41 = vrot.slane %v1805_v40, 7  ;;  %v1778_v11 = vsel %vm1775_vm6, %v1776_v48, %v1777_v46  ;;  %11850 = vmatprep.subr.bf16.mxu1 %v13168_v60  ;;  %v1779_v19 = vrot.slane %v14277_v17, 6  ;;  %v13170_v25 = vld [vmem:[%s16824_s6 + $0x30] sm:$0xff]  }
 0x3de   :  { %v14346_v47 = vmul.f32 %v14302_v50, %v1640_v21  ;;  %11743 = vmatmul.mubr.msk.bf16.gmra.mrb[36].mxu0 %vm170_vm1, %v1819_v29  ;;  %11851 = vmatpush3.bf16.msra.mxu1 %v13168_v60  ;;  %v1781_v21 = vrot.slane %v14321_v44, 6  ;;  %v13157_v29 = vld [vmem:[#allocation4 + $0xe8] sm:$0xff]  }
 0x3df   :  { %v1746_v28 = vpack.c.bf16 %v14339_v57, %v14336_v30  ;;  %11759 = vmatpush3.bf16.msra.mxu0 %v13154_v56  ;;  %11852 = vmatprep.subr.bf16.mxu1 %v13169_v18  ;;  %v13161_v60 = vld [vmem:[#allocation4 + $0x108] sm:$0xff]  }
 0x3e0   :  { %v1745_v34 = vpack.c.bf16 %v14346_v47, %v14343_v33  ;;  %v14353_v0 = vld [vmem:[#allocation2 + $0x40] sm:$0xff]  ;;  %11760 = vmatprep.subr.bf16.mxu0 %v13155_v23  ;;  %v1782_v40 = vsel %vm1775_vm6, %v1779_v19, %v1781_v21 }
 0x3e1   :  { %1754 = vst.msk [vmem:[#allocation2 + $0x50] sm:$0xff] %vm170_vm1, %v1746_v28  ;;  %v14356_v42 = vld [vmem:[#allocation2 + $0x38] sm:$0xff]  ;;  %v1823_v52 = vrot.slane %v14353_v0, 7  ;;  %v1759_v28 = vld [vmem:[#allocation2 + $0x20] sm:$0x3f] }
 0x3e2   :  { %1753 = vst.msk [vmem:[#allocation2 + $0x48] sm:$0xff] %vm170_vm1, %v1745_v34  ;;  %v1821_v59 = vrot.slane %v14356_v42, 7  ;;  %11853 = vmatpush3.bf16.msra.mxu1 %v13169_v18  ;;  %v1760_v34 = vld [vmem:[#allocation2 + $0x30] sm:$0xc0] }
 0x3e3   :  { %11761 = vmatpush3.bf16.msra.mxu0 %v13155_v23  ;;  %v1780_v23 = vsel %vm1775_vm6, %v1777_v46, %v1779_v19  ;;  %11854 = vmatprep.subr.bf16.mxu1 %v13170_v25  ;;  %v13162_v18 = vld [vmem:[#allocation4 + $0x110] sm:$0xff]   ;;  %v13163_v19 = vld [vmem:[#allocation4 + $0x118] sm:$0xff]  }
 0x3e4   :  { %v1822_v55 = vsel %vm403_vm4, %v1820_v41, %v1821_v59  ;;  %v1824_v61 = vsel %vm403_vm4, %v1821_v59, %v1823_v52  ;;  %11778 = vmatprep.subr.bf16.mxu0 %v13156_v36  ;;  %v13158_v41 = vld [vmem:[#allocation4 + $0xf0] sm:$0xff]   ;;  %v1785_v59 = vrot.slane %v1760_v34, 6 }
 0x3e5   :  { %11746 = vmatprep.mubr.msk.bf16.mxu0 %vm170_vm1, %v1822_v55  ;;  %v1786_v55 = vrot.slane %v14356_v42, 6 }
 0x3e6   :  { %11747 = vmatmul.mubr.msk.bf16.gmra.mrb[40].mxu0 %vm170_vm1, %v1824_v61  ;;  %11855 = vmatpush3.bf16.msra.mxu1 %v13170_v25  ;;  %v13159_v61 = vld [vmem:[#allocation4 + $0xf8] sm:$0xff]   ;;  %v2300_v25 = vld [vmem:[#allocation2 + $0x8] sm:$0xfe] }
 0x3e8   :  { %v1806_v3 = vld [vmem:[#allocation2 + $0x50] sm:$0x7f] }
 0x3e9   :  { %v14365_v5 = vld [vmem:[#allocation2 + $0x48] sm:$0xff]  ;;  %v1827_v6 = vrot.slane %v1806_v3, 7  ;;  %v1787_v3 = vsel %vm1775_vm6, %v1785_v59, %v1786_v55 }
 0x3ea   :  { %v1825_v56 = vrot.slane %v14365_v5, 7 }
 0x3ec   :  { %v1826_v49 = vsel %vm403_vm4, %v1823_v52, %v1825_v56  ;;  %v1828_v12 = vsel %vm403_vm4, %v1825_v56, %v1827_v6  ;;  %v1783_v52 = vrot.slane %v1759_v28, 6  ;;  %v1788_v6 = vrot.slane %v14353_v0, 6 }
 0x3ed   :  { %11750 = vmatprep.mubr.msk.bf16.mxu0 %vm170_vm1, %v1826_v49  ;;  %v1790_v56 = vrot.slane %v14365_v5, 6  ;;  %v1764_v49 = vld [vmem:[#allocation2 + $0x50] sm:$0x3f]  ;;  %v2323_v28 = vrot.slane %v14321_v44, 1 }
 0x3ee   :  { %11751 = vmatmul.mubr.msk.bf16.gmra.mrb[44].mxu0 %vm170_vm1, %v1828_v12  ;;  %v1784_v51 = vsel %vm1775_vm6, %v1781_v21, %v1783_v52  ;;  %v1789_v48 = vsel %vm1775_vm6, %v1786_v55, %v1788_v6  ;;  %v1792_v12 = vrot.slane %v1764_v49, 6  ;;  %v14409_v21 = vld [vmem:[#allocation2 + $0x20] sm:$0xff]  ;;  %v2304_v55 = vld [vmem:[#allocation2 + $0x28] sm:$0x1]  ;;  %v2332_v49 = vrot.slane %v14365_v5, 1 }
 0x3ef   :  { %11762 = vmatprep.mubr.msk.bf16.mxu0 %vm170_vm1, %v1778_v11  ;;  %v1791_v46 = vsel %vm1775_vm6, %v1788_v6, %v1790_v56  ;;  %v2325_v34 = vrot.slane %v14409_v21, 1  ;;  %v2330_v6 = vrot.slane %v14353_v0, 1 }
 0x3f0   :  { %v1793_v11 = vsel %vm1775_vm6, %v1790_v56, %v1792_v12  ;;  %v13167_v56 = vld [vmem:[#allocation4 + $0x138] sm:$0xff]  }
 0x3f1   :  { %v2326_v59 = vsel %vm1231_vm5, %v2323_v28, %v2325_v34 }
 0x3f6   :  { %11763 = vmatmul.mubr.msk.bf16.vlgmr.msra.gmra.mrb[32].mxu0 %vm170_vm1, %v1780_v23  ;;  %v2321_v23 = vrot.slane %v14277_v17, 1 }
 0x3f7   :  { %11779 = vmatpush3.bf16.msra.mxu0 %v13156_v36  ;;  %11766 = vmatprep.mubr.msk.bf16.mxu0 %vm170_vm1, %v1782_v40  ;;  %v13160_v36 = vld [vmem:[#allocation4 + $0x100] sm:$0xff]   ;;  %v14420_v40 = vld [vmem:[#allocation2 + $0x50] sm:$0xff] }
 0x3f8   :  { %11780 = vmatprep.subr.bf16.mxu0 %v13157_v29  ;;  %v2324_v52 = vsel %vm1231_vm5, %v2321_v23, %v2323_v28  ;;  %v2334_v12 = vrot.slane %v14420_v40, 1  ;;  %v2520_v28 = vrot.slane %v14321_v44, 2 }
 0x3fb   :  { %11781 = vmatpush3.bf16.msra.mxu0 %v13157_v29  ;;  %v2320_v29 = vrot.slane %v2300_v25, 1 }
 0x3fc   :  { %11782 = vmatprep.subr.bf16.mxu0 %v13158_v41 }
 0x3fe   :  { %11767 = vmatmul.mubr.msk.bf16.gmra.mrb[36].mxu0 %vm170_vm1, %v1784_v51  ;;  %v13166_v51 = vld [vmem:[#allocation4 + $0x130] sm:$0xff]  }
 0x3ff   :  { %11770 = vmatprep.mubr.msk.bf16.mxu0 %vm170_vm1, %v1787_v3  ;;  %11783 = vmatpush3.bf16.msra.mxu0 %v13158_v41  ;;  %v13165_v41 = vld [vmem:[#allocation4 + $0x128] sm:$0xff]   ;;  %v2327_v3 = vrot.slane %v2304_v55, 1 }
 0x400   :  { %11784 = vmatprep.subr.bf16.mxu0 %v13159_v61 }
 0x403   :  { %11785 = vmatpush3.bf16.msra.mxu0 %v13159_v61  ;;  %v2305_v61 = vld [vmem:[#allocation2 + $0x38] sm:$0xfe] }
 0x404   :  { %11802 = vmatprep.subr.bf16.mxu0 %v13160_v36 }
 0x406   :  { %11771 = vmatmul.mubr.msk.bf16.gmra.mrb[40].mxu0 %vm170_vm1, %v1789_v48  ;;  %v2328_v48 = vsel %vm1231_vm5, %v2325_v34, %v2327_v3  ;;  %v2522_v34 = vrot.slane %v14409_v21, 2 }
 0x407   :  { %11774 = vmatprep.mubr.msk.bf16.mxu0 %vm170_vm1, %v1791_v46 }
 0x40e   :  { %11775 = vmatmul.mubr.msk.bf16.gmra.mrb[44].mxu0 %vm170_vm1, %v1793_v11  ;;  %v2333_v11 = vsel %vm1231_vm5, %v2330_v6, %v2332_v49 }
 0x40f   :  { %11786 = vmatprep.mubr.msk.bf16.mxu0 %vm170_vm1, %v14282_v32  ;;  %v13164_v32 = vld [vmem:[#allocation4 + $0x120] sm:$0xff]  }
 0x416   :  { %11787 = vmatmul.mubr.msk.bf16.vlgmr.msra.gmra.mrb[32].mxu0 %vm170_vm1, %v14277_v17 }
 0x417   :  { %11803 = vmatpush3.bf16.msra.mxu0 %v13160_v36  ;;  %11790 = vmatprep.mubr.msk.bf16.mxu0 %vm170_vm1, %v14321_v44  ;;  %v2329_v36 = vrot.slane %v2305_v61, 1 }
 0x418   :  { %11804 = vmatprep.subr.bf16.mxu0 %v13161_v60 }
 0x419   :  { %v2331_v46 = vsel %vm1231_vm5, %v2329_v36, %v2330_v6  ;;  %v2531_v36 = vrot.slane %v14420_v40, 2 }
 0x41b   :  { %11805 = vmatpush3.bf16.msra.mxu0 %v13161_v60  ;;  %v2335_v60 = vsel %vm1231_vm5, %v2332_v49, %v2334_v12  ;;  %v10492_v49 = vld [vmem:[#allocation7 + $0x1] ss:$0 sm:$0xff] }
 0x41c   :  { %11806 = vmatprep.subr.bf16.mxu0 %v13162_v18 }
 0x41e   :  { %11791 = vmatmul.mubr.msk.bf16.gmra.mrb[36].mxu0 %vm170_vm1, %v14409_v21  ;;  %v2529_v21 = vrot.slane %v14365_v5, 2 }
 0x41f   :  { %11794 = vmatprep.mubr.msk.bf16.mxu0 %vm170_vm1, %v14356_v42  ;;  %11807 = vmatpush3.bf16.msra.mxu0 %v13162_v18  ;;  %v2322_v42 = vsel %vm1231_vm5, %v2320_v29, %v2321_v23  ;;  %v2309_v18 = vld [vmem:[#allocation2 + $0x58] sm:$0x1]  ;;  %v2518_v29 = vrot.slane %v14277_v17, 2  ;;  %v2509_v17 = vld [vmem:[#allocation2 + $0x28] sm:$0x3] }
 0x420   :  { %11808 = vmatprep.subr.bf16.mxu0 %v13163_v19  ;;  %v2524_v55 = vrot.slane %v2509_v17, 2 }
 0x422   :  { %v2525_v3 = vsel %vm2516_vm7, %v2522_v34, %v2524_v55 }
 0x423   :  { %11809 = vmatpush3.bf16.msra.mxu0 %v13163_v19  ;;  %v2508_v19 = vld [vmem:[#allocation2 + $0x8] sm:$0xfc] }
 0x424   :  { %11826 = vmatprep.subr.bf16.mxu0 %v13164_v32  ;;  %v2517_v25 = vrot.slane %v2508_v19, 2 }
 0x426   :  { %11795 = vmatmul.mubr.msk.bf16.gmra.mrb[40].mxu0 %vm170_vm1, %v14353_v0 }
 0x427   :  { %11798 = vmatprep.mubr.msk.bf16.mxu0 %vm170_vm1, %v14365_v5  ;;  %v13171_v5 = vld [vmem:[%s16824_s6 + $0x38] sm:$0xff]  }
 0x428   :  { %11856 = vmatprep.subr.bf16.mxu1 %v13171_v5 }
 0x429   :  { %11857 = vmatpush3.bf16.msra.mxu1 %v13171_v5 }
 0x42e   :  { %11799 = vmatmul.mubr.msk.bf16.gmra.mrb[44].mxu0 %vm170_vm1, %v14420_v40  ;;  %v13172_v40 = vld [vmem:[#allocation4 + $0x160] sm:$0xff]  }
 0x42f   :  { %11810 = vmatprep.mubr.msk.bf16.mxu0 %vm170_vm1, %v2322_v42  ;;  %v2519_v42 = vsel %vm2516_vm7, %v2517_v25, %v2518_v29  ;;  %11874 = vmatprep.subr.bf16.mxu1 %v13172_v40 }
 0x436   :  { %11811 = vmatmul.mubr.msk.bf16.vlgmr.msra.gmra.mrb[32].mxu0 %vm170_vm1, %v2324_v52  ;;  %v2523_v52 = vsel %vm2516_vm7, %v2520_v28, %v2522_v34 }
 0x437   :  { %11827 = vmatpush3.bf16.msra.mxu0 %v13164_v32  ;;  %11814 = vmatprep.mubr.msk.bf16.mxu0 %vm170_vm1, %v2326_v59  ;;  %v2336_v32 = vrot.slane %v2309_v18, 1  ;;  %v2510_v59 = vld [vmem:[#allocation2 + $0x38] sm:$0xfc] }
 0x438   :  { %11828 = vmatprep.subr.bf16.mxu0 %v13165_v41  ;;  %v2526_v61 = vrot.slane %v2510_v59, 2 }
 0x439   :  { %v2337_v23 = vsel %vm1231_vm5, %v2334_v12, %v2336_v32 }
 0x43b   :  { %11829 = vmatpush3.bf16.msra.mxu0 %v13165_v41  ;;  %v2521_v41 = vsel %vm2516_vm7, %v2518_v29, %v2520_v28 }
 0x43c   :  { %11830 = vmatprep.subr.bf16.mxu0 %v13166_v51 }
 0x43e   :  { %11815 = vmatmul.mubr.msk.bf16.gmra.mrb[36].mxu0 %vm170_vm1, %v2328_v48  ;;  %v2511_v48 = vld [vmem:[#allocation2 + $0x58] sm:$0x3] }
 0x43f   :  { %11818 = vmatprep.mubr.msk.bf16.mxu0 %vm170_vm1, %v2331_v46  ;;  %11831 = vmatpush3.bf16.msra.mxu0 %v13166_v51  ;;  %v2527_v51 = vrot.slane %v14353_v0, 2  ;;  %v2533_v0 = vrot.slane %v2511_v48, 2 }
 0x440   :  { %11832 = vmatprep.subr.bf16.mxu0 %v13167_v56 }
 0x441   :  { %v2528_v44 = vsel %vm2516_vm7, %v2526_v61, %v2527_v51  ;;  %v2530_v6 = vsel %vm2516_vm7, %v2527_v51, %v2529_v21  ;;  %v2534_v46 = vsel %vm2516_vm7, %v2531_v36, %v2533_v0  ;;  %v13173_v61 = vld [vmem:[#allocation4 + $0x168] sm:$0xff]  }
 0x443   :  { %11833 = vmatpush3.bf16.msra.mxu0 %v13167_v56  ;;  %v2532_v56 = vsel %vm2516_vm7, %v2529_v21, %v2531_v36 }
 0x446   :  { %11819 = vmatmul.mubr.msk.bf16.gmra.mrb[40].mxu0 %vm170_vm1, %v2333_v11 }
 0x447   :  { %11822 = vmatprep.mubr.msk.bf16.mxu0 %vm170_vm1, %v2335_v60 }
 0x44e   :  { %11823 = vmatmul.mubr.msk.bf16.gmra.mrb[44].mxu0 %vm170_vm1, %v2337_v23 }
 0x44f   :  { %11834 = vmatprep.mubr.msk.bf16.mxu0 %vm170_vm1, %v2519_v42 }
 0x456   :  { %11835 = vmatmul.mubr.msk.bf16.vlgmr.msra.gmra.mrb[32].mxu0 %vm170_vm1, %v2521_v41 }
 0x457   :  { %11838 = vmatprep.mubr.msk.bf16.mxu0 %vm170_vm1, %v2523_v52 }
 0x45e   :  { %11839 = vmatmul.mubr.msk.bf16.gmra.mrb[36].mxu0 %vm170_vm1, %v2525_v3 }
 0x45f   :  { %11842 = vmatprep.mubr.msk.bf16.mxu0 %vm170_vm1, %v2528_v44 }
 0x466   :  { %11843 = vmatmul.mubr.msk.bf16.gmra.mrb[40].mxu0 %vm170_vm1, %v2530_v6 }
 0x467   :  { %11846 = vmatprep.mubr.msk.bf16.mxu0 %vm170_vm1, %v2532_v56 }
 0x46e   :  { %11847 = vmatmul.mubr.msk.bf16.gmra.mrb[44].mxu0 %vm170_vm1, %v2534_v46 }
 0x529   :  { %v11836_v12 = vpop.f32.mrb[32].mxu0 }
 0x52a   :  { %v2715_v11 = vadd.f32 %v11836_v12, %v10492_v49  ;;  %v2626_v60 = vpop.f32.mrb[33].mxu0 }
 0x52b   :  { %v2713_v18 = vadd.f32 %v10492_v49, %v2626_v60  ;;  %v11837_v19 = vpop.f32.mrb[34].mxu0 }
 0x52c   :  { %v2716_v32 = vadd.f32 %v11837_v19, %v10492_v49  ;;  %v2629_v25 = vpop.f32.mrb[35].mxu0  ;;  %v2731_v23 = vmax.f32 %v2715_v11, 0.0 }
 0x52d   :  { %v2714_v29 = vadd.f32 %v10492_v49, %v2629_v25  ;;  %v2729_v28 = vmax.f32 %v2713_v18, 0.0 }
 0x52e   :  { %v2732_v42 = vmax.f32 %v2716_v32, 0.0 }
 0x52f   :  { %v2730_v34 = vmax.f32 %v2714_v29, 0.0 }
 0x530   :  { %v2746_v41 = vpack.c.bf16 %v2732_v42, %v2731_v23 }
 0x531   :  { %v2745_v52 = vpack.c.bf16 %v2730_v34, %v2729_v28  ;;  %v11840_v17 = vpop.f32.mrb[36].mxu0 }
 0x532   :  { %v2719_v59 = vadd.f32 %v11840_v17, %v10492_v49  ;;  %v2642_v55 = vpop.f32.mrb[37].mxu0 }
 0x533   :  { %v2717_v51 = vadd.f32 %v10492_v49, %v2642_v55  ;;  %v11841_v3 = vpop.f32.mrb[38].mxu0  ;;  %11858 = vmatprep.mubr.msk.bf16.mxu1 %vm170_vm1, %v2745_v52 }
 0x534   :  { %v2720_v44 = vadd.f32 %v11841_v3, %v10492_v49  ;;  %v2645_v21 = vpop.f32.mrb[39].mxu0  ;;  %11859 = vmatmul.mubr.msk.bf16.vlgmr.msra.gmra.mrb[16].mxu1 %vm170_vm1, %v2746_v41  ;;  %v2735_v6 = vmax.f32 %v2719_v59, 0.0 }
 0x535   :  { %v2718_v36 = vadd.f32 %v10492_v49, %v2645_v21  ;;  %11875 = vmatpush3.bf16.msra.mxu1 %v13172_v40  ;;  %v2733_v48 = vmax.f32 %v2717_v51, 0.0 }
 0x536   :  { %v2736_v56 = vmax.f32 %v2720_v44, 0.0  ;;  %11876 = vmatprep.subr.bf16.mxu1 %v13173_v61 }
 0x537   :  { %v2734_v0 = vmax.f32 %v2718_v36, 0.0 }
 0x538   :  { %v2748_v46 = vpack.c.bf16 %v2736_v56, %v2735_v6 }
 0x539   :  { %v2747_v5 = vpack.c.bf16 %v2734_v0, %v2733_v48  ;;  %v11844_v12 = vpop.f32.mrb[40].mxu0  ;;  %11877 = vmatpush3.bf16.msra.mxu1 %v13173_v61 }
 0x53a   :  { %v2723_v11 = vadd.f32 %v11844_v12, %v10492_v49  ;;  %v2658_v60 = vpop.f32.mrb[41].mxu0  ;;  %v14478_v12 = vld [vmem:[#allocation4 + $0x140] sm:$0xff]  }
 0x53b   :  { %v2721_v18 = vadd.f32 %v10492_v49, %v2658_v60  ;;  %v11845_v19 = vpop.f32.mrb[42].mxu0  ;;  %11862 = vmatprep.mubr.msk.bf16.mxu1 %vm170_vm1, %v2747_v5  ;;  %v13175_v5 = vld [vmem:[#allocation4 + $0x178] sm:$0xff]  }
 0x53c   :  { %v2724_v32 = vadd.f32 %v11845_v19, %v10492_v49  ;;  %v2661_v25 = vpop.f32.mrb[43].mxu0  ;;  %11863 = vmatmul.mubr.msk.bf16.gmra.mrb[20].mxu1 %vm170_vm1, %v2748_v46  ;;  %v2739_v29 = vmax.f32 %v2723_v11, 0.0  ;;  %v13174_v46 = vld [vmem:[#allocation4 + $0x170] sm:$0xff]  }
 0x53d   :  { %v2722_v40 = vadd.f32 %v10492_v49, %v2661_v25  ;;  %v2737_v42 = vmax.f32 %v2721_v18, 0.0  ;;  %11878 = vmatprep.subr.bf16.mxu1 %v13174_v46 }
 0x53e   :  { %v2740_v23 = vmax.f32 %v2724_v32, 0.0  ;;  %11879 = vmatpush3.bf16.msra.mxu1 %v13174_v46 }
 0x53f   :  { %v2738_v28 = vmax.f32 %v2722_v40, 0.0  ;;  %11880 = vmatprep.subr.bf16.mxu1 %v13175_v5 }
 0x540   :  { %v2750_v34 = vpack.c.bf16 %v2740_v23, %v2739_v29 }
 0x541   :  { %v2749_v41 = vpack.c.bf16 %v2738_v28, %v2737_v42  ;;  %v11848_v52 = vpop.f32.mrb[44].mxu0 }
 0x542   :  { %v2727_v17 = vadd.f32 %v11848_v52, %v10492_v49  ;;  %v2674_v59 = vpop.f32.mrb[45].mxu0  ;;  %11881 = vmatpush3.bf16.msra.mxu1 %v13175_v5 }
 0x543   :  { %v2725_v55 = vadd.f32 %v10492_v49, %v2674_v59  ;;  %v11849_v61 = vpop.f32.mrb[46].mxu0  ;;  %11866 = vmatprep.mubr.msk.bf16.mxu1 %vm170_vm1, %v2749_v41  ;;  %11898 = vmatprep.subr.bf16.mxu1 %v14478_v12 }
 0x544   :  { %v2728_v51 = vadd.f32 %v11849_v61, %v10492_v49  ;;  %v2677_v3 = vpop.f32.mrb[47].mxu0  ;;  %11867 = vmatmul.mubr.msk.bf16.gmra.mrb[24].mxu1 %vm170_vm1, %v2750_v34  ;;  %v2743_v21 = vmax.f32 %v2727_v17, 0.0 }
 0x545   :  { %v2726_v44 = vadd.f32 %v10492_v49, %v2677_v3  ;;  %v2741_v6 = vmax.f32 %v2725_v55, 0.0  ;;  %v14481_v49 = vld [vmem:[#allocation9 + $0x1] ss:$0 sm:$0xff] }
 0x546   :  { %v2744_v36 = vmax.f32 %v2728_v51, 0.0 }
 0x547   :  { %v2742_v56 = vmax.f32 %v2726_v44, 0.0 }
 0x548   :  { %v2752_v48 = vpack.c.bf16 %v2744_v36, %v2743_v21 }
 0x549   :  { %v2751_v0 = vpack.c.bf16 %v2742_v56, %v2741_v6 }
 0x54b   :  { %11870 = vmatprep.mubr.msk.bf16.mxu1 %vm170_vm1, %v2751_v0 }
 0x54c   :  { %11871 = vmatmul.mubr.msk.bf16.gmra.mrb[28].mxu1 %vm170_vm1, %v2752_v48 }
 0x607   :  { %v11860_v11 = vpop.f32.mrb[16].mxu1 }
 0x608   :  { %v2861_v60 = vadd.f32 %v11860_v11, %v14481_v49  ;;  %v2852_v18 = vpop.f32.mrb[17].mxu1 }
 0x609   :  { %v2853_v19 = vadd.f32 %v14481_v49, %v2852_v18  ;;  %v11861_v32 = vpop.f32.mrb[18].mxu1 }
 0x60a   :  { %v2917_v25 = vadd.f32 %v2861_v60, %v14226_v53  ;;  %v2864_v40 = vadd.f32 %v11861_v32, %v14481_v49  ;;  %v2855_v29 = vpop.f32.mrb[19].mxu1 }
 0x60b   :  { %v2915_v23 = vadd.f32 %v2853_v19, %v14232_v37  ;;  %v2856_v42 = vadd.f32 %v14481_v49, %v2855_v29 }
 0x60c   :  { %v2918_v28 = vadd.f32 %v2864_v40, %v14229_v35  ;;  %v14492_v41 = vmul.f32 %v2917_v25, %v14201_v2 }
 0x60d   :  { %v2916_v34 = vadd.f32 %v2856_v42, %v14235_v38  ;;  %v14498_v17 = vmul.f32 %v2915_v23, %v14199_v1 }
 0x60e   :  { %v14495_v52 = vmul.f32 %v2918_v28, %v14205_v14 }
 0x60f   :  { %v14501_v53 = vmul.f32 %v2916_v34, %v14203_v54  ;;  %v11864_v59 = vpop.f32.mrb[20].mxu1 }
 0x610   :  { %v2948_v37 = vpack.c.bf16 %v14495_v52, %v14492_v41  ;;  %v2877_v35 = vadd.f32 %v11864_v59, %v14481_v49  ;;  %v2868_v55 = vpop.f32.mrb[21].mxu1 }
 0x611   :  { %v2947_v38 = vpack.c.bf16 %v14501_v53, %v14498_v17  ;;  %v2869_v61 = vadd.f32 %v14481_v49, %v2868_v55  ;;  %v11865_v51 = vpop.f32.mrb[22].mxu1 }
 0x612   :  { %2956 = vst.msk [vmem:[#allocation2 + $0x10] sm:$0xff] %vm170_vm1, %v2948_v37  ;;  %v2921_v3 = vadd.f32 %v2877_v35, %v14256_v22  ;;  %v2880_v44 = vadd.f32 %v11865_v51, %v14481_v49  ;;  %v2871_v21 = vpop.f32.mrb[23].mxu1  ;;  %v3011_v22 = vld [vmem:[#allocation2] sm:$0xc0]  ;;  %v13177_v51 = vld [vmem:[#allocation4 + $0x148] sm:$0xff]  }
 0x613   :  { %2955 = vst.msk [vmem:[#allocation2 + $0x8] sm:$0xff] %vm170_vm1, %v2947_v38  ;;  %v2919_v36 = vadd.f32 %v2869_v61, %v14262_v62  ;;  %v2872_v6 = vadd.f32 %v14481_v49, %v2871_v21  ;;  %v3019_v25 = vrot.slane %v3011_v22, 6 }
 0x614   :  { %v2922_v56 = vadd.f32 %v2880_v44, %v14259_v45  ;;  %v14518_v0 = vmul.f32 %v2921_v3, %v14219_v27 }
 0x615   :  { %v2920_v48 = vadd.f32 %v2872_v6, %v14265_v7  ;;  %v14524_v5 = vmul.f32 %v2919_v36, %v14209_v15 }
 0x616   :  { %v14521_v46 = vmul.f32 %v2922_v56, %v14222_v13 }
 0x617   :  { %v14527_v11 = vmul.f32 %v2920_v48, %v14211_v16  ;;  %v11868_v62 = vpop.f32.mrb[24].mxu1 }
 0x618   :  { %v2950_v60 = vpack.c.bf16 %v14521_v46, %v14518_v0  ;;  %v2893_v45 = vadd.f32 %v11868_v62, %v14481_v49  ;;  %v2884_v7 = vpop.f32.mrb[25].mxu1 }
 0x619   :  { %v2949_v18 = vpack.c.bf16 %v14527_v11, %v14524_v5  ;;  %v2885_v19 = vadd.f32 %v14481_v49, %v2884_v7  ;;  %v11869_v32 = vpop.f32.mrb[26].mxu1  ;;  %v14535_v40 = vld [vmem:[#allocation2 + $0x10] sm:$0xff] }
 0x61a   :  { %2958 = vst.msk [vmem:[#allocation2 + $0x20] sm:$0xff] %vm170_vm1, %v2950_v60  ;;  %v2925_v29 = vadd.f32 %v2893_v45, %v14296_v39  ;;  %v2896_v23 = vadd.f32 %v11869_v32, %v14481_v49  ;;  %v2887_v42 = vpop.f32.mrb[27].mxu1  ;;  %v14540_v28 = vld [vmem:[#allocation2 + $0x8] sm:$0xff]  ;;  %v3022_v34 = vrot.slane %v14535_v40, 6  ;;  %v13178_v60 = vld [vmem:[#allocation4 + $0x150] sm:$0xff]  }
 0x61b   :  { %2957 = vst.msk [vmem:[#allocation2 + $0x18] sm:$0xff] %vm170_vm1, %v2949_v18  ;;  %v2923_v59 = vadd.f32 %v2885_v19, %v14305_v4  ;;  %v2888_v37 = vadd.f32 %v14481_v49, %v2887_v42  ;;  %v3020_v35 = vrot.slane %v14540_v28, 6 }
 0x61c   :  { %v2926_v55 = vadd.f32 %v2896_v23, %v14299_v9  ;;  %v14552_v3 = vmul.f32 %v2925_v29, %v14267_v8 }
 0x61d   :  { %v2924_v38 = vadd.f32 %v2888_v37, %v14308_v10  ;;  %v3021_v39 = vsel %vm1775_vm6, %v3019_v25, %v3020_v35  ;;  %v3023_v61 = vsel %vm1775_vm6, %v3020_v35, %v3022_v34  ;;  %v14559_v4 = vmul.f32 %v2923_v59, %v14243_v58  ;;  %v13179_v37 = vld [vmem:[#allocation4 + $0x158] sm:$0xff]  }
 0x61e   :  { %v14555_v44 = vmul.f32 %v2926_v55, %v14272_v24  ;;  %11882 = vmatprep.mubr.msk.bf16.mxu1 %vm170_vm1, %v3021_v39 }
 0x61f   :  { %v14562_v9 = vmul.f32 %v2924_v38, %v14248_v63  ;;  %v11872_v10 = vpop.f32.mrb[28].mxu1  ;;  %11883 = vmatmul.mubr.msk.bf16.vlgmr.msra.gmra.mrb[32].mxu1 %vm170_vm1, %v3023_v61  ;;  %v13180_v61 = vld [vmem:[#allocation4 + $0x180] sm:$0xff]  }
 0x620   :  { %v2952_v21 = vpack.c.bf16 %v14555_v44, %v14552_v3  ;;  %v2909_v36 = vadd.f32 %v11872_v10, %v14481_v49  ;;  %11899 = vmatpush3.bf16.msra.mxu1 %v14478_v12  ;;  %v2900_v6 = vpop.f32.mrb[29].mxu1 }
 0x621   :  { %v2951_v56 = vpack.c.bf16 %v14562_v9, %v14559_v4  ;;  %v2901_v48 = vadd.f32 %v14481_v49, %v2900_v6  ;;  %v11873_v22 = vpop.f32.mrb[30].mxu1  ;;  %11900 = vmatprep.subr.bf16.mxu1 %v13177_v51  ;;  %v3012_v62 = vld [vmem:[#allocation2 + $0x20] sm:$0x3f] }
 0x622   :  { %2960 = vst.msk [vmem:[#allocation2 + $0x40] sm:$0xff] %vm170_vm1, %v2952_v21  ;;  %v2929_v45 = vadd.f32 %v2909_v36, %v14336_v30  ;;  %v2912_v7 = vadd.f32 %v11873_v22, %v14481_v49  ;;  %v2903_v18 = vpop.f32.mrb[31].mxu1  ;;  %v14575_v19 = vld [vmem:[#allocation2 + $0x18] sm:$0xff]  ;;  %v3026_v12 = vrot.slane %v3012_v62, 6 }
 0x623   :  { %2959 = vst.msk [vmem:[#allocation2 + $0x38] sm:$0xff] %vm170_vm1, %v2951_v56  ;;  %v2927_v32 = vadd.f32 %v2901_v48, %v14343_v33  ;;  %v2904_v25 = vadd.f32 %v14481_v49, %v2903_v18  ;;  %v3024_v29 = vrot.slane %v14575_v19, 6  ;;  %v3013_v49 = vld [vmem:[#allocation2 + $0x30] sm:$0xc0]  ;;  %v2963_v56 = vld [vmem:[#allocation2] sm:$0xf0] }
 0x624   :  { %v2930_v23 = vadd.f32 %v2912_v7, %v14339_v57  ;;  %11901 = vmatpush3.bf16.msra.mxu1 %v13177_v51  ;;  %v14586_v35 = vmul.f32 %v2929_v45, %v14328_v20  ;;  %v3028_v38 = vrot.slane %v3013_v49, 6  ;;  %v2984_v45 = vrot.slane %v2963_v56, 4 }
 0x625   :  { %v2928_v42 = vadd.f32 %v2904_v25, %v14346_v47  ;;  %v3025_v30 = vsel %vm1775_vm6, %v3022_v34, %v3024_v29  ;;  %v3027_v59 = vsel %vm1775_vm6, %v3024_v29, %v3026_v12  ;;  %11902 = vmatprep.subr.bf16.mxu1 %v13178_v60  ;;  %v14593_v57 = vmul.f32 %v2927_v32, %v14293_v43  ;;  %v13192_v25 = vld [vmem:[%s16824_s6 + $0x40] sm:$0xff]   ;;  %v13193_v29 = vld [vmem:[%s16824_s6 + $0x48] sm:$0xff]  }
 0x626   :  { %v14589_v33 = vmul.f32 %v2930_v23, %v14330_v31  ;;  %11886 = vmatprep.mubr.msk.bf16.mxu1 %vm170_vm1, %v3025_v30  ;;  %v2985_v7 = vrot.slane %v14540_v28, 4  ;;  %11994 = vmatprep.subr.bf16.mxu0 %v13192_v25  ;;  %v14632_v23 = vrot.slane %v14535_v40, 4  ;;  %v13194_v30 = vld [vmem:[%s16824_s6 + $0x50] sm:$0xff]  }
 0x627   :  { %v14596_v47 = vmul.f32 %v2928_v42, %v14302_v50  ;;  %11887 = vmatmul.mubr.msk.bf16.gmra.mrb[36].mxu1 %vm170_vm1, %v3027_v59  ;;  %11995 = vmatpush3.bf16.msra.mxu0 %v13192_v25  ;;  %v14635_v42 = vrot.slane %v14575_v19, 4  ;;  %v13181_v59 = vld [vmem:[#allocation4 + $0x188] sm:$0xff]  }
 0x628   :  { %v2954_v34 = vpack.c.bf16 %v14589_v33, %v14586_v35  ;;  %11903 = vmatpush3.bf16.msra.mxu1 %v13178_v60  ;;  %v2986_v32 = vsel %vm2983_vm8, %v2984_v45, %v2985_v7  ;;  %11996 = vmatprep.subr.bf16.mxu0 %v13193_v29  ;;  %v13185_v25 = vld [vmem:[#allocation4 + $0x1a8] sm:$0xff]  }
 0x629   :  { %v2953_v55 = vpack.c.bf16 %v14596_v47, %v14593_v57  ;;  %v14603_v39 = vld [vmem:[#allocation2 + $0x40] sm:$0xff]  ;;  %11904 = vmatprep.subr.bf16.mxu1 %v13179_v37  ;;  %v14646_v49 = vsel %vm2983_vm8, %v14632_v23, %v14635_v42 }
 0x62a   :  { %2962 = vst.msk [vmem:[#allocation2 + $0x50] sm:$0xff] %vm170_vm1, %v2954_v34  ;;  %v14606_v51 = vld [vmem:[#allocation2 + $0x38] sm:$0xff]  ;;  %v3031_v10 = vrot.slane %v14603_v39, 6  ;;  %v2967_v34 = vld [vmem:[#allocation2 + $0x20] sm:$0xf] }
 0x62b   :  { %2961 = vst.msk [vmem:[#allocation2 + $0x48] sm:$0xff] %vm170_vm1, %v2953_v55  ;;  %v3029_v21 = vrot.slane %v14606_v51, 6  ;;  %11997 = vmatpush3.bf16.msra.mxu0 %v13193_v29  ;;  %v2968_v55 = vld [vmem:[#allocation2 + $0x30] sm:$0xf0] }
 0x62c   :  { %11905 = vmatpush3.bf16.msra.mxu1 %v13179_v37  ;;  %v2988_v37 = vsel %vm2983_vm8, %v2985_v7, %v14632_v23  ;;  %11998 = vmatprep.subr.bf16.mxu0 %v13194_v30  ;;  %v13186_v29 = vld [vmem:[#allocation4 + $0x1b0] sm:$0xff]  }
 0x62d   :  { %v3030_v36 = vsel %vm1775_vm6, %v3028_v38, %v3029_v21  ;;  %v3032_v6 = vsel %vm1775_vm6, %v3029_v21, %v3031_v10  ;;  %11922 = vmatprep.subr.bf16.mxu1 %v13180_v61  ;;  %v13182_v38 = vld [vmem:[#allocation4 + $0x190] sm:$0xff]   ;;  %v2993_v21 = vrot.slane %v2968_v55, 4  ;;  %v3529_v55 = vrot.slane %v14535_v40, 2 }
 0x62e   :  { %11890 = vmatprep.mubr.msk.bf16.mxu1 %vm170_vm1, %v3030_v36  ;;  %v2994_v36 = vrot.slane %v14606_v51, 4 }
 0x62f   :  { %11891 = vmatmul.mubr.msk.bf16.gmra.mrb[40].mxu1 %vm170_vm1, %v3032_v6  ;;  %11999 = vmatpush3.bf16.msra.mxu0 %v13194_v30  ;;  %v13183_v6 = vld [vmem:[#allocation4 + $0x198] sm:$0xff]  }
 0x630   :  { %v13187_v30 = vld [vmem:[#allocation4 + $0x1b8] sm:$0xff]  }
 0x631   :  { %v3014_v48 = vld [vmem:[#allocation2 + $0x50] sm:$0x3f] }
 0x632   :  { %v14615_v22 = vld [vmem:[#allocation2 + $0x48] sm:$0xff]  ;;  %v3035_v62 = vrot.slane %v3014_v48, 6  ;;  %v13184_v48 = vld [vmem:[#allocation4 + $0x1a0] sm:$0xff]  }
 0x633   :  { %v3033_v60 = vrot.slane %v14615_v22, 6 }
 0x635   :  { %v3034_v18 = vsel %vm1775_vm6, %v3031_v10, %v3033_v60  ;;  %v3036_v12 = vsel %vm1775_vm6, %v3033_v60, %v3035_v62  ;;  %v2991_v10 = vrot.slane %v2967_v34, 4  ;;  %v14657_v62 = vrot.slane %v14603_v39, 4 }
 0x636   :  { %11894 = vmatprep.mubr.msk.bf16.mxu1 %vm170_vm1, %v3034_v18  ;;  %v14660_v60 = vrot.slane %v14615_v22, 4  ;;  %v2972_v18 = vld [vmem:[#allocation2 + $0x50] sm:$0xf] }
 0x637   :  { %11895 = vmatmul.mubr.msk.bf16.gmra.mrb[44].mxu1 %vm170_vm1, %v3036_v12  ;;  %v2992_v56 = vsel %vm2983_vm8, %v14635_v42, %v2991_v10  ;;  %v2997_v45 = vsel %vm2983_vm8, %v2994_v36, %v14657_v62  ;;  %v3000_v12 = vrot.slane %v2972_v18, 4  ;;  %v3531_v10 = vrot.slane %v14575_v19, 2 }
 0x638   :  { %11906 = vmatprep.mubr.msk.bf16.mxu1 %vm170_vm1, %v2986_v32  ;;  %v14668_v7 = vsel %vm2983_vm8, %v14657_v62, %v14660_v60 }
 0x639   :  { %v3001_v32 = vsel %vm2983_vm8, %v14660_v60, %v3000_v12  ;;  %v13191_v12 = vld [vmem:[#allocation4 + $0x1d8] sm:$0xff]  }
 0x63f   :  { %11907 = vmatmul.mubr.msk.bf16.vlgmr.msra.gmra.mrb[32].mxu1 %vm170_vm1, %v2988_v37  ;;  %v3508_v37 = vld [vmem:[#allocation2 + $0x8] sm:$0xfc] }
 0x640   :  { %11923 = vmatpush3.bf16.msra.mxu1 %v13180_v61  ;;  %11910 = vmatprep.mubr.msk.bf16.mxu1 %vm170_vm1, %v14646_v49  ;;  %v2995_v61 = vsel %vm2983_vm8, %v2993_v21, %v2994_v36  ;;  %v3528_v34 = vrot.slane %v3508_v37, 2  ;;  %v13189_v36 = vld [vmem:[#allocation4 + $0x1c8] sm:$0xff]   ;;  %v3517_v37 = vld [vmem:[#allocation2 + $0x58] sm:$0x3] }
 0x641   :  { %11924 = vmatprep.subr.bf16.mxu1 %v13181_v59 }
 0x644   :  { %11925 = vmatpush3.bf16.msra.mxu1 %v13181_v59  ;;  %v14681_v59 = vld [vmem:[#allocation2 + $0x20] sm:$0xff] }
 0x645   :  { %11926 = vmatprep.subr.bf16.mxu1 %v13182_v38  ;;  %v3533_v21 = vrot.slane %v14681_v59, 2 }
 0x647   :  { %11911 = vmatmul.mubr.msk.bf16.gmra.mrb[36].mxu1 %vm170_vm1, %v2992_v56  ;;  %v3512_v56 = vld [vmem:[#allocation2 + $0x28] sm:$0x3] }
 0x648   :  { %11914 = vmatprep.mubr.msk.bf16.mxu1 %vm170_vm1, %v2995_v61  ;;  %11927 = vmatpush3.bf16.msra.mxu1 %v13182_v38  ;;  %v14692_v38 = vld [vmem:[#allocation2 + $0x50] sm:$0xff]  ;;  %v3513_v61 = vld [vmem:[#allocation2 + $0x38] sm:$0xfc] }
 0x649   :  { %11928 = vmatprep.subr.bf16.mxu1 %v13183_v6  ;;  %v3537_v18 = vrot.slane %v3513_v61, 2 }
 0x64c   :  { %11929 = vmatpush3.bf16.msra.mxu1 %v13183_v6  ;;  %v3532_v6 = vsel %vm2516_vm7, %v3529_v55, %v3531_v10 }
 0x64d   :  { %11946 = vmatprep.subr.bf16.mxu1 %v13184_v48 }
 0x64f   :  { %11915 = vmatmul.mubr.msk.bf16.gmra.mrb[40].mxu1 %vm170_vm1, %v2997_v45  ;;  %v3535_v45 = vrot.slane %v3512_v56, 2 }
 0x650   :  { %11918 = vmatprep.mubr.msk.bf16.mxu1 %vm170_vm1, %v14668_v7 }
 0x657   :  { %11919 = vmatmul.mubr.msk.bf16.gmra.mrb[44].mxu1 %vm170_vm1, %v3001_v32  ;;  %v3536_v32 = vsel %vm2516_vm7, %v3533_v21, %v3535_v45 }
 0x658   :  { %11930 = vmatprep.mubr.msk.bf16.mxu1 %vm170_vm1, %v14540_v28  ;;  %v13188_v28 = vld [vmem:[#allocation4 + $0x1c0] sm:$0xff]  }
 0x65f   :  { %11931 = vmatmul.mubr.msk.bf16.vlgmr.msra.gmra.mrb[32].mxu1 %vm170_vm1, %v14535_v40  ;;  %v3534_v40 = vsel %vm2516_vm7, %v3531_v10, %v3533_v21  ;;  %v3729_v21 = vrot.slane %v14681_v59, 4 }
 0x660   :  { %11947 = vmatpush3.bf16.msra.mxu1 %v13184_v48  ;;  %11934 = vmatprep.mubr.msk.bf16.mxu1 %vm170_vm1, %v14575_v19  ;;  %v13190_v48 = vld [vmem:[#allocation4 + $0x1d0] sm:$0xff]   ;;  %v3538_v19 = vrot.slane %v14603_v39, 2 }
 0x661   :  { %11948 = vmatprep.subr.bf16.mxu1 %v13185_v25 }
 0x664   :  { %11949 = vmatpush3.bf16.msra.mxu1 %v13185_v25  ;;  %v3539_v25 = vsel %vm2516_vm7, %v3537_v18, %v3538_v19 }
 0x665   :  { %11950 = vmatprep.subr.bf16.mxu1 %v13186_v29 }
 0x667   :  { %11935 = vmatmul.mubr.msk.bf16.gmra.mrb[36].mxu1 %vm170_vm1, %v14681_v59  ;;  %v3719_v59 = vld [vmem:[#allocation2 + $0x58] sm:$0xf] }
 0x668   :  { %11938 = vmatprep.mubr.msk.bf16.mxu1 %vm170_vm1, %v14606_v51  ;;  %11951 = vmatpush3.bf16.msra.mxu1 %v13186_v29  ;;  %v3530_v51 = vsel %vm2516_vm7, %v3528_v34, %v3529_v55  ;;  %v3540_v29 = vrot.slane %v14615_v22, 2  ;;  %v3716_v34 = vld [vmem:[#allocation2 + $0x8] sm:$0xf0]  ;;  %v3544_v55 = vrot.slane %v3517_v37, 2  ;;  %v3740_v45 = vrot.slane %v3719_v59, 4  ;;  %v13198_v59 = vld [vmem:[%s16826_s8 + $0x10] sm:$0xff]  }
 0x669   :  { %11952 = vmatprep.subr.bf16.mxu1 %v13187_v30 }
 0x66c   :  { %11953 = vmatpush3.bf16.msra.mxu1 %v13187_v30  ;;  %v3542_v30 = vrot.slane %v14692_v38, 2 }
 0x66d   :  { %11970 = vmatprep.subr.bf16.mxu1 %v13188_v28 }
 0x66e   :  { %v3545_v10 = vsel %vm2516_vm7, %v3542_v30, %v3544_v55 }
 0x66f   :  { %11939 = vmatmul.mubr.msk.bf16.gmra.mrb[40].mxu1 %vm170_vm1, %v14603_v39  ;;  %v3541_v39 = vsel %vm2516_vm7, %v3538_v19, %v3540_v29 }
 0x670   :  { %11942 = vmatprep.mubr.msk.bf16.mxu1 %vm170_vm1, %v14615_v22 }
 0x677   :  { %11943 = vmatmul.mubr.msk.bf16.gmra.mrb[44].mxu1 %vm170_vm1, %v14692_v38 }
 0x678   :  { %11954 = vmatprep.mubr.msk.bf16.mxu1 %vm170_vm1, %v3530_v51  ;;  %v3724_v51 = vrot.slane %v3716_v34, 4 }
 0x67a   :  { %v3726_v22 = vsel %vm2983_vm8, %v3724_v51, %v14632_v23 }
 0x67f   :  { %11955 = vmatmul.mubr.msk.bf16.vlgmr.msra.gmra.mrb[32].mxu1 %vm170_vm1, %v3532_v6  ;;  %v3717_v6 = vld [vmem:[#allocation2 + $0x28] sm:$0xf] }
 0x680   :  { %11971 = vmatpush3.bf16.msra.mxu1 %v13188_v28  ;;  %11958 = vmatprep.mubr.msk.bf16.mxu1 %vm170_vm1, %v3534_v40  ;;  %v3543_v28 = vsel %vm2516_vm7, %v3540_v29, %v3542_v30  ;;  %v3718_v40 = vld [vmem:[#allocation2 + $0x38] sm:$0xf0]  ;;  %v3731_v56 = vrot.slane %v3717_v6, 4  ;;  %v13197_v6 = vld [vmem:[%s16826_s8 + $0x8] sm:$0xff]  }
 0x681   :  { %11972 = vmatprep.subr.bf16.mxu1 %v13189_v36  ;;  %v3733_v61 = vrot.slane %v3718_v40, 4 }
 0x683   :  { %v3735_v23 = vsel %vm2983_vm8, %v3733_v61, %v14657_v62  ;;  %v13195_v62 = vld [vmem:[%s16824_s6 + $0x58] sm:$0xff]  }
 0x684   :  { %11973 = vmatpush3.bf16.msra.mxu1 %v13189_v36  ;;  %v3730_v36 = vsel %vm2983_vm8, %v14635_v42, %v3729_v21  ;;  %12000 = vmatprep.subr.bf16.mxu0 %v13195_v62 }
 0x685   :  { %11974 = vmatprep.subr.bf16.mxu1 %v13190_v48  ;;  %12001 = vmatpush3.bf16.msra.mxu0 %v13195_v62 }
 0x687   :  { %11959 = vmatmul.mubr.msk.bf16.gmra.mrb[36].mxu1 %vm170_vm1, %v3536_v32 }
 0x688   :  { %11962 = vmatprep.mubr.msk.bf16.mxu1 %vm170_vm1, %v3539_v25  ;;  %11975 = vmatpush3.bf16.msra.mxu1 %v13190_v48  ;;  %v3732_v48 = vsel %vm2983_vm8, %v3729_v21, %v3731_v56 }
 0x689   :  { %11976 = vmatprep.subr.bf16.mxu1 %v13191_v12 }
 0x68c   :  { %11977 = vmatpush3.bf16.msra.mxu1 %v13191_v12 }
 0x68f   :  { %11963 = vmatmul.mubr.msk.bf16.gmra.mrb[40].mxu1 %vm170_vm1, %v3541_v39 }
 0x690   :  { %11966 = vmatprep.mubr.msk.bf16.mxu1 %vm170_vm1, %v3543_v28 }
 0x697   :  { %11967 = vmatmul.mubr.msk.bf16.gmra.mrb[44].mxu1 %vm170_vm1, %v3545_v10 }
 0x698   :  { %11978 = vmatprep.mubr.msk.bf16.mxu1 %vm170_vm1, %v3726_v22 }
 0x69f   :  { %11979 = vmatmul.mubr.msk.bf16.vlgmr.msra.gmra.mrb[32].mxu1 %vm170_vm1, %v14646_v49  ;;  %v3738_v49 = vrot.slane %v14692_v38, 4 }
 0x6a0   :  { %11982 = vmatprep.mubr.msk.bf16.mxu1 %vm170_vm1, %v3730_v36 }
 0x6a1   :  { %v3739_v42 = vsel %vm2983_vm8, %v14660_v60, %v3738_v49  ;;  %v3741_v18 = vsel %vm2983_vm8, %v3738_v49, %v3740_v45  ;;  %v14745_v60 = vld [vmem:[#allocation7 + $0x2] ss:$0 sm:$0xff] }
 0x6a7   :  { %11983 = vmatmul.mubr.msk.bf16.gmra.mrb[36].mxu1 %vm170_vm1, %v3732_v48 }
 0x6a8   :  { %11986 = vmatprep.mubr.msk.bf16.mxu1 %vm170_vm1, %v3735_v23 }
 0x6af   :  { %11987 = vmatmul.mubr.msk.bf16.gmra.mrb[40].mxu1 %vm170_vm1, %v14668_v7  ;;  %v13196_v7 = vld [vmem:[%s16826_s8] sm:$0xff]  }
 0x6b0   :  { %11990 = vmatprep.mubr.msk.bf16.mxu1 %vm170_vm1, %v3739_v42  ;;  %12018 = vmatprep.subr.bf16.mxu0 %v13196_v7 }
 0x6b7   :  { %11991 = vmatmul.mubr.msk.bf16.gmra.mrb[44].mxu1 %vm170_vm1, %v3741_v18 }
 0x772   :  { %v11980_v38 = vpop.f32.mrb[32].mxu1 }
 0x773   :  { %v3922_v19 = vadd.f32 %v11980_v38, %v14745_v60  ;;  %v3833_v12 = vpop.f32.mrb[33].mxu1 }
 0x774   :  { %v3920_v32 = vadd.f32 %v14745_v60, %v3833_v12  ;;  %v11981_v25 = vpop.f32.mrb[34].mxu1 }
 0x775   :  { %v3923_v29 = vadd.f32 %v11981_v25, %v14745_v60  ;;  %v3836_v30 = vpop.f32.mrb[35].mxu1  ;;  %v3938_v28 = vmax.f32 %v3922_v19, 0.0 }
 0x776   :  { %v3921_v39 = vadd.f32 %v14745_v60, %v3836_v30  ;;  %v3936_v34 = vmax.f32 %v3920_v32, 0.0 }
 0x777   :  { %v3939_v37 = vmax.f32 %v3923_v29, 0.0 }
 0x778   :  { %v3937_v55 = vmax.f32 %v3921_v39, 0.0 }
 0x779   :  { %v3953_v51 = vpack.c.bf16 %v3939_v37, %v3938_v28 }
 0x77a   :  { %v3952_v10 = vpack.c.bf16 %v3937_v55, %v3936_v34  ;;  %v11984_v22 = vpop.f32.mrb[36].mxu1 }
 0x77b   :  { %v3926_v21 = vadd.f32 %v11984_v22, %v14745_v60  ;;  %v3849_v36 = vpop.f32.mrb[37].mxu1 }
 0x77c   :  { %v3924_v40 = vadd.f32 %v14745_v60, %v3849_v36  ;;  %v11985_v56 = vpop.f32.mrb[38].mxu1  ;;  %12002 = vmatprep.mubr.msk.bf16.mxu0 %vm170_vm1, %v3952_v10 }
 0x77d   :  { %v3927_v61 = vadd.f32 %v11985_v56, %v14745_v60  ;;  %v3852_v48 = vpop.f32.mrb[39].mxu1  ;;  %12003 = vmatmul.mubr.msk.bf16.vlgmr.msra.gmra.mrb[48].mxu0 %vm170_vm1, %v3953_v51  ;;  %v3942_v49 = vmax.f32 %v3926_v21, 0.0 }
 0x77e   :  { %v3925_v23 = vadd.f32 %v14745_v60, %v3852_v48  ;;  %12019 = vmatpush3.bf16.msra.mxu0 %v13196_v7  ;;  %v3940_v45 = vmax.f32 %v3924_v40, 0.0 }
 0x77f   :  { %v3943_v42 = vmax.f32 %v3927_v61, 0.0  ;;  %12020 = vmatprep.subr.bf16.mxu0 %v13197_v6 }
 0x780   :  { %v3941_v18 = vmax.f32 %v3925_v23, 0.0 }
 0x781   :  { %v3955_v62 = vpack.c.bf16 %v3943_v42, %v3942_v49 }
 0x782   :  { %v3954_v38 = vpack.c.bf16 %v3941_v18, %v3940_v45  ;;  %v11988_v19 = vpop.f32.mrb[40].mxu1  ;;  %12021 = vmatpush3.bf16.msra.mxu0 %v13197_v6 }
 0x783   :  { %v3930_v12 = vadd.f32 %v11988_v19, %v14745_v60  ;;  %v3865_v32 = vpop.f32.mrb[41].mxu1  ;;  %12022 = vmatprep.subr.bf16.mxu0 %v13198_v59 }
 0x784   :  { %v3928_v25 = vadd.f32 %v14745_v60, %v3865_v32  ;;  %v11989_v7 = vpop.f32.mrb[42].mxu1  ;;  %12006 = vmatprep.mubr.msk.bf16.mxu0 %vm170_vm1, %v3954_v38  ;;  %v14780_v38 = vld [vmem:[#allocation9 + $0x2] ss:$0 sm:$0xff] }
 0x785   :  { %v3931_v29 = vadd.f32 %v11989_v7, %v14745_v60  ;;  %v3868_v30 = vpop.f32.mrb[43].mxu1  ;;  %12007 = vmatmul.mubr.msk.bf16.gmra.mrb[52].mxu0 %vm170_vm1, %v3955_v62  ;;  %v3946_v28 = vmax.f32 %v3930_v12, 0.0  ;;  %v13199_v62 = vld [vmem:[%s16826_s8 + $0x18] sm:$0xff]  }
 0x786   :  { %v3929_v39 = vadd.f32 %v14745_v60, %v3868_v30  ;;  %12023 = vmatpush3.bf16.msra.mxu0 %v13198_v59  ;;  %v3944_v34 = vmax.f32 %v3928_v25, 0.0 }
 0x787   :  { %v3947_v37 = vmax.f32 %v3931_v29, 0.0  ;;  %12024 = vmatprep.subr.bf16.mxu0 %v13199_v62 }
 0x788   :  { %v3945_v55 = vmax.f32 %v3929_v39, 0.0 }
 0x789   :  { %v3957_v51 = vpack.c.bf16 %v3947_v37, %v3946_v28 }
 0x78a   :  { %v3956_v10 = vpack.c.bf16 %v3945_v55, %v3944_v34  ;;  %v11992_v22 = vpop.f32.mrb[44].mxu1  ;;  %12025 = vmatpush3.bf16.msra.mxu0 %v13199_v62 }
 0x78b   :  { %v3934_v21 = vadd.f32 %v11992_v22, %v14745_v60  ;;  %v3881_v36 = vpop.f32.mrb[45].mxu1 }
 0x78c   :  { %v3932_v6 = vadd.f32 %v14745_v60, %v3881_v36  ;;  %v11993_v40 = vpop.f32.mrb[46].mxu1  ;;  %12010 = vmatprep.mubr.msk.bf16.mxu0 %vm170_vm1, %v3956_v10 }
 0x78d   :  { %v3935_v56 = vadd.f32 %v11993_v40, %v14745_v60  ;;  %v3884_v61 = vpop.f32.mrb[47].mxu1  ;;  %12011 = vmatmul.mubr.msk.bf16.gmra.mrb[56].mxu0 %vm170_vm1, %v3957_v51  ;;  %v3950_v23 = vmax.f32 %v3934_v21, 0.0 }
 0x78e   :  { %v3933_v48 = vadd.f32 %v14745_v60, %v3884_v61  ;;  %v3948_v42 = vmax.f32 %v3932_v6, 0.0 }
 0x78f   :  { %v3951_v49 = vmax.f32 %v3935_v56, 0.0 }
 0x790   :  { %v3949_v59 = vmax.f32 %v3933_v48, 0.0 }
 0x791   :  { %v3959_v45 = vpack.c.bf16 %v3951_v49, %v3950_v23 }
 0x792   :  { %v3958_v18 = vpack.c.bf16 %v3949_v59, %v3948_v42 }
 0x794   :  { %12014 = vmatprep.mubr.msk.bf16.mxu0 %vm170_vm1, %v3958_v18 }
 0x795   :  { %12015 = vmatmul.mubr.msk.bf16.gmra.mrb[60].mxu0 %vm170_vm1, %v3959_v45 }
 0x850   :  { %v12004_v19 = vpop.f32.mrb[48].mxu0 }
 0x851   :  { %v4068_v60 = vadd.f32 %v12004_v19, %v14780_v38  ;;  %v4059_v12 = vpop.f32.mrb[49].mxu0 }
 0x852   :  { %v4060_v32 = vadd.f32 %v14780_v38, %v4059_v12  ;;  %v12005_v25 = vpop.f32.mrb[50].mxu0 }
 0x853   :  { %v4124_v7 = vadd.f32 %v4068_v60, %v14492_v41  ;;  %v4071_v29 = vadd.f32 %v12005_v25, %v14780_v38  ;;  %v4062_v30 = vpop.f32.mrb[51].mxu0 }
 0x854   :  { %v4122_v39 = vadd.f32 %v4060_v32, %v14498_v17  ;;  %v4063_v28 = vadd.f32 %v14780_v38, %v4062_v30 }
 0x855   :  { %v4125_v37 = vadd.f32 %v4071_v29, %v14495_v52  ;;  %v4140_v55 = vmul.f32 %v4124_v7, %v14201_v2 }
 0x856   :  { %v4123_v34 = vadd.f32 %v4063_v28, %v14501_v53  ;;  %v4138_v10 = vmul.f32 %v4122_v39, %v14199_v1 }
 0x857   :  { %v4141_v51 = vmul.f32 %v4125_v37, %v14205_v14 }
 0x858   :  { %v4139_v22 = vmul.f32 %v4123_v34, %v14203_v54  ;;  %v12008_v41 = vpop.f32.mrb[52].mxu0 }
 0x859   :  { %v4155_v21 = vpack.c.bf16 %v4141_v51, %v4140_v55  ;;  %v4084_v36 = vadd.f32 %v12008_v41, %v14780_v38  ;;  %v4075_v6 = vpop.f32.mrb[53].mxu0 }
 0x85a   :  { %v4154_v17 = vpack.c.bf16 %v4139_v22, %v4138_v10  ;;  %v4076_v40 = vadd.f32 %v14780_v38, %v4075_v6  ;;  %v12009_v56 = vpop.f32.mrb[54].mxu0 }
 0x85b   :  { %v4128_v52 = vadd.f32 %v4084_v36, %v14518_v0  ;;  %v4087_v53 = vadd.f32 %v12009_v56, %v14780_v38  ;;  %v4078_v61 = vpop.f32.mrb[55].mxu0 }
 0x85c   :  { %v4126_v48 = vadd.f32 %v4076_v40, %v14524_v5  ;;  %v4079_v23 = vadd.f32 %v14780_v38, %v4078_v61  ;;  %12026 = vmatprep.mubr.msk.bf16.mxu0 %vm170_vm1, %v4154_v17 }
 0x85d   :  { %v4129_v49 = vadd.f32 %v4087_v53, %v14521_v46  ;;  %12027 = vmatmul.mubr.msk.bf16.vlgmr.msra.gmra.mrb[64].mxu0 %vm170_vm1, %v4155_v21  ;;  %v4144_v59 = vmul.f32 %v4128_v52, %v14219_v27 }
 0x85e   :  { %v4127_v42 = vadd.f32 %v4079_v23, %v14527_v11  ;;  %v4142_v0 = vmul.f32 %v4126_v48, %v14209_v15 }
 0x85f   :  { %v4145_v45 = vmul.f32 %v4129_v49, %v14222_v13 }
 0x860   :  { %v4143_v18 = vmul.f32 %v4127_v42, %v14211_v16  ;;  %v12012_v62 = vpop.f32.mrb[56].mxu0 }
 0x861   :  { %v4157_v5 = vpack.c.bf16 %v4145_v45, %v4144_v59  ;;  %v4100_v19 = vadd.f32 %v12012_v62, %v14780_v38  ;;  %v4091_v60 = vpop.f32.mrb[57].mxu0 }
 0x862   :  { %v4156_v12 = vpack.c.bf16 %v4143_v18, %v4142_v0  ;;  %v4092_v46 = vadd.f32 %v14780_v38, %v4091_v60  ;;  %v12013_v32 = vpop.f32.mrb[58].mxu0 }
 0x863   :  { %v4132_v25 = vadd.f32 %v4100_v19, %v14552_v3  ;;  %v4103_v11 = vadd.f32 %v12013_v32, %v14780_v38  ;;  %v4094_v7 = vpop.f32.mrb[59].mxu0 }
 0x864   :  { %v4130_v29 = vadd.f32 %v4092_v46, %v14559_v4  ;;  %v4095_v30 = vadd.f32 %v14780_v38, %v4094_v7  ;;  %12030 = vmatprep.mubr.msk.bf16.mxu0 %vm170_vm1, %v4156_v12 }
 0x865   :  { %v4133_v39 = vadd.f32 %v4103_v11, %v14555_v44  ;;  %12031 = vmatmul.mubr.msk.bf16.gmra.mrb[68].mxu0 %vm170_vm1, %v4157_v5  ;;  %v4148_v37 = vmul.f32 %v4132_v25, %v14267_v8 }
 0x866   :  { %v4131_v28 = vadd.f32 %v4095_v30, %v14562_v9  ;;  %v4146_v3 = vmul.f32 %v4130_v29, %v14243_v58 }
 0x867   :  { %v4149_v34 = vmul.f32 %v4133_v39, %v14272_v24 }
 0x868   :  { %v4147_v55 = vmul.f32 %v4131_v28, %v14248_v63  ;;  %v12016_v51 = vpop.f32.mrb[60].mxu0 }
 0x869   :  { %v4159_v4 = vpack.c.bf16 %v4149_v34, %v4148_v37  ;;  %v4116_v10 = vadd.f32 %v12016_v51, %v14780_v38  ;;  %v4107_v22 = vpop.f32.mrb[61].mxu0 }
 0x86a   :  { %v4158_v41 = vpack.c.bf16 %v4147_v55, %v4146_v3  ;;  %v4108_v44 = vadd.f32 %v14780_v38, %v4107_v22  ;;  %v12017_v21 = vpop.f32.mrb[62].mxu0 }
 0x86b   :  { %v4136_v36 = vadd.f32 %v4116_v10, %v14586_v35  ;;  %v4119_v9 = vadd.f32 %v12017_v21, %v14780_v38  ;;  %v4110_v6 = vpop.f32.mrb[63].mxu0 }
 0x86c   :  { %v4134_v17 = vadd.f32 %v4108_v44, %v14593_v57  ;;  %v4111_v40 = vadd.f32 %v14780_v38, %v4110_v6  ;;  %12034 = vmatprep.mubr.msk.bf16.mxu0 %vm170_vm1, %v4158_v41 }
 0x86d   :  { %v4137_v56 = vadd.f32 %v4119_v9, %v14589_v33  ;;  %12035 = vmatmul.mubr.msk.bf16.gmra.mrb[72].mxu0 %vm170_vm1, %v4159_v4  ;;  %v4152_v53 = vmul.f32 %v4136_v36, %v14328_v20  ;;  %v14841_v33 = vld [vmem:[%s16827_s9] ss:$0 sm:$0xff] }
 0x86e   :  { %v4135_v52 = vadd.f32 %v4111_v40, %v14596_v47  ;;  %v4150_v35 = vmul.f32 %v4134_v17, %v14293_v43 }
 0x86f   :  { %v4153_v61 = vmul.f32 %v4137_v56, %v14330_v31 }
 0x870   :  { %v4151_v48 = vmul.f32 %v4135_v52, %v14302_v50 }
 0x871   :  { %v4161_v23 = vpack.c.bf16 %v4153_v61, %v4152_v53 }
 0x872   :  { %v4160_v57 = vpack.c.bf16 %v4151_v48, %v4150_v35 }
 0x874   :  { %12038 = vmatprep.mubr.msk.bf16.mxu0 %vm170_vm1, %v4160_v57 }
 0x875   :  { %12039 = vmatmul.mubr.msk.bf16.gmra.mrb[76].mxu0 %vm170_vm1, %v4161_v23 }
 0x930   :  { %v12028_v47 = vpop.f32.mrb[64].mxu0 }
 0x931   :  { %v4250_v38 = vpop.f32.mrb[65].mxu0  ;;  %v4259_v49 = vadd.f32 %v12028_v47, %v14841_v33 }
 0x932   :  { %v4251_v42 = vadd.f32 %v14841_v33, %v4250_v38  ;;  %v12029_v59 = vpop.f32.mrb[66].mxu0 }
 0x933   :  { %v4253_v45 = vpop.f32.mrb[67].mxu0  ;;  %v14850_v62 = vmul.f32 %v4259_v49, %v14201_v2  ;;  %v4262_v5 = vadd.f32 %v12029_v59, %v14841_v33 }
 0x934   :  { %v14846_v0 = vmul.f32 %v4251_v42, %v14199_v1  ;;  %v4254_v18 = vadd.f32 %v14841_v33, %v4253_v45 }
 0x935   :  { %16871 = vst [vmem:[#allocation27_spill] sm:$0xff] %v14850_v62  ;;  %v14861_v25 = vmul.f32 %v4262_v5, %v14205_v14  ;;  %v4336_v30 = vsel %vm4329_vm9, %v14850_v62, -inf }
 0x936   :  { %v14854_v19 = vmul.f32 %v4254_v18, %v14203_v54  ;;  %v4330_v60 = vsel %vm4329_vm9, %v14846_v0, -inf }
 0x937   :  { %4331 = vmax.xlane.f32.xlu0 %v4330_v60  ;;  %16873 = vst [vmem:[#allocation29_spill] sm:$0xff] %v14861_v25  ;;  %v4339_v4 = vsel %vm4329_vm9, %v14861_v25, -inf }
 0x938   :  { %16872 = vst [vmem:[#allocation28_spill] sm:$0xff] %v14854_v19  ;;  %v12032_v12 = vpop.f32.mrb[68].mxu0  ;;  %v4333_v46 = vsel %vm4329_vm9, %v14854_v19, -inf }
 0x939   :  { %v4266_v32 = vpop.f32.mrb[69].mxu0  ;;  %4334 = vmax.xlane.f32.xlu1 %v4333_v46  ;;  %v4275_v11 = vadd.f32 %v12032_v12, %v14841_v33 }
 0x93a   :  { %v4267_v7 = vadd.f32 %v14841_v33, %v4266_v32  ;;  %v12033_v29 = vpop.f32.mrb[70].mxu0 }
 0x93b   :  { %v4269_v39 = vpop.f32.mrb[71].mxu0  ;;  %4337 = vmax.xlane.f32.xlu0 %v4336_v30  ;;  %v4278_v34 = vadd.f32 %v12033_v29, %v14841_v33  ;;  %v14873_v3 = vmul.f32 %v4275_v11, %v14219_v27 }
 0x93c   :  { %v14868_v28 = vmul.f32 %v4267_v7, %v14209_v15  ;;  %v4270_v37 = vadd.f32 %v14841_v33, %v4269_v39 }
 0x93d   :  { %16875 = vst [vmem:[#allocation31_spill] sm:$0xff] %v14873_v3  ;;  %v14883_v22 = vmul.f32 %v4278_v34, %v14222_v13  ;;  %v4348_v9 = vsel %vm4329_vm9, %v14873_v3, -inf }
 0x93e   :  { %16874 = vst [vmem:[#allocation30_spill] sm:$0xff] %v14868_v28  ;;  %v14876_v55 = vmul.f32 %v4270_v37, %v14211_v16  ;;  %v4342_v51 = vsel %vm4329_vm9, %v14868_v28, -inf  ;;  %v4522_v37 = vld [vmem:[#allocation10] sm:$0xf] }
 0x93f   :  { %4343 = vmax.xlane.f32.xlu1 %v4342_v51  ;;  %4340 = vmax.xlane.f32.xlu0 %v4339_v4  ;;  %16877 = vst [vmem:[#allocation33_spill] sm:$0xff] %v14883_v22  ;;  %v4351_v48 = vsel %vm4329_vm9, %v14883_v22, -inf  ;;  %v4569_v34 = vsel %vm2983_vm8, %v4522_v37, 0 }
 0x940   :  { %16876 = vst [vmem:[#allocation32_spill] sm:$0xff] %v14876_v55  ;;  %v12036_v10 = vpop.f32.mrb[72].mxu0  ;;  %v4345_v6 = vsel %vm4329_vm9, %v14876_v55, -inf  ;;  %12982 = vmatprep.subr.msk.bf16.mxu0 %vm2983_vm8, %v4522_v37 }
 0x941   :  { %v4282_v41 = vpop.f32.mrb[73].mxu0  ;;  %v4291_v44 = vadd.f32 %v12036_v10, %v14841_v33  ;;  %12043 = vmatpush3.bf16.msra.mxu0 %v4569_v34 }
 0x942   :  { %v4283_v21 = vadd.f32 %v14841_v33, %v4282_v41  ;;  %v12037_v36 = vpop.f32.mrb[74].mxu0 }
 0x943   :  { %v4285_v17 = vpop.f32.mrb[75].mxu0  ;;  %4349 = vmax.xlane.f32.xlu1 %v4348_v9  ;;  %4346 = vmax.xlane.f32.xlu0 %v4345_v6  ;;  %v4294_v52 = vadd.f32 %v12037_v36, %v14841_v33  ;;  %v14897_v53 = vmul.f32 %v4291_v44, %v14267_v8 }
 0x944   :  { %v14892_v40 = vmul.f32 %v4283_v21, %v14243_v58  ;;  %v4286_v56 = vadd.f32 %v14841_v33, %v4285_v17 }
 0x945   :  { %16879 = vst [vmem:[#allocation35_spill] sm:$0xff] %v14897_v53  ;;  %v14907_v57 = vmul.f32 %v4294_v52, %v14272_v24  ;;  %v4360_v59 = vsel %vm4329_vm9, %v14897_v53, -inf }
 0x946   :  { %16878 = vst [vmem:[#allocation34_spill] sm:$0xff] %v14892_v40  ;;  %v14900_v61 = vmul.f32 %v4286_v56, %v14248_v63  ;;  %v4354_v35 = vsel %vm4329_vm9, %v14892_v40, -inf }
 0x947   :  { %4355 = vmax.xlane.f32.xlu1 %v4354_v35  ;;  %4352 = vmax.xlane.f32.xlu0 %v4351_v48  ;;  %16881 = vst [vmem:[#allocation37_spill] sm:$0xff] %v14907_v57  ;;  %v4363_v12 = vsel %vm4329_vm9, %v14907_v57, -inf }
 0x948   :  { %16880 = vst [vmem:[#allocation36_spill] sm:$0xff] %v14900_v61  ;;  %v12040_v23 = vpop.f32.mrb[76].mxu0  ;;  %v4357_v45 = vsel %vm4329_vm9, %v14900_v61, -inf }
 0x949   :  { %v4298_v47 = vpop.f32.mrb[77].mxu0  ;;  %v4307_v38 = vadd.f32 %v12040_v23, %v14841_v33 }
 0x94a   :  { %v4299_v49 = vadd.f32 %v14841_v33, %v4298_v47  ;;  %v12041_v42 = vpop.f32.mrb[78].mxu0 }
 0x94b   :  { %4361 = vmax.xlane.f32.xlu1 %v4360_v59  ;;  %4358 = vmax.xlane.f32.xlu0 %v4357_v45  ;;  %v4301_v18 = vpop.f32.mrb[79].mxu0  ;;  %v14922_v46 = vmul.f32 %v4307_v38, %v14328_v20  ;;  %v4310_v32 = vadd.f32 %v12041_v42, %v14841_v33 }
 0x94c   :  { %v14916_v5 = vmul.f32 %v4299_v49, %v14293_v43  ;;  %v4302_v60 = vadd.f32 %v14841_v33, %v4301_v18 }
 0x94d   :  { %16883 = vst [vmem:[#allocation39_spill] sm:$0xff] %v14922_v46  ;;  %v14931_v29 = vmul.f32 %v4310_v32, %v14330_v31  ;;  %v4372_v39 = vsel %vm4329_vm9, %v14922_v46, -inf }
 0x94e   :  { %16882 = vst [vmem:[#allocation38_spill] sm:$0xff] %v14916_v5  ;;  %v14926_v11 = vmul.f32 %v4302_v60, %v14302_v50  ;;  %v4366_v7 = vsel %vm4329_vm9, %v14916_v5, -inf }
 0x94f   :  { %4364 = vmax.xlane.f32.xlu0 %v4363_v12  ;;  %4367 = vmax.xlane.f32.xlu1 %v4366_v7  ;;  %16885 = vst [vmem:[#allocation41_spill] sm:$0xff] %v14931_v29  ;;  %v4375_v33 = vsel %vm4329_vm9, %v14931_v29, -inf }
 0x950   :  { %16884 = vst [vmem:[#allocation40_spill] sm:$0xff] %v14926_v11  ;;  %v4369_v30 = vsel %vm4329_vm9, %v14926_v11, -inf }
 0x953   :  { %4370 = vmax.xlane.f32.xlu0 %v4369_v30  ;;  %4373 = vmax.xlane.f32.xlu1 %v4372_v39 }
 0x957   :  { %4376 = vmax.xlane.f32.xlu0 %v4375_v33 }
 0x9c4   :  { %v4332_v51 = vpop.xlane.xlu0 %4331 }
 0x9c5   :  { %v4378_v4 = vsub.f32 %v14846_v0, %v4332_v51 }
 0x9c6   :  { %v4335_v10 = vpop.xlane.xlu1 %4334 }
 0x9c7   :  { %v4394_v41 = vmul.f32 1.442695, %v4378_v4  ;;  %v4379_v44 = vsub.f32 %v14854_v19, %v4335_v10 }
 0x9c8   :  { %v4338_v21 = vpop.xlane.xlu0 %4337 }
 0x9c9   :  { %13252 = vpow2.f32 %v4394_v41  ;;  %v4396_v36 = vmul.f32 1.442695, %v4379_v44  ;;  %v4380_v9 = vsub.f32 %v14850_v62, %v4338_v21 }
 0x9cb   :  { %13254 = vpow2.f32 %v4396_v36  ;;  %v4398_v6 = vmul.f32 1.442695, %v4380_v9 }
 0x9cc   :  { %v4344_v17 = vpop.xlane.xlu1 %4343  ;;  %v4341_v56 = vpop.xlane.xlu0 %4340 }
 0x9cd   :  { %13256 = vpow2.f32 %v4398_v6  ;;  %v4382_v52 = vsub.f32 %v14868_v28, %v4344_v17  ;;  %v4381_v35 = vsub.f32 %v14861_v25, %v4341_v56 }
 0x9cf   :  { %v4402_v48 = vmul.f32 1.442695, %v4382_v52  ;;  %v4400_v23 = vmul.f32 1.442695, %v4381_v35 }
 0x9d0   :  { %v4350_v47 = vpop.xlane.xlu1 %4349  ;;  %v4347_v38 = vpop.xlane.xlu0 %4346 }
 0x9d1   :  { %13258 = vpow2.f32 %v4402_v48  ;;  %v4384_v49 = vsub.f32 %v14873_v3, %v4350_v47  ;;  %v4383_v42 = vsub.f32 %v14876_v55, %v4347_v38 }
 0x9d2   :  { %13260 = vpow2.f32 %v4400_v23 }
 0x9d3   :  { %v14948_v59 = vpop.eup %13252  ;;  %v4406_v45 = vmul.f32 1.442695, %v4384_v49  ;;  %v4404_v18 = vmul.f32 1.442695, %v4383_v42 }
 0x9d4   :  { %v4356_v60 = vpop.xlane.xlu1 %4355  ;;  %v4353_v12 = vpop.xlane.xlu0 %4352  ;;  %v4426_v32 = vsel %vm4329_vm9, %v14948_v59, 0.0 }
 0x9d5   :  { %v14952_v7 = vpop.eup %13254  ;;  %13262 = vpow2.f32 %v4406_v45  ;;  %v4386_v30 = vsub.f32 %v14892_v40, %v4356_v60  ;;  %v4385_v39 = vsub.f32 %v14883_v22, %v4353_v12  ;;  %4427 = vadd.xlane.f32.xlu1 %v4426_v32  ;;  %v4690_v40 = vld [vmem:[#allocation3 + $0x30] sm:$0x80]  ;;  %v13205_v22 = vld [vmem:[%s16830_s12 + $0x28] sm:$0xff]  }
 0x9d6   :  { %13264 = vpow2.f32 %v4404_v18  ;;  %v4429_v33 = vsel %vm4329_vm9, %v14952_v7, 0.0 }
 0x9d7   :  { %v14958_v37 = vpop.eup %13256  ;;  %v4410_v34 = vmul.f32 1.442695, %v4386_v30  ;;  %v4408_v51 = vmul.f32 1.442695, %v4385_v39  ;;  %4430 = vadd.xlane.f32.xlu0 %v4429_v33 }
 0x9d8   :  { %v4362_v4 = vpop.xlane.xlu1 %4361  ;;  %v4359_v10 = vpop.xlane.xlu0 %4358  ;;  %v4432_v41 = vsel %vm4329_vm9, %v14958_v37, 0.0 }
 0x9d9   :  { %13266 = vpow2.f32 %v4410_v34  ;;  %v4388_v44 = vsub.f32 %v14897_v53, %v4362_v4  ;;  %v4387_v21 = vsub.f32 %v14900_v61, %v4359_v10  ;;  %4433 = vadd.xlane.f32.xlu1 %v4432_v41 }
 0x9da   :  { %13268 = vpow2.f32 %v4408_v51 }
 0x9db   :  { %v14964_v36 = vpop.eup %13258  ;;  %v4414_v9 = vmul.f32 1.442695, %v4388_v44  ;;  %v4412_v6 = vmul.f32 1.442695, %v4387_v21 }
 0x9dc   :  { %v14966_v17 = vpop.eup %13260  ;;  %v4365_v56 = vpop.xlane.xlu0 %4364  ;;  %v4438_v35 = vsel %vm4329_vm9, %v14964_v36, 0.0 }
 0x9dd   :  { %v4368_v52 = vpop.xlane.xlu1 %4367  ;;  %13270 = vpow2.f32 %v4414_v9  ;;  %v4389_v48 = vsub.f32 %v14907_v57, %v4365_v56  ;;  %v4435_v47 = vsel %vm4329_vm9, %v14966_v17, 0.0  ;;  %4439 = vadd.xlane.f32.xlu1 %v4438_v35 }
 0x9de   :  { %v4390_v23 = vsub.f32 %v14916_v5, %v4368_v52  ;;  %13272 = vpow2.f32 %v4412_v6  ;;  %4436 = vadd.xlane.f32.xlu0 %v4435_v47 }
 0x9df   :  { %v14974_v38 = vpop.eup %13262  ;;  %v4416_v49 = vmul.f32 1.442695, %v4389_v48 }
 0x9e0   :  { %v4418_v42 = vmul.f32 1.442695, %v4390_v23  ;;  %v14976_v45 = vpop.eup %13264  ;;  %v4371_v18 = vpop.xlane.xlu0 %4370  ;;  %v4444_v12 = vsel %vm4329_vm9, %v14974_v38, 0.0 }
 0x9e1   :  { %v4374_v60 = vpop.xlane.xlu1 %4373  ;;  %13274 = vpow2.f32 %v4416_v49  ;;  %v4391_v32 = vsub.f32 %v14926_v11, %v4371_v18  ;;  %v4441_v39 = vsel %vm4329_vm9, %v14976_v45, 0.0  ;;  %4445 = vadd.xlane.f32.xlu1 %v4444_v12 }
 0x9e2   :  { %v4392_v30 = vsub.f32 %v14922_v46, %v4374_v60  ;;  %13276 = vpow2.f32 %v4418_v42  ;;  %4442 = vadd.xlane.f32.xlu0 %v4441_v39  ;;  %v13200_v39 = vld [vmem:[%s16830_s12 + $0x10] sm:$0xff]  }
 0x9e3   :  { %v14984_v33 = vpop.eup %13266  ;;  %v4420_v34 = vmul.f32 1.442695, %v4391_v32  ;;  %12060 = vmatprep.subr.bf16.mxu0 %v13200_v39 }
 0x9e4   :  { %v4422_v51 = vmul.f32 1.442695, %v4392_v30  ;;  %v14986_v4 = vpop.eup %13268  ;;  %v4377_v10 = vpop.xlane.xlu0 %4376  ;;  %v4450_v41 = vsel %vm4329_vm9, %v14984_v33, 0.0 }
 0x9e5   :  { %13278 = vpow2.f32 %v4420_v34  ;;  %v4393_v44 = vsub.f32 %v14931_v29, %v4377_v10  ;;  %v4447_v21 = vsel %vm4329_vm9, %v14986_v4, 0.0  ;;  %4451 = vadd.xlane.f32.xlu1 %v4450_v41 }
 0x9e6   :  { %13280 = vpow2.f32 %v4422_v51  ;;  %4448 = vadd.xlane.f32.xlu0 %v4447_v21 }
 0x9e7   :  { %v14993_v9 = vpop.eup %13270  ;;  %v4424_v6 = vmul.f32 1.442695, %v4393_v44 }
 0x9e8   :  { %v14995_v56 = vpop.eup %13272  ;;  %v4456_v52 = vsel %vm4329_vm9, %v14993_v9, 0.0 }
 0x9e9   :  { %13282 = vpow2.f32 %v4424_v6  ;;  %v4453_v35 = vsel %vm4329_vm9, %v14995_v56, 0.0  ;;  %4457 = vadd.xlane.f32.xlu1 %v4456_v52 }
 0x9ea   :  { %4454 = vadd.xlane.f32.xlu0 %v4453_v35 }
 0x9eb   :  { %v15001_v48 = vpop.eup %13274 }
 0x9ec   :  { %v15003_v23 = vpop.eup %13276  ;;  %v4459_v47 = vsel %vm4329_vm9, %v15001_v48, 0.0 }
 0x9ed   :  { %v4462_v49 = vsel %vm4329_vm9, %v15003_v23, 0.0 }
 0x9ee   :  { %4460 = vadd.xlane.f32.xlu0 %v4459_v47  ;;  %4463 = vadd.xlane.f32.xlu1 %v4462_v49 }
 0x9ef   :  { %v15009_v42 = vpop.eup %13278 }
 0x9f0   :  { %v15011_v18 = vpop.eup %13280  ;;  %v4465_v60 = vsel %vm4329_vm9, %v15009_v42, 0.0 }
 0x9f1   :  { %v4468_v12 = vsel %vm4329_vm9, %v15011_v18, 0.0 }
 0x9f2   :  { %4466 = vadd.xlane.f32.xlu0 %v4465_v60  ;;  %4469 = vadd.xlane.f32.xlu1 %v4468_v12 }
 0x9f3   :  { %v15017_v32 = vpop.eup %13282 }
 0x9f4   :  { %v4471_v30 = vsel %vm4329_vm9, %v15017_v32, 0.0 }
 0x9f6   :  { %4472 = vadd.xlane.f32.xlu0 %v4471_v30 }
 0xa62   :  { %v4428_v34 = vpop.xlane.xlu1 %4427 }
 0xa63   :  { %13284 = vrcp.f32 %v4428_v34 }
 0xa64   :  { %v4431_v51 = vpop.xlane.xlu0 %4430 }
 0xa65   :  { %13286 = vrcp.f32 %v4431_v51 }
 0xa66   :  { %v4434_v10 = vpop.xlane.xlu1 %4433 }
 0xa67   :  { %13288 = vrcp.f32 %v4434_v10 }
 0xa6a   :  { %v4440_v41 = vpop.xlane.xlu1 %4439 }
 0xa6b   :  { %v4437_v44 = vpop.xlane.xlu0 %4436  ;;  %13290 = vrcp.f32 %v4440_v41 }
 0xa6c   :  { %13292 = vrcp.f32 %v4437_v44 }
 0xa6d   :  { %v13285_v21 = vpop.eup %13284 }
 0xa6e   :  { %v4446_v6 = vpop.xlane.xlu1 %4445  ;;  %v4475_v52 = vmul.f32 %v13285_v21, %v14948_v59 }
 0xa6f   :  { %v13287_v35 = vpop.eup %13286  ;;  %v4443_v47 = vpop.xlane.xlu0 %4442  ;;  %13294 = vrcp.f32 %v4446_v6 }
 0xa70   :  { %13296 = vrcp.f32 %v4443_v47  ;;  %v4477_v49 = vmul.f32 %v13287_v35, %v14952_v7  ;;  %v4506_v30 = vmul.f32 %v4475_v52, %v14199_v1 }
 0xa71   :  { %v13289_v60 = vpop.eup %13288 }
 0xa72   :  { %v4452_v12 = vpop.xlane.xlu1 %4451  ;;  %v4507_v34 = vmul.f32 %v4477_v49, %v14203_v54  ;;  %v4479_v44 = vmul.f32 %v13289_v60, %v14958_v37 }
 0xa73   :  { %v4449_v51 = vpop.xlane.xlu0 %4448  ;;  %13298 = vrcp.f32 %v4452_v12 }
 0xa74   :  { %13300 = vrcp.f32 %v4449_v51  ;;  %v4529_v10 = vpack.c.bf16 %v4507_v34, %v4506_v30  ;;  %v4508_v52 = vmul.f32 %v4479_v44, %v14201_v2 }
 0xa75   :  { %v13291_v41 = vpop.eup %13290 }
 0xa76   :  { %v13293_v59 = vpop.eup %13292  ;;  %12044 = vmatprep.mubr.msk.bf16.mxu0 %vm4329_vm9, %v4529_v10  ;;  %v4458_v21 = vpop.xlane.xlu1 %4457  ;;  %v4483_v49 = vmul.f32 %v13291_v41, %v14964_v36 }
 0xa77   :  { %v4481_v6 = vmul.f32 %v13293_v59, %v14966_v17  ;;  %v4455_v7 = vpop.xlane.xlu0 %4454  ;;  %13302 = vrcp.f32 %v4458_v21 }
 0xa78   :  { %13304 = vrcp.f32 %v4455_v7  ;;  %v4510_v17 = vmul.f32 %v4483_v49, %v14209_v15 }
 0xa79   :  { %v13295_v35 = vpop.eup %13294  ;;  %v4509_v47 = vmul.f32 %v4481_v6, %v14205_v14 }
 0xa7a   :  { %v13297_v12 = vpop.eup %13296  ;;  %v4487_v44 = vmul.f32 %v13295_v35, %v14974_v38 }
 0xa7b   :  { %v4530_v30 = vpack.c.bf16 %v4509_v47, %v4508_v52  ;;  %v4461_v34 = vpop.xlane.xlu0 %4460  ;;  %v4464_v37 = vpop.xlane.xlu1 %4463  ;;  %v4485_v60 = vmul.f32 %v13297_v12, %v14976_v45 }
 0xa7c   :  { %13306 = vrcp.f32 %v4461_v34  ;;  %v4512_v7 = vmul.f32 %v4487_v44, %v14219_v27 }
 0xa7d   :  { %v13299_v51 = vpop.eup %13298  ;;  %13308 = vrcp.f32 %v4464_v37  ;;  %12045 = vmatmul.mubr.msk.bf16.vlgmr.msra.gmra.mrb[80].mxu0 %vm4329_vm9, %v4530_v30  ;;  %v4511_v10 = vmul.f32 %v4485_v60, %v14211_v16 }
 0xa7e   :  { %v13301_v59 = vpop.eup %13300  ;;  %12061 = vmatpush3.bf16.msra.mxu0 %v13200_v39  ;;  %v4491_v47 = vmul.f32 %v13299_v51, %v14984_v33 }
 0xa7f   :  { %v4467_v36 = vpop.xlane.xlu0 %4466  ;;  %v4470_v41 = vpop.xlane.xlu1 %4469  ;;  %v4531_v21 = vpack.c.bf16 %v4511_v10, %v4510_v17  ;;  %v4489_v6 = vmul.f32 %v13301_v59, %v14986_v4 }
 0xa80   :  { %13310 = vrcp.f32 %v4467_v36  ;;  %v4514_v4 = vmul.f32 %v4491_v47, %v14243_v58  ;;  %v13207_v47 = vld [vmem:[#allocation15 + $0x8] sm:$0xff]  }
 0xa81   :  { %v13303_v45 = vpop.eup %13302  ;;  %13312 = vrcp.f32 %v4470_v41  ;;  %12048 = vmatprep.mubr.msk.bf16.mxu0 %vm4329_vm9, %v4531_v21  ;;  %v4513_v52 = vmul.f32 %v4489_v6, %v14222_v13 }
 0xa82   :  { %v13305_v49 = vpop.eup %13304  ;;  %v4495_v30 = vmul.f32 %v13303_v45, %v14993_v9 }
 0xa83   :  { %v4473_v38 = vpop.xlane.xlu0 %4472  ;;  %v4532_v35 = vpack.c.bf16 %v4513_v52, %v4512_v7  ;;  %v4493_v39 = vmul.f32 %v13305_v49, %v14995_v56 }
 0xa84   :  { %13314 = vrcp.f32 %v4473_v38  ;;  %v4516_v33 = vmul.f32 %v4495_v30, %v14267_v8  ;;  %v10609_v38 = vld [vmem:[#allocation12] ss:$0 sm:$0xff] }
 0xa85   :  { %12049 = vmatmul.mubr.msk.bf16.gmra.mrb[84].mxu0 %vm4329_vm9, %v4532_v35  ;;  %v4515_v12 = vmul.f32 %v4493_v39, %v14248_v63 }
 0xa86   :  { %v13307_v34 = vpop.eup %13306 }
 0xa87   :  { %v13309_v37 = vpop.eup %13308  ;;  %v4533_v60 = vpack.c.bf16 %v4515_v12, %v4514_v4  ;;  %v4497_v17 = vmul.f32 %v13307_v34, %v15001_v48 }
 0xa88   :  { %v4499_v51 = vmul.f32 %v13309_v37, %v15003_v23 }
 0xa89   :  { %12052 = vmatprep.mubr.msk.bf16.mxu0 %vm4329_vm9, %v4533_v60  ;;  %v4517_v56 = vmul.f32 %v4497_v17, %v14272_v24 }
 0xa8a   :  { %v13311_v10 = vpop.eup %13310  ;;  %v4518_v9 = vmul.f32 %v4499_v51, %v14293_v43 }
 0xa8b   :  { %v13313_v44 = vpop.eup %13312  ;;  %v4534_v59 = vpack.c.bf16 %v4517_v56, %v4516_v33  ;;  %v4501_v36 = vmul.f32 %v13311_v10, %v15009_v42  ;;  %v13201_v42 = vld [vmem:[%s16830_s12 + $0x18] sm:$0xff]  }
 0xa8c   :  { %v4503_v48 = vmul.f32 %v13313_v44, %v15011_v18  ;;  %12062 = vmatprep.subr.bf16.mxu0 %v13201_v42  ;;  %v13202_v18 = vld [vmem:[%s16830_s12] sm:$0xff]  }
 0xa8d   :  { %12053 = vmatmul.mubr.msk.bf16.gmra.mrb[88].mxu0 %vm4329_vm9, %v4534_v59  ;;  %v4519_v41 = vmul.f32 %v4501_v36, %v14302_v50 }
 0xa8e   :  { %v13315_v21 = vpop.eup %13314  ;;  %v4520_v23 = vmul.f32 %v4503_v48, %v14328_v20  ;;  %12063 = vmatpush3.bf16.msra.mxu0 %v13201_v42 }
 0xa8f   :  { %v4535_v6 = vpack.c.bf16 %v4519_v41, %v4518_v9  ;;  %v4505_v45 = vmul.f32 %v13315_v21, %v15017_v32  ;;  %12080 = vmatprep.subr.bf16.mxu0 %v13202_v18  ;;  %v13206_v32 = vld [vmem:[#allocation15] sm:$0xff]   ;;  %v13203_v21 = vld [vmem:[%s16830_s12 + $0x8] sm:$0xff]  }
 0xa90   :  { %12120 = vmatprep.subr.bf16.mxu1 %v13206_v32 }
 0xa91   :  { %12056 = vmatprep.mubr.msk.bf16.mxu0 %vm4329_vm9, %v4535_v6  ;;  %v4521_v7 = vmul.f32 %v4505_v45, %v14330_v31  ;;  %12121 = vmatpush3.bf16.msra.mxu1 %v13206_v32 }
 0xa92   :  { %12122 = vmatprep.subr.bf16.mxu1 %v13207_v47 }
 0xa93   :  { %v4536_v52 = vpack.c.bf16 %v4521_v7, %v4520_v23 }
 0xa95   :  { %12057 = vmatmul.mubr.msk.bf16.gmra.mrb[92].mxu0 %vm4329_vm9, %v4536_v52  ;;  %12123 = vmatpush3.bf16.msra.mxu1 %v13207_v47  ;;  %v13204_v47 = vld [vmem:[%s16830_s12 + $0x20] sm:$0xff]  }
 0xb50   :  { %v12046_v49 = vpop.f32.mrb[80].mxu0 }
 0xb51   :  { %v4605_v35 = vpop.f32.mrb[81].mxu0  ;;  %v15078_v4 = vadd.f32 %v12046_v49, %v10609_v38 }
 0xb52   :  { %v12047_v39 = vpop.f32.mrb[82].mxu0  ;;  %v15082_v30 = vadd.f32 %v10609_v38, %v4605_v35 }
 0xb53   :  { %v15080_v12 = vadd.f32 %v12047_v39, %v10609_v38  ;;  %v4608_v26 = vpop.f32.mrb[83].mxu0 }
 0xb54   :  { %v15084_v34 = vadd.f32 %v10609_v38, %v4608_v26 }
 0xb55   :  { %v4669_v37 = vpack.c.bf16 %v15080_v12, %v15078_v4 }
 0xb56   :  { %v4668_v60 = vpack.c.bf16 %v15084_v34, %v15082_v30 }
 0xb57   :  { %4677 = vst.msk [vmem:[#allocation3 + $0x10] sm:$0xff] %vm175_vm10, %v4669_v37 }
 0xb58   :  { %4676 = vst.msk [vmem:[#allocation3 + $0x8] sm:$0xff] %vm175_vm10, %v4668_v60  ;;  %v12050_v17 = vpop.f32.mrb[84].mxu0 }
 0xb59   :  { %v4621_v33 = vpop.f32.mrb[85].mxu0  ;;  %v15092_v51 = vadd.f32 %v12050_v17, %v10609_v38 }
 0xb5a   :  { %v12051_v56 = vpop.f32.mrb[86].mxu0  ;;  %v15096_v59 = vadd.f32 %v10609_v38, %v4621_v33 }
 0xb5b   :  { %v15094_v10 = vadd.f32 %v12051_v56, %v10609_v38  ;;  %v4624_v44 = vpop.f32.mrb[87].mxu0 }
 0xb5c   :  { %v15098_v36 = vadd.f32 %v10609_v38, %v4624_v44 }
 0xb5d   :  { %v4671_v9 = vpack.c.bf16 %v15094_v10, %v15092_v51 }
 0xb5e   :  { %v4670_v41 = vpack.c.bf16 %v15098_v36, %v15096_v59  ;;  %v15113_v45 = vld [vmem:[#allocation3 + $0x10] sm:$0xff] }
 0xb5f   :  { %4679 = vst.msk [vmem:[#allocation3 + $0x20] sm:$0xff] %vm175_vm10, %v4671_v9  ;;  %v15105_v48 = vld [vmem:[#allocation3 + $0x8] sm:$0xff]  ;;  %v4711_v5 = vshll.u32 %v15113_v45, 16 }
 0xb60   :  { %4678 = vst.msk [vmem:[#allocation3 + $0x18] sm:$0xff] %vm175_vm10, %v4670_v41  ;;  %v12054_v6 = vpop.f32.mrb[88].mxu0  ;;  %12064 = vmatprep.mubr.msk.bf16.mxu0 %vm175_vm10, %v15105_v48 }
 0xb61   :  { %v4637_v23 = vpop.f32.mrb[89].mxu0  ;;  %12065 = vmatmul.mubr.msk.bf16.vlgmr.msra.gmra.mrb[96].mxu0 %vm175_vm10, %v15113_v45  ;;  %v15117_v52 = vadd.f32 %v12054_v6, %v10609_v38  ;;  %v16842_v6 = vshrl.u32 %v15105_v48, 16 }
 0xb62   :  { %12081 = vmatpush3.bf16.msra.mxu0 %v13202_v18  ;;  %v12055_v7 = vpop.f32.mrb[90].mxu0  ;;  %v15124_v49 = vadd.f32 %v10609_v38, %v4637_v23 }
 0xb63   :  { %v15119_v42 = vadd.f32 %v12055_v7, %v10609_v38  ;;  %v4640_v32 = vpop.f32.mrb[91].mxu0  ;;  %12082 = vmatprep.subr.bf16.mxu0 %v13203_v21 }
 0xb64   :  { %v15126_v35 = vadd.f32 %v10609_v38, %v4640_v32  ;;  %v4685_v32 = vld [vmem:[#allocation3] sm:$0x80] }
 0xb65   :  { %v4673_v39 = vpack.c.bf16 %v15119_v42, %v15117_v52 }
 0xb66   :  { %v4672_v18 = vpack.c.bf16 %v15126_v35, %v15124_v49  ;;  %12083 = vmatpush3.bf16.msra.mxu0 %v13203_v21  ;;  %v15138_v60 = vld [vmem:[#allocation3 + $0x20] sm:$0xff] }
 0xb67   :  { %4682 = vst.msk [vmem:[#allocation3 + $0x40] sm:$0xff] %vm175_vm10, %v4673_v39  ;;  %v15133_v26 = vld [vmem:[#allocation3 + $0x18] sm:$0xff]  ;;  %12100 = vmatprep.subr.bf16.mxu0 %v13204_v47  ;;  %v4724_v57 = vshrl.u32 %v15138_v60, 16  ;;  %v4727_v25 = vshll.u32 %v15138_v60, 16 }
 0xb68   :  { %4681 = vst.msk [vmem:[#allocation3 + $0x38] sm:$0xff] %vm175_vm10, %v4672_v18  ;;  %v12058_v37 = vpop.f32.mrb[92].mxu0  ;;  %12068 = vmatprep.mubr.msk.bf16.mxu0 %vm175_vm10, %v15133_v26  ;;  %v4702_v18 = vrot.slane %v16842_v6, 7 }
 0xb69   :  { %v4653_v17 = vpop.f32.mrb[93].mxu0  ;;  %12069 = vmatmul.mubr.msk.bf16.gmra.mrb[100].mxu0 %vm175_vm10, %v15138_v60  ;;  %v15142_v56 = vadd.f32 %v12058_v37, %v10609_v38  ;;  %v4696_v37 = vshrl.u32 %v4685_v32, 16  ;;  %v4726_v3 = vrot.slane %v4724_v57, 7 }
 0xb6a   :  { %v12059_v33 = vpop.f32.mrb[94].mxu0  ;;  %v15146_v41 = vadd.f32 %v10609_v38, %v4653_v17  ;;  %v4703_v17 = vshll.u32 %v15105_v48, 16 }
 0xb6b   :  { %v15144_v44 = vadd.f32 %v12059_v33, %v10609_v38  ;;  %v4656_v9 = vpop.f32.mrb[95].mxu0  ;;  %v16846_v33 = vshrl.u32 %v15113_v45, 16  ;;  %v4729_v28 = vor.u32 %v4727_v25, %v4726_v3 }
 0xb6c   :  { %v15148_v21 = vadd.f32 %v10609_v38, %v4656_v9  ;;  %v4716_v9 = vshrl.u32 %v15133_v26, 16 }
 0xb6d   :  { %v4675_v23 = vpack.c.bf16 %v15144_v44, %v15142_v56  ;;  %v4710_v46 = vrot.slane %v16846_v33, 7 }
 0xb6e   :  { %v4674_v7 = vpack.c.bf16 %v15148_v21, %v15146_v41  ;;  %v15161_v38 = vld [vmem:[#allocation3 + $0x40] sm:$0xff]  ;;  %v4718_v11 = vrot.slane %v4716_v9, 7 }
 0xb6f   :  { %4684 = vst.msk [vmem:[#allocation3 + $0x50] sm:$0xff] %vm175_vm10, %v4675_v23  ;;  %v15156_v39 = vld [vmem:[#allocation3 + $0x38] sm:$0xff]  ;;  %v4698_v23 = vrot.slane %v4696_v37, 7  ;;  %v4719_v37 = vshll.u32 %v15133_v26, 16  ;;  %v4713_v33 = vor.u32 %v4711_v5, %v4710_v46  ;;  %v4732_v26 = vshrl.u32 %v4690_v40, 16 }
 0xb70   :  { %4683 = vst.msk [vmem:[#allocation3 + $0x48] sm:$0xff] %vm175_vm10, %v4674_v7  ;;  %12072 = vmatprep.mubr.msk.bf16.mxu0 %vm175_vm10, %v15156_v39  ;;  %v4705_v7 = vor.u32 %v4703_v17, %v4702_v18  ;;  %v4736_v53 = vshrl.u32 %v15156_v39, 16  ;;  %v4739_v62 = vshll.u32 %v15156_v39, 16  ;;  %v4744_v55 = vshrl.u32 %v15161_v38, 16 }
 0xb71   :  { %12073 = vmatmul.mubr.msk.bf16.gmra.mrb[104].mxu0 %vm175_vm10, %v15161_v38  ;;  %v4721_v61 = vor.u32 %v4719_v37, %v4718_v11 }
 0xb72   :  { %v4706_v32 = vsel %vm432_vm2, %v4698_v23, %v4705_v7  ;;  %v4714_v23 = vsel %vm432_vm2, %v4702_v18, %v4713_v33  ;;  %v4738_v7 = vrot.slane %v4736_v53, 7  ;;  %v4734_v18 = vrot.slane %v4732_v26, 7 }
 0xb74   :  { %v4741_v33 = vor.u32 %v4739_v62, %v4738_v7 }
 0xb76   :  { %v15176_v6 = vld [vmem:[#allocation3 + $0x50] sm:$0xff] }
 0xb77   :  { %v15170_v29 = vld [vmem:[#allocation3 + $0x48] sm:$0xff]  ;;  %v4760_v3 = vshrl.u32 %v15176_v6, 16 }
 0xb78   :  { %12076 = vmatprep.mubr.msk.bf16.mxu0 %vm175_vm10, %v15170_v29  ;;  %v4752_v19 = vshrl.u32 %v15170_v29, 16  ;;  %v4755_v60 = vshll.u32 %v15170_v29, 16 }
 0xb79   :  { %12077 = vmatmul.mubr.msk.bf16.gmra.mrb[108].mxu0 %vm175_vm10, %v15176_v6  ;;  %v4762_v26 = vrot.slane %v4760_v3, 7 }
 0xb7a   :  { %12084 = vmatprep.mubr.msk.bf16.mxu0 %vm175_vm10, %v4706_v32  ;;  %v4722_v32 = vsel %vm432_vm2, %v4710_v46, %v4721_v61  ;;  %v4730_v61 = vsel %vm432_vm2, %v4718_v11, %v4729_v28  ;;  %v4754_v40 = vrot.slane %v4752_v19, 7  ;;  %v4742_v46 = vsel %vm432_vm2, %v4734_v18, %v4741_v33 }
 0xb7b   :  { %v5049_v11 = vrot.slane %v4703_v17, 1  ;;  %v4763_v18 = vshll.u32 %v15176_v6, 16  ;;  %v16886_v33 = vshrl.u32 %v15105_v48, 16  ;;  %v5038_v17 = vld [vmem:[#allocation3 + $0x28] sm:$0x1]  ;;  %v16887_v6 = vshrl.u32 %v15113_v45, 16 }
 0xb7c   :  { %v5076_v48 = vshll.u32 %v5038_v17, 16  ;;  %v5098_v45 = vrot.slane %v4755_v60, 1 }
 0xb7d   :  { %v5050_v29 = vor.u32 %v5049_v11, %v16886_v33 }
 0xb7e   :  { %v5102_v33 = vor.u32 %v5098_v45, %v4752_v19  ;;  %v13208_v19 = vld [vmem:[%s16830_s12 + $0x40] sm:$0xff]  }
 0xb7f   :  { %12140 = vmatprep.subr.bf16.mxu1 %v13208_v19 }
 0xb81   :  { %12085 = vmatmul.mubr.msk.bf16.vlgmr.msra.gmra.mrb[96].mxu0 %vm175_vm10, %v4714_v23  ;;  %v4746_v23 = vrot.slane %v4744_v55, 7 }
 0xb82   :  { %12101 = vmatpush3.bf16.msra.mxu0 %v13204_v47  ;;  %12088 = vmatprep.mubr.msk.bf16.mxu0 %vm175_vm10, %v4722_v32  ;;  %v4747_v47 = vshll.u32 %v15161_v38, 16  ;;  %v4757_v32 = vor.u32 %v4755_v60, %v4754_v40  ;;  %v4765_v38 = vor.u32 %v4763_v18, %v4762_v26 }
 0xb83   :  { %12102 = vmatprep.subr.bf16.mxu0 %v13205_v22 }
 0xb84   :  { %v4749_v39 = vor.u32 %v4747_v47, %v4746_v23  ;;  %v4758_v28 = vsel %vm432_vm2, %v4746_v23, %v4757_v32 }
 0xb86   :  { %12103 = vmatpush3.bf16.msra.mxu0 %v13205_v22  ;;  %v4750_v22 = vsel %vm432_vm2, %v4738_v7, %v4749_v39  ;;  %v5062_v39 = vrot.slane %v4719_v37, 1  ;;  %v5078_v37 = vrot.slane %v5076_v48, 1 }
 0xb88   :  { %v5066_v23 = vor.u32 %v5062_v39, %v4716_v9 }
 0xb89   :  { %12089 = vmatmul.mubr.msk.bf16.gmra.mrb[100].mxu0 %vm175_vm10, %v4730_v61  ;;  %v5054_v61 = vrot.slane %v4711_v5, 1 }
 0xb8a   :  { %12092 = vmatprep.mubr.msk.bf16.mxu0 %vm175_vm10, %v4742_v46  ;;  %v4766_v46 = vsel %vm432_vm2, %v4754_v40, %v4765_v38  ;;  %v5085_v40 = vrot.slane %v4739_v62, 1  ;;  %v5090_v38 = vrot.slane %v4747_v47, 1 }
 0xb8b   :  { %v5055_v7 = vsel %vm976_vm3, %v5050_v29, %v5054_v61  ;;  %v5058_v32 = vor.u32 %v5054_v61, %v16887_v6  ;;  %v5043_v29 = vld [vmem:[#allocation3 + $0x58] sm:$0x1] }
 0xb8c   :  { %v5086_v11 = vor.u32 %v5085_v40, %v4736_v53  ;;  %v5094_v61 = vor.u32 %v5090_v38, %v4744_v55  ;;  %v10656_v55 = vld [vmem:[#allocation13] ss:$0 sm:$0xff] }
 0xb8d   :  { %v5063_v26 = vsel %vm976_vm3, %v5058_v32, %v5062_v39 }
 0xb8e   :  { %v5099_v62 = vsel %vm976_vm3, %v5094_v61, %v5098_v45 }
 0xb91   :  { %12093 = vmatmul.mubr.msk.bf16.gmra.mrb[104].mxu0 %vm175_vm10, %v4750_v22  ;;  %v5070_v22 = vrot.slane %v4727_v25, 1  ;;  %v5091_v25 = vsel %vm976_vm3, %v5086_v11, %v5090_v38 }
 0xb92   :  { %12096 = vmatprep.mubr.msk.bf16.mxu0 %vm175_vm10, %v4758_v28 }
 0xb93   :  { %v5071_v5 = vsel %vm976_vm3, %v5066_v23, %v5070_v22  ;;  %v5074_v28 = vor.u32 %v5070_v22, %v4724_v57 }
 0xb95   :  { %v5079_v9 = vsel %vm976_vm3, %v5074_v28, %v5078_v37 }
 0xb99   :  { %12097 = vmatmul.mubr.msk.bf16.gmra.mrb[108].mxu0 %vm175_vm10, %v4766_v46  ;;  %v5106_v46 = vrot.slane %v4763_v18, 1 }
 0xb9a   :  { %12104 = vmatprep.mubr.msk.bf16.mxu0 %vm175_vm10, %v5055_v7  ;;  %v5112_v7 = vshll.u32 %v5043_v29, 16 }
 0xb9b   :  { %v5107_v53 = vsel %vm976_vm3, %v5102_v33, %v5106_v46  ;;  %v5110_v57 = vor.u32 %v5106_v46, %v4760_v3 }
 0xb9c   :  { %v5114_v47 = vrot.slane %v5112_v7, 1 }
 0xb9e   :  { %v5115_v39 = vsel %vm976_vm3, %v5110_v57, %v5114_v47 }
 0xba1   :  { %12105 = vmatmul.mubr.msk.bf16.vlgmr.msra.gmra.mrb[96].mxu0 %vm175_vm10, %v5063_v26 }
 0xba2   :  { %12108 = vmatprep.mubr.msk.bf16.mxu0 %vm175_vm10, %v5071_v5 }
 0xba9   :  { %12109 = vmatmul.mubr.msk.bf16.gmra.mrb[100].mxu0 %vm175_vm10, %v5079_v9 }
 0xbaa   :  { %12112 = vmatprep.mubr.msk.bf16.mxu0 %vm175_vm10, %v5091_v25 }
 0xbb1   :  { %12113 = vmatmul.mubr.msk.bf16.gmra.mrb[104].mxu0 %vm175_vm10, %v5099_v62 }
 0xbb2   :  { %12116 = vmatprep.mubr.msk.bf16.mxu0 %vm175_vm10, %v5107_v53 }
 0xbb9   :  { %12117 = vmatmul.mubr.msk.bf16.gmra.mrb[108].mxu0 %vm175_vm10, %v5115_v39 }
 0xc74   :  { %v12106_v60 = vpop.f32.mrb[96].mxu0 }
 0xc75   :  { %v5279_v18 = vadd.f32 %v12106_v60, %v10656_v55  ;;  %v5191_v23 = vpop.f32.mrb[97].mxu0 }
 0xc76   :  { %v5277_v17 = vadd.f32 %v10656_v55, %v5191_v23  ;;  %v12107_v6 = vpop.f32.mrb[98].mxu0 }
 0xc77   :  { %v5280_v32 = vadd.f32 %v12107_v6, %v10656_v55  ;;  %v5194_v22 = vpop.f32.mrb[99].mxu0  ;;  %v5295_v3 = vmax.f32 %v5279_v18, 0.0 }
 0xc78   :  { %v5278_v26 = vadd.f32 %v10656_v55, %v5194_v22  ;;  %v5293_v5 = vmax.f32 %v5277_v17, 0.0 }
 0xc79   :  { %v5296_v48 = vmax.f32 %v5280_v32, 0.0 }
 0xc7a   :  { %v5294_v40 = vmax.f32 %v5278_v26, 0.0 }
 0xc7b   :  { %v5310_v28 = vpack.c.bf16 %v5296_v48, %v5295_v3 }
 0xc7c   :  { %v5309_v37 = vpack.c.bf16 %v5294_v40, %v5293_v5  ;;  %v12110_v11 = vpop.f32.mrb[100].mxu0 }
 0xc7d   :  { %v5283_v38 = vadd.f32 %v12110_v11, %v10656_v55  ;;  %v5207_v9 = vpop.f32.mrb[101].mxu0 }
 0xc7e   :  { %v5281_v25 = vadd.f32 %v10656_v55, %v5207_v9  ;;  %v12111_v45 = vpop.f32.mrb[102].mxu0  ;;  %12124 = vmatprep.mubr.msk.bf16.mxu1 %vm175_vm10, %v5309_v37 }
 0xc7f   :  { %v5284_v33 = vadd.f32 %v12111_v45, %v10656_v55  ;;  %v5210_v29 = vpop.f32.mrb[103].mxu0  ;;  %12125 = vmatmul.mubr.msk.bf16.vlgmr.msra.gmra.mrb[48].mxu1 %vm175_vm10, %v5310_v28  ;;  %v5299_v46 = vmax.f32 %v5283_v38, 0.0 }
 0xc80   :  { %v5282_v61 = vadd.f32 %v10656_v55, %v5210_v29  ;;  %12141 = vmatpush3.bf16.msra.mxu1 %v13208_v19  ;;  %v5297_v7 = vmax.f32 %v5281_v25, 0.0 }
 0xc81   :  { %v5300_v62 = vmax.f32 %v5284_v33, 0.0 }
 0xc82   :  { %v5298_v53 = vmax.f32 %v5282_v61, 0.0 }
 0xc83   :  { %v5312_v57 = vpack.c.bf16 %v5300_v62, %v5299_v46 }
 0xc84   :  { %v5311_v47 = vpack.c.bf16 %v5298_v53, %v5297_v7  ;;  %v12114_v39 = vpop.f32.mrb[104].mxu0 }
 0xc85   :  { %v5287_v60 = vadd.f32 %v12114_v39, %v10656_v55  ;;  %v5223_v18 = vpop.f32.mrb[105].mxu0  ;;  %v13215_v39 = vld [vmem:[#allocation15 + $0x18] sm:$0xff]  }
 0xc86   :  { %v5285_v23 = vadd.f32 %v10656_v55, %v5223_v18  ;;  %v12115_v17 = vpop.f32.mrb[106].mxu0  ;;  %12128 = vmatprep.mubr.msk.bf16.mxu1 %vm175_vm10, %v5311_v47  ;;  %v13214_v47 = vld [vmem:[#allocation15 + $0x10] sm:$0xff]  }
 0xc87   :  { %v5288_v6 = vadd.f32 %v12115_v17, %v10656_v55  ;;  %v5226_v32 = vpop.f32.mrb[107].mxu0  ;;  %12129 = vmatmul.mubr.msk.bf16.gmra.mrb[52].mxu1 %vm175_vm10, %v5312_v57  ;;  %v5303_v26 = vmax.f32 %v5287_v60, 0.0  ;;  %v13209_v57 = vld [vmem:[%s16830_s12 + $0x48] sm:$0xff]   ;;  %12200 = vmatprep.subr.bf16.mxu0 %v13214_v47  ;;  %v15251_v60 = vld [vmem:[#allocation16] ss:$0 sm:$0xff] }
 0xc88   :  { %v5286_v22 = vadd.f32 %v10656_v55, %v5226_v32  ;;  %v5301_v3 = vmax.f32 %v5285_v23, 0.0  ;;  %12142 = vmatprep.subr.bf16.mxu1 %v13209_v57  ;;  %12201 = vmatpush3.bf16.msra.mxu0 %v13214_v47 }
 0xc89   :  { %v5304_v19 = vmax.f32 %v5288_v6, 0.0  ;;  %12143 = vmatpush3.bf16.msra.mxu1 %v13209_v57  ;;  %12202 = vmatprep.subr.bf16.mxu0 %v13215_v39 }
 0xc8a   :  { %v5302_v48 = vmax.f32 %v5286_v22, 0.0 }
 0xc8b   :  { %v5314_v5 = vpack.c.bf16 %v5304_v19, %v5303_v26 }
 0xc8c   :  { %v5313_v40 = vpack.c.bf16 %v5302_v48, %v5301_v3  ;;  %v12118_v28 = vpop.f32.mrb[108].mxu0  ;;  %12203 = vmatpush3.bf16.msra.mxu0 %v13215_v39 }
 0xc8d   :  { %v5291_v37 = vadd.f32 %v12118_v28, %v10656_v55  ;;  %v5239_v11 = vpop.f32.mrb[109].mxu0 }
 0xc8e   :  { %v5289_v38 = vadd.f32 %v10656_v55, %v5239_v11  ;;  %v12119_v9 = vpop.f32.mrb[110].mxu0  ;;  %12132 = vmatprep.mubr.msk.bf16.mxu1 %vm175_vm10, %v5313_v40 }
 0xc8f   :  { %v5292_v25 = vadd.f32 %v12119_v9, %v10656_v55  ;;  %v5242_v45 = vpop.f32.mrb[111].mxu0  ;;  %12133 = vmatmul.mubr.msk.bf16.gmra.mrb[56].mxu1 %vm175_vm10, %v5314_v5  ;;  %v5307_v29 = vmax.f32 %v5291_v37, 0.0 }
 0xc90   :  { %v5290_v33 = vadd.f32 %v10656_v55, %v5242_v45  ;;  %v5305_v46 = vmax.f32 %v5289_v38, 0.0  ;;  %v15248_v55 = vld [vmem:[%s16830_s12 + $0x30] sm:$0xff]  }
 0xc91   :  { %v5308_v61 = vmax.f32 %v5292_v25, 0.0  ;;  %12160 = vmatprep.subr.bf16.mxu1 %v15248_v55 }
 0xc92   :  { %v5306_v62 = vmax.f32 %v5290_v33, 0.0 }
 0xc93   :  { %v5316_v7 = vpack.c.bf16 %v5308_v61, %v5307_v29 }
 0xc94   :  { %v5315_v53 = vpack.c.bf16 %v5306_v62, %v5305_v46 }
 0xc96   :  { %12136 = vmatprep.mubr.msk.bf16.mxu1 %vm175_vm10, %v5315_v53 }
 0xc97   :  { %12137 = vmatmul.mubr.msk.bf16.gmra.mrb[60].mxu1 %vm175_vm10, %v5316_v7 }
 0xd52   :  { %v12126_v18 = vpop.f32.mrb[48].mxu1 }
 0xd53   :  { %v5407_v23 = vadd.f32 %v12126_v18, %v15251_v60  ;;  %v5398_v17 = vpop.f32.mrb[49].mxu1 }
 0xd54   :  { %v5399_v6 = vadd.f32 %v15251_v60, %v5398_v17  ;;  %v12127_v32 = vpop.f32.mrb[50].mxu1 }
 0xd55   :  { %v5463_v22 = vadd.f32 %v5407_v23, %v15078_v4  ;;  %v5410_v26 = vadd.f32 %v12127_v32, %v15251_v60  ;;  %v5401_v19 = vpop.f32.mrb[51].mxu1 }
 0xd56   :  { %v5461_v3 = vadd.f32 %v5399_v6, %v15082_v30  ;;  %v5402_v48 = vadd.f32 %v15251_v60, %v5401_v19 }
 0xd57   :  { %v5464_v5 = vadd.f32 %v5410_v26, %v15080_v12  ;;  %v15262_v28 = vmul.f32 %v5463_v22, %v14201_v2 }
 0xd58   :  { %v5462_v40 = vadd.f32 %v5402_v48, %v15084_v34  ;;  %v15268_v11 = vmul.f32 %v5461_v3, %v14199_v1  ;;  %v13211_v3 = vld [vmem:[%s16830_s12 + $0x38] sm:$0xff]  }
 0xd59   :  { %v15265_v37 = vmul.f32 %v5464_v5, %v14205_v14 }
 0xd5a   :  { %v15271_v4 = vmul.f32 %v5462_v40, %v14203_v54  ;;  %v12130_v38 = vpop.f32.mrb[52].mxu1 }
 0xd5b   :  { %v5494_v30 = vpack.c.bf16 %v15265_v37, %v15262_v28  ;;  %v5423_v12 = vadd.f32 %v12130_v38, %v15251_v60  ;;  %v5414_v9 = vpop.f32.mrb[53].mxu1 }
 0xd5c   :  { %v5493_v34 = vpack.c.bf16 %v15271_v4, %v15268_v11  ;;  %v5415_v25 = vadd.f32 %v15251_v60, %v5414_v9  ;;  %v12131_v45 = vpop.f32.mrb[54].mxu1 }
 0xd5d   :  { %5502 = vst.msk [vmem:[#allocation3 + $0x10] sm:$0xff] %vm175_vm10, %v5494_v30  ;;  %v5467_v33 = vadd.f32 %v5423_v12, %v15092_v51  ;;  %v5426_v29 = vadd.f32 %v12131_v45, %v15251_v60  ;;  %v5417_v61 = vpop.f32.mrb[55].mxu1  ;;  %v13212_v12 = vld [vmem:[%s16830_s12 + $0x50] sm:$0xff]  }
 0xd5e   :  { %5501 = vst.msk [vmem:[#allocation3 + $0x8] sm:$0xff] %vm175_vm10, %v5493_v34  ;;  %v5465_v46 = vadd.f32 %v5415_v25, %v15096_v59  ;;  %v5418_v62 = vadd.f32 %v15251_v60, %v5417_v61 }
 0xd5f   :  { %v5468_v7 = vadd.f32 %v5426_v29, %v15094_v10  ;;  %v15288_v57 = vmul.f32 %v5467_v33, %v14219_v27 }
 0xd60   :  { %v5466_v53 = vadd.f32 %v5418_v62, %v15098_v36  ;;  %v15294_v51 = vmul.f32 %v5465_v46, %v14209_v15 }
 0xd61   :  { %v15291_v47 = vmul.f32 %v5468_v7, %v14222_v13 }
 0xd62   :  { %v15297_v39 = vmul.f32 %v5466_v53, %v14211_v16  ;;  %v12134_v18 = vpop.f32.mrb[56].mxu1 }
 0xd63   :  { %v5496_v59 = vpack.c.bf16 %v15291_v47, %v15288_v57  ;;  %v5439_v10 = vadd.f32 %v12134_v18, %v15251_v60  ;;  %v5430_v23 = vpop.f32.mrb[57].mxu1 }
 0xd64   :  { %v5495_v36 = vpack.c.bf16 %v15297_v39, %v15294_v51  ;;  %v5431_v17 = vadd.f32 %v15251_v60, %v5430_v23  ;;  %v12135_v6 = vpop.f32.mrb[58].mxu1  ;;  %v15318_v40 = vld [vmem:[#allocation3 + $0x10] sm:$0xff] }
 0xd65   :  { %5504 = vst.msk [vmem:[#allocation3 + $0x20] sm:$0xff] %vm175_vm10, %v5496_v59  ;;  %v5471_v32 = vadd.f32 %v5439_v10, %v15117_v52  ;;  %v5442_v22 = vadd.f32 %v12135_v6, %v15251_v60  ;;  %v5433_v26 = vpop.f32.mrb[59].mxu1  ;;  %v15308_v19 = vld [vmem:[#allocation3 + $0x8] sm:$0xff] }
 0xd66   :  { %5503 = vst.msk [vmem:[#allocation3 + $0x18] sm:$0xff] %vm175_vm10, %v5495_v36  ;;  %v5469_v48 = vadd.f32 %v5431_v17, %v15124_v49  ;;  %v5434_v5 = vadd.f32 %v15251_v60, %v5433_v26  ;;  %12144 = vmatprep.mubr.msk.bf16.mxu1 %vm175_vm10, %v15308_v19 }
 0xd67   :  { %v5472_v52 = vadd.f32 %v5442_v22, %v15119_v42  ;;  %12145 = vmatmul.mubr.msk.bf16.vlgmr.msra.gmra.mrb[64].mxu1 %vm175_vm10, %v15318_v40  ;;  %v15326_v30 = vmul.f32 %v5471_v32, %v14267_v8  ;;  %v5509_v32 = vld [vmem:[#allocation3] sm:$0x80]  ;;  %v5530_v22 = vrot.slane %v15308_v19, 7  ;;  %v13213_v19 = vld [vmem:[%s16830_s12 + $0x58] sm:$0xff]  }
 0xd68   :  { %v5470_v38 = vadd.f32 %v5434_v5, %v15126_v35  ;;  %12161 = vmatpush3.bf16.msra.mxu1 %v15248_v55  ;;  %v15335_v42 = vmul.f32 %v5469_v48, %v14243_v58  ;;  %v5529_v26 = vrot.slane %v5509_v32, 7 }
 0xd69   :  { %v15329_v49 = vmul.f32 %v5472_v52, %v14272_v24  ;;  %12162 = vmatprep.subr.bf16.mxu1 %v13211_v3  ;;  %v5532_v52 = vrot.slane %v15318_v40, 7 }
 0xd6a   :  { %v15338_v9 = vmul.f32 %v5470_v38, %v14248_v63  ;;  %v12138_v35 = vpop.f32.mrb[60].mxu1  ;;  %v5531_v5 = vsel %vm403_vm4, %v5529_v26, %v5530_v22 }
 0xd6b   :  { %v5498_v55 = vpack.c.bf16 %v15329_v49, %v15326_v30  ;;  %v5455_v34 = vadd.f32 %v12138_v35, %v15251_v60  ;;  %v5446_v25 = vpop.f32.mrb[61].mxu1  ;;  %v5533_v35 = vsel %vm403_vm4, %v5530_v22, %v5532_v52 }
 0xd6c   :  { %v5497_v45 = vpack.c.bf16 %v15338_v9, %v15335_v42  ;;  %v5447_v33 = vadd.f32 %v15251_v60, %v5446_v25  ;;  %v12139_v29 = vpop.f32.mrb[62].mxu1  ;;  %12163 = vmatpush3.bf16.msra.mxu1 %v13211_v3  ;;  %v15356_v59 = vld [vmem:[#allocation3 + $0x20] sm:$0xff]  ;;  %v5514_v25 = vld [vmem:[#allocation3 + $0x30] sm:$0x80] }
 0xd6d   :  { %5506 = vst.msk [vmem:[#allocation3 + $0x40] sm:$0xff] %vm175_vm10, %v5498_v55  ;;  %v5475_v61 = vadd.f32 %v5455_v34, %v15142_v56  ;;  %v5458_v46 = vadd.f32 %v12139_v29, %v15251_v60  ;;  %v5449_v62 = vpop.f32.mrb[63].mxu1  ;;  %v15349_v7 = vld [vmem:[#allocation3 + $0x18] sm:$0xff]  ;;  %12180 = vmatprep.subr.bf16.mxu1 %v13212_v12  ;;  %v5513_v34 = vld [vmem:[#allocation3 + $0x20] sm:$0x7f]  ;;  %v5538_v29 = vrot.slane %v5514_v25, 7 }
 0xd6e   :  { %5505 = vst.msk [vmem:[#allocation3 + $0x38] sm:$0xff] %vm175_vm10, %v5497_v45  ;;  %v5473_v53 = vadd.f32 %v5447_v33, %v15146_v41  ;;  %v5450_v18 = vadd.f32 %v15251_v60, %v5449_v62  ;;  %12148 = vmatprep.mubr.msk.bf16.mxu1 %vm175_vm10, %v15349_v7  ;;  %v5534_v38 = vrot.slane %v15349_v7, 7  ;;  %v5536_v45 = vrot.slane %v5513_v34, 7 }
 0xd6f   :  { %v5476_v10 = vadd.f32 %v5458_v46, %v15144_v44  ;;  %12149 = vmatmul.mubr.msk.bf16.gmra.mrb[68].mxu1 %vm175_vm10, %v15356_v59  ;;  %v15363_v23 = vmul.f32 %v5475_v61, %v14328_v20  ;;  %v5848_v26 = vrot.slane %v15349_v7, 1 }
 0xd70   :  { %v5474_v56 = vadd.f32 %v5450_v18, %v15148_v21  ;;  %v15369_v41 = vmul.f32 %v5473_v53, %v14293_v43  ;;  %v5535_v55 = vsel %vm403_vm4, %v5532_v52, %v5534_v38  ;;  %v5537_v61 = vsel %vm403_vm4, %v5534_v38, %v5536_v45 }
 0xd71   :  { %v15366_v36 = vmul.f32 %v5476_v10, %v14330_v31 }
 0xd72   :  { %v15372_v60 = vmul.f32 %v5474_v56, %v14302_v50  ;;  %v5825_v56 = vld [vmem:[#allocation3 + $0x8] sm:$0xfe] }
 0xd73   :  { %v5500_v44 = vpack.c.bf16 %v15366_v36, %v15363_v23 }
 0xd74   :  { %v5499_v17 = vpack.c.bf16 %v15372_v60, %v15369_v41  ;;  %v15381_v6 = vld [vmem:[#allocation3 + $0x40] sm:$0xff] }
 0xd75   :  { %5508 = vst.msk [vmem:[#allocation3 + $0x50] sm:$0xff] %vm175_vm10, %v5500_v44  ;;  %v5515_v21 = vld [vmem:[#allocation3 + $0x38] sm:$0xff]  ;;  %v5541_v62 = vrot.slane %v15381_v6, 7  ;;  %v5855_v34 = vrot.slane %v15381_v6, 1 }
 0xd76   :  { %5507 = vst.msk [vmem:[#allocation3 + $0x48] sm:$0xff] %vm175_vm10, %v5499_v17  ;;  %12152 = vmatprep.mubr.msk.bf16.mxu1 %vm175_vm10, %v5515_v21  ;;  %v5539_v33 = vrot.slane %v5515_v21, 7  ;;  %v5845_v17 = vrot.slane %v5825_v56, 1  ;;  %v5846_v21 = vrot.slane %v15318_v40, 1  ;;  %v5830_v40 = vld [vmem:[#allocation3 + $0x38] sm:$0xfe] }
 0xd77   :  { %12153 = vmatmul.mubr.msk.bf16.gmra.mrb[72].mxu1 %vm175_vm10, %v15381_v6 }
 0xd78   :  { %v5540_v46 = vsel %vm403_vm4, %v5538_v29, %v5539_v33  ;;  %v5847_v22 = vsel %vm1231_vm5, %v5845_v17, %v5846_v21  ;;  %v5849_v52 = vsel %vm1231_vm5, %v5846_v21, %v5848_v26 }
 0xd7c   :  { %v15387_v48 = vld [vmem:[#allocation3 + $0x50] sm:$0xff] }
 0xd7d   :  { %v5517_v3 = vld [vmem:[#allocation3 + $0x48] sm:$0xff]  ;;  %v5518_v10 = vld [vmem:[#allocation3 + $0x50] sm:$0x7f]  ;;  %v5859_v45 = vrot.slane %v15387_v48, 1 }
 0xd7e   :  { %12156 = vmatprep.mubr.msk.bf16.mxu1 %vm175_vm10, %v5517_v3  ;;  %v5543_v53 = vrot.slane %v5517_v3, 7  ;;  %v5545_v44 = vrot.slane %v5518_v10, 7 }
 0xd7f   :  { %12157 = vmatmul.mubr.msk.bf16.gmra.mrb[76].mxu1 %vm175_vm10, %v15387_v48  ;;  %v10710_v48 = vld [vmem:[#allocation13 + $0x1] ss:$0 sm:$0xff] }
 0xd80   :  { %12164 = vmatprep.mubr.msk.bf16.mxu1 %vm175_vm10, %v5531_v5  ;;  %v5544_v18 = vsel %vm403_vm4, %v5541_v62, %v5543_v53  ;;  %v5546_v32 = vsel %vm403_vm4, %v5543_v53, %v5545_v44  ;;  %v5850_v5 = vrot.slane %v15356_v59, 1  ;;  %v5857_v59 = vrot.slane %v5517_v3, 1  ;;  %v13216_v3 = vld [vmem:[%s16830_s12 + $0x70] sm:$0xff]  }
 0xd81   :  { %12220 = vmatprep.subr.bf16.mxu0 %v13216_v3 }
 0xd82   :  { %v5851_v38 = vsel %vm1231_vm5, %v5848_v26, %v5850_v5  ;;  %v5860_v29 = vsel %vm1231_vm5, %v5857_v59, %v5859_v45 }
 0xd87   :  { %12165 = vmatmul.mubr.msk.bf16.vlgmr.msra.gmra.mrb[64].mxu1 %vm175_vm10, %v5533_v35 }
 0xd88   :  { %12181 = vmatpush3.bf16.msra.mxu1 %v13212_v12  ;;  %12168 = vmatprep.mubr.msk.bf16.mxu1 %vm175_vm10, %v5535_v55  ;;  %v5542_v12 = vsel %vm403_vm4, %v5539_v33, %v5541_v62  ;;  %v5854_v55 = vrot.slane %v5830_v40, 1  ;;  %v5858_v33 = vsel %vm1231_vm5, %v5855_v34, %v5857_v59 }
 0xd89   :  { %12182 = vmatprep.subr.bf16.mxu1 %v13213_v19 }
 0xd8a   :  { %v5856_v7 = vsel %vm1231_vm5, %v5854_v55, %v5855_v34 }
 0xd8c   :  { %12183 = vmatpush3.bf16.msra.mxu1 %v13213_v19  ;;  %v5829_v19 = vld [vmem:[#allocation3 + $0x28] sm:$0x1] }
 0xd8d   :  { %v5852_v35 = vrot.slane %v5829_v19, 1 }
 0xd8f   :  { %12169 = vmatmul.mubr.msk.bf16.gmra.mrb[68].mxu1 %vm175_vm10, %v5537_v61  ;;  %v5853_v25 = vsel %vm1231_vm5, %v5850_v5, %v5852_v35  ;;  %v5834_v61 = vld [vmem:[#allocation3 + $0x58] sm:$0x1] }
 0xd90   :  { %12172 = vmatprep.mubr.msk.bf16.mxu1 %vm175_vm10, %v5540_v46  ;;  %v5861_v6 = vrot.slane %v5834_v61, 1 }
 0xd92   :  { %v5862_v46 = vsel %vm1231_vm5, %v5859_v45, %v5861_v6 }
 0xd97   :  { %12173 = vmatmul.mubr.msk.bf16.gmra.mrb[72].mxu1 %vm175_vm10, %v5542_v12 }
 0xd98   :  { %12176 = vmatprep.mubr.msk.bf16.mxu1 %vm175_vm10, %v5544_v18 }
 0xd9f   :  { %12177 = vmatmul.mubr.msk.bf16.gmra.mrb[76].mxu1 %vm175_vm10, %v5546_v32 }
 0xda0   :  { %12184 = vmatprep.mubr.msk.bf16.mxu1 %vm175_vm10, %v5847_v22 }
 0xda7   :  { %12185 = vmatmul.mubr.msk.bf16.vlgmr.msra.gmra.mrb[64].mxu1 %vm175_vm10, %v5849_v52 }
 0xda8   :  { %12188 = vmatprep.mubr.msk.bf16.mxu1 %vm175_vm10, %v5851_v38 }
 0xdaf   :  { %12189 = vmatmul.mubr.msk.bf16.gmra.mrb[68].mxu1 %vm175_vm10, %v5853_v25 }
 0xdb0   :  { %12192 = vmatprep.mubr.msk.bf16.mxu1 %vm175_vm10, %v5856_v7 }
 0xdb7   :  { %12193 = vmatmul.mubr.msk.bf16.gmra.mrb[72].mxu1 %vm175_vm10, %v5858_v33 }
 0xdb8   :  { %12196 = vmatprep.mubr.msk.bf16.mxu1 %vm175_vm10, %v5860_v29 }
 0xdbf   :  { %12197 = vmatmul.mubr.msk.bf16.gmra.mrb[76].mxu1 %vm175_vm10, %v5862_v46 }
 0xe7a   :  { %v12186_v62 = vpop.f32.mrb[64].mxu1 }
 0xe7b   :  { %v6027_v53 = vadd.f32 %v12186_v62, %v10710_v48  ;;  %v5938_v12 = vpop.f32.mrb[65].mxu1 }
 0xe7c   :  { %v6025_v18 = vadd.f32 %v10710_v48, %v5938_v12  ;;  %v12187_v10 = vpop.f32.mrb[66].mxu1 }
 0xe7d   :  { %v6028_v56 = vadd.f32 %v12187_v10, %v10710_v48  ;;  %v5941_v44 = vpop.f32.mrb[67].mxu1  ;;  %v6043_v21 = vmax.f32 %v6027_v53, 0.0 }
 0xe7e   :  { %v6026_v17 = vadd.f32 %v10710_v48, %v5941_v44  ;;  %v6041_v22 = vmax.f32 %v6025_v18, 0.0 }
 0xe7f   :  { %v6044_v32 = vmax.f32 %v6028_v56, 0.0 }
 0xe80   :  { %v6042_v26 = vmax.f32 %v6026_v17, 0.0 }
 0xe81   :  { %v6058_v5 = vpack.c.bf16 %v6044_v32, %v6043_v21 }
 0xe82   :  { %v6057_v52 = vpack.c.bf16 %v6042_v26, %v6041_v22  ;;  %v12190_v38 = vpop.f32.mrb[68].mxu1 }
 0xe83   :  { %v6031_v19 = vadd.f32 %v12190_v38, %v10710_v48  ;;  %v5954_v40 = vpop.f32.mrb[69].mxu1 }
 0xe84   :  { %v6029_v35 = vadd.f32 %v10710_v48, %v5954_v40  ;;  %v12191_v55 = vpop.f32.mrb[70].mxu1  ;;  %12204 = vmatprep.mubr.msk.bf16.mxu0 %vm175_vm10, %v6057_v52 }
 0xe85   :  { %v6032_v34 = vadd.f32 %v12191_v55, %v10710_v48  ;;  %v5957_v25 = vpop.f32.mrb[71].mxu1  ;;  %12205 = vmatmul.mubr.msk.bf16.vlgmr.msra.gmra.mrb[112].mxu0 %vm175_vm10, %v6058_v5  ;;  %v6047_v59 = vmax.f32 %v6031_v19, 0.0 }
 0xe86   :  { %v6030_v7 = vadd.f32 %v10710_v48, %v5957_v25  ;;  %12221 = vmatpush3.bf16.msra.mxu0 %v13216_v3  ;;  %v6045_v33 = vmax.f32 %v6029_v35, 0.0 }
 0xe87   :  { %v6048_v45 = vmax.f32 %v6032_v34, 0.0 }
 0xe88   :  { %v6046_v29 = vmax.f32 %v6030_v7, 0.0 }
 0xe89   :  { %v6060_v61 = vpack.c.bf16 %v6048_v45, %v6047_v59 }
 0xe8a   :  { %v6059_v6 = vpack.c.bf16 %v6046_v29, %v6045_v33  ;;  %v12194_v46 = vpop.f32.mrb[72].mxu1 }
 0xe8b   :  { %v6035_v62 = vadd.f32 %v12194_v46, %v10710_v48  ;;  %v5970_v53 = vpop.f32.mrb[73].mxu1  ;;  %v13223_v46 = vld [vmem:[#allocation15 + $0x28] sm:$0xff]  }
 0xe8c   :  { %v6033_v12 = vadd.f32 %v10710_v48, %v5970_v53  ;;  %v12195_v18 = vpop.f32.mrb[74].mxu1  ;;  %12208 = vmatprep.mubr.msk.bf16.mxu0 %vm175_vm10, %v6059_v6  ;;  %v13222_v6 = vld [vmem:[#allocation15 + $0x20] sm:$0xff]  }
 0xe8d   :  { %v6036_v10 = vadd.f32 %v12195_v18, %v10710_v48  ;;  %v5973_v56 = vpop.f32.mrb[75].mxu1  ;;  %12209 = vmatmul.mubr.msk.bf16.gmra.mrb[116].mxu0 %vm175_vm10, %v6060_v61  ;;  %v6051_v17 = vmax.f32 %v6035_v62, 0.0  ;;  %v13217_v61 = vld [vmem:[%s16830_s12 + $0x78] sm:$0xff]   ;;  %12280 = vmatprep.subr.bf16.mxu1 %v13222_v6 }
 0xe8e   :  { %v6034_v44 = vadd.f32 %v10710_v48, %v5973_v56  ;;  %v6049_v21 = vmax.f32 %v6033_v12, 0.0  ;;  %12222 = vmatprep.subr.bf16.mxu0 %v13217_v61  ;;  %12281 = vmatpush3.bf16.msra.mxu1 %v13222_v6  ;;  %v15454_v62 = vld [vmem:[#allocation16 + $0x1] ss:$0 sm:$0xff] }
 0xe8f   :  { %v6052_v3 = vmax.f32 %v6036_v10, 0.0  ;;  %12223 = vmatpush3.bf16.msra.mxu0 %v13217_v61  ;;  %12282 = vmatprep.subr.bf16.mxu1 %v13223_v46 }
 0xe90   :  { %v6050_v32 = vmax.f32 %v6034_v44, 0.0 }
 0xe91   :  { %v6062_v22 = vpack.c.bf16 %v6052_v3, %v6051_v17 }
 0xe92   :  { %v6061_v26 = vpack.c.bf16 %v6050_v32, %v6049_v21  ;;  %v12198_v5 = vpop.f32.mrb[76].mxu1  ;;  %12283 = vmatpush3.bf16.msra.mxu1 %v13223_v46 }
 0xe93   :  { %v6039_v52 = vadd.f32 %v12198_v5, %v10710_v48  ;;  %v5986_v38 = vpop.f32.mrb[77].mxu1 }
 0xe94   :  { %v6037_v19 = vadd.f32 %v10710_v48, %v5986_v38  ;;  %v12199_v40 = vpop.f32.mrb[78].mxu1  ;;  %12212 = vmatprep.mubr.msk.bf16.mxu0 %vm175_vm10, %v6061_v26 }
 0xe95   :  { %v6040_v35 = vadd.f32 %v12199_v40, %v10710_v48  ;;  %v5989_v55 = vpop.f32.mrb[79].mxu1  ;;  %12213 = vmatmul.mubr.msk.bf16.gmra.mrb[120].mxu0 %vm175_vm10, %v6062_v22  ;;  %v6055_v25 = vmax.f32 %v6039_v52, 0.0 }
 0xe96   :  { %v6038_v34 = vadd.f32 %v10710_v48, %v5989_v55  ;;  %v6053_v59 = vmax.f32 %v6037_v19, 0.0  ;;  %v15451_v48 = vld [vmem:[%s16830_s12 + $0x60] sm:$0xff]  }
 0xe97   :  { %v6056_v7 = vmax.f32 %v6040_v35, 0.0  ;;  %12240 = vmatprep.subr.bf16.mxu0 %v15451_v48 }
 0xe98   :  { %v6054_v45 = vmax.f32 %v6038_v34, 0.0 }
 0xe99   :  { %v6064_v33 = vpack.c.bf16 %v6056_v7, %v6055_v25 }
 0xe9a   :  { %v6063_v29 = vpack.c.bf16 %v6054_v45, %v6053_v59 }
 0xe9c   :  { %12216 = vmatprep.mubr.msk.bf16.mxu0 %vm175_vm10, %v6063_v29 }
 0xe9d   :  { %12217 = vmatmul.mubr.msk.bf16.gmra.mrb[124].mxu0 %vm175_vm10, %v6064_v33 }
 0xf58   :  { %v12206_v53 = vpop.f32.mrb[112].mxu0 }
 0xf59   :  { %v6157_v12 = vadd.f32 %v12206_v53, %v15454_v62  ;;  %v6148_v18 = vpop.f32.mrb[113].mxu0 }
 0xf5a   :  { %v6149_v10 = vadd.f32 %v15454_v62, %v6148_v18  ;;  %v12207_v56 = vpop.f32.mrb[114].mxu0 }
 0xf5b   :  { %v6213_v44 = vadd.f32 %v6157_v12, %v15262_v28  ;;  %v6160_v17 = vadd.f32 %v12207_v56, %v15454_v62  ;;  %v6151_v3 = vpop.f32.mrb[115].mxu0 }
 0xf5c   :  { %v6211_v21 = vadd.f32 %v6149_v10, %v15268_v11  ;;  %v6152_v32 = vadd.f32 %v15454_v62, %v6151_v3 }
 0xf5d   :  { %v6214_v22 = vadd.f32 %v6160_v17, %v15265_v37  ;;  %v15465_v5 = vmul.f32 %v6213_v44, %v14201_v2 }
 0xf5e   :  { %v6212_v26 = vadd.f32 %v6152_v32, %v15271_v4  ;;  %v15471_v38 = vmul.f32 %v6211_v21, %v14199_v1  ;;  %v13219_v21 = vld [vmem:[%s16830_s12 + $0x68] sm:$0xff]  }
 0xf5f   :  { %v15468_v52 = vmul.f32 %v6214_v22, %v14205_v14 }
 0xf60   :  { %v15474_v28 = vmul.f32 %v6212_v26, %v14203_v54  ;;  %v12210_v19 = vpop.f32.mrb[116].mxu0 }
 0xf61   :  { %v6244_v11 = vpack.c.bf16 %v15468_v52, %v15465_v5  ;;  %v6173_v37 = vadd.f32 %v12210_v19, %v15454_v62  ;;  %v6164_v40 = vpop.f32.mrb[117].mxu0 }
 0xf62   :  { %v6243_v4 = vpack.c.bf16 %v15474_v28, %v15471_v38  ;;  %v6165_v35 = vadd.f32 %v15454_v62, %v6164_v40  ;;  %v12211_v55 = vpop.f32.mrb[118].mxu0 }
 0xf63   :  { %6252 = vst.msk [vmem:[#allocation3 + $0x10] sm:$0xff] %vm175_vm10, %v6244_v11  ;;  %v6217_v34 = vadd.f32 %v6173_v37, %v15288_v57  ;;  %v6176_v25 = vadd.f32 %v12211_v55, %v15454_v62  ;;  %v6167_v7 = vpop.f32.mrb[119].mxu0  ;;  %v13220_v37 = vld [vmem:[%s16830_s12 + $0x80] sm:$0xff]  }
 0xf64   :  { %6251 = vst.msk [vmem:[#allocation3 + $0x8] sm:$0xff] %vm175_vm10, %v6243_v4  ;;  %v6215_v59 = vadd.f32 %v6165_v35, %v15294_v51  ;;  %v6168_v45 = vadd.f32 %v15454_v62, %v6167_v7 }
 0xf65   :  { %v6218_v33 = vadd.f32 %v6176_v25, %v15291_v47  ;;  %v15491_v61 = vmul.f32 %v6217_v34, %v14219_v27 }
 0xf66   :  { %v6216_v29 = vadd.f32 %v6168_v45, %v15297_v39  ;;  %v15497_v57 = vmul.f32 %v6215_v59, %v14209_v15 }
 0xf67   :  { %v15494_v6 = vmul.f32 %v6218_v33, %v14222_v13 }
 0xf68   :  { %v15500_v46 = vmul.f32 %v6216_v29, %v14211_v16  ;;  %v12214_v53 = vpop.f32.mrb[120].mxu0 }
 0xf69   :  { %v6246_v51 = vpack.c.bf16 %v15494_v6, %v15491_v61  ;;  %v6189_v47 = vadd.f32 %v12214_v53, %v15454_v62  ;;  %v6180_v12 = vpop.f32.mrb[121].mxu0 }
 0xf6a   :  { %v6245_v39 = vpack.c.bf16 %v15500_v46, %v15497_v57  ;;  %v6181_v18 = vadd.f32 %v15454_v62, %v6180_v12  ;;  %v12215_v10 = vpop.f32.mrb[122].mxu0  ;;  %v15521_v26 = vld [vmem:[#allocation3 + $0x10] sm:$0xff] }
 0xf6b   :  { %6254 = vst.msk [vmem:[#allocation3 + $0x20] sm:$0xff] %vm175_vm10, %v6246_v51  ;;  %v6221_v56 = vadd.f32 %v6189_v47, %v15326_v30  ;;  %v6192_v44 = vadd.f32 %v12215_v10, %v15454_v62  ;;  %v6183_v17 = vpop.f32.mrb[123].mxu0  ;;  %v15511_v3 = vld [vmem:[#allocation3 + $0x8] sm:$0xff] }
 0xf6c   :  { %6253 = vst.msk [vmem:[#allocation3 + $0x18] sm:$0xff] %vm175_vm10, %v6245_v39  ;;  %v6219_v32 = vadd.f32 %v6181_v18, %v15335_v42  ;;  %v6184_v22 = vadd.f32 %v15454_v62, %v6183_v17  ;;  %12224 = vmatprep.mubr.msk.bf16.mxu0 %vm175_vm10, %v15511_v3 }
 0xf6d   :  { %v6222_v30 = vadd.f32 %v6192_v44, %v15329_v49  ;;  %12225 = vmatmul.mubr.msk.bf16.vlgmr.msra.gmra.mrb[128].mxu0 %vm175_vm10, %v15521_v26  ;;  %v15529_v11 = vmul.f32 %v6221_v56, %v14267_v8  ;;  %v6259_v56 = vld [vmem:[#allocation3] sm:$0xc0]  ;;  %v6280_v44 = vrot.slane %v15511_v3, 6  ;;  %v13221_v3 = vld [vmem:[%s16830_s12 + $0x88] sm:$0xff]  }
 0xf6e   :  { %v6220_v19 = vadd.f32 %v6184_v22, %v15338_v9  ;;  %12241 = vmatpush3.bf16.msra.mxu0 %v15451_v48  ;;  %v15538_v49 = vmul.f32 %v6219_v32, %v14243_v58  ;;  %v6279_v17 = vrot.slane %v6259_v56, 6 }
 0xf6f   :  { %v15532_v42 = vmul.f32 %v6222_v30, %v14272_v24  ;;  %12242 = vmatprep.subr.bf16.mxu0 %v13219_v21  ;;  %v6282_v30 = vrot.slane %v15521_v26, 6 }
 0xf70   :  { %v15541_v40 = vmul.f32 %v6220_v19, %v14248_v63  ;;  %v12218_v9 = vpop.f32.mrb[124].mxu0  ;;  %v6281_v22 = vsel %vm1775_vm6, %v6279_v17, %v6280_v44 }
 0xf71   :  { %v6248_v48 = vpack.c.bf16 %v15532_v42, %v15529_v11  ;;  %v6205_v4 = vadd.f32 %v12218_v9, %v15454_v62  ;;  %v6196_v35 = vpop.f32.mrb[125].mxu0  ;;  %v6283_v9 = vsel %vm1775_vm6, %v6280_v44, %v6282_v30 }
 0xf72   :  { %v6247_v55 = vpack.c.bf16 %v15541_v40, %v15538_v49  ;;  %v6197_v34 = vadd.f32 %v15454_v62, %v6196_v35  ;;  %v12219_v25 = vpop.f32.mrb[126].mxu0  ;;  %12243 = vmatpush3.bf16.msra.mxu0 %v13219_v21  ;;  %v15559_v51 = vld [vmem:[#allocation3 + $0x20] sm:$0xff]  ;;  %v6264_v35 = vld [vmem:[#allocation3 + $0x30] sm:$0xc0] }
 0xf73   :  { %6256 = vst.msk [vmem:[#allocation3 + $0x40] sm:$0xff] %vm175_vm10, %v6248_v48  ;;  %v6225_v7 = vadd.f32 %v6205_v4, %v15363_v23  ;;  %v6208_v59 = vadd.f32 %v12219_v25, %v15454_v62  ;;  %v6199_v45 = vpop.f32.mrb[127].mxu0  ;;  %v15552_v33 = vld [vmem:[#allocation3 + $0x18] sm:$0xff]  ;;  %12260 = vmatprep.subr.bf16.mxu0 %v13220_v37  ;;  %v6263_v4 = vld [vmem:[#allocation3 + $0x20] sm:$0x3f]  ;;  %v6288_v25 = vrot.slane %v6264_v35, 6 }
 0xf74   :  { %6255 = vst.msk [vmem:[#allocation3 + $0x38] sm:$0xff] %vm175_vm10, %v6247_v55  ;;  %v6223_v29 = vadd.f32 %v6197_v34, %v15369_v41  ;;  %v6200_v53 = vadd.f32 %v15454_v62, %v6199_v45  ;;  %12228 = vmatprep.mubr.msk.bf16.mxu0 %vm175_vm10, %v15552_v33  ;;  %v6284_v19 = vrot.slane %v15552_v33, 6  ;;  %v6286_v55 = vrot.slane %v6263_v4, 6 }
 0xf75   :  { %v6226_v47 = vadd.f32 %v6208_v59, %v15366_v36  ;;  %12229 = vmatmul.mubr.msk.bf16.gmra.mrb[132].mxu0 %vm175_vm10, %v15559_v51  ;;  %v15566_v12 = vmul.f32 %v6225_v7, %v14328_v20  ;;  %v6598_v17 = vrot.slane %v15552_v33, 2 }
 0xf76   :  { %v6224_v23 = vadd.f32 %v6200_v53, %v15372_v60  ;;  %v15572_v41 = vmul.f32 %v6223_v29, %v14293_v43  ;;  %v6285_v48 = vsel %vm1775_vm6, %v6282_v30, %v6284_v19  ;;  %v6287_v7 = vsel %vm1775_vm6, %v6284_v19, %v6286_v55 }
 0xf77   :  { %v15569_v39 = vmul.f32 %v6226_v47, %v14330_v31 }
 0xf78   :  { %v15575_v62 = vmul.f32 %v6224_v23, %v14302_v50  ;;  %v6575_v23 = vld [vmem:[#allocation3 + $0x8] sm:$0xfc] }
 0xf79   :  { %v6250_v36 = vpack.c.bf16 %v15569_v39, %v15566_v12 }
 0xf7a   :  { %v6249_v18 = vpack.c.bf16 %v15575_v62, %v15572_v41  ;;  %v15584_v10 = vld [vmem:[#allocation3 + $0x40] sm:$0xff] }
 0xf7b   :  { %6258 = vst.msk [vmem:[#allocation3 + $0x50] sm:$0xff] %vm175_vm10, %v6250_v36  ;;  %v6265_v60 = vld [vmem:[#allocation3 + $0x38] sm:$0xff]  ;;  %v6291_v45 = vrot.slane %v15584_v10, 6  ;;  %v6605_v4 = vrot.slane %v15584_v10, 2 }
 0xf7c   :  { %6257 = vst.msk [vmem:[#allocation3 + $0x48] sm:$0xff] %vm175_vm10, %v6249_v18  ;;  %12232 = vmatprep.mubr.msk.bf16.mxu0 %vm175_vm10, %v6265_v60  ;;  %v6289_v34 = vrot.slane %v6265_v60, 6  ;;  %v6595_v18 = vrot.slane %v6575_v23, 2  ;;  %v6596_v60 = vrot.slane %v15521_v26, 2  ;;  %v6580_v26 = vld [vmem:[#allocation3 + $0x38] sm:$0xfc] }
 0xf7d   :  { %12233 = vmatmul.mubr.msk.bf16.gmra.mrb[136].mxu0 %vm175_vm10, %v15584_v10 }
 0xf7e   :  { %v6290_v59 = vsel %vm1775_vm6, %v6288_v25, %v6289_v34  ;;  %v6597_v44 = vsel %vm2516_vm7, %v6595_v18, %v6596_v60  ;;  %v6599_v30 = vsel %vm2516_vm7, %v6596_v60, %v6598_v17 }
 0xf82   :  { %v15590_v32 = vld [vmem:[#allocation3 + $0x50] sm:$0xff] }
 0xf83   :  { %v6267_v21 = vld [vmem:[#allocation3 + $0x48] sm:$0xff]  ;;  %v6268_v47 = vld [vmem:[#allocation3 + $0x50] sm:$0x3f]  ;;  %v6609_v55 = vrot.slane %v15590_v32, 2 }
 0xf84   :  { %12236 = vmatprep.mubr.msk.bf16.mxu0 %vm175_vm10, %v6267_v21  ;;  %v6293_v29 = vrot.slane %v6267_v21, 6  ;;  %v6295_v36 = vrot.slane %v6268_v47, 6 }
 0xf85   :  { %12237 = vmatmul.mubr.msk.bf16.gmra.mrb[140].mxu0 %vm175_vm10, %v15590_v32  ;;  %v10764_v32 = vld [vmem:[#allocation13 + $0x2] ss:$0 sm:$0xff] }
 0xf86   :  { %12244 = vmatprep.mubr.msk.bf16.mxu0 %vm175_vm10, %v6281_v22  ;;  %v6294_v53 = vsel %vm1775_vm6, %v6291_v45, %v6293_v29  ;;  %v6296_v56 = vsel %vm1775_vm6, %v6293_v29, %v6295_v36  ;;  %v6600_v22 = vrot.slane %v15559_v51, 2  ;;  %v6607_v51 = vrot.slane %v6267_v21, 2  ;;  %v13224_v21 = vld [vmem:[%s16834_s16] sm:$0xff]  }
 0xf87   :  { %12300 = vmatprep.subr.bf16.mxu1 %v13224_v21 }
 0xf88   :  { %v6601_v19 = vsel %vm2516_vm7, %v6598_v17, %v6600_v22  ;;  %v6610_v25 = vsel %vm2516_vm7, %v6607_v51, %v6609_v55 }
 0xf8d   :  { %12245 = vmatmul.mubr.msk.bf16.vlgmr.msra.gmra.mrb[128].mxu0 %vm175_vm10, %v6283_v9 }
 0xf8e   :  { %12261 = vmatpush3.bf16.msra.mxu0 %v13220_v37  ;;  %12248 = vmatprep.mubr.msk.bf16.mxu0 %vm175_vm10, %v6285_v48  ;;  %v6292_v37 = vsel %vm1775_vm6, %v6289_v34, %v6291_v45  ;;  %v6604_v48 = vrot.slane %v6580_v26, 2  ;;  %v6608_v34 = vsel %vm2516_vm7, %v6605_v4, %v6607_v51 }
 0xf8f   :  { %12262 = vmatprep.subr.bf16.mxu0 %v13221_v3 }
 0xf90   :  { %v6606_v33 = vsel %vm2516_vm7, %v6604_v48, %v6605_v4 }
 0xf92   :  { %12263 = vmatpush3.bf16.msra.mxu0 %v13221_v3  ;;  %v6579_v3 = vld [vmem:[#allocation3 + $0x28] sm:$0x3] }
 0xf93   :  { %v6602_v9 = vrot.slane %v6579_v3, 2 }
 0xf95   :  { %12249 = vmatmul.mubr.msk.bf16.gmra.mrb[132].mxu0 %vm175_vm10, %v6287_v7  ;;  %v6603_v35 = vsel %vm2516_vm7, %v6600_v22, %v6602_v9  ;;  %v6584_v7 = vld [vmem:[#allocation3 + $0x58] sm:$0x3]  ;;  %v13225_v9 = vld [vmem:[%s16834_s16 + $0x8] sm:$0xff]  }
 0xf96   :  { %12252 = vmatprep.mubr.msk.bf16.mxu0 %vm175_vm10, %v6290_v59  ;;  %v6611_v10 = vrot.slane %v6584_v7, 2 }
 0xf98   :  { %v6612_v59 = vsel %vm2516_vm7, %v6609_v55, %v6611_v10 }
 0xf9d   :  { %12253 = vmatmul.mubr.msk.bf16.gmra.mrb[136].mxu0 %vm175_vm10, %v6292_v37 }
 0xf9e   :  { %12256 = vmatprep.mubr.msk.bf16.mxu0 %vm175_vm10, %v6294_v53 }
 0xfa5   :  { %12257 = vmatmul.mubr.msk.bf16.gmra.mrb[140].mxu0 %vm175_vm10, %v6296_v56 }
 0xfa6   :  { %12264 = vmatprep.mubr.msk.bf16.mxu0 %vm175_vm10, %v6597_v44 }
 0xfad   :  { %12265 = vmatmul.mubr.msk.bf16.vlgmr.msra.gmra.mrb[128].mxu0 %vm175_vm10, %v6599_v30 }
 0xfae   :  { %12268 = vmatprep.mubr.msk.bf16.mxu0 %vm175_vm10, %v6601_v19 }
 0xfb5   :  { %12269 = vmatmul.mubr.msk.bf16.gmra.mrb[132].mxu0 %vm175_vm10, %v6603_v35 }
 0xfb6   :  { %12272 = vmatprep.mubr.msk.bf16.mxu0 %vm175_vm10, %v6606_v33 }
 0xfbd   :  { %12273 = vmatmul.mubr.msk.bf16.gmra.mrb[136].mxu0 %vm175_vm10, %v6608_v34 }
 0xfbe   :  { %12276 = vmatprep.mubr.msk.bf16.mxu0 %vm175_vm10, %v6610_v25 }
 0xfc5   :  { %12277 = vmatmul.mubr.msk.bf16.gmra.mrb[140].mxu0 %vm175_vm10, %v6612_v59 }
0x1080   :  { %v12266_v45 = vpop.f32.mrb[128].mxu0 }
0x1081   :  { %v6777_v29 = vadd.f32 %v12266_v45, %v10764_v32  ;;  %v6688_v37 = vpop.f32.mrb[129].mxu0 }
0x1082   :  { %v6775_v53 = vadd.f32 %v10764_v32, %v6688_v37  ;;  %v12267_v47 = vpop.f32.mrb[130].mxu0 }
0x1083   :  { %v6778_v23 = vadd.f32 %v12267_v47, %v10764_v32  ;;  %v6691_v36 = vpop.f32.mrb[131].mxu0  ;;  %v6793_v60 = vmax.f32 %v6777_v29, 0.0 }
0x1084   :  { %v6776_v18 = vadd.f32 %v10764_v32, %v6691_v36  ;;  %v6791_v44 = vmax.f32 %v6775_v53, 0.0 }
0x1085   :  { %v6794_v56 = vmax.f32 %v6778_v23, 0.0 }
0x1086   :  { %v6792_v17 = vmax.f32 %v6776_v18, 0.0 }
0x1087   :  { %v6808_v22 = vpack.c.bf16 %v6794_v56, %v6793_v60 }
0x1088   :  { %v6807_v30 = vpack.c.bf16 %v6792_v17, %v6791_v44  ;;  %v12270_v19 = vpop.f32.mrb[132].mxu0 }
0x1089   :  { %v6781_v3 = vadd.f32 %v12270_v19, %v10764_v32  ;;  %v6704_v26 = vpop.f32.mrb[133].mxu0 }
0x108a   :  { %v6779_v48 = vadd.f32 %v10764_v32, %v6704_v26  ;;  %v12271_v4 = vpop.f32.mrb[134].mxu0  ;;  %12284 = vmatprep.mubr.msk.bf16.mxu1 %vm175_vm10, %v6807_v30 }
0x108b   :  { %v6782_v35 = vadd.f32 %v12271_v4, %v10764_v32  ;;  %v6707_v33 = vpop.f32.mrb[135].mxu0  ;;  %12285 = vmatmul.mubr.msk.bf16.vlgmr.msra.gmra.mrb[80].mxu1 %vm175_vm10, %v6808_v22  ;;  %v6797_v55 = vmax.f32 %v6781_v3, 0.0 }
0x108c   :  { %v6780_v51 = vadd.f32 %v10764_v32, %v6707_v33  ;;  %12301 = vmatpush3.bf16.msra.mxu1 %v13224_v21  ;;  %v6795_v25 = vmax.f32 %v6779_v48, 0.0 }
0x108d   :  { %v6798_v34 = vmax.f32 %v6782_v35, 0.0  ;;  %12302 = vmatprep.subr.bf16.mxu1 %v13225_v9 }
0x108e   :  { %v6796_v7 = vmax.f32 %v6780_v51, 0.0 }
0x108f   :  { %v6810_v10 = vpack.c.bf16 %v6798_v34, %v6797_v55 }
0x1090   :  { %v6809_v59 = vpack.c.bf16 %v6796_v7, %v6795_v25  ;;  %v12274_v45 = vpop.f32.mrb[136].mxu0  ;;  %12303 = vmatpush3.bf16.msra.mxu1 %v13225_v9 }
0x1091   :  { %v6785_v29 = vadd.f32 %v12274_v45, %v10764_v32  ;;  %v6720_v37 = vpop.f32.mrb[137].mxu0 }
0x1092   :  { %v6783_v53 = vadd.f32 %v10764_v32, %v6720_v37  ;;  %v12275_v47 = vpop.f32.mrb[138].mxu0  ;;  %12288 = vmatprep.mubr.msk.bf16.mxu1 %vm175_vm10, %v6809_v59 }
0x1093   :  { %v6786_v23 = vadd.f32 %v12275_v47, %v10764_v32  ;;  %v6723_v36 = vpop.f32.mrb[139].mxu0  ;;  %12289 = vmatmul.mubr.msk.bf16.gmra.mrb[84].mxu1 %vm175_vm10, %v6810_v10  ;;  %v6801_v18 = vmax.f32 %v6785_v29, 0.0  ;;  %v15651_v10 = vld [vmem:[#allocation16 + $0x2] ss:$0 sm:$0xff] }
0x1094   :  { %v6784_v21 = vadd.f32 %v10764_v32, %v6723_v36  ;;  %v6799_v56 = vmax.f32 %v6783_v53, 0.0 }
0x1095   :  { %v6802_v60 = vmax.f32 %v6786_v23, 0.0 }
0x1096   :  { %v6800_v44 = vmax.f32 %v6784_v21, 0.0 }
0x1097   :  { %v6812_v17 = vpack.c.bf16 %v6802_v60, %v6801_v18 }
0x1098   :  { %v6811_v22 = vpack.c.bf16 %v6800_v44, %v6799_v56  ;;  %v12278_v30 = vpop.f32.mrb[140].mxu0 }
0x1099   :  { %v6789_v19 = vadd.f32 %v12278_v30, %v10764_v32  ;;  %v6736_v3 = vpop.f32.mrb[141].mxu0 }
0x109a   :  { %v6787_v26 = vadd.f32 %v10764_v32, %v6736_v3  ;;  %v12279_v9 = vpop.f32.mrb[142].mxu0  ;;  %12292 = vmatprep.mubr.msk.bf16.mxu1 %vm175_vm10, %v6811_v22 }
0x109b   :  { %v6790_v48 = vadd.f32 %v12279_v9, %v10764_v32  ;;  %v6739_v4 = vpop.f32.mrb[143].mxu0  ;;  %12293 = vmatmul.mubr.msk.bf16.gmra.mrb[88].mxu1 %vm175_vm10, %v6812_v17  ;;  %v6805_v33 = vmax.f32 %v6789_v19, 0.0 }
0x109c   :  { %v6788_v35 = vadd.f32 %v10764_v32, %v6739_v4  ;;  %v6803_v55 = vmax.f32 %v6787_v26, 0.0 }
0x109d   :  { %v6806_v51 = vmax.f32 %v6790_v48, 0.0 }
0x109e   :  { %v6804_v34 = vmax.f32 %v6788_v35, 0.0 }
0x109f   :  { %v6814_v25 = vpack.c.bf16 %v6806_v51, %v6805_v33 }
0x10a0   :  { %v6813_v7 = vpack.c.bf16 %v6804_v34, %v6803_v55 }
0x10a2   :  { %12296 = vmatprep.mubr.msk.bf16.mxu1 %vm175_vm10, %v6813_v7 }
0x10a3   :  { %12297 = vmatmul.mubr.msk.bf16.gmra.mrb[92].mxu1 %vm175_vm10, %v6814_v25 }
0x115e   :  { %v12286_v59 = vpop.f32.mrb[80].mxu1 }
0x115f   :  { %v6907_v45 = vadd.f32 %v12286_v59, %v15651_v10  ;;  %v6898_v29 = vpop.f32.mrb[81].mxu1 }
0x1160   :  { %v6899_v37 = vadd.f32 %v15651_v10, %v6898_v29  ;;  %v12287_v53 = vpop.f32.mrb[82].mxu1 }
0x1161   :  { %v6963_v32 = vadd.f32 %v6907_v45, %v15465_v5  ;;  %v6910_v47 = vadd.f32 %v12287_v53, %v15651_v10  ;;  %v6901_v23 = vpop.f32.mrb[83].mxu1 }
0x1162   :  { %v6961_v36 = vadd.f32 %v6899_v37, %v15471_v38  ;;  %v6902_v21 = vadd.f32 %v15651_v10, %v6901_v23 }
0x1163   :  { %v6964_v18 = vadd.f32 %v6910_v47, %v15468_v52  ;;  %v6979_v56 = vmul.f32 %v6963_v32, %v14201_v2 }
0x1164   :  { %v6962_v60 = vadd.f32 %v6902_v21, %v15474_v28  ;;  %v6977_v17 = vmul.f32 %v6961_v36, %v14199_v1 }
0x1165   :  { %v6980_v44 = vmul.f32 %v6964_v18, %v14205_v14 }
0x1166   :  { %v6978_v22 = vmul.f32 %v6962_v60, %v14203_v54  ;;  %v12290_v5 = vpop.f32.mrb[84].mxu1 }
0x1167   :  { %v6994_v30 = vpack.c.bf16 %v6980_v44, %v6979_v56  ;;  %v6923_v19 = vadd.f32 %v12290_v5, %v15651_v10  ;;  %v6914_v3 = vpop.f32.mrb[85].mxu1 }
0x1168   :  { %v6993_v38 = vpack.c.bf16 %v6978_v22, %v6977_v17  ;;  %v6915_v26 = vadd.f32 %v15651_v10, %v6914_v3  ;;  %v12291_v9 = vpop.f32.mrb[86].mxu1 }
0x1169   :  { %v6967_v52 = vadd.f32 %v6923_v19, %v15491_v61  ;;  %v6926_v28 = vadd.f32 %v12291_v9, %v15651_v10  ;;  %v6917_v48 = vpop.f32.mrb[87].mxu1 }
0x116a   :  { %v6965_v4 = vadd.f32 %v6915_v26, %v15497_v57  ;;  %v6918_v35 = vadd.f32 %v15651_v10, %v6917_v48  ;;  %12304 = vmatprep.mubr.msk.bf16.mxu1 %vm175_vm10, %v6993_v38 }
0x116b   :  { %v6968_v33 = vadd.f32 %v6926_v28, %v15494_v6  ;;  %12305 = vmatmul.mubr.msk.bf16.vlgmr.msra.gmra.mrb[96].mxu1 %vm175_vm10, %v6994_v30  ;;  %v6983_v55 = vmul.f32 %v6967_v52, %v14219_v27 }
0x116c   :  { %v6966_v51 = vadd.f32 %v6918_v35, %v15500_v46  ;;  %v6981_v61 = vmul.f32 %v6965_v4, %v14209_v15 }
0x116d   :  { %v6984_v34 = vmul.f32 %v6968_v33, %v14222_v13 }
0x116e   :  { %v6982_v25 = vmul.f32 %v6966_v51, %v14211_v16  ;;  %v12294_v7 = vpop.f32.mrb[88].mxu1 }
0x116f   :  { %v6996_v57 = vpack.c.bf16 %v6984_v34, %v6983_v55  ;;  %v6939_v59 = vadd.f32 %v12294_v7, %v15651_v10  ;;  %v6930_v45 = vpop.f32.mrb[89].mxu1 }
0x1170   :  { %v6995_v29 = vpack.c.bf16 %v6982_v25, %v6981_v61  ;;  %v6931_v6 = vadd.f32 %v15651_v10, %v6930_v45  ;;  %v12295_v37 = vpop.f32.mrb[90].mxu1 }
0x1171   :  { %v6971_v53 = vadd.f32 %v6939_v59, %v15529_v11  ;;  %v6942_v46 = vadd.f32 %v12295_v37, %v15651_v10  ;;  %v6933_v32 = vpop.f32.mrb[91].mxu1 }
0x1172   :  { %v6969_v47 = vadd.f32 %v6931_v6, %v15538_v49  ;;  %v6934_v23 = vadd.f32 %v15651_v10, %v6933_v32  ;;  %12308 = vmatprep.mubr.msk.bf16.mxu1 %vm175_vm10, %v6995_v29 }
0x1173   :  { %v6972_v36 = vadd.f32 %v6942_v46, %v15532_v42  ;;  %12309 = vmatmul.mubr.msk.bf16.gmra.mrb[100].mxu1 %vm175_vm10, %v6996_v57  ;;  %v6987_v18 = vmul.f32 %v6971_v53, %v14267_v8 }
0x1174   :  { %v6970_v21 = vadd.f32 %v6934_v23, %v15541_v40  ;;  %v6985_v11 = vmul.f32 %v6969_v47, %v14243_v58 }
0x1175   :  { %v6988_v60 = vmul.f32 %v6972_v36, %v14272_v24 }
0x1176   :  { %v6986_v56 = vmul.f32 %v6970_v21, %v14248_v63  ;;  %v12298_v44 = vpop.f32.mrb[92].mxu1 }
0x1177   :  { %v6998_v49 = vpack.c.bf16 %v6988_v60, %v6987_v18  ;;  %v6955_v17 = vadd.f32 %v12298_v44, %v15651_v10  ;;  %v6946_v22 = vpop.f32.mrb[93].mxu1 }
0x1178   :  { %v6997_v5 = vpack.c.bf16 %v6986_v56, %v6985_v11  ;;  %v6947_v42 = vadd.f32 %v15651_v10, %v6946_v22  ;;  %v12299_v30 = vpop.f32.mrb[94].mxu1 }
0x1179   :  { %v6975_v19 = vadd.f32 %v6955_v17, %v15566_v12  ;;  %v6958_v40 = vadd.f32 %v12299_v30, %v15651_v10  ;;  %v6949_v3 = vpop.f32.mrb[95].mxu1 }
0x117a   :  { %v6973_v38 = vadd.f32 %v6947_v42, %v15572_v41  ;;  %v6950_v26 = vadd.f32 %v15651_v10, %v6949_v3  ;;  %12312 = vmatprep.mubr.msk.bf16.mxu1 %vm175_vm10, %v6997_v5 }
0x117b   :  { %v6976_v9 = vadd.f32 %v6958_v40, %v15569_v39  ;;  %12313 = vmatmul.mubr.msk.bf16.gmra.mrb[104].mxu1 %vm175_vm10, %v6998_v49  ;;  %v6991_v28 = vmul.f32 %v6975_v19, %v14328_v20  ;;  %v15712_v39 = vld [vmem:[%s16835_s17] ss:$0 sm:$0xff] }
0x117c   :  { %v6974_v52 = vadd.f32 %v6950_v26, %v15575_v62  ;;  %v6989_v12 = vmul.f32 %v6973_v38, %v14293_v43 }
0x117d   :  { %v6992_v48 = vmul.f32 %v6976_v9, %v14330_v31 }
0x117e   :  { %v6990_v4 = vmul.f32 %v6974_v52, %v14302_v50 }
0x117f   :  { %v7000_v35 = vpack.c.bf16 %v6992_v48, %v6991_v28 }
0x1180   :  { %v6999_v41 = vpack.c.bf16 %v6990_v4, %v6989_v12 }
0x1182   :  { %12316 = vmatprep.mubr.msk.bf16.mxu1 %vm175_vm10, %v6999_v41 }
0x1183   :  { %12317 = vmatmul.mubr.msk.bf16.gmra.mrb[108].mxu1 %vm175_vm10, %v7000_v35 }
0x123e   :  { %v12306_v62 = vpop.f32.mrb[96].mxu1 }
0x123f   :  { %v7077_v10 = vpop.f32.mrb[97].mxu1  ;;  %v7086_v33 = vadd.f32 %v12306_v62, %v15712_v39 }
0x1240   :  { %v7078_v51 = vadd.f32 %v15712_v39, %v7077_v10  ;;  %v12307_v55 = vpop.f32.mrb[98].mxu1 }
0x1241   :  { %v7080_v34 = vpop.f32.mrb[99].mxu1  ;;  %v7089_v25 = vadd.f32 %v12307_v55, %v15712_v39  ;;  %v15722_v57 = vmul.f32 %v7086_v33, %v14201_v2 }
0x1242   :  { %v15717_v61 = vmul.f32 %v7078_v51, %v14199_v1  ;;  %v7081_v7 = vadd.f32 %v15712_v39, %v7080_v34 }
0x1243   :  { %v15730_v29 = vmul.f32 %v7089_v25, %v14205_v14  ;;  %v7162_v23 = vsel %vm4329_vm9, %v15722_v57, -inf }
0x1244   :  { %v15725_v59 = vmul.f32 %v7081_v7, %v14203_v54  ;;  %v7156_v45 = vsel %vm4329_vm9, %v15717_v61, -inf }
0x1245   :  { %7157 = vmax.xlane.f32.xlu1 %v7156_v45  ;;  %v7165_v11 = vsel %vm4329_vm9, %v15730_v29, -inf }
0x1246   :  { %v12310_v6 = vpop.f32.mrb[100].mxu1  ;;  %v7159_v37 = vsel %vm4329_vm9, %v15725_v59, -inf }
0x1247   :  { %v7093_v53 = vpop.f32.mrb[101].mxu1  ;;  %7160 = vmax.xlane.f32.xlu0 %v7159_v37  ;;  %v7102_v46 = vadd.f32 %v12310_v6, %v15712_v39 }
0x1248   :  { %v7094_v32 = vadd.f32 %v15712_v39, %v7093_v53  ;;  %v12311_v47 = vpop.f32.mrb[102].mxu1 }
0x1249   :  { %v7096_v36 = vpop.f32.mrb[103].mxu1  ;;  %7163 = vmax.xlane.f32.xlu1 %v7162_v23  ;;  %v7105_v18 = vadd.f32 %v12311_v47, %v15712_v39  ;;  %v15746_v56 = vmul.f32 %v7102_v46, %v14219_v27 }
0x124a   :  { %v15739_v21 = vmul.f32 %v7094_v32, %v14209_v15  ;;  %v7097_v60 = vadd.f32 %v15712_v39, %v7096_v36 }
0x124b   :  { %7166 = vmax.xlane.f32.xlu0 %v7165_v11  ;;  %v15754_v17 = vmul.f32 %v7105_v18, %v14222_v13  ;;  %v7174_v3 = vsel %vm4329_vm9, %v15746_v56, -inf  ;;  %v7349_v18 = vld [vmem:[#allocation10 + $0x4] sm:$0xf] }
0x124c   :  { %v15749_v44 = vmul.f32 %v7097_v60, %v14211_v16  ;;  %v7168_v49 = vsel %vm4329_vm9, %v15739_v21, -inf  ;;  %12983 = vmatprep.subr.msk.bf16.mxu0 %vm2983_vm8, %v7349_v18  ;;  %v7398_v60 = vsel %vm2983_vm8, %v7349_v18, 0 }
0x124d   :  { %7169 = vmax.xlane.f32.xlu1 %v7168_v49  ;;  %v7177_v28 = vsel %vm4329_vm9, %v15754_v17, -inf  ;;  %12321 = vmatpush3.bf16.msra.mxu0 %v7398_v60 }
0x124e   :  { %v12314_v22 = vpop.f32.mrb[104].mxu1  ;;  %v7171_v5 = vsel %vm4329_vm9, %v15749_v44, -inf }
0x124f   :  { %v7109_v42 = vpop.f32.mrb[105].mxu1  ;;  %7172 = vmax.xlane.f32.xlu0 %v7171_v5  ;;  %v7118_v30 = vadd.f32 %v12314_v22, %v15712_v39 }
0x1250   :  { %v7110_v19 = vadd.f32 %v15712_v39, %v7109_v42  ;;  %v12315_v40 = vpop.f32.mrb[106].mxu1 }
0x1251   :  { %v7112_v38 = vpop.f32.mrb[107].mxu1  ;;  %7175 = vmax.xlane.f32.xlu1 %v7174_v3  ;;  %v7121_v9 = vadd.f32 %v12315_v40, %v15712_v39  ;;  %v15770_v48 = vmul.f32 %v7118_v30, %v14267_v8 }
0x1252   :  { %v15763_v26 = vmul.f32 %v7110_v19, %v14243_v58  ;;  %v7113_v52 = vadd.f32 %v15712_v39, %v7112_v38 }
0x1253   :  { %7178 = vmax.xlane.f32.xlu0 %v7177_v28  ;;  %v15778_v35 = vmul.f32 %v7121_v9, %v14272_v24  ;;  %v7186_v34 = vsel %vm4329_vm9, %v15770_v48, -inf }
0x1254   :  { %v15773_v12 = vmul.f32 %v7113_v52, %v14248_v63  ;;  %v7180_v4 = vsel %vm4329_vm9, %v15763_v26, -inf }
0x1255   :  { %7181 = vmax.xlane.f32.xlu1 %v7180_v4  ;;  %v7189_v37 = vsel %vm4329_vm9, %v15778_v35, -inf }
0x1256   :  { %v12318_v41 = vpop.f32.mrb[108].mxu1  ;;  %v7183_v62 = vsel %vm4329_vm9, %v15773_v12, -inf }
0x1257   :  { %7184 = vmax.xlane.f32.xlu0 %v7183_v62  ;;  %v7125_v10 = vpop.f32.mrb[109].mxu1  ;;  %v7134_v33 = vadd.f32 %v12318_v41, %v15712_v39 }
0x1258   :  { %v7126_v51 = vadd.f32 %v15712_v39, %v7125_v10  ;;  %v12319_v55 = vpop.f32.mrb[110].mxu1 }
0x1259   :  { %7187 = vmax.xlane.f32.xlu1 %v7186_v34  ;;  %v7128_v25 = vpop.f32.mrb[111].mxu1  ;;  %v7137_v45 = vadd.f32 %v12319_v55, %v15712_v39  ;;  %v15794_v53 = vmul.f32 %v7134_v33, %v14328_v20 }
0x125a   :  { %v15787_v7 = vmul.f32 %v7126_v51, %v14293_v43  ;;  %v7129_v6 = vadd.f32 %v15712_v39, %v7128_v25 }
0x125b   :  { %7190 = vmax.xlane.f32.xlu0 %v7189_v37  ;;  %v15802_v47 = vmul.f32 %v7137_v45, %v14330_v31  ;;  %v7198_v23 = vsel %vm4329_vm9, %v15794_v53, -inf  ;;  %v16898_v31 = vld [vmem:[#allocation37_spill] sm:$0xff] }
0x125c   :  { %v15797_v46 = vmul.f32 %v7129_v6, %v14302_v50  ;;  %v7192_v32 = vsel %vm4329_vm9, %v15787_v7, -inf }
0x125d   :  { %7193 = vmax.xlane.f32.xlu1 %v7192_v32  ;;  %v7201_v36 = vsel %vm4329_vm9, %v15802_v47, -inf }
0x125e   :  { %v7195_v39 = vsel %vm4329_vm9, %v15797_v46, -inf }
0x125f   :  { %7196 = vmax.xlane.f32.xlu0 %v7195_v39 }
0x1261   :  { %7199 = vmax.xlane.f32.xlu1 %v7198_v23 }
0x1263   :  { %7202 = vmax.xlane.f32.xlu0 %v7201_v36 }
0x12d2   :  { %v7158_v11 = vpop.xlane.xlu1 %7157 }
0x12d3   :  { %v7204_v49 = vsub.f32 %v15717_v61, %v7158_v11 }
0x12d4   :  { %v7161_v22 = vpop.xlane.xlu0 %7160 }
0x12d5   :  { %v7220_v5 = vmul.f32 1.442695, %v7204_v49  ;;  %v7205_v42 = vsub.f32 %v15725_v59, %v7161_v22 }
0x12d6   :  { %v7164_v30 = vpop.xlane.xlu1 %7163 }
0x12d7   :  { %13316 = vpow2.f32 %v7220_v5  ;;  %v7222_v19 = vmul.f32 1.442695, %v7205_v42  ;;  %v7206_v40 = vsub.f32 %v15722_v57, %v7164_v30 }
0x12d8   :  { %v7167_v3 = vpop.xlane.xlu0 %7166 }
0x12d9   :  { %13318 = vpow2.f32 %v7222_v19  ;;  %v7224_v38 = vmul.f32 1.442695, %v7206_v40  ;;  %v7207_v9 = vsub.f32 %v15730_v29, %v7167_v3 }
0x12da   :  { %v7170_v52 = vpop.xlane.xlu1 %7169 }
0x12db   :  { %13320 = vpow2.f32 %v7224_v38  ;;  %v7226_v28 = vmul.f32 1.442695, %v7207_v9  ;;  %v7208_v4 = vsub.f32 %v15739_v21, %v7170_v52 }
0x12dc   :  { %v7173_v41 = vpop.xlane.xlu0 %7172 }
0x12dd   :  { %13322 = vpow2.f32 %v7226_v28  ;;  %v7228_v62 = vmul.f32 1.442695, %v7208_v4  ;;  %v7209_v10 = vsub.f32 %v15749_v44, %v7173_v41 }
0x12de   :  { %v7176_v33 = vpop.xlane.xlu1 %7175 }
0x12df   :  { %13324 = vpow2.f32 %v7228_v62  ;;  %v7230_v51 = vmul.f32 1.442695, %v7209_v10  ;;  %v7210_v55 = vsub.f32 %v15746_v56, %v7176_v33 }
0x12e0   :  { %v7179_v34 = vpop.xlane.xlu0 %7178 }
0x12e1   :  { %v15819_v25 = vpop.eup %13316  ;;  %13326 = vpow2.f32 %v7230_v51  ;;  %v7232_v45 = vmul.f32 1.442695, %v7210_v55  ;;  %v7211_v6 = vsub.f32 %v15754_v17, %v7179_v34 }
0x12e2   :  { %v7182_v37 = vpop.xlane.xlu1 %7181  ;;  %v7252_v32 = vsel %vm4329_vm9, %v15819_v25, 0.0 }
0x12e3   :  { %v15824_v39 = vpop.eup %13318  ;;  %13328 = vpow2.f32 %v7232_v45  ;;  %v7234_v23 = vmul.f32 1.442695, %v7211_v6  ;;  %v7212_v36 = vsub.f32 %v15763_v26, %v7182_v37  ;;  %7253 = vadd.xlane.f32.xlu1 %v7252_v32 }
0x12e4   :  { %v7185_v18 = vpop.xlane.xlu0 %7184  ;;  %v7255_v60 = vsel %vm4329_vm9, %v15824_v39, 0.0 }
0x12e5   :  { %v15829_v11 = vpop.eup %13320  ;;  %13330 = vpow2.f32 %v7234_v23  ;;  %v7236_v49 = vmul.f32 1.442695, %v7212_v36  ;;  %v7213_v22 = vsub.f32 %v15773_v12, %v7185_v18  ;;  %7256 = vadd.xlane.f32.xlu0 %v7255_v60 }
0x12e6   :  { %v7188_v5 = vpop.xlane.xlu1 %7187  ;;  %v7258_v42 = vsel %vm4329_vm9, %v15829_v11, 0.0 }
0x12e7   :  { %v15834_v30 = vpop.eup %13322  ;;  %13332 = vpow2.f32 %v7236_v49  ;;  %v7238_v19 = vmul.f32 1.442695, %v7213_v22  ;;  %v7214_v40 = vsub.f32 %v15770_v48, %v7188_v5  ;;  %7259 = vadd.xlane.f32.xlu1 %v7258_v42 }
0x12e8   :  { %v7191_v3 = vpop.xlane.xlu0 %7190  ;;  %v7261_v38 = vsel %vm4329_vm9, %v15834_v30, 0.0 }
0x12e9   :  { %v15839_v9 = vpop.eup %13324  ;;  %13334 = vpow2.f32 %v7238_v19  ;;  %v7240_v52 = vmul.f32 1.442695, %v7214_v40  ;;  %v7215_v28 = vsub.f32 %v15778_v35, %v7191_v3  ;;  %7262 = vadd.xlane.f32.xlu0 %v7261_v38 }
0x12ea   :  { %v7194_v4 = vpop.xlane.xlu1 %7193  ;;  %v7264_v41 = vsel %vm4329_vm9, %v15839_v9, 0.0 }
0x12eb   :  { %v15844_v62 = vpop.eup %13326  ;;  %13336 = vpow2.f32 %v7240_v52  ;;  %v7242_v10 = vmul.f32 1.442695, %v7215_v28  ;;  %v7216_v33 = vsub.f32 %v15787_v7, %v7194_v4  ;;  %7265 = vadd.xlane.f32.xlu1 %v7264_v41 }
0x12ec   :  { %v7197_v51 = vpop.xlane.xlu0 %7196  ;;  %v7267_v55 = vsel %vm4329_vm9, %v15844_v62, 0.0 }
0x12ed   :  { %v15849_v34 = vpop.eup %13328  ;;  %13338 = vpow2.f32 %v7242_v10  ;;  %v7244_v45 = vmul.f32 1.442695, %v7216_v33  ;;  %v7217_v6 = vsub.f32 %v15797_v46, %v7197_v51  ;;  %7268 = vadd.xlane.f32.xlu0 %v7267_v55 }
0x12ee   :  { %v7200_v37 = vpop.xlane.xlu1 %7199  ;;  %v7270_v32 = vsel %vm4329_vm9, %v15849_v34, 0.0 }
0x12ef   :  { %v15854_v23 = vpop.eup %13330  ;;  %13340 = vpow2.f32 %v7244_v45  ;;  %v7246_v36 = vmul.f32 1.442695, %v7217_v6  ;;  %v7218_v18 = vsub.f32 %v15794_v53, %v7200_v37  ;;  %7271 = vadd.xlane.f32.xlu1 %v7270_v32 }
0x12f0   :  { %v7203_v60 = vpop.xlane.xlu0 %7202  ;;  %v7273_v49 = vsel %vm4329_vm9, %v15854_v23, 0.0 }
0x12f1   :  { %v15859_v22 = vpop.eup %13332  ;;  %13342 = vpow2.f32 %v7246_v36  ;;  %v7248_v5 = vmul.f32 1.442695, %v7218_v18  ;;  %v7219_v42 = vsub.f32 %v15802_v47, %v7203_v60  ;;  %7274 = vadd.xlane.f32.xlu0 %v7273_v49  ;;  %v16888_v36 = vld [vmem:[#allocation28_spill] sm:$0xff]  ;;  %v16889_v60 = vld [vmem:[#allocation30_spill] sm:$0xff] }
0x12f2   :  { %v7276_v19 = vsel %vm4329_vm9, %v15859_v22, 0.0  ;;  %v13003_v18 = vpack.i.bf16 %v16888_v36, %v14846_v0  ;;  %v16890_v49 = vld [vmem:[#allocation32_spill] sm:$0xff]  ;;  %v16899_v36 = vld [vmem:[#allocation38_spill] sm:$0xff] }
0x12f3   :  { %v15864_v40 = vpop.eup %13334  ;;  %13344 = vpow2.f32 %v7248_v5  ;;  %v7250_v3 = vmul.f32 1.442695, %v7219_v42  ;;  %7277 = vadd.xlane.f32.xlu1 %v7276_v19  ;;  %v13013_v5 = vpack.i.bf16 %v16890_v49, %v16889_v60  ;;  %v16891_v42 = vld [vmem:[#allocation27_spill] sm:$0xff]  ;;  %v16892_v19 = vld [vmem:[#allocation29_spill] sm:$0xff] }
0x12f4   :  { %v7279_v38 = vsel %vm4329_vm9, %v15864_v40, 0.0  ;;  %v16901_v49 = vld [vmem:[#allocation39_spill] sm:$0xff] }
0x12f5   :  { %v15868_v52 = vpop.eup %13336  ;;  %13346 = vpow2.f32 %v7250_v3  ;;  %7280 = vadd.xlane.f32.xlu0 %v7279_v38  ;;  %v13008_v3 = vpack.i.bf16 %v16892_v19, %v16891_v42  ;;  %v16893_v38 = vld [vmem:[#allocation31_spill] sm:$0xff]  ;;  %v13043_v42 = vpack.i.bf16 %v15725_v59, %v15717_v61  ;;  %v13048_v19 = vpack.i.bf16 %v15730_v29, %v15722_v57  ;;  %v13226_v29 = vld [vmem:[%s16830_s12 + $0xa0] sm:$0xff]  }
0x12f6   :  { %v7282_v28 = vsel %vm4329_vm9, %v15868_v52, 0.0  ;;  %v13068_v61 = vpack.i.bf16 %v15778_v35, %v15770_v48  ;;  %v13073_v57 = vpack.i.bf16 %v15797_v46, %v15787_v7  ;;  %v13078_v59 = vpack.i.bf16 %v15802_v47, %v15794_v53  ;;  %12338 = vmatprep.subr.bf16.mxu1 %v13226_v29 }
0x12f7   :  { %v15872_v4 = vpop.eup %13338  ;;  %7283 = vadd.xlane.f32.xlu1 %v7282_v28  ;;  %v16894_v28 = vld [vmem:[#allocation33_spill] sm:$0xff]  ;;  %12339 = vmatpush3.bf16.msra.mxu1 %v13226_v29 }
0x12f8   :  { %v7285_v41 = vsel %vm4329_vm9, %v15872_v4, 0.0 }
0x12f9   :  { %v15876_v10 = vpop.eup %13340  ;;  %7286 = vadd.xlane.f32.xlu0 %v7285_v41  ;;  %v13018_v41 = vpack.i.bf16 %v16894_v28, %v16893_v38 }
0x12fa   :  { %v7288_v33 = vsel %vm4329_vm9, %v15876_v10, 0.0 }
0x12fb   :  { %v15880_v51 = vpop.eup %13342  ;;  %7289 = vadd.xlane.f32.xlu1 %v7288_v33  ;;  %v16895_v33 = vld [vmem:[#allocation34_spill] sm:$0xff] }
0x12fc   :  { %v7291_v55 = vsel %vm4329_vm9, %v15880_v51, 0.0 }
0x12fd   :  { %v15884_v45 = vpop.eup %13344  ;;  %7292 = vadd.xlane.f32.xlu0 %v7291_v55  ;;  %v16896_v55 = vld [vmem:[#allocation36_spill] sm:$0xff] }
0x12fe   :  { %v7294_v6 = vsel %vm4329_vm9, %v15884_v45, 0.0 }
0x12ff   :  { %v15888_v37 = vpop.eup %13346  ;;  %7295 = vadd.xlane.f32.xlu1 %v7294_v6  ;;  %v13023_v6 = vpack.i.bf16 %v16896_v55, %v16895_v33 }
0x1300   :  { %v7297_v32 = vsel %vm4329_vm9, %v15888_v37, 0.0 }
0x1301   :  { %7298 = vadd.xlane.f32.xlu0 %v7297_v32  ;;  %v16897_v32 = vld [vmem:[#allocation35_spill] sm:$0xff] }
0x1302   :  { %v13028_v0 = vpack.i.bf16 %v16898_v31, %v16897_v32  ;;  %v13053_v31 = vpack.i.bf16 %v15749_v44, %v15739_v21 }
0x1310   :  { %13004 = vrot.lane.b32.xlu1 %v13003_v18, %s13603_s13  ;;  %v16900_v18 = vld [vmem:[#allocation40_spill] sm:$0xff] }
0x1311   :  { %v13033_v60 = vpack.i.bf16 %v16900_v18, %v16899_v36 }
0x1314   :  { %13014 = vrot.lane.b32.xlu1 %v13013_v5, %s13603_s13  ;;  %v16902_v5 = vld [vmem:[#allocation41_spill] sm:$0xff] }
0x1315   :  { %v13038_v20 = vpack.i.bf16 %v16902_v5, %v16901_v49 }
0x1317   :  { %13009 = vrot.lane.b32.xlu0 %v13008_v3, %s13603_s13  ;;  %v13058_v3 = vpack.i.bf16 %v15754_v17, %v15746_v56 }
0x1318   :  { %13019 = vrot.lane.b32.xlu1 %v13018_v41, %s13603_s13 }
0x131b   :  { %13024 = vrot.lane.b32.xlu0 %v13023_v6, %s13603_s13 }
0x131c   :  { %13029 = vrot.lane.b32.xlu1 %v13028_v0, %s13603_s13 }
0x131f   :  { %13034 = vrot.lane.b32.xlu0 %v13033_v60, %s13603_s13 }
0x1320   :  { %13039 = vrot.lane.b32.xlu1 %v13038_v20, %s13603_s13  ;;  %v13063_v20 = vpack.i.bf16 %v15773_v12, %v15763_v26 }
0x1323   :  { %13044 = vrot.lane.b32.xlu0 %v13043_v42, %s13604_s15 }
0x1324   :  { %13049 = vrot.lane.b32.xlu1 %v13048_v19, %s13604_s15 }
0x1327   :  { %13054 = vrot.lane.b32.xlu0 %v13053_v31, %s13604_s15 }
0x1328   :  { %13059 = vrot.lane.b32.xlu1 %v13058_v3, %s13604_s15 }
0x132b   :  { %13064 = vrot.lane.b32.xlu0 %v13063_v20, %s13604_s15 }
0x132c   :  { %13069 = vrot.lane.b32.xlu1 %v13068_v61, %s13604_s15 }
0x132f   :  { %13074 = vrot.lane.b32.xlu0 %v13073_v57, %s13604_s15 }
0x1330   :  { %13079 = vrot.lane.b32.xlu1 %v13078_v59, %s13604_s15 }
0x1370   :  { %v7254_v21 = vpop.xlane.xlu1 %7253 }
0x1371   :  { %13348 = vrcp.f32 %v7254_v21 }
0x1372   :  { %v7257_v56 = vpop.xlane.xlu0 %7256 }
0x1373   :  { %13350 = vrcp.f32 %v7257_v56 }
0x1374   :  { %v7260_v44 = vpop.xlane.xlu1 %7259 }
0x1375   :  { %13352 = vrcp.f32 %v7260_v44 }
0x1376   :  { %v7263_v17 = vpop.xlane.xlu0 %7262 }
0x1377   :  { %13354 = vrcp.f32 %v7263_v17 }
0x1378   :  { %v7266_v26 = vpop.xlane.xlu1 %7265 }
0x1379   :  { %13356 = vrcp.f32 %v7266_v26 }
0x137a   :  { %v7269_v48 = vpop.xlane.xlu0 %7268 }
0x137b   :  { %v13349_v12 = vpop.eup %13348  ;;  %13358 = vrcp.f32 %v7269_v48 }
0x137c   :  { %v7272_v35 = vpop.xlane.xlu1 %7271  ;;  %v7301_v7 = vmul.f32 %v13349_v12, %v15819_v25 }
0x137d   :  { %v13351_v53 = vpop.eup %13350  ;;  %13360 = vrcp.f32 %v7272_v35 }
0x137e   :  { %v7275_v46 = vpop.xlane.xlu0 %7274  ;;  %v7303_v47 = vmul.f32 %v13351_v53, %v15824_v39  ;;  %v7332_v33 = vmul.f32 %v7301_v7, %v14199_v1 }
0x137f   :  { %v13353_v38 = vpop.eup %13352  ;;  %13362 = vrcp.f32 %v7275_v46 }
0x1380   :  { %v7305_v28 = vmul.f32 %v13353_v38, %v15829_v11  ;;  %v7278_v41 = vpop.xlane.xlu1 %7277  ;;  %v7333_v55 = vmul.f32 %v7303_v47, %v14203_v54 }
0x1381   :  { %v13355_v6 = vpop.eup %13354  ;;  %13364 = vrcp.f32 %v7278_v41 }
0x1382   :  { %v7307_v32 = vmul.f32 %v13355_v6, %v15834_v30  ;;  %v7281_v0 = vpop.xlane.xlu0 %7280  ;;  %v7359_v25 = vpack.c.bf16 %v7333_v55, %v7332_v33  ;;  %v7334_v18 = vmul.f32 %v7305_v28, %v14201_v2 }
0x1383   :  { %v13357_v36 = vpop.eup %13356  ;;  %13366 = vrcp.f32 %v7281_v0 }
0x1384   :  { %v7335_v39 = vmul.f32 %v7307_v32, %v14205_v14  ;;  %12322 = vmatprep.mubr.msk.bf16.mxu0 %vm4329_vm9, %v7359_v25  ;;  %v7284_v11 = vpop.xlane.xlu1 %7283  ;;  %v7309_v60 = vmul.f32 %v13357_v36, %v15839_v9 }
0x1385   :  { %v13359_v49 = vpop.eup %13358  ;;  %13368 = vrcp.f32 %v7284_v11  ;;  %v16904_v11 = vld [vmem:[#allocation26_spill] sm:$0xff] }
0x1386   :  { %v7360_v5 = vpack.c.bf16 %v7335_v39, %v7334_v18  ;;  %v7287_v42 = vpop.xlane.xlu0 %7286  ;;  %v7311_v19 = vmul.f32 %v13359_v49, %v15844_v62  ;;  %v7336_v3 = vmul.f32 %v7309_v60, %v14209_v15  ;;  %v13227_v49 = vld [vmem:[%s16830_s12 + $0xa8] sm:$0xff]  }
0x1387   :  { %v13361_v30 = vpop.eup %13360  ;;  %13370 = vrcp.f32 %v7287_v42  ;;  %12340 = vmatprep.subr.bf16.mxu1 %v13227_v49 }
0x1388   :  { %12323 = vmatmul.mubr.msk.bf16.vlgmr.msra.gmra.mrb[144].mxu0 %vm4329_vm9, %v7360_v5  ;;  %v7290_v31 = vpop.xlane.xlu1 %7289  ;;  %v7337_v20 = vmul.f32 %v7311_v19, %v14211_v16  ;;  %v7313_v61 = vmul.f32 %v13361_v30, %v15849_v34  ;;  %12341 = vmatpush3.bf16.msra.mxu1 %v13227_v49  ;;  %v13233_v5 = vld [vmem:[#allocation15 + $0x38] sm:$0xff]  }
0x1389   :  { %v13363_v57 = vpop.eup %13362  ;;  %13372 = vrcp.f32 %v7290_v31  ;;  %v10792_v19 = vld [vmem:[#allocation12 + $0x1] ss:$0 sm:$0xff] }
0x138a   :  { %v7293_v9 = vpop.xlane.xlu0 %7292  ;;  %v7361_v59 = vpack.c.bf16 %v7337_v20, %v7336_v3  ;;  %v7315_v29 = vmul.f32 %v13363_v57, %v15854_v23  ;;  %v7338_v56 = vmul.f32 %v7313_v61, %v14219_v27 }
0x138b   :  { %v13365_v21 = vpop.eup %13364  ;;  %13374 = vrcp.f32 %v7293_v9 }
0x138c   :  { %12326 = vmatprep.mubr.msk.bf16.mxu0 %vm4329_vm9, %v7361_v59  ;;  %v7296_v62 = vpop.xlane.xlu1 %7295  ;;  %v7339_v44 = vmul.f32 %v7315_v29, %v14222_v13  ;;  %v7317_v17 = vmul.f32 %v13365_v21, %v15859_v22 }
0x138d   :  { %v13367_v26 = vpop.eup %13366  ;;  %13376 = vrcp.f32 %v7296_v62 }
0x138e   :  { %v7299_v34 = vpop.xlane.xlu0 %7298  ;;  %v7362_v48 = vpack.c.bf16 %v7339_v44, %v7338_v56  ;;  %v7319_v12 = vmul.f32 %v13367_v26, %v15864_v40  ;;  %v7340_v23 = vmul.f32 %v7317_v17, %v14243_v58 }
0x138f   :  { %v13369_v35 = vpop.eup %13368  ;;  %13378 = vrcp.f32 %v7299_v34 }
0x1390   :  { %12327 = vmatmul.mubr.msk.bf16.gmra.mrb[148].mxu0 %vm4329_vm9, %v7362_v48  ;;  %v7341_v7 = vmul.f32 %v7319_v12, %v14248_v63  ;;  %v7321_v53 = vmul.f32 %v13369_v35, %v15868_v52 }
0x1391   :  { %v13371_v46 = vpop.eup %13370 }
0x1392   :  { %v7363_v47 = vpack.c.bf16 %v7341_v7, %v7340_v23  ;;  %v7323_v22 = vmul.f32 %v13371_v46, %v15872_v4  ;;  %v7342_v28 = vmul.f32 %v7321_v53, %v14267_v8  ;;  %v13229_v7 = vld [vmem:[%s16830_s12 + $0x98] sm:$0xff]  }
0x1393   :  { %v13373_v38 = vpop.eup %13372 }
0x1394   :  { %12330 = vmatprep.mubr.msk.bf16.mxu0 %vm4329_vm9, %v7363_v47  ;;  %v7343_v40 = vmul.f32 %v7323_v22, %v14272_v24  ;;  %v7325_v41 = vmul.f32 %v13373_v38, %v15876_v10  ;;  %v16903_v10 = vld [vmem:[#allocation25_spill] sm:$0xff] }
0x1395   :  { %v13375_v33 = vpop.eup %13374 }
0x1396   :  { %v7364_v55 = vpack.c.bf16 %v7343_v40, %v7342_v28  ;;  %v7327_v6 = vmul.f32 %v13375_v33, %v15880_v51  ;;  %v7344_v52 = vmul.f32 %v7325_v41, %v14293_v43  ;;  %v13230_v41 = vld [vmem:[%s16830_s12 + $0xb0] sm:$0xff]  }
0x1397   :  { %v13377_v32 = vpop.eup %13376 }
0x1398   :  { %12331 = vmatmul.mubr.msk.bf16.gmra.mrb[152].mxu0 %vm4329_vm9, %v7364_v55  ;;  %v7345_v4 = vmul.f32 %v7327_v6, %v14302_v50  ;;  %v7329_v0 = vmul.f32 %v13377_v32, %v15884_v45  ;;  %v13228_v45 = vld [vmem:[%s16830_s12 + $0x90] sm:$0xff]  }
0x1399   :  { %v13379_v25 = vpop.eup %13378  ;;  %12358 = vmatprep.subr.bf16.mxu1 %v13228_v45 }
0x139a   :  { %v7365_v36 = vpack.c.bf16 %v7345_v4, %v7344_v52  ;;  %v7331_v18 = vmul.f32 %v13379_v25, %v15888_v37  ;;  %v7346_v39 = vmul.f32 %v7329_v0, %v16903_v10  ;;  %v13232_v37 = vld [vmem:[#allocation15 + $0x30] sm:$0xff]  }
0x139b   :  { %12398 = vmatprep.subr.bf16.mxu0 %v13232_v37 }
0x139c   :  { %12334 = vmatprep.mubr.msk.bf16.mxu0 %vm4329_vm9, %v7365_v36  ;;  %v7347_v60 = vmul.f32 %v7331_v18, %v16904_v11  ;;  %12399 = vmatpush3.bf16.msra.mxu0 %v13232_v37 }
0x139d   :  { %12400 = vmatprep.subr.bf16.mxu0 %v13233_v5 }
0x139e   :  { %v7366_v51 = vpack.c.bf16 %v7347_v60, %v7346_v39 }
0x13a0   :  { %12335 = vmatmul.mubr.msk.bf16.gmra.mrb[156].mxu0 %vm4329_vm9, %v7366_v51 }
0x13a1   :  { %12401 = vmatpush3.bf16.msra.mxu0 %v13233_v5 }
0x145b   :  { %v12324_v42 = vpop.f32.mrb[144].mxu0 }
0x145c   :  { %v7434_v30 = vpop.f32.mrb[145].mxu0  ;;  %v15973_v3 = vadd.f32 %v12324_v42, %v10792_v19  ;;  %v7513_v42 = vld [vmem:[#allocation3] sm:$0x80] }
0x145d   :  { %v12325_v31 = vpop.f32.mrb[146].mxu0  ;;  %v15977_v57 = vadd.f32 %v10792_v19, %v7434_v30 }
0x145e   :  { %v15975_v20 = vadd.f32 %v12325_v31, %v10792_v19  ;;  %v7437_v61 = vpop.f32.mrb[147].mxu0 }
0x145f   :  { %v15979_v9 = vadd.f32 %v10792_v19, %v7437_v61  ;;  %v7524_v61 = vshrl.u32 %v7513_v42, 16 }
0x1460   :  { %v7498_v59 = vpack.c.bf16 %v15975_v20, %v15973_v3 }
0x1461   :  { %v7497_v29 = vpack.c.bf16 %v15979_v9, %v15977_v57 }
0x1462   :  { %7506 = vst.msk [vmem:[#allocation3 + $0x10] sm:$0xff] %vm175_vm10, %v7498_v59 }
0x1463   :  { %7505 = vst.msk [vmem:[#allocation3 + $0x8] sm:$0xff] %vm175_vm10, %v7497_v29  ;;  %v12328_v21 = vpop.f32.mrb[148].mxu0 }
0x1464   :  { %v7450_v62 = vpop.f32.mrb[149].mxu0  ;;  %v15987_v44 = vadd.f32 %v12328_v21, %v10792_v19 }
0x1465   :  { %v12329_v56 = vpop.f32.mrb[150].mxu0  ;;  %v15991_v34 = vadd.f32 %v10792_v19, %v7450_v62  ;;  %v7526_v62 = vrot.slane %v7524_v61, 7 }
0x1466   :  { %v15989_v17 = vadd.f32 %v12329_v56, %v10792_v19  ;;  %v7453_v26 = vpop.f32.mrb[151].mxu0 }
0x1467   :  { %v15993_v48 = vadd.f32 %v10792_v19, %v7453_v26 }
0x1468   :  { %v7500_v12 = vpack.c.bf16 %v15989_v17, %v15987_v44 }
0x1469   :  { %v7499_v35 = vpack.c.bf16 %v15993_v48, %v15991_v34  ;;  %v16008_v46 = vld [vmem:[#allocation3 + $0x10] sm:$0xff] }
0x146a   :  { %7508 = vst.msk [vmem:[#allocation3 + $0x20] sm:$0xff] %vm175_vm10, %v7500_v12  ;;  %v16000_v23 = vld [vmem:[#allocation3 + $0x8] sm:$0xff]  ;;  %v16861_v29 = vshrl.u32 %v16008_v46, 16 }
0x146b   :  { %7507 = vst.msk [vmem:[#allocation3 + $0x18] sm:$0xff] %vm175_vm10, %v7499_v35  ;;  %v12332_v53 = vpop.f32.mrb[152].mxu0  ;;  %12342 = vmatprep.mubr.msk.bf16.mxu1 %vm175_vm10, %v16000_v23  ;;  %v7531_v59 = vshll.u32 %v16000_v23, 16 }
0x146c   :  { %v7466_v47 = vpop.f32.mrb[153].mxu0  ;;  %12343 = vmatmul.mubr.msk.bf16.vlgmr.msra.gmra.mrb[112].mxu1 %vm175_vm10, %v16008_v46  ;;  %v16012_v38 = vadd.f32 %v12332_v53, %v10792_v19  ;;  %v7538_v12 = vrot.slane %v16861_v29, 7 }
0x146d   :  { %12359 = vmatpush3.bf16.msra.mxu1 %v13228_v45  ;;  %v12333_v22 = vpop.f32.mrb[154].mxu0  ;;  %v16019_v33 = vadd.f32 %v10792_v19, %v7466_v47  ;;  %v7528_v45 = vshrl.u32 %v16000_v23, 16  ;;  %v7539_v47 = vshll.u32 %v16008_v46, 16 }
0x146e   :  { %v16014_v28 = vadd.f32 %v12333_v22, %v10792_v19  ;;  %v7469_v40 = vpop.f32.mrb[155].mxu0  ;;  %12360 = vmatprep.subr.bf16.mxu1 %v13229_v7 }
0x146f   :  { %v16021_v55 = vadd.f32 %v10792_v19, %v7469_v40  ;;  %v7530_v31 = vrot.slane %v7528_v45, 7 }
0x1470   :  { %v7502_v6 = vpack.c.bf16 %v16014_v28, %v16012_v38 }
0x1471   :  { %v7501_v32 = vpack.c.bf16 %v16021_v55, %v16019_v33  ;;  %12361 = vmatpush3.bf16.msra.mxu1 %v13229_v7  ;;  %v16033_v0 = vld [vmem:[#allocation3 + $0x20] sm:$0xff]  ;;  %v7533_v56 = vor.u32 %v7531_v59, %v7530_v31 }
0x1472   :  { %7510 = vst.msk [vmem:[#allocation3 + $0x40] sm:$0xff] %vm175_vm10, %v7502_v6  ;;  %v16028_v52 = vld [vmem:[#allocation3 + $0x18] sm:$0xff]  ;;  %12378 = vmatprep.subr.bf16.mxu1 %v13230_v41  ;;  %v7552_v40 = vshrl.u32 %v16033_v0, 16  ;;  %v7541_v6 = vor.u32 %v7539_v47, %v7538_v12  ;;  %v7555_v61 = vshll.u32 %v16033_v0, 16 }
0x1473   :  { %7509 = vst.msk [vmem:[#allocation3 + $0x38] sm:$0xff] %vm175_vm10, %v7501_v32  ;;  %v12336_v4 = vpop.f32.mrb[156].mxu0  ;;  %12346 = vmatprep.mubr.msk.bf16.mxu1 %vm175_vm10, %v16028_v52  ;;  %v7544_v21 = vshrl.u32 %v16028_v52, 16  ;;  %v7534_v53 = vsel %vm432_vm2, %v7526_v62, %v7533_v56  ;;  %v7547_v22 = vshll.u32 %v16028_v52, 16 }
0x1474   :  { %v7482_v25 = vpop.f32.mrb[157].mxu0  ;;  %12347 = vmatmul.mubr.msk.bf16.gmra.mrb[116].mxu1 %vm175_vm10, %v16033_v0  ;;  %v16037_v18 = vadd.f32 %v12336_v4, %v10792_v19 }
0x1475   :  { %v12337_v36 = vpop.f32.mrb[158].mxu0  ;;  %v16041_v51 = vadd.f32 %v10792_v19, %v7482_v25  ;;  %v7546_v7 = vrot.slane %v7544_v21, 7  ;;  %v7518_v25 = vld [vmem:[#allocation3 + $0x30] sm:$0x80] }
0x1476   :  { %v16039_v39 = vadd.f32 %v12337_v36, %v10792_v19  ;;  %v7485_v60 = vpop.f32.mrb[159].mxu0  ;;  %v13231_v36 = vld [vmem:[%s16830_s12 + $0xb8] sm:$0xff]   ;;  %v7560_v52 = vshrl.u32 %v7518_v25, 16 }
0x1477   :  { %v16043_v49 = vadd.f32 %v10792_v19, %v7485_v60  ;;  %v7549_v4 = vor.u32 %v7547_v22, %v7546_v7  ;;  %v7554_v60 = vrot.slane %v7552_v40, 7 }
0x1478   :  { %v7504_v37 = vpack.c.bf16 %v16039_v39, %v16037_v18 }
0x1479   :  { %v7503_v5 = vpack.c.bf16 %v16043_v49, %v16041_v51  ;;  %v16056_v19 = vld [vmem:[#allocation3 + $0x40] sm:$0xff]  ;;  %v7550_v42 = vsel %vm432_vm2, %v7538_v12, %v7549_v4 }
0x147a   :  { %7512 = vst.msk [vmem:[#allocation3 + $0x50] sm:$0xff] %vm175_vm10, %v7504_v37  ;;  %v16051_v30 = vld [vmem:[#allocation3 + $0x38] sm:$0xff]  ;;  %v7542_v37 = vsel %vm432_vm2, %v7530_v31, %v7541_v6  ;;  %v7572_v56 = vshrl.u32 %v16056_v19, 16  ;;  %v7562_v31 = vrot.slane %v7560_v52, 7  ;;  %v7575_v0 = vshll.u32 %v16056_v19, 16 }
0x147b   :  { %7511 = vst.msk [vmem:[#allocation3 + $0x48] sm:$0xff] %vm175_vm10, %v7503_v5  ;;  %12350 = vmatprep.mubr.msk.bf16.mxu1 %vm175_vm10, %v16051_v30  ;;  %v7564_v32 = vshrl.u32 %v16051_v30, 16  ;;  %v7567_v62 = vshll.u32 %v16051_v30, 16 }
0x147c   :  { %12351 = vmatmul.mubr.msk.bf16.gmra.mrb[120].mxu1 %vm175_vm10, %v16056_v19 }
0x147d   :  { %v7566_v5 = vrot.slane %v7564_v32, 7 }
0x147f   :  { %v7569_v6 = vor.u32 %v7567_v62, %v7566_v5 }
0x1481   :  { %v16071_v35 = vld [vmem:[#allocation3 + $0x50] sm:$0xff] }
0x1482   :  { %v16065_v26 = vld [vmem:[#allocation3 + $0x48] sm:$0xff]  ;;  %v7588_v25 = vshrl.u32 %v16071_v35, 16 }
0x1483   :  { %12354 = vmatprep.mubr.msk.bf16.mxu1 %vm175_vm10, %v16065_v26  ;;  %v7580_v29 = vshrl.u32 %v16065_v26, 16  ;;  %v7583_v30 = vshll.u32 %v16065_v26, 16 }
0x1484   :  { %12355 = vmatmul.mubr.msk.bf16.gmra.mrb[124].mxu1 %vm175_vm10, %v16071_v35  ;;  %v7590_v52 = vrot.slane %v7588_v25, 7 }
0x1485   :  { %12362 = vmatprep.mubr.msk.bf16.mxu1 %vm175_vm10, %v7534_v53  ;;  %v7557_v53 = vor.u32 %v7555_v61, %v7554_v60  ;;  %v7582_v4 = vrot.slane %v7580_v29, 7 }
0x1487   :  { %v7558_v12 = vsel %vm432_vm2, %v7546_v7, %v7557_v53  ;;  %v7878_v53 = vrot.slane %v7531_v59, 1  ;;  %v7867_v59 = vld [vmem:[#allocation3 + $0x28] sm:$0x1] }
0x1488   :  { %v7905_v23 = vshll.u32 %v7867_v59, 16 }
0x1489   :  { %v7879_v26 = vor.u32 %v7878_v53, %v7528_v45 }
0x148c   :  { %12363 = vmatmul.mubr.msk.bf16.vlgmr.msra.gmra.mrb[112].mxu1 %vm175_vm10, %v7542_v37  ;;  %v7574_v37 = vrot.slane %v7572_v56, 7 }
0x148d   :  { %12379 = vmatpush3.bf16.msra.mxu1 %v13230_v41  ;;  %12366 = vmatprep.mubr.msk.bf16.mxu1 %vm175_vm10, %v7550_v42  ;;  %v7570_v41 = vsel %vm432_vm2, %v7562_v31, %v7569_v6  ;;  %v7585_v42 = vor.u32 %v7583_v30, %v7582_v4  ;;  %v7591_v31 = vshll.u32 %v16071_v35, 16  ;;  %v7883_v6 = vrot.slane %v7539_v47, 1 }
0x148e   :  { %12380 = vmatprep.subr.bf16.mxu1 %v13231_v36  ;;  %v7577_v60 = vor.u32 %v7575_v0, %v7574_v37  ;;  %v16905_v35 = vshrl.u32 %v16008_v46, 16  ;;  %v7914_v47 = vrot.slane %v7567_v62, 1 }
0x148f   :  { %v7586_v7 = vsel %vm432_vm2, %v7574_v37, %v7585_v42  ;;  %v7593_v19 = vor.u32 %v7591_v31, %v7590_v52  ;;  %v7899_v42 = vrot.slane %v7555_v61, 1  ;;  %v7927_v61 = vrot.slane %v7583_v30, 1 }
0x1491   :  { %12381 = vmatpush3.bf16.msra.mxu1 %v13231_v36  ;;  %v7578_v36 = vsel %vm432_vm2, %v7566_v5, %v7577_v60  ;;  %v7884_v5 = vsel %vm976_vm3, %v7879_v26, %v7883_v6  ;;  %v7887_v60 = vor.u32 %v7883_v6, %v16905_v35  ;;  %v7931_v53 = vor.u32 %v7927_v61, %v7580_v29  ;;  %v13234_v29 = vld [vmem:[%s16830_s12 + $0xd0] sm:$0xff]  }
0x1492   :  { %v7935_v6 = vrot.slane %v7591_v31, 1  ;;  %12418 = vmatprep.subr.bf16.mxu0 %v13234_v29 }
0x1494   :  { %12367 = vmatmul.mubr.msk.bf16.gmra.mrb[116].mxu1 %vm175_vm10, %v7558_v12  ;;  %v7594_v12 = vsel %vm432_vm2, %v7582_v4, %v7593_v19  ;;  %v7903_v4 = vor.u32 %v7899_v42, %v7552_v40  ;;  %v7872_v19 = vld [vmem:[#allocation3 + $0x58] sm:$0x1]  ;;  %v7936_v40 = vsel %vm976_vm3, %v7931_v53, %v7935_v6 }
0x1495   :  { %12370 = vmatprep.mubr.msk.bf16.mxu1 %vm175_vm10, %v7570_v41  ;;  %v7891_v41 = vrot.slane %v7547_v22, 1  ;;  %v7907_v22 = vrot.slane %v7905_v23, 1 }
0x1497   :  { %v7895_v37 = vor.u32 %v7891_v41, %v7544_v21  ;;  %v7892_v52 = vsel %vm976_vm3, %v7887_v60, %v7891_v41  ;;  %v7908_v21 = vsel %vm976_vm3, %v7903_v4, %v7907_v22 }
0x1499   :  { %v7900_v45 = vsel %vm976_vm3, %v7895_v37, %v7899_v42 }
0x149c   :  { %12371 = vmatmul.mubr.msk.bf16.gmra.mrb[120].mxu1 %vm175_vm10, %v7578_v36  ;;  %v7915_v36 = vor.u32 %v7914_v47, %v7564_v32  ;;  %v7939_v32 = vor.u32 %v7935_v6, %v7588_v25 }
0x149d   :  { %12374 = vmatprep.mubr.msk.bf16.mxu1 %vm175_vm10, %v7586_v7  ;;  %v7919_v7 = vrot.slane %v7575_v0, 1 }
0x149f   :  { %v7920_v46 = vsel %vm976_vm3, %v7915_v36, %v7919_v7  ;;  %v7923_v26 = vor.u32 %v7919_v7, %v7572_v56  ;;  %v10843_v56 = vld [vmem:[#allocation13 + $0x3] ss:$0 sm:$0xff] }
0x14a1   :  { %v7928_v62 = vsel %vm976_vm3, %v7923_v26, %v7927_v61 }
0x14a4   :  { %12375 = vmatmul.mubr.msk.bf16.gmra.mrb[124].mxu1 %vm175_vm10, %v7594_v12  ;;  %v7941_v12 = vshll.u32 %v7872_v19, 16 }
0x14a5   :  { %12382 = vmatprep.mubr.msk.bf16.mxu1 %vm175_vm10, %v7884_v5 }
0x14a6   :  { %v7943_v0 = vrot.slane %v7941_v12, 1 }
0x14a8   :  { %v7944_v5 = vsel %vm976_vm3, %v7939_v32, %v7943_v0 }
0x14ac   :  { %12383 = vmatmul.mubr.msk.bf16.vlgmr.msra.gmra.mrb[112].mxu1 %vm175_vm10, %v7892_v52 }
0x14ad   :  { %12386 = vmatprep.mubr.msk.bf16.mxu1 %vm175_vm10, %v7900_v45 }
0x14b4   :  { %12387 = vmatmul.mubr.msk.bf16.gmra.mrb[116].mxu1 %vm175_vm10, %v7908_v21 }
0x14b5   :  { %12390 = vmatprep.mubr.msk.bf16.mxu1 %vm175_vm10, %v7920_v46 }
0x14bc   :  { %12391 = vmatmul.mubr.msk.bf16.gmra.mrb[120].mxu1 %vm175_vm10, %v7928_v62 }
0x14bd   :  { %12394 = vmatprep.mubr.msk.bf16.mxu1 %vm175_vm10, %v7936_v40 }
0x14c4   :  { %12395 = vmatmul.mubr.msk.bf16.gmra.mrb[124].mxu1 %vm175_vm10, %v7944_v5 }
0x157f   :  { %v12384_v30 = vpop.f32.mrb[112].mxu1 }
0x1580   :  { %v8109_v31 = vadd.f32 %v12384_v30, %v10843_v56  ;;  %v8020_v41 = vpop.f32.mrb[113].mxu1 }
0x1581   :  { %v8107_v37 = vadd.f32 %v10843_v56, %v8020_v41  ;;  %v12385_v59 = vpop.f32.mrb[114].mxu1 }
0x1582   :  { %v8110_v35 = vadd.f32 %v12385_v59, %v10843_v56  ;;  %v8023_v60 = vpop.f32.mrb[115].mxu1  ;;  %v8125_v25 = vmax.f32 %v8109_v31, 0.0 }
0x1583   :  { %v8108_v42 = vadd.f32 %v10843_v56, %v8023_v60  ;;  %v8123_v23 = vmax.f32 %v8107_v37, 0.0 }
0x1584   :  { %v8126_v52 = vmax.f32 %v8110_v35, 0.0 }
0x1585   :  { %v8124_v45 = vmax.f32 %v8108_v42, 0.0 }
0x1586   :  { %v8140_v47 = vpack.c.bf16 %v8126_v52, %v8125_v25 }
0x1587   :  { %v8139_v4 = vpack.c.bf16 %v8124_v45, %v8123_v23  ;;  %v12388_v22 = vpop.f32.mrb[116].mxu1 }
0x1588   :  { %v8113_v36 = vadd.f32 %v12388_v22, %v10843_v56  ;;  %v8036_v7 = vpop.f32.mrb[117].mxu1 }
0x1589   :  { %v8111_v21 = vadd.f32 %v10843_v56, %v8036_v7  ;;  %v12389_v46 = vpop.f32.mrb[118].mxu1  ;;  %12402 = vmatprep.mubr.msk.bf16.mxu0 %vm175_vm10, %v8139_v4 }
0x158a   :  { %v8114_v61 = vadd.f32 %v12389_v46, %v10843_v56  ;;  %v8039_v53 = vpop.f32.mrb[119].mxu1  ;;  %12403 = vmatmul.mubr.msk.bf16.vlgmr.msra.gmra.mrb[160].mxu0 %vm175_vm10, %v8140_v47  ;;  %v8129_v26 = vmax.f32 %v8113_v36, 0.0 }
0x158b   :  { %v8112_v19 = vadd.f32 %v10843_v56, %v8039_v53  ;;  %12419 = vmatpush3.bf16.msra.mxu0 %v13234_v29  ;;  %v8127_v62 = vmax.f32 %v8111_v21, 0.0 }
0x158c   :  { %v8130_v6 = vmax.f32 %v8114_v61, 0.0 }
0x158d   :  { %v8128_v12 = vmax.f32 %v8112_v19, 0.0 }
0x158e   :  { %v8142_v40 = vpack.c.bf16 %v8130_v6, %v8129_v26 }
0x158f   :  { %v8141_v32 = vpack.c.bf16 %v8128_v12, %v8127_v62  ;;  %v12392_v0 = vpop.f32.mrb[120].mxu1  ;;  %v13235_v12 = vld [vmem:[%s16830_s12 + $0xd8] sm:$0xff]  }
0x1590   :  { %v8117_v5 = vadd.f32 %v12392_v0, %v10843_v56  ;;  %v8052_v30 = vpop.f32.mrb[121].mxu1  ;;  %12420 = vmatprep.subr.bf16.mxu0 %v13235_v12  ;;  %v16146_v0 = vld [vmem:[#allocation16 + $0x3] ss:$0 sm:$0xff] }
0x1591   :  { %v8115_v31 = vadd.f32 %v10843_v56, %v8052_v30  ;;  %v12393_v41 = vpop.f32.mrb[122].mxu1  ;;  %12406 = vmatprep.mubr.msk.bf16.mxu0 %vm175_vm10, %v8141_v32  ;;  %12421 = vmatpush3.bf16.msra.mxu0 %v13235_v12  ;;  %v13241_v32 = vld [vmem:[#allocation15 + $0x48] sm:$0xff]  }
0x1592   :  { %v8118_v37 = vadd.f32 %v12393_v41, %v10843_v56  ;;  %v8055_v59 = vpop.f32.mrb[123].mxu1  ;;  %12407 = vmatmul.mubr.msk.bf16.gmra.mrb[164].mxu0 %vm175_vm10, %v8142_v40  ;;  %v8133_v60 = vmax.f32 %v8117_v5, 0.0  ;;  %v13240_v40 = vld [vmem:[#allocation15 + $0x40] sm:$0xff]  }
0x1593   :  { %v8116_v35 = vadd.f32 %v10843_v56, %v8055_v59  ;;  %v8131_v42 = vmax.f32 %v8115_v31, 0.0  ;;  %12478 = vmatprep.subr.bf16.mxu1 %v13240_v40 }
0x1594   :  { %v8134_v29 = vmax.f32 %v8118_v37, 0.0  ;;  %12479 = vmatpush3.bf16.msra.mxu1 %v13240_v40 }
0x1595   :  { %v8132_v25 = vmax.f32 %v8116_v35, 0.0  ;;  %12480 = vmatprep.subr.bf16.mxu1 %v13241_v32 }
0x1596   :  { %v8144_v52 = vpack.c.bf16 %v8134_v29, %v8133_v60 }
0x1597   :  { %v8143_v23 = vpack.c.bf16 %v8132_v25, %v8131_v42  ;;  %v12396_v45 = vpop.f32.mrb[124].mxu1 }
0x1598   :  { %v8121_v47 = vadd.f32 %v12396_v45, %v10843_v56  ;;  %v8068_v4 = vpop.f32.mrb[125].mxu1  ;;  %12481 = vmatpush3.bf16.msra.mxu1 %v13241_v32 }
0x1599   :  { %v8119_v22 = vadd.f32 %v10843_v56, %v8068_v4  ;;  %v12397_v36 = vpop.f32.mrb[126].mxu1  ;;  %12410 = vmatprep.mubr.msk.bf16.mxu0 %vm175_vm10, %v8143_v23 }
0x159a   :  { %v8122_v7 = vadd.f32 %v12397_v36, %v10843_v56  ;;  %v8071_v21 = vpop.f32.mrb[127].mxu1  ;;  %12411 = vmatmul.mubr.msk.bf16.gmra.mrb[168].mxu0 %vm175_vm10, %v8144_v52  ;;  %v8137_v61 = vmax.f32 %v8121_v47, 0.0 }
0x159b   :  { %v8120_v46 = vadd.f32 %v10843_v56, %v8071_v21  ;;  %v8135_v19 = vmax.f32 %v8119_v22, 0.0  ;;  %v16143_v56 = vld [vmem:[%s16830_s12 + $0xc0] sm:$0xff]  }
0x159c   :  { %v8138_v53 = vmax.f32 %v8122_v7, 0.0  ;;  %12438 = vmatprep.subr.bf16.mxu0 %v16143_v56 }
0x159d   :  { %v8136_v26 = vmax.f32 %v8120_v46, 0.0 }
0x159e   :  { %v8146_v6 = vpack.c.bf16 %v8138_v53, %v8137_v61 }
0x159f   :  { %v8145_v62 = vpack.c.bf16 %v8136_v26, %v8135_v19 }
0x15a1   :  { %12414 = vmatprep.mubr.msk.bf16.mxu0 %vm175_vm10, %v8145_v62 }
0x15a2   :  { %12415 = vmatmul.mubr.msk.bf16.gmra.mrb[172].mxu0 %vm175_vm10, %v8146_v6 }
0x165d   :  { %v12404_v5 = vpop.f32.mrb[160].mxu0 }
0x165e   :  { %v8239_v30 = vadd.f32 %v12404_v5, %v16146_v0  ;;  %v8230_v31 = vpop.f32.mrb[161].mxu0 }
0x165f   :  { %v8231_v41 = vadd.f32 %v16146_v0, %v8230_v31  ;;  %v12405_v37 = vpop.f32.mrb[162].mxu0 }
0x1660   :  { %v8295_v59 = vadd.f32 %v8239_v30, %v15973_v3  ;;  %v8242_v35 = vadd.f32 %v12405_v37, %v16146_v0  ;;  %v8233_v60 = vpop.f32.mrb[163].mxu0 }
0x1661   :  { %v8293_v29 = vadd.f32 %v8231_v41, %v15977_v57  ;;  %v8234_v42 = vadd.f32 %v16146_v0, %v8233_v60  ;;  %v13237_v60 = vld [vmem:[%s16830_s12 + $0xc8] sm:$0xff]  }
0x1662   :  { %v8296_v25 = vadd.f32 %v8242_v35, %v15975_v20  ;;  %v16157_v23 = vmul.f32 %v8295_v59, %v14201_v2 }
0x1663   :  { %v8294_v52 = vadd.f32 %v8234_v42, %v15979_v9  ;;  %v16163_v47 = vmul.f32 %v8293_v29, %v14199_v1 }
0x1664   :  { %v16160_v45 = vmul.f32 %v8296_v25, %v14205_v14 }
0x1665   :  { %v16166_v3 = vmul.f32 %v8294_v52, %v14203_v54  ;;  %v12408_v4 = vpop.f32.mrb[164].mxu0 }
0x1666   :  { %v8326_v57 = vpack.c.bf16 %v16160_v45, %v16157_v23  ;;  %v8255_v20 = vadd.f32 %v12408_v4, %v16146_v0  ;;  %v8246_v22 = vpop.f32.mrb[165].mxu0 }
0x1667   :  { %v8325_v9 = vpack.c.bf16 %v16166_v3, %v16163_v47  ;;  %v8247_v36 = vadd.f32 %v16146_v0, %v8246_v22  ;;  %v12409_v7 = vpop.f32.mrb[166].mxu0 }
0x1668   :  { %8334 = vst.msk [vmem:[#allocation3 + $0x10] sm:$0xff] %vm175_vm10, %v8326_v57  ;;  %v8299_v21 = vadd.f32 %v8255_v20, %v15987_v44  ;;  %v8258_v46 = vadd.f32 %v12409_v7, %v16146_v0  ;;  %v8249_v61 = vpop.f32.mrb[167].mxu0  ;;  %v13238_v57 = vld [vmem:[%s16830_s12 + $0xe0] sm:$0xff]  }
0x1669   :  { %8333 = vst.msk [vmem:[#allocation3 + $0x8] sm:$0xff] %vm175_vm10, %v8325_v9  ;;  %v8297_v53 = vadd.f32 %v8247_v36, %v15991_v34  ;;  %v8250_v19 = vadd.f32 %v16146_v0, %v8249_v61 }
0x166a   :  { %v8300_v26 = vadd.f32 %v8258_v46, %v15989_v17  ;;  %v16183_v62 = vmul.f32 %v8299_v21, %v14219_v27 }
0x166b   :  { %v8298_v6 = vadd.f32 %v8250_v19, %v15993_v48  ;;  %v16189_v44 = vmul.f32 %v8297_v53, %v14209_v15 }
0x166c   :  { %v16186_v12 = vmul.f32 %v8300_v26, %v14222_v13 }
0x166d   :  { %v16192_v40 = vmul.f32 %v8298_v6, %v14211_v16  ;;  %v12412_v32 = vpop.f32.mrb[168].mxu0 }
0x166e   :  { %v8328_v34 = vpack.c.bf16 %v16186_v12, %v16183_v62  ;;  %v8271_v17 = vadd.f32 %v12412_v32, %v16146_v0  ;;  %v8262_v5 = vpop.f32.mrb[169].mxu0 }
0x166f   :  { %v8327_v48 = vpack.c.bf16 %v16192_v40, %v16189_v44  ;;  %v8263_v30 = vadd.f32 %v16146_v0, %v8262_v5  ;;  %v12413_v31 = vpop.f32.mrb[170].mxu0  ;;  %v16213_v25 = vld [vmem:[#allocation3 + $0x10] sm:$0xff] }
0x1670   :  { %8336 = vst.msk [vmem:[#allocation3 + $0x20] sm:$0xff] %vm175_vm10, %v8328_v34  ;;  %v8303_v41 = vadd.f32 %v8271_v17, %v16012_v38  ;;  %v8274_v37 = vadd.f32 %v12413_v31, %v16146_v0  ;;  %v8265_v59 = vpop.f32.mrb[171].mxu0  ;;  %v16203_v35 = vld [vmem:[#allocation3 + $0x8] sm:$0xff]  ;;  %v8341_v31 = vld [vmem:[#allocation3] sm:$0x80] }
0x1671   :  { %8335 = vst.msk [vmem:[#allocation3 + $0x18] sm:$0xff] %vm175_vm10, %v8327_v48  ;;  %v8301_v29 = vadd.f32 %v8263_v30, %v16019_v33  ;;  %v8266_v42 = vadd.f32 %v16146_v0, %v8265_v59  ;;  %12422 = vmatprep.mubr.msk.bf16.mxu0 %vm175_vm10, %v16203_v35 }
0x1672   :  { %v8304_v38 = vadd.f32 %v8274_v37, %v16014_v28  ;;  %12423 = vmatmul.mubr.msk.bf16.vlgmr.msra.gmra.mrb[176].mxu0 %vm175_vm10, %v16213_v25  ;;  %v16221_v4 = vmul.f32 %v8303_v41, %v14267_v8  ;;  %v8362_v41 = vrot.slane %v16203_v35, 7  ;;  %v8361_v37 = vrot.slane %v8341_v31, 7  ;;  %v13239_v35 = vld [vmem:[%s16830_s12 + $0xe8] sm:$0xff]  }
0x1673   :  { %v8302_v52 = vadd.f32 %v8266_v42, %v16021_v55  ;;  %12439 = vmatpush3.bf16.msra.mxu0 %v16143_v56  ;;  %v16230_v28 = vmul.f32 %v8301_v29, %v14243_v58  ;;  %v8364_v42 = vrot.slane %v16213_v25, 7 }
0x1674   :  { %v16224_v33 = vmul.f32 %v8304_v38, %v14272_v24  ;;  %12440 = vmatprep.subr.bf16.mxu0 %v13237_v60  ;;  %v8363_v29 = vsel %vm403_vm4, %v8361_v37, %v8362_v41 }
0x1675   :  { %v16233_v20 = vmul.f32 %v8302_v52, %v14248_v63  ;;  %v12416_v55 = vpop.f32.mrb[172].mxu0  ;;  %v8365_v52 = vsel %vm403_vm4, %v8362_v41, %v8364_v42 }
0x1676   :  { %v8330_v56 = vpack.c.bf16 %v16224_v33, %v16221_v4  ;;  %v8287_v22 = vadd.f32 %v12416_v55, %v16146_v0  ;;  %v8278_v9 = vpop.f32.mrb[173].mxu0 }
0x1677   :  { %v8329_v36 = vpack.c.bf16 %v16233_v20, %v16230_v28  ;;  %v8279_v7 = vadd.f32 %v16146_v0, %v8278_v9  ;;  %v12417_v21 = vpop.f32.mrb[174].mxu0  ;;  %12441 = vmatpush3.bf16.msra.mxu0 %v13237_v60  ;;  %v16251_v32 = vld [vmem:[#allocation3 + $0x20] sm:$0xff] }
0x1678   :  { %8338 = vst.msk [vmem:[#allocation3 + $0x40] sm:$0xff] %vm175_vm10, %v8330_v56  ;;  %v8307_v46 = vadd.f32 %v8287_v22, %v16037_v18  ;;  %v8290_v61 = vadd.f32 %v12417_v21, %v16146_v0  ;;  %v8281_v53 = vpop.f32.mrb[175].mxu0  ;;  %v16244_v19 = vld [vmem:[#allocation3 + $0x18] sm:$0xff]  ;;  %12458 = vmatprep.subr.bf16.mxu0 %v13238_v57  ;;  %v8345_v56 = vld [vmem:[#allocation3 + $0x20] sm:$0x7f]  ;;  %v8682_v37 = vrot.slane %v16251_v32, 1 }
0x1679   :  { %8337 = vst.msk [vmem:[#allocation3 + $0x38] sm:$0xff] %vm175_vm10, %v8329_v36  ;;  %v8305_v26 = vadd.f32 %v8279_v7, %v16041_v51  ;;  %v8282_v6 = vadd.f32 %v16146_v0, %v8281_v53  ;;  %12426 = vmatprep.mubr.msk.bf16.mxu0 %vm175_vm10, %v16244_v19  ;;  %v8366_v38 = vrot.slane %v16244_v19, 7  ;;  %v8346_v22 = vld [vmem:[#allocation3 + $0x30] sm:$0x80]  ;;  %v8368_v9 = vrot.slane %v8345_v56, 7 }
0x167a   :  { %v8308_v34 = vadd.f32 %v8290_v61, %v16039_v39  ;;  %12427 = vmatmul.mubr.msk.bf16.gmra.mrb[180].mxu0 %vm175_vm10, %v16251_v32  ;;  %v16258_v17 = vmul.f32 %v8307_v46, %v16903_v10  ;;  %v8370_v7 = vrot.slane %v8346_v22, 7  ;;  %v8680_v41 = vrot.slane %v16244_v19, 1 }
0x167b   :  { %v8306_v18 = vadd.f32 %v8282_v6, %v16043_v49  ;;  %v16264_v51 = vmul.f32 %v8305_v26, %v14293_v43  ;;  %v8367_v55 = vsel %vm403_vm4, %v8364_v42, %v8366_v38  ;;  %v8369_v21 = vsel %vm403_vm4, %v8366_v38, %v8368_v9  ;;  %v8661_v38 = vld [vmem:[#allocation3 + $0x28] sm:$0x1] }
0x167c   :  { %v16261_v5 = vmul.f32 %v8308_v34, %v16904_v11  ;;  %v8657_v34 = vld [vmem:[#allocation3 + $0x8] sm:$0xfe]  ;;  %v8683_v42 = vsel %vm1231_vm5, %v8680_v41, %v8682_v37 }
0x167d   :  { %v16267_v0 = vmul.f32 %v8306_v18, %v14302_v50 }
0x167e   :  { %v8332_v39 = vpack.c.bf16 %v16261_v5, %v16258_v17 }
0x167f   :  { %v8331_v48 = vpack.c.bf16 %v16267_v0, %v16264_v51  ;;  %v16276_v30 = vld [vmem:[#allocation3 + $0x40] sm:$0xff] }
0x1680   :  { %8340 = vst.msk [vmem:[#allocation3 + $0x50] sm:$0xff] %vm175_vm10, %v8332_v39  ;;  %v8347_v49 = vld [vmem:[#allocation3 + $0x38] sm:$0xff]  ;;  %v8373_v61 = vrot.slane %v16276_v30, 7  ;;  %v8677_v39 = vrot.slane %v8657_v34, 1 }
0x1681   :  { %8339 = vst.msk [vmem:[#allocation3 + $0x48] sm:$0xff] %vm175_vm10, %v8331_v48  ;;  %12430 = vmatprep.mubr.msk.bf16.mxu0 %vm175_vm10, %v8347_v49  ;;  %v8371_v36 = vrot.slane %v8347_v49, 7  ;;  %v8678_v48 = vrot.slane %v16213_v25, 1  ;;  %v8662_v25 = vld [vmem:[#allocation3 + $0x38] sm:$0xfe] }
0x1682   :  { %12431 = vmatmul.mubr.msk.bf16.gmra.mrb[184].mxu0 %vm175_vm10, %v16276_v30 }
0x1683   :  { %v8372_v46 = vsel %vm403_vm4, %v8370_v7, %v8371_v36  ;;  %v8679_v31 = vsel %vm1231_vm5, %v8677_v39, %v8678_v48  ;;  %v8666_v7 = vld [vmem:[#allocation3 + $0x58] sm:$0x1] }
0x1687   :  { %v16282_v60 = vld [vmem:[#allocation3 + $0x50] sm:$0xff] }
0x1688   :  { %v8349_v59 = vld [vmem:[#allocation3 + $0x48] sm:$0xff]  ;;  %v8350_v6 = vld [vmem:[#allocation3 + $0x50] sm:$0x7f]  ;;  %v8691_v22 = vrot.slane %v16282_v60, 1 }
0x1689   :  { %12434 = vmatprep.mubr.msk.bf16.mxu0 %vm175_vm10, %v8349_v59  ;;  %v8375_v53 = vrot.slane %v8349_v59, 7  ;;  %v8377_v18 = vrot.slane %v8350_v6, 7  ;;  %v8689_v32 = vrot.slane %v8349_v59, 1  ;;  %v13242_v59 = vld [vmem:[%s16830_s12 + $0x100] sm:$0xff]  }
0x168a   :  { %12435 = vmatmul.mubr.msk.bf16.gmra.mrb[188].mxu0 %vm175_vm10, %v16282_v60  ;;  %12498 = vmatprep.subr.bf16.mxu1 %v13242_v59  ;;  %v10897_v60 = vld [vmem:[#allocation13 + $0x4] ss:$0 sm:$0xff] }
0x168b   :  { %12442 = vmatprep.mubr.msk.bf16.mxu0 %vm175_vm10, %v8363_v29  ;;  %v8376_v26 = vsel %vm403_vm4, %v8373_v61, %v8375_v53  ;;  %v8378_v49 = vsel %vm403_vm4, %v8375_v53, %v8377_v18  ;;  %v8681_v29 = vsel %vm1231_vm5, %v8678_v48, %v8680_v41 }
0x1692   :  { %12443 = vmatmul.mubr.msk.bf16.vlgmr.msra.gmra.mrb[176].mxu0 %vm175_vm10, %v8365_v52  ;;  %v8686_v52 = vrot.slane %v8662_v25, 1 }
0x1693   :  { %12459 = vmatpush3.bf16.msra.mxu0 %v13238_v57  ;;  %12446 = vmatprep.mubr.msk.bf16.mxu0 %vm175_vm10, %v8367_v55  ;;  %v8374_v57 = vsel %vm403_vm4, %v8371_v36, %v8373_v61  ;;  %v8687_v55 = vrot.slane %v16276_v30, 1  ;;  %v8692_v36 = vsel %vm1231_vm5, %v8689_v32, %v8691_v22  ;;  %v8693_v30 = vrot.slane %v8666_v7, 1 }
0x1694   :  { %12460 = vmatprep.subr.bf16.mxu0 %v13239_v35 }
0x1695   :  { %v8688_v19 = vsel %vm1231_vm5, %v8686_v52, %v8687_v55  ;;  %v8690_v9 = vsel %vm1231_vm5, %v8687_v55, %v8689_v32 }
0x1697   :  { %12461 = vmatpush3.bf16.msra.mxu0 %v13239_v35  ;;  %v8684_v35 = vrot.slane %v8661_v38, 1 }
0x1699   :  { %v8685_v56 = vsel %vm1231_vm5, %v8682_v37, %v8684_v35 }
0x169a   :  { %12447 = vmatmul.mubr.msk.bf16.gmra.mrb[180].mxu0 %vm175_vm10, %v8369_v21  ;;  %v8694_v21 = vsel %vm1231_vm5, %v8691_v22, %v8693_v30 }
0x169b   :  { %12450 = vmatprep.mubr.msk.bf16.mxu0 %vm175_vm10, %v8372_v46 }
0x16a2   :  { %12451 = vmatmul.mubr.msk.bf16.gmra.mrb[184].mxu0 %vm175_vm10, %v8374_v57 }
0x16a3   :  { %12454 = vmatprep.mubr.msk.bf16.mxu0 %vm175_vm10, %v8376_v26 }
0x16aa   :  { %12455 = vmatmul.mubr.msk.bf16.gmra.mrb[188].mxu0 %vm175_vm10, %v8378_v49 }
0x16ab   :  { %12462 = vmatprep.mubr.msk.bf16.mxu0 %vm175_vm10, %v8679_v31 }
0x16b2   :  { %12463 = vmatmul.mubr.msk.bf16.vlgmr.msra.gmra.mrb[176].mxu0 %vm175_vm10, %v8681_v29 }
0x16b3   :  { %12466 = vmatprep.mubr.msk.bf16.mxu0 %vm175_vm10, %v8683_v42 }
0x16ba   :  { %12467 = vmatmul.mubr.msk.bf16.gmra.mrb[180].mxu0 %vm175_vm10, %v8685_v56 }
0x16bb   :  { %12470 = vmatprep.mubr.msk.bf16.mxu0 %vm175_vm10, %v8688_v19 }
0x16c2   :  { %12471 = vmatmul.mubr.msk.bf16.gmra.mrb[184].mxu0 %vm175_vm10, %v8690_v9 }
0x16c3   :  { %12474 = vmatprep.mubr.msk.bf16.mxu0 %vm175_vm10, %v8692_v36 }
0x16ca   :  { %12475 = vmatmul.mubr.msk.bf16.gmra.mrb[188].mxu0 %vm175_vm10, %v8694_v21 }
0x1785   :  { %v12464_v46 = vpop.f32.mrb[176].mxu0 }
0x1786   :  { %v8859_v61 = vadd.f32 %v12464_v46, %v10897_v60  ;;  %v8770_v53 = vpop.f32.mrb[177].mxu0 }
0x1787   :  { %v8857_v57 = vadd.f32 %v10897_v60, %v8770_v53  ;;  %v12465_v26 = vpop.f32.mrb[178].mxu0 }
0x1788   :  { %v8860_v6 = vadd.f32 %v12465_v26, %v10897_v60  ;;  %v8773_v34 = vpop.f32.mrb[179].mxu0  ;;  %v8875_v39 = vmax.f32 %v8859_v61, 0.0 }
0x1789   :  { %v8858_v18 = vadd.f32 %v10897_v60, %v8773_v34  ;;  %v8873_v49 = vmax.f32 %v8857_v57, 0.0 }
0x178a   :  { %v8876_v48 = vmax.f32 %v8860_v6, 0.0 }
0x178b   :  { %v8874_v31 = vmax.f32 %v8858_v18, 0.0 }
0x178c   :  { %v8890_v41 = vpack.c.bf16 %v8876_v48, %v8875_v39 }
0x178d   :  { %v8889_v37 = vpack.c.bf16 %v8874_v31, %v8873_v49  ;;  %v12468_v29 = vpop.f32.mrb[180].mxu0 }
0x178e   :  { %v8863_v42 = vadd.f32 %v12468_v29, %v10897_v60  ;;  %v8786_v38 = vpop.f32.mrb[181].mxu0 }
0x178f   :  { %v8861_v25 = vadd.f32 %v10897_v60, %v8786_v38  ;;  %v12469_v35 = vpop.f32.mrb[182].mxu0  ;;  %12482 = vmatprep.mubr.msk.bf16.mxu1 %vm175_vm10, %v8889_v37 }
0x1790   :  { %v8864_v52 = vadd.f32 %v12469_v35, %v10897_v60  ;;  %v8789_v55 = vpop.f32.mrb[183].mxu0  ;;  %12483 = vmatmul.mubr.msk.bf16.vlgmr.msra.gmra.mrb[128].mxu1 %vm175_vm10, %v8890_v41  ;;  %v8879_v19 = vmax.f32 %v8863_v42, 0.0 }
0x1791   :  { %v8862_v56 = vadd.f32 %v10897_v60, %v8789_v55  ;;  %12499 = vmatpush3.bf16.msra.mxu1 %v13242_v59  ;;  %v8877_v22 = vmax.f32 %v8861_v25, 0.0 }
0x1792   :  { %v8880_v32 = vmax.f32 %v8864_v52, 0.0 }
0x1793   :  { %v8878_v9 = vmax.f32 %v8862_v56, 0.0 }
0x1794   :  { %v8892_v36 = vpack.c.bf16 %v8880_v32, %v8879_v19 }
0x1795   :  { %v8891_v7 = vpack.c.bf16 %v8878_v9, %v8877_v22  ;;  %v12472_v30 = vpop.f32.mrb[184].mxu0  ;;  %v13243_v9 = vld [vmem:[%s16830_s12 + $0x108] sm:$0xff]  }
0x1796   :  { %v8867_v21 = vadd.f32 %v12472_v30, %v10897_v60  ;;  %v8802_v46 = vpop.f32.mrb[185].mxu0  ;;  %12500 = vmatprep.subr.bf16.mxu1 %v13243_v9  ;;  %v16349_v30 = vld [vmem:[#allocation16 + $0x4] ss:$0 sm:$0xff] }
0x1797   :  { %v8865_v61 = vadd.f32 %v10897_v60, %v8802_v46  ;;  %v12473_v53 = vpop.f32.mrb[186].mxu0  ;;  %12486 = vmatprep.mubr.msk.bf16.mxu1 %vm175_vm10, %v8891_v7  ;;  %12501 = vmatpush3.bf16.msra.mxu1 %v13243_v9  ;;  %v13249_v7 = vld [vmem:[#allocation15 + $0x58] sm:$0xff]  }
0x1798   :  { %v8868_v57 = vadd.f32 %v12473_v53, %v10897_v60  ;;  %v8805_v26 = vpop.f32.mrb[187].mxu0  ;;  %12487 = vmatmul.mubr.msk.bf16.gmra.mrb[132].mxu1 %vm175_vm10, %v8892_v36  ;;  %v8883_v34 = vmax.f32 %v8867_v21, 0.0  ;;  %v13248_v36 = vld [vmem:[#allocation15 + $0x50] sm:$0xff]  }
0x1799   :  { %v8866_v6 = vadd.f32 %v10897_v60, %v8805_v26  ;;  %v8881_v18 = vmax.f32 %v8865_v61, 0.0  ;;  %12558 = vmatprep.subr.bf16.mxu0 %v13248_v36 }
0x179a   :  { %v8884_v59 = vmax.f32 %v8868_v57, 0.0  ;;  %12559 = vmatpush3.bf16.msra.mxu0 %v13248_v36 }
0x179b   :  { %v8882_v39 = vmax.f32 %v8866_v6, 0.0  ;;  %12560 = vmatprep.subr.bf16.mxu0 %v13249_v7 }
0x179c   :  { %v8894_v48 = vpack.c.bf16 %v8884_v59, %v8883_v34 }
0x179d   :  { %v8893_v49 = vpack.c.bf16 %v8882_v39, %v8881_v18  ;;  %v12476_v31 = vpop.f32.mrb[188].mxu0 }
0x179e   :  { %v8871_v41 = vadd.f32 %v12476_v31, %v10897_v60  ;;  %v8818_v37 = vpop.f32.mrb[189].mxu0  ;;  %12561 = vmatpush3.bf16.msra.mxu0 %v13249_v7 }
0x179f   :  { %v8869_v29 = vadd.f32 %v10897_v60, %v8818_v37  ;;  %v12477_v42 = vpop.f32.mrb[190].mxu0  ;;  %12490 = vmatprep.mubr.msk.bf16.mxu1 %vm175_vm10, %v8893_v49 }
0x17a0   :  { %v8872_v38 = vadd.f32 %v12477_v42, %v10897_v60  ;;  %v8821_v25 = vpop.f32.mrb[191].mxu0  ;;  %12491 = vmatmul.mubr.msk.bf16.gmra.mrb[136].mxu1 %vm175_vm10, %v8894_v48  ;;  %v8887_v52 = vmax.f32 %v8871_v41, 0.0 }
0x17a1   :  { %v8870_v35 = vadd.f32 %v10897_v60, %v8821_v25  ;;  %v8885_v56 = vmax.f32 %v8869_v29, 0.0  ;;  %v16346_v60 = vld [vmem:[%s16830_s12 + $0xf0] sm:$0xff]  }
0x17a2   :  { %v8888_v55 = vmax.f32 %v8872_v38, 0.0  ;;  %12518 = vmatprep.subr.bf16.mxu1 %v16346_v60 }
0x17a3   :  { %v8886_v19 = vmax.f32 %v8870_v35, 0.0 }
0x17a4   :  { %v8896_v32 = vpack.c.bf16 %v8888_v55, %v8887_v52 }
0x17a5   :  { %v8895_v22 = vpack.c.bf16 %v8886_v19, %v8885_v56 }
0x17a7   :  { %12494 = vmatprep.mubr.msk.bf16.mxu1 %vm175_vm10, %v8895_v22 }
0x17a8   :  { %12495 = vmatmul.mubr.msk.bf16.gmra.mrb[140].mxu1 %vm175_vm10, %v8896_v32 }
0x1863   :  { %v12484_v21 = vpop.f32.mrb[128].mxu1 }
0x1864   :  { %v8989_v46 = vadd.f32 %v12484_v21, %v16349_v30  ;;  %v8980_v61 = vpop.f32.mrb[129].mxu1 }
0x1865   :  { %v8981_v53 = vadd.f32 %v16349_v30, %v8980_v61  ;;  %v12485_v57 = vpop.f32.mrb[130].mxu1 }
0x1866   :  { %v9045_v26 = vadd.f32 %v8989_v46, %v16157_v23  ;;  %v8992_v6 = vadd.f32 %v12485_v57, %v16349_v30  ;;  %v8983_v34 = vpop.f32.mrb[131].mxu1 }
0x1867   :  { %v9043_v59 = vadd.f32 %v8981_v53, %v16163_v47  ;;  %v8984_v18 = vadd.f32 %v16349_v30, %v8983_v34  ;;  %v13245_v34 = vld [vmem:[%s16830_s12 + $0xf8] sm:$0xff]  }
0x1868   :  { %v9046_v39 = vadd.f32 %v8992_v6, %v16160_v45  ;;  %v16360_v49 = vmul.f32 %v9045_v26, %v14201_v2 }
0x1869   :  { %v9044_v48 = vadd.f32 %v8984_v18, %v16166_v3  ;;  %v16366_v41 = vmul.f32 %v9043_v59, %v14199_v1 }
0x186a   :  { %v16363_v31 = vmul.f32 %v9046_v39, %v14205_v14 }
0x186b   :  { %v16369_v23 = vmul.f32 %v9044_v48, %v14203_v54  ;;  %v12488_v37 = vpop.f32.mrb[132].mxu1 }
0x186c   :  { %v9076_v47 = vpack.c.bf16 %v16363_v31, %v16360_v49  ;;  %v9005_v45 = vadd.f32 %v12488_v37, %v16349_v30  ;;  %v8996_v29 = vpop.f32.mrb[133].mxu1 }
0x186d   :  { %v9075_v3 = vpack.c.bf16 %v16369_v23, %v16366_v41  ;;  %v8997_v42 = vadd.f32 %v16349_v30, %v8996_v29  ;;  %v12489_v38 = vpop.f32.mrb[134].mxu1 }
0x186e   :  { %9084 = vst.msk [vmem:[#allocation3 + $0x10] sm:$0xff] %vm175_vm10, %v9076_v47  ;;  %v9049_v25 = vadd.f32 %v9005_v45, %v16183_v62  ;;  %v9008_v35 = vadd.f32 %v12489_v38, %v16349_v30  ;;  %v8999_v52 = vpop.f32.mrb[135].mxu1  ;;  %v13246_v47 = vld [vmem:[%s16830_s12 + $0x110] sm:$0xff]  }
0x186f   :  { %9083 = vst.msk [vmem:[#allocation3 + $0x8] sm:$0xff] %vm175_vm10, %v9075_v3  ;;  %v9047_v55 = vadd.f32 %v8997_v42, %v16189_v44  ;;  %v9000_v56 = vadd.f32 %v16349_v30, %v8999_v52 }
0x1870   :  { %v9050_v19 = vadd.f32 %v9008_v35, %v16186_v12  ;;  %v16386_v22 = vmul.f32 %v9049_v25, %v14219_v27 }
0x1871   :  { %v9048_v32 = vadd.f32 %v9000_v56, %v16192_v40  ;;  %v16392_v62 = vmul.f32 %v9047_v55, %v14209_v15 }
0x1872   :  { %v16389_v9 = vmul.f32 %v9050_v19, %v14222_v13 }
0x1873   :  { %v16395_v36 = vmul.f32 %v9048_v32, %v14211_v16  ;;  %v12492_v7 = vpop.f32.mrb[136].mxu1 }
0x1874   :  { %v9078_v44 = vpack.c.bf16 %v16389_v9, %v16386_v22  ;;  %v9021_v12 = vadd.f32 %v12492_v7, %v16349_v30  ;;  %v9012_v21 = vpop.f32.mrb[137].mxu1 }
0x1875   :  { %v9077_v40 = vpack.c.bf16 %v16395_v36, %v16392_v62  ;;  %v9013_v46 = vadd.f32 %v16349_v30, %v9012_v21  ;;  %v12493_v61 = vpop.f32.mrb[138].mxu1  ;;  %v16416_v39 = vld [vmem:[#allocation3 + $0x10] sm:$0xff] }
0x1876   :  { %9086 = vst.msk [vmem:[#allocation3 + $0x20] sm:$0xff] %vm175_vm10, %v9078_v44  ;;  %v9053_v53 = vadd.f32 %v9021_v12, %v16221_v4  ;;  %v9024_v57 = vadd.f32 %v12493_v61, %v16349_v30  ;;  %v9015_v26 = vpop.f32.mrb[139].mxu1  ;;  %v16406_v6 = vld [vmem:[#allocation3 + $0x8] sm:$0xff]  ;;  %v9091_v61 = vld [vmem:[#allocation3] sm:$0xc0] }
0x1877   :  { %9085 = vst.msk [vmem:[#allocation3 + $0x18] sm:$0xff] %vm175_vm10, %v9077_v40  ;;  %v9051_v59 = vadd.f32 %v9013_v46, %v16230_v28  ;;  %v9016_v18 = vadd.f32 %v16349_v30, %v9015_v26  ;;  %12502 = vmatprep.mubr.msk.bf16.mxu1 %vm175_vm10, %v16406_v6 }
0x1878   :  { %v9054_v4 = vadd.f32 %v9024_v57, %v16224_v33  ;;  %12503 = vmatmul.mubr.msk.bf16.vlgmr.msra.gmra.mrb[144].mxu1 %vm175_vm10, %v16416_v39  ;;  %v16424_v37 = vmul.f32 %v9053_v53, %v14267_v8  ;;  %v9112_v53 = vrot.slane %v16406_v6, 6  ;;  %v9111_v57 = vrot.slane %v9091_v61, 6  ;;  %v13247_v6 = vld [vmem:[%s16830_s12 + $0x118] sm:$0xff]  }
0x1879   :  { %v9052_v48 = vadd.f32 %v9016_v18, %v16233_v20  ;;  %12519 = vmatpush3.bf16.msra.mxu1 %v16346_v60  ;;  %v16433_v33 = vmul.f32 %v9051_v59, %v14243_v58  ;;  %v9114_v18 = vrot.slane %v16416_v39, 6 }
0x187a   :  { %v16427_v28 = vmul.f32 %v9054_v4, %v14272_v24  ;;  %12520 = vmatprep.subr.bf16.mxu1 %v13245_v34  ;;  %v9113_v59 = vsel %vm1775_vm6, %v9111_v57, %v9112_v53 }
0x187b   :  { %v16436_v45 = vmul.f32 %v9052_v48, %v14248_v63  ;;  %v12496_v20 = vpop.f32.mrb[140].mxu1  ;;  %v9115_v48 = vsel %vm1775_vm6, %v9112_v53, %v9114_v18 }
0x187c   :  { %v9080_v60 = vpack.c.bf16 %v16427_v28, %v16424_v37  ;;  %v9037_v29 = vadd.f32 %v12496_v20, %v16349_v30  ;;  %v9028_v3 = vpop.f32.mrb[141].mxu1 }
0x187d   :  { %v9079_v42 = vpack.c.bf16 %v16436_v45, %v16433_v33  ;;  %v9029_v38 = vadd.f32 %v16349_v30, %v9028_v3  ;;  %v12497_v25 = vpop.f32.mrb[142].mxu1  ;;  %12521 = vmatpush3.bf16.msra.mxu1 %v13245_v34  ;;  %v16454_v7 = vld [vmem:[#allocation3 + $0x20] sm:$0xff] }
0x187e   :  { %9088 = vst.msk [vmem:[#allocation3 + $0x40] sm:$0xff] %vm175_vm10, %v9080_v60  ;;  %v9057_v35 = vadd.f32 %v9037_v29, %v16258_v17  ;;  %v9040_v52 = vadd.f32 %v12497_v25, %v16349_v30  ;;  %v9031_v55 = vpop.f32.mrb[143].mxu1  ;;  %v16447_v56 = vld [vmem:[#allocation3 + $0x18] sm:$0xff]  ;;  %12538 = vmatprep.subr.bf16.mxu1 %v13246_v47  ;;  %v9095_v60 = vld [vmem:[#allocation3 + $0x20] sm:$0x3f]  ;;  %v9432_v57 = vrot.slane %v16454_v7, 2 }
0x187f   :  { %9087 = vst.msk [vmem:[#allocation3 + $0x38] sm:$0xff] %vm175_vm10, %v9079_v42  ;;  %v9055_v19 = vadd.f32 %v9029_v38, %v16264_v51  ;;  %v9032_v32 = vadd.f32 %v16349_v30, %v9031_v55  ;;  %12506 = vmatprep.mubr.msk.bf16.mxu1 %vm175_vm10, %v16447_v56  ;;  %v9116_v4 = vrot.slane %v16447_v56, 6  ;;  %v9096_v29 = vld [vmem:[#allocation3 + $0x30] sm:$0xc0]  ;;  %v9118_v3 = vrot.slane %v9095_v60, 6 }
0x1880   :  { %v9058_v44 = vadd.f32 %v9040_v52, %v16261_v5  ;;  %12507 = vmatmul.mubr.msk.bf16.gmra.mrb[148].mxu1 %vm175_vm10, %v16454_v7  ;;  %v16461_v12 = vmul.f32 %v9057_v35, %v16903_v10  ;;  %v9120_v38 = vrot.slane %v9096_v29, 6  ;;  %v9430_v53 = vrot.slane %v16447_v56, 2 }
0x1881   :  { %v9056_v17 = vadd.f32 %v9032_v32, %v16267_v0  ;;  %v16467_v51 = vmul.f32 %v9055_v19, %v14293_v43  ;;  %v9117_v20 = vsel %vm1775_vm6, %v9114_v18, %v9116_v4  ;;  %v9119_v25 = vsel %vm1775_vm6, %v9116_v4, %v9118_v3  ;;  %v9411_v4 = vld [vmem:[#allocation3 + $0x28] sm:$0x3] }
0x1882   :  { %v16464_v21 = vmul.f32 %v9058_v44, %v16904_v11  ;;  %v9407_v44 = vld [vmem:[#allocation3 + $0x8] sm:$0xfc]  ;;  %v9433_v18 = vsel %vm2516_vm7, %v9430_v53, %v9432_v57 }
0x1883   :  { %v16470_v30 = vmul.f32 %v9056_v17, %v14302_v50 }
0x1884   :  { %v9082_v5 = vpack.c.bf16 %v16464_v21, %v16461_v12 }
0x1885   :  { %v9081_v40 = vpack.c.bf16 %v16470_v30, %v16467_v51  ;;  %v16479_v46 = vld [vmem:[#allocation3 + $0x40] sm:$0xff] }
0x1886   :  { %9090 = vst.msk [vmem:[#allocation3 + $0x50] sm:$0xff] %vm175_vm10, %v9082_v5  ;;  %v9097_v0 = vld [vmem:[#allocation3 + $0x38] sm:$0xff]  ;;  %v9123_v52 = vrot.slane %v16479_v46, 6  ;;  %v9427_v5 = vrot.slane %v9407_v44, 2 }
0x1887   :  { %9089 = vst.msk [vmem:[#allocation3 + $0x48] sm:$0xff] %vm175_vm10, %v9081_v40  ;;  %12510 = vmatprep.mubr.msk.bf16.mxu1 %vm175_vm10, %v9097_v0  ;;  %v9121_v42 = vrot.slane %v9097_v0, 6  ;;  %v9428_v40 = vrot.slane %v16416_v39, 2  ;;  %v9412_v39 = vld [vmem:[#allocation3 + $0x38] sm:$0xfc] }
0x1888   :  { %12511 = vmatmul.mubr.msk.bf16.gmra.mrb[152].mxu1 %vm175_vm10, %v16479_v46 }
0x1889   :  { %v9122_v35 = vsel %vm1775_vm6, %v9120_v38, %v9121_v42  ;;  %v9429_v61 = vsel %vm2516_vm7, %v9427_v5, %v9428_v40  ;;  %v9416_v38 = vld [vmem:[#allocation3 + $0x58] sm:$0x3] }
0x188d   :  { %v16485_v34 = vld [vmem:[#allocation3 + $0x50] sm:$0xff] }
0x188e   :  { %v9099_v26 = vld [vmem:[#allocation3 + $0x48] sm:$0xff]  ;;  %v9100_v32 = vld [vmem:[#allocation3 + $0x50] sm:$0x3f]  ;;  %v9441_v29 = vrot.slane %v16485_v34, 2 }
0x188f   :  { %12514 = vmatprep.mubr.msk.bf16.mxu1 %vm175_vm10, %v9099_v26  ;;  %v9125_v55 = vrot.slane %v9099_v26, 6  ;;  %v9127_v17 = vrot.slane %v9100_v32, 6  ;;  %v9439_v7 = vrot.slane %v9099_v26, 2  ;;  %v13250_v26 = vld [vmem:[%s16834_s16 + $0x10] sm:$0xff]  }
0x1890   :  { %12515 = vmatmul.mubr.msk.bf16.gmra.mrb[156].mxu1 %vm175_vm10, %v16485_v34  ;;  %12578 = vmatprep.subr.bf16.mxu0 %v13250_v26  ;;  %v10951_v34 = vld [vmem:[#allocation13 + $0x5] ss:$0 sm:$0xff] }
0x1891   :  { %12522 = vmatprep.mubr.msk.bf16.mxu1 %vm175_vm10, %v9113_v59  ;;  %v9126_v19 = vsel %vm1775_vm6, %v9123_v52, %v9125_v55  ;;  %v9128_v0 = vsel %vm1775_vm6, %v9125_v55, %v9127_v17  ;;  %v9431_v59 = vsel %vm2516_vm7, %v9428_v40, %v9430_v53 }
0x1898   :  { %12523 = vmatmul.mubr.msk.bf16.vlgmr.msra.gmra.mrb[144].mxu1 %vm175_vm10, %v9115_v48  ;;  %v9436_v48 = vrot.slane %v9412_v39, 2  ;;  %v13251_v39 = vld [vmem:[%s16834_s16 + $0x18] sm:$0xff]  }
0x1899   :  { %12539 = vmatpush3.bf16.msra.mxu1 %v13246_v47  ;;  %12526 = vmatprep.mubr.msk.bf16.mxu1 %vm175_vm10, %v9117_v20  ;;  %v9124_v47 = vsel %vm1775_vm6, %v9121_v42, %v9123_v52  ;;  %v9437_v20 = vrot.slane %v16479_v46, 2  ;;  %v9442_v42 = vsel %vm2516_vm7, %v9439_v7, %v9441_v29  ;;  %v9443_v46 = vrot.slane %v9416_v38, 2 }
0x189a   :  { %12540 = vmatprep.subr.bf16.mxu1 %v13247_v6 }
0x189b   :  { %v9438_v56 = vsel %vm2516_vm7, %v9436_v48, %v9437_v20  ;;  %v9440_v3 = vsel %vm2516_vm7, %v9437_v20, %v9439_v7 }
0x189d   :  { %12541 = vmatpush3.bf16.msra.mxu1 %v13247_v6  ;;  %v9434_v6 = vrot.slane %v9411_v4, 2 }
0x189f   :  { %v9435_v60 = vsel %vm2516_vm7, %v9432_v57, %v9434_v6 }
0x18a0   :  { %12527 = vmatmul.mubr.msk.bf16.gmra.mrb[148].mxu1 %vm175_vm10, %v9119_v25  ;;  %v9444_v25 = vsel %vm2516_vm7, %v9441_v29, %v9443_v46 }
0x18a1   :  { %12530 = vmatprep.mubr.msk.bf16.mxu1 %vm175_vm10, %v9122_v35 }
0x18a8   :  { %12531 = vmatmul.mubr.msk.bf16.gmra.mrb[152].mxu1 %vm175_vm10, %v9124_v47 }
0x18a9   :  { %12534 = vmatprep.mubr.msk.bf16.mxu1 %vm175_vm10, %v9126_v19 }
0x18b0   :  { %12535 = vmatmul.mubr.msk.bf16.gmra.mrb[156].mxu1 %vm175_vm10, %v9128_v0 }
0x18b1   :  { %12542 = vmatprep.mubr.msk.bf16.mxu1 %vm175_vm10, %v9429_v61 }
0x18b8   :  { %12543 = vmatmul.mubr.msk.bf16.vlgmr.msra.gmra.mrb[144].mxu1 %vm175_vm10, %v9431_v59 }
0x18b9   :  { %12546 = vmatprep.mubr.msk.bf16.mxu1 %vm175_vm10, %v9433_v18 }
0x18c0   :  { %12547 = vmatmul.mubr.msk.bf16.gmra.mrb[148].mxu1 %vm175_vm10, %v9435_v60 }
0x18c1   :  { %12550 = vmatprep.mubr.msk.bf16.mxu1 %vm175_vm10, %v9438_v56 }
0x18c8   :  { %12551 = vmatmul.mubr.msk.bf16.gmra.mrb[152].mxu1 %vm175_vm10, %v9440_v3 }
0x18c9   :  { %12554 = vmatprep.mubr.msk.bf16.mxu1 %vm175_vm10, %v9442_v42 }
0x18d0   :  { %12555 = vmatmul.mubr.msk.bf16.gmra.mrb[156].mxu1 %vm175_vm10, %v9444_v25 }
0x198b   :  { %v12544_v35 = vpop.f32.mrb[144].mxu1 }
0x198c   :  { %v9609_v52 = vadd.f32 %v12544_v35, %v10951_v34  ;;  %v9520_v55 = vpop.f32.mrb[145].mxu1 }
0x198d   :  { %v9607_v47 = vadd.f32 %v10951_v34, %v9520_v55  ;;  %v12545_v19 = vpop.f32.mrb[146].mxu1 }
0x198e   :  { %v9610_v32 = vadd.f32 %v12545_v19, %v10951_v34  ;;  %v9523_v44 = vpop.f32.mrb[147].mxu1  ;;  %v9625_v5 = vmax.f32 %v9609_v52, 0.0 }
0x198f   :  { %v9608_v17 = vadd.f32 %v10951_v34, %v9523_v44  ;;  %v9623_v0 = vmax.f32 %v9607_v47, 0.0 }
0x1990   :  { %v9626_v40 = vmax.f32 %v9610_v32, 0.0 }
0x1991   :  { %v9624_v61 = vmax.f32 %v9608_v17, 0.0 }
0x1992   :  { %v9640_v53 = vpack.c.bf16 %v9626_v40, %v9625_v5 }
0x1993   :  { %v9639_v57 = vpack.c.bf16 %v9624_v61, %v9623_v0  ;;  %v12548_v59 = vpop.f32.mrb[148].mxu1 }
0x1994   :  { %v9613_v18 = vadd.f32 %v12548_v59, %v10951_v34  ;;  %v9536_v4 = vpop.f32.mrb[149].mxu1 }
0x1995   :  { %v9611_v6 = vadd.f32 %v10951_v34, %v9536_v4  ;;  %v12549_v48 = vpop.f32.mrb[150].mxu1  ;;  %12562 = vmatprep.mubr.msk.bf16.mxu0 %vm175_vm10, %v9639_v57 }
0x1996   :  { %v9614_v20 = vadd.f32 %v12549_v48, %v10951_v34  ;;  %v9539_v60 = vpop.f32.mrb[151].mxu1  ;;  %12563 = vmatmul.mubr.msk.bf16.vlgmr.msra.gmra.mrb[192].mxu0 %vm175_vm10, %v9640_v53  ;;  %v9629_v7 = vmax.f32 %v9613_v18, 0.0 }
0x1997   :  { %v9612_v56 = vadd.f32 %v10951_v34, %v9539_v60  ;;  %12579 = vmatpush3.bf16.msra.mxu0 %v13250_v26  ;;  %v9627_v3 = vmax.f32 %v9611_v6, 0.0 }
0x1998   :  { %v9630_v29 = vmax.f32 %v9614_v20, 0.0  ;;  %12580 = vmatprep.subr.bf16.mxu0 %v13251_v39 }
0x1999   :  { %v9628_v42 = vmax.f32 %v9612_v56, 0.0 }
0x199a   :  { %v9642_v38 = vpack.c.bf16 %v9630_v29, %v9629_v7 }
0x199b   :  { %v9641_v46 = vpack.c.bf16 %v9628_v42, %v9627_v3  ;;  %v12552_v25 = vpop.f32.mrb[152].mxu1  ;;  %12581 = vmatpush3.bf16.msra.mxu0 %v13251_v39  ;;  %v16546_v42 = vld [vmem:[#allocation16 + $0x5] ss:$0 sm:$0xff] }
0x199c   :  { %v9617_v35 = vadd.f32 %v12552_v25, %v10951_v34  ;;  %v9552_v52 = vpop.f32.mrb[153].mxu1 }
0x199d   :  { %v9615_v55 = vadd.f32 %v10951_v34, %v9552_v52  ;;  %v12553_v47 = vpop.f32.mrb[154].mxu1  ;;  %12566 = vmatprep.mubr.msk.bf16.mxu0 %vm175_vm10, %v9641_v46 }
0x199e   :  { %v9618_v19 = vadd.f32 %v12553_v47, %v10951_v34  ;;  %v9555_v32 = vpop.f32.mrb[155].mxu1  ;;  %12567 = vmatmul.mubr.msk.bf16.gmra.mrb[196].mxu0 %vm175_vm10, %v9642_v38  ;;  %v9633_v44 = vmax.f32 %v9617_v35, 0.0 }
0x199f   :  { %v9616_v26 = vadd.f32 %v10951_v34, %v9555_v32  ;;  %v9631_v5 = vmax.f32 %v9615_v55, 0.0 }
0x19a0   :  { %v9634_v17 = vmax.f32 %v9618_v19, 0.0 }
0x19a1   :  { %v9632_v40 = vmax.f32 %v9616_v26, 0.0 }
0x19a2   :  { %v9644_v0 = vpack.c.bf16 %v9634_v17, %v9633_v44 }
0x19a3   :  { %v9643_v61 = vpack.c.bf16 %v9632_v40, %v9631_v5  ;;  %v12556_v53 = vpop.f32.mrb[156].mxu1 }
0x19a4   :  { %v9621_v57 = vadd.f32 %v12556_v53, %v10951_v34  ;;  %v9568_v59 = vpop.f32.mrb[157].mxu1 }
0x19a5   :  { %v9619_v18 = vadd.f32 %v10951_v34, %v9568_v59  ;;  %v12557_v4 = vpop.f32.mrb[158].mxu1  ;;  %12570 = vmatprep.mubr.msk.bf16.mxu0 %vm175_vm10, %v9643_v61 }
0x19a6   :  { %v9622_v39 = vadd.f32 %v12557_v4, %v10951_v34  ;;  %v9571_v6 = vpop.f32.mrb[159].mxu1  ;;  %12571 = vmatmul.mubr.msk.bf16.gmra.mrb[200].mxu0 %vm175_vm10, %v9644_v0  ;;  %v9637_v20 = vmax.f32 %v9621_v57, 0.0 }
0x19a7   :  { %v9620_v48 = vadd.f32 %v10951_v34, %v9571_v6  ;;  %v9635_v56 = vmax.f32 %v9619_v18, 0.0 }
0x19a8   :  { %v9638_v60 = vmax.f32 %v9622_v39, 0.0 }
0x19a9   :  { %v9636_v7 = vmax.f32 %v9620_v48, 0.0 }
0x19aa   :  { %v9646_v29 = vpack.c.bf16 %v9638_v60, %v9637_v20 }
0x19ab   :  { %v9645_v3 = vpack.c.bf16 %v9636_v7, %v9635_v56 }
0x19ad   :  { %12574 = vmatprep.mubr.msk.bf16.mxu0 %vm175_vm10, %v9645_v3 }
0x19ae   :  { %12575 = vmatmul.mubr.msk.bf16.gmra.mrb[204].mxu0 %vm175_vm10, %v9646_v29 }
0x1a69   :  { %v12564_v38 = vpop.f32.mrb[192].mxu0 }
0x1a6a   :  { %v9739_v46 = vadd.f32 %v12564_v38, %v16546_v42  ;;  %v9730_v25 = vpop.f32.mrb[193].mxu0 }
0x1a6b   :  { %v9731_v35 = vadd.f32 %v16546_v42, %v9730_v25  ;;  %v12565_v52 = vpop.f32.mrb[194].mxu0 }
0x1a6c   :  { %v9795_v34 = vadd.f32 %v9739_v46, %v16360_v49  ;;  %v9742_v55 = vadd.f32 %v12565_v52, %v16546_v42  ;;  %v9733_v47 = vpop.f32.mrb[195].mxu0 }
0x1a6d   :  { %v9793_v19 = vadd.f32 %v9731_v35, %v16366_v41  ;;  %v9734_v32 = vadd.f32 %v16546_v42, %v9733_v47 }
0x1a6e   :  { %v9796_v26 = vadd.f32 %v9742_v55, %v16363_v31  ;;  %v16557_v17 = vmul.f32 %v9795_v34, %v14201_v2 }
0x1a6f   :  { %v9794_v44 = vadd.f32 %v9734_v32, %v16369_v23  ;;  %v16563_v40 = vmul.f32 %v9793_v19, %v14199_v1 }
0x1a70   :  { %v16560_v5 = vmul.f32 %v9796_v26, %v14205_v14 }
0x1a71   :  { %v16566_v49 = vmul.f32 %v9794_v44, %v14203_v54  ;;  %v12568_v0 = vpop.f32.mrb[196].mxu0 }
0x1a72   :  { %v9826_v41 = vpack.c.bf16 %v16560_v5, %v16557_v17  ;;  %v9755_v31 = vadd.f32 %v12568_v0, %v16546_v42  ;;  %v9746_v61 = vpop.f32.mrb[197].mxu0 }
0x1a73   :  { %v9825_v23 = vpack.c.bf16 %v16566_v49, %v16563_v40  ;;  %v9747_v53 = vadd.f32 %v16546_v42, %v9746_v61  ;;  %v12569_v57 = vpop.f32.mrb[198].mxu0 }
0x1a74   :  { %v9799_v59 = vadd.f32 %v9755_v31, %v16386_v22  ;;  %v9758_v18 = vadd.f32 %v12569_v57, %v16546_v42  ;;  %v9749_v4 = vpop.f32.mrb[199].mxu0 }
0x1a75   :  { %v9797_v39 = vadd.f32 %v9747_v53, %v16392_v62  ;;  %v9750_v6 = vadd.f32 %v16546_v42, %v9749_v4  ;;  %12582 = vmatprep.mubr.msk.bf16.mxu0 %vm175_vm10, %v9825_v23 }
0x1a76   :  { %v9800_v48 = vadd.f32 %v9758_v18, %v16389_v9  ;;  %12583 = vmatmul.mubr.msk.bf16.vlgmr.msra.gmra.mrb[208].mxu0 %vm175_vm10, %v9826_v41  ;;  %v16583_v60 = vmul.f32 %v9799_v59, %v14219_v27 }
0x1a77   :  { %v9798_v20 = vadd.f32 %v9750_v6, %v16395_v36  ;;  %v16589_v56 = vmul.f32 %v9797_v39, %v14209_v15 }
0x1a78   :  { %v16586_v22 = vmul.f32 %v9800_v48, %v14222_v13 }
0x1a79   :  { %v16592_v62 = vmul.f32 %v9798_v20, %v14211_v16  ;;  %v12572_v7 = vpop.f32.mrb[200].mxu0 }
0x1a7a   :  { %v9828_v9 = vpack.c.bf16 %v16586_v22, %v16583_v60  ;;  %v9771_v29 = vadd.f32 %v12572_v7, %v16546_v42  ;;  %v9762_v3 = vpop.f32.mrb[201].mxu0 }
0x1a7b   :  { %v9827_v36 = vpack.c.bf16 %v16592_v62, %v16589_v56  ;;  %v9763_v38 = vadd.f32 %v16546_v42, %v9762_v3  ;;  %v12573_v46 = vpop.f32.mrb[202].mxu0 }
0x1a7c   :  { %v9803_v25 = vadd.f32 %v9771_v29, %v16424_v37  ;;  %v9774_v35 = vadd.f32 %v12573_v46, %v16546_v42  ;;  %v9765_v52 = vpop.f32.mrb[203].mxu0 }
0x1a7d   :  { %v9801_v34 = vadd.f32 %v9763_v38, %v16433_v33  ;;  %v9766_v55 = vadd.f32 %v16546_v42, %v9765_v52  ;;  %12586 = vmatprep.mubr.msk.bf16.mxu0 %vm175_vm10, %v9827_v36 }
0x1a7e   :  { %v9804_v47 = vadd.f32 %v9774_v35, %v16427_v28  ;;  %12587 = vmatmul.mubr.msk.bf16.gmra.mrb[212].mxu0 %vm175_vm10, %v9828_v9  ;;  %v16609_v32 = vmul.f32 %v9803_v25, %v14267_v8 }
0x1a7f   :  { %v9802_v19 = vadd.f32 %v9766_v55, %v16436_v45  ;;  %v16615_v26 = vmul.f32 %v9801_v34, %v14243_v58 }
0x1a80   :  { %v16612_v37 = vmul.f32 %v9804_v47, %v14272_v24 }
0x1a81   :  { %v16618_v33 = vmul.f32 %v9802_v19, %v14248_v63  ;;  %v12576_v44 = vpop.f32.mrb[204].mxu0 }
0x1a82   :  { %v9830_v28 = vpack.c.bf16 %v16612_v37, %v16609_v32  ;;  %v9787_v0 = vadd.f32 %v12576_v44, %v16546_v42  ;;  %v9778_v41 = vpop.f32.mrb[205].mxu0 }
0x1a83   :  { %v9829_v45 = vpack.c.bf16 %v16618_v33, %v16615_v26  ;;  %v9779_v31 = vadd.f32 %v16546_v42, %v9778_v41  ;;  %v12577_v61 = vpop.f32.mrb[206].mxu0 }
0x1a84   :  { %v9807_v23 = vadd.f32 %v9787_v0, %v16461_v12  ;;  %v9790_v53 = vadd.f32 %v12577_v61, %v16546_v42  ;;  %v9781_v57 = vpop.f32.mrb[207].mxu0 }
0x1a85   :  { %v9805_v59 = vadd.f32 %v9779_v31, %v16467_v51  ;;  %v9782_v18 = vadd.f32 %v16546_v42, %v9781_v57  ;;  %12590 = vmatprep.mubr.msk.bf16.mxu0 %vm175_vm10, %v9829_v45 }
0x1a86   :  { %v9808_v4 = vadd.f32 %v9790_v53, %v16464_v21  ;;  %12591 = vmatmul.mubr.msk.bf16.gmra.mrb[216].mxu0 %vm175_vm10, %v9830_v28  ;;  %v16635_v6 = vmul.f32 %v9807_v23, %v16903_v10 }
0x1a87   :  { %v9806_v39 = vadd.f32 %v9782_v18, %v16470_v30  ;;  %v16641_v48 = vmul.f32 %v9805_v59, %v14293_v43  ;;  %v10963_v30 = vld [vmem:[%s16835_s17 + $0x1] ss:$0 sm:$0xff]  ;;  %s13605_s17 = smov 48  }
0x1a88   :  { %v16638_v12 = vmul.f32 %v9808_v4, %v16904_v11 }
0x1a89   :  { %v16644_v51 = vmul.f32 %v9806_v39, %v14302_v50 }
0x1a8a   :  { %v9832_v42 = vpack.c.bf16 %v16638_v12, %v16635_v6 }
0x1a8b   :  { %v9831_v21 = vpack.c.bf16 %v16644_v51, %v16641_v48 }
0x1a8d   :  { %12594 = vmatprep.mubr.msk.bf16.mxu0 %vm175_vm10, %v9831_v21 }
0x1a8e   :  { %12595 = vmatmul.mubr.msk.bf16.gmra.mrb[220].mxu0 %vm175_vm10, %v9832_v42 }
0x1b49   :  { %v12584_v20 = vpop.f32.mrb[208].mxu0 }
0x1b4a   :  { %v9918_v7 = vadd.f32 %v12584_v20, %v10963_v30  ;;  %v9909_v9 = vpop.f32.mrb[209].mxu0 }
0x1b4b   :  { %v9910_v29 = vadd.f32 %v10963_v30, %v9909_v9  ;;  %v12585_v3 = vpop.f32.mrb[210].mxu0 }
0x1b4c   :  { %v9921_v36 = vadd.f32 %v12585_v3, %v10963_v30  ;;  %v9912_v38 = vpop.f32.mrb[211].mxu0  ;;  %v9974_v25 = vmul.f32 %v9918_v7, %v14201_v2 }
0x1b4d   :  { %v9913_v46 = vadd.f32 %v10963_v30, %v9912_v38  ;;  %v9972_v52 = vmul.f32 %v9910_v29, %v14199_v1 }
0x1b4e   :  { %v9975_v35 = vmul.f32 %v9921_v36, %v14205_v14 }
0x1b4f   :  { %v9973_v34 = vmul.f32 %v9913_v46, %v14203_v54 }
0x1b50   :  { %v13083_v55 = vpack.i.bf16 %v9975_v35, %v9974_v25 }
0x1b51   :  { %v12588_v47 = vpop.f32.mrb[212].mxu0  ;;  %v13088_v19 = vpack.i.bf16 %v9973_v34, %v9972_v52 }
0x1b52   :  { %v9934_v44 = vadd.f32 %v12588_v47, %v10963_v30  ;;  %13084 = vrot.lane.b32.xlu1 %v13083_v55, %s13605_s17  ;;  %v9925_v28 = vpop.f32.mrb[213].mxu0  ;;  %v13005_v47 = vpop.permute.xlu1 %13004 }
0x1b53   :  { %v9926_v0 = vadd.f32 %v10963_v30, %v9925_v28  ;;  %v12589_v41 = vpop.f32.mrb[214].mxu0  ;;  %13089 = vrot.lane.b32.xlu0 %v13088_v19, %s13605_s17  ;;  %v13010_v28 = vpop.permute.xlu0 %13009 }
0x1b54   :  { %v9937_v45 = vadd.f32 %v12589_v41, %v10963_v30  ;;  %v9928_v2 = vpop.f32.mrb[215].mxu0  ;;  %v9978_v14 = vmul.f32 %v9934_v44, %v14219_v27 }
0x1b55   :  { %v9929_v31 = vadd.f32 %v10963_v30, %v9928_v2  ;;  %v9976_v54 = vmul.f32 %v9926_v0, %v14209_v15 }
0x1b56   :  { %v9979_v1 = vmul.f32 %v9937_v45, %v14222_v13  ;;  %v16679_v19 = vpop.permute.xlu1 %13014 }
0x1b57   :  { %v9977_v61 = vmul.f32 %v9929_v31, %v14211_v16 }
0x1b58   :  { %v13093_v23 = vpack.i.bf16 %v9979_v1, %v9978_v14  ;;  %v13012_v1 = vunpack.i.h.bf16 %v13010_v28 }
0x1b59   :  { %v13098_v53 = vpack.i.bf16 %v9977_v61, %v9976_v54  ;;  %v12592_v57 = vpop.f32.mrb[216].mxu0  ;;  %v13011_v54 = vunpack.i.l.bf16 %v13010_v28 }
0x1b5a   :  { %v9950_v59 = vadd.f32 %v12592_v57, %v10963_v30  ;;  %13094 = vrot.lane.b32.xlu1 %v13093_v23, %s13605_s17  ;;  %v9941_v18 = vpop.f32.mrb[217].mxu0  ;;  %v13020_v44 = vpop.permute.xlu1 %13019  ;;  %v13007_v23 = vunpack.i.h.bf16 %v13005_v47 }
0x1b5b   :  { %v9942_v4 = vadd.f32 %v10963_v30, %v9941_v18  ;;  %v12593_v39 = vpop.f32.mrb[218].mxu0  ;;  %13099 = vrot.lane.b32.xlu0 %v13098_v53, %s13605_s17  ;;  %v13006_v53 = vunpack.i.l.bf16 %v13005_v47  ;;  %v13022_v57 = vunpack.i.h.bf16 %v13020_v44 }
0x1b5c   :  { %v9953_v42 = vadd.f32 %v12593_v39, %v10963_v30  ;;  %v9944_v21 = vpop.f32.mrb[219].mxu0  ;;  %v9982_v13 = vmul.f32 %v9950_v59, %v14267_v8  ;;  %v10183_v39 = vsel %vm175_vm10, %v16560_v5, %v13012_v1 }
0x1b5d   :  { %v9945_v27 = vadd.f32 %v10963_v30, %v9944_v21  ;;  %v9980_v16 = vmul.f32 %v9942_v4, %v14243_v58  ;;  %v10182_v4 = vsel %vm175_vm10, %v16557_v17, %v13011_v54  ;;  %v10180_v21 = vsel %vm175_vm10, %v16563_v40, %v13006_v53 }
0x1b5e   :  { %v9983_v15 = vmul.f32 %v9953_v42, %v14272_v24 }
0x1b5f   :  { %v9981_v20 = vmul.f32 %v9945_v27, %v14248_v63  ;;  %v10181_v27 = vsel %vm175_vm10, %v16566_v49, %v13007_v23 }
0x1b60   :  { %v13103_v7 = vpack.i.bf16 %v9983_v15, %v9982_v13 }
0x1b61   :  { %v13108_v9 = vpack.i.bf16 %v9981_v20, %v9980_v16  ;;  %v12596_v29 = vpop.f32.mrb[220].mxu0 }
0x1b62   :  { %v9966_v3 = vadd.f32 %v12596_v29, %v10963_v30  ;;  %13104 = vrot.lane.b32.xlu1 %v13103_v7, %s13605_s17  ;;  %v9957_v36 = vpop.f32.mrb[221].mxu0 }
0x1b63   :  { %v9958_v38 = vadd.f32 %v10963_v30, %v9957_v36  ;;  %13109 = vrot.lane.b32.xlu0 %v13108_v9, %s13605_s17  ;;  %v12597_v46 = vpop.f32.mrb[222].mxu0 }
0x1b64   :  { %v9969_v25 = vadd.f32 %v12597_v46, %v10963_v30  ;;  %v9960_v35 = vpop.f32.mrb[223].mxu0  ;;  %v9986_v24 = vmul.f32 %v9966_v3, %v16903_v10  ;;  %v16683_v10 = vpop.permute.xlu0 %13024 }
0x1b65   :  { %v9961_v8 = vadd.f32 %v10963_v30, %v9960_v35  ;;  %v9984_v63 = vmul.f32 %v9958_v38, %v14293_v43  ;;  %v16681_v30 = vpop.permute.xlu1 %13029 }
0x1b66   :  { %v9987_v58 = vmul.f32 %v9969_v25, %v16904_v11  ;;  %v13032_v47 = vunpack.i.h.bf16 %v16681_v30 }
0x1b67   :  { %v9985_v52 = vmul.f32 %v9961_v8, %v14302_v50  ;;  %v13021_v8 = vunpack.i.l.bf16 %v13020_v44 }
0x1b68   :  { %v13118_v34 = vpack.i.bf16 %v9987_v58, %v9986_v24  ;;  %v16687_v43 = vpop.permute.xlu0 %13034 }
0x1b69   :  { %v13113_v55 = vpack.i.bf16 %v9985_v52, %v9984_v63  ;;  %v16685_v11 = vpop.permute.xlu1 %13039  ;;  %v13017_v52 = vunpack.i.h.bf16 %v16679_v19  ;;  %v10186_v28 = vsel %vm175_vm10, %v16583_v60, %v13021_v8 }
0x1b6a   :  { %13119 = vrot.lane.b32.xlu1 %v13118_v34, %s13605_s17  ;;  %v13016_v34 = vunpack.i.l.bf16 %v16679_v19 }
0x1b6b   :  { %13114 = vrot.lane.b32.xlu0 %v13113_v55, %s13605_s17  ;;  %v10185_v19 = vsel %vm175_vm10, %v16592_v62, %v13017_v52 }
0x1b6c   :  { %v13045_v0 = vpop.permute.xlu0 %13044  ;;  %v10184_v1 = vsel %vm175_vm10, %v16589_v56, %v13016_v34 }
0x1b6d   :  { %v13050_v50 = vpop.permute.xlu1 %13049  ;;  %v13047_v59 = vunpack.i.h.bf16 %v13045_v0  ;;  %v13046_v15 = vunpack.i.l.bf16 %v13045_v0 }
0x1b6e   :  { %v13052_v18 = vunpack.i.h.bf16 %v13050_v50  ;;  %v13051_v42 = vunpack.i.l.bf16 %v13050_v50  ;;  %v10187_v50 = vsel %vm175_vm10, %v16586_v22, %v13022_v57 }
0x1b6f   :  { %v10197_v36 = vsel %vm10196_vm11, %v10180_v21, %v13046_v15  ;;  %v10198_v49 = vsel %vm10196_vm11, %v10181_v27, %v13047_v59  ;;  %v13031_v15 = vunpack.i.l.bf16 %v16681_v30 }
0x1b70   :  { %v16691_v45 = vpop.permute.xlu0 %13054  ;;  %v10199_v17 = vsel %vm10196_vm11, %v10182_v4, %v13051_v42  ;;  %v10200_v9 = vsel %vm10196_vm11, %v10183_v39, %v13052_v18 }
0x1b71   :  { %v16689_v41 = vpop.permute.xlu1 %13059  ;;  %v13057_v23 = vunpack.i.h.bf16 %v16691_v45  ;;  %v13056_v60 = vunpack.i.l.bf16 %v16691_v45 }
0x1b72   :  { %v13062_v44 = vunpack.i.h.bf16 %v16689_v41  ;;  %v13061_v0 = vunpack.i.l.bf16 %v16689_v41 }
0x1b73   :  { %v10201_v62 = vsel %vm10196_vm11, %v10184_v1, %v13056_v60  ;;  %v10202_v42 = vsel %vm10196_vm11, %v10185_v19, %v13057_v23  ;;  %v13037_v1 = vunpack.i.h.bf16 %v16687_v43  ;;  %v13036_v19 = vunpack.i.l.bf16 %v16687_v43 }
0x1b74   :  { %v16695_v31 = vpop.permute.xlu0 %13064  ;;  %v10203_v57 = vsel %vm10196_vm11, %v10186_v28, %v13061_v0  ;;  %v10204_v18 = vsel %vm10196_vm11, %v10187_v50, %v13062_v44  ;;  %v13041_v28 = vunpack.i.l.bf16 %v16685_v11 }
0x1b75   :  { %v16693_v2 = vpop.permute.xlu1 %13069 }
0x1b76   :  { %v13072_v30 = vunpack.i.h.bf16 %v16693_v2  ;;  %v10194_v23 = vsel %vm175_vm10, %v16635_v6, %v13041_v28 }
0x1b78   :  { %v16699_v61 = vpop.permute.xlu0 %13074 }
0x1b79   :  { %v16697_v14 = vpop.permute.xlu1 %13079  ;;  %v13076_v6 = vunpack.i.l.bf16 %v16699_v61 }
0x1bc4   :  { %v13085_v13 = vpop.permute.xlu1 %13084 }
0x1bc5   :  { %v13087_v16 = vunpack.i.h.bf16 %v13085_v13  ;;  %v13086_v20 = vunpack.i.l.bf16 %v13085_v13  ;;  %v13090_v7 = vpop.permute.xlu0 %13089 }
0x1bc6   :  { %v13092_v5 = vunpack.i.h.bf16 %v13090_v7  ;;  %v13091_v29 = vunpack.i.l.bf16 %v13090_v7 }
0x1bc7   :  { %v10216_v3 = vsel %vm10213_vm12, %v10199_v17, %v13086_v20  ;;  %v10217_v40 = vsel %vm10213_vm12, %v10200_v9, %v13087_v16  ;;  %v13027_v17 = vunpack.i.h.bf16 %v16683_v10  ;;  %v13026_v9 = vunpack.i.l.bf16 %v16683_v10 }
0x1bc8   :  { %v10233_v38 = vsel %vm10230_vm13, %v10216_v3, 0.0  ;;  %v10234_v46 = vsel %vm10230_vm13, %v10217_v40, 0.0  ;;  %v10214_v25 = vsel %vm10213_vm12, %v10197_v36, %v13091_v29  ;;  %v10215_v35 = vsel %vm10213_vm12, %v10198_v49, %v13092_v5 }
0x1bc9   :  { %v11014_v24 = vpack.c.bf16 %v10234_v46, %v10233_v38  ;;  %v10231_v58 = vsel %vm10230_vm13, %v10214_v25, 0.0  ;;  %v10232_v63 = vsel %vm10230_vm13, %v10215_v35, 0.0  ;;  %v13042_v29 = vunpack.i.h.bf16 %v16685_v11 }
0x1bca   :  { %v11009_v55 = vpack.c.bf16 %v10232_v63, %v10231_v58  ;;  %v10190_v3 = vsel %vm175_vm10, %v16609_v32, %v13031_v15  ;;  %v10191_v40 = vsel %vm175_vm10, %v16612_v37, %v13032_v47  ;;  %v13071_v36 = vunpack.i.l.bf16 %v16693_v2 }
0x1bcb   :  { %11046 = vst [vmem:[#allocation18 + $0x8] sm:$0xff] %v11014_v24   ;;  %v10188_v49 = vsel %vm175_vm10, %v16615_v26, %v13026_v9  ;;  %v10189_v10 = vsel %vm175_vm10, %v16618_v33, %v13027_v17  ;;  %v13067_v46 = vunpack.i.h.bf16 %v16695_v31  ;;  %v13066_v32 = vunpack.i.l.bf16 %v16695_v31 }
0x1bcc   :  { %11010 = vst [vmem:[#allocation18] sm:$0xff] %v11009_v55   ;;  %v13095_v54 = vpop.permute.xlu1 %13094  ;;  %v10207_v8 = vsel %vm10196_vm11, %v10190_v3, %v13071_v36  ;;  %v10208_v24 = vsel %vm10196_vm11, %v10191_v40, %v13072_v30  ;;  %v10195_v60 = vsel %vm175_vm10, %v16638_v12, %v13042_v29  ;;  %v13081_v11 = vunpack.i.l.bf16 %v16697_v14 }
0x1bcd   :  { %v13097_v53 = vunpack.i.h.bf16 %v13095_v54  ;;  %v13096_v59 = vunpack.i.l.bf16 %v13095_v54  ;;  %v13100_v22 = vpop.permute.xlu0 %13099  ;;  %v10205_v33 = vsel %vm10196_vm11, %v10188_v49, %v13066_v32  ;;  %v10206_v52 = vsel %vm10196_vm11, %v10189_v10, %v13067_v46 }
0x1bce   :  { %v13102_v41 = vunpack.i.h.bf16 %v13100_v22  ;;  %v13101_v4 = vunpack.i.l.bf16 %v13100_v22  ;;  %v10193_v22 = vsel %vm175_vm10, %v16644_v51, %v13037_v1 }
0x1bcf   :  { %v10220_v56 = vsel %vm10213_vm12, %v10203_v57, %v13096_v59  ;;  %v10221_v39 = vsel %vm10213_vm12, %v10204_v18, %v13097_v53  ;;  %v13082_v53 = vunpack.i.h.bf16 %v16697_v14  ;;  %v10192_v59 = vsel %vm175_vm10, %v16641_v48, %v13036_v19 }
0x1bd0   :  { %v10237_v21 = vsel %vm10230_vm13, %v10220_v56, 0.0  ;;  %v10238_v45 = vsel %vm10230_vm13, %v10221_v39, 0.0  ;;  %v10218_v27 = vsel %vm10213_vm12, %v10201_v62, %v13101_v4  ;;  %v10219_v13 = vsel %vm10213_vm12, %v10202_v42, %v13102_v41 }
0x1bd1   :  { %v11024_v16 = vpack.c.bf16 %v10238_v45, %v10237_v21  ;;  %v10235_v20 = vsel %vm10230_vm13, %v10218_v27, 0.0  ;;  %v10236_v7 = vsel %vm10230_vm13, %v10219_v13, 0.0  ;;  %v13077_v57 = vunpack.i.h.bf16 %v16699_v61 }
0x1bd2   :  { %v11019_v5 = vpack.c.bf16 %v10236_v7, %v10235_v20  ;;  %v10211_v4 = vsel %vm10196_vm11, %v10194_v23, %v13081_v11  ;;  %v10212_v56 = vsel %vm10196_vm11, %v10195_v60, %v13082_v53  ;;  %v10209_v51 = vsel %vm10196_vm11, %v10192_v59, %v13076_v6 }
0x1bd3   :  { %11048 = vst [vmem:[#allocation18 + $0x18] sm:$0xff] %v11024_v16   ;;  %v10210_v42 = vsel %vm10196_vm11, %v10193_v22, %v13077_v57 }
0x1bd4   :  { %11047 = vst [vmem:[#allocation18 + $0x10] sm:$0xff] %v11019_v5   ;;  %v13105_v38 = vpop.permute.xlu1 %13104 }
0x1bd5   :  { %v13107_v25 = vunpack.i.h.bf16 %v13105_v38  ;;  %v13106_v35 = vunpack.i.l.bf16 %v13105_v38  ;;  %v13110_v37 = vpop.permute.xlu0 %13109 }
0x1bd6   :  { %v13112_v2 = vunpack.i.h.bf16 %v13110_v37  ;;  %v13111_v58 = vunpack.i.l.bf16 %v13110_v37 }
0x1bd7   :  { %v10224_v26 = vsel %vm10213_vm12, %v10207_v8, %v13106_v35  ;;  %v10225_v63 = vsel %vm10213_vm12, %v10208_v24, %v13107_v25 }
0x1bd8   :  { %v10241_v34 = vsel %vm10230_vm13, %v10224_v26, 0.0  ;;  %v10242_v31 = vsel %vm10230_vm13, %v10225_v63, 0.0  ;;  %v10223_v55 = vsel %vm10213_vm12, %v10206_v52, %v13112_v2  ;;  %v10222_v47 = vsel %vm10213_vm12, %v10205_v33, %v13111_v58 }
0x1bd9   :  { %v11034_v50 = vpack.c.bf16 %v10242_v31, %v10241_v34  ;;  %v10240_v44 = vsel %vm10230_vm13, %v10223_v55, 0.0  ;;  %v10239_v0 = vsel %vm10230_vm13, %v10222_v47, 0.0 }
0x1bda   :  { %v11029_v54 = vpack.c.bf16 %v10240_v44, %v10239_v0 }
0x1bdb   :  { %11050 = vst [vmem:[#allocation18 + $0x28] sm:$0xff] %v11034_v50  }
0x1bdc   :  { %11049 = vst [vmem:[#allocation18 + $0x20] sm:$0xff] %v11029_v54   ;;  %v13120_v43 = vpop.permute.xlu1 %13119 }
0x1bdd   :  { %v13122_v18 = vunpack.i.h.bf16 %v13120_v43  ;;  %v13121_v41 = vunpack.i.l.bf16 %v13120_v43  ;;  %v13115_v12 = vpop.permute.xlu0 %13114 }
0x1bde   :  { %v13117_v14 = vunpack.i.h.bf16 %v13115_v12  ;;  %v13116_v39 = vunpack.i.l.bf16 %v13115_v12 }
0x1bdf   :  { %v10228_v48 = vsel %vm10213_vm12, %v10211_v4, %v13121_v41  ;;  %v10229_v62 = vsel %vm10213_vm12, %v10212_v56, %v13122_v18 }
0x1be0   :  { %v10245_v61 = vsel %vm10230_vm13, %v10228_v48, 0.0  ;;  %v10246_v21 = vsel %vm10230_vm13, %v10229_v62, 0.0  ;;  %v10227_v45 = vsel %vm10213_vm12, %v10210_v42, %v13117_v14  ;;  %v10226_v27 = vsel %vm10213_vm12, %v10209_v51, %v13116_v39 }
0x1be1   :  { %v11044_v13 = vpack.c.bf16 %v10246_v21, %v10245_v61  ;;  %v10244_v15 = vsel %vm10230_vm13, %v10227_v45, 0.0  ;;  %v10243_v16 = vsel %vm10230_vm13, %v10226_v27, 0.0 }
0x1be2   :  { %v11039_v20 = vpack.c.bf16 %v10244_v15, %v10243_v16 }
0x1be3   :  { %11052 = vst [vmem:[#allocation18 + $0x38] sm:$0xff] %v11044_v13  }
0x1be4   :  { %11051 = vst [vmem:[#allocation18 + $0x30] sm:$0xff] %v11039_v20  }
0x1be5   :  { %13567 = shalt.err (!%p13564_p12)
}
0x1be6   :  { %s16906_s10 = sld [smem:[#allocation45_spill]] }
0x1bec   :  { %s13568_s2 = scalar_lea.hbm %s16906_s10, 1024 }
0x1bed   :  { %p13569_p13 = scmp.ne.s32.totalorder %s16906_s10, %s13568_s2  ;;  %p13572_p0 = scmp.lt.u32.totalorder %s13568_s2, %s16906_s10 }
0x1bef   :  { %p13574_p1 = pnand %p13572_p0, %p13569_p13 }
0x1bf1   :  { %13577 = shalt.err (!%p13574_p1)
}
0x1bf2   :  { %10338 = dma.vmem_to_hbm [thread:$0]  %s10333_s22, 1024, %s16906_s10, [#allocation6], %s13595_s28, %s13595_s28, %s13596_s25  }
0x1bf3   :  { %13588 = dma.done.wait [#allocation6], 1024  }
0x1bf4   :  { %13589 = vsyncadd [#allocation6], 4294966272 }
0x1bf5   :  { %10342 = vsyncpa [#allocation5], 1 }
0x1bf6   :  { %10343 = vsyncpa [#allocation8], 1 }
0x1bf7   :  { %10344 = vsyncpa [#allocation11], 1 }
0x1bf8   :  { %10345 = vsyncpa [#allocation14], 1 }
0x1bf9   :  { %10346 = vsyncpa [#allocation17], 1 }
0x1bfa   :  { %10347 = vsyncpa [#allocation6], 1 }

</bundles_post_ra>
